<compile_context>
chip_gen: v5e
topology: v5e:2x2
jax: 0.10.0
libtpu: 0.0.40
codegen_flags: <defaults>
</compile_context>

<pallas_src>
import math

import numpy as np
import jax
import jax.numpy as jnp
from jax.experimental import pallas as pl
from jax.experimental.pallas import tpu as pltpu


# ----------------------------------------------------------------------------
# Kernel
# ----------------------------------------------------------------------------
def _make_block_kernel(stride, has_down, is_last):
    """Build the fused BasicBlock kernel for a given static configuration."""

    def kernel(*refs):
        it = iter(refs)
        x_ref = next(it)                 # (P, Hs, Ws, Ci)  halo-padded (P=1 or 4 parity planes)
        w1_ref = next(it)                # (9*Ci, Co) bf16, BN1 scale folded
        b1_ref = next(it)                # (1, Co)   f32
        w2_ref = next(it)                # (9*Co, Co) bf16, BN2 scale folded
        b2_ref = next(it)                # (1, Co)   f32
        wd_ref = bd_ref = None
        if has_down:
            wd_ref = next(it)            # (Ci, Co) bf16, BNd scale folded
            bd_ref = next(it)            # (1, Co)  f32
        o_ref = next(it)                 # (Ho, Wo, Co) f32
        pre_ref = next(it) if is_last else None
        h_ref = next(it)                 # (Ho+2, Wo+2, Co) bf16 scratch (conv1 out, halo)
        col1_ref = next(it)              # (Ho*Wo, 9*Ci) bf16 scratch (im2col, conv1)
        col2_ref = next(it)              # (Ho*Wo, 9*Co) bf16 scratch (im2col, conv2)

        Ho, Wo, Co = o_ref.shape
        Ci = x_ref.shape[-1]
        M = Ho * Wo

        # ---- conv1 (BN1 folded into weights) + ReLU: one im2col matmul ----
        for dh in range(3):
            for dw in range(3):
                if stride == 1:
                    win = x_ref[0, dh:dh + Ho, dw:dw + Wo, :]
                else:
                    win = x_ref[(dh % 2) * 2 + (dw % 2),
                                dh // 2:dh // 2 + Ho,
                                dw // 2:dw // 2 + Wo, :]
                t = dh * 3 + dw
                col1_ref[:, t * Ci:(t + 1) * Ci] = win.reshape(M, Ci)
        acc1 = jnp.dot(col1_ref[...], w1_ref[...],
                       preferred_element_type=jnp.float32)
        out1 = jnp.maximum(acc1 + b1_ref[...], 0.0)

        # ---- re-halo conv1 output in VMEM (never leaves VMEM) ----
        # Zero only the 1-wide halo border (4 thin stores). Done every step
        # (not pl.when(step==0)) so it is safe when the "parallel" batch grid
        # axis is split across TensorCores, each with its own scratch copy.
        z_row = jnp.zeros((1, Wo + 2, Co), h_ref.dtype)
        z_col = jnp.zeros((Ho + 2, 1, Co), h_ref.dtype)
        h_ref[0:1, :, :] = z_row
        h_ref[Ho + 1:Ho + 2, :, :] = z_row
        h_ref[:, 0:1, :] = z_col
        h_ref[:, Wo + 1:Wo + 2, :] = z_col
        h_ref[1:1 + Ho, 1:1 + Wo, :] = out1.reshape(Ho, Wo, Co).astype(h_ref.dtype)

        # ---- conv2 (BN2 folded): one im2col matmul ----
        for dh in range(3):
            for dw in range(3):
                t = dh * 3 + dw
                col2_ref[:, t * Co:(t + 1) * Co] = (
                    h_ref[dh:dh + Ho, dw:dw + Wo, :].reshape(M, Co))
        acc2 = jnp.dot(col2_ref[...], w2_ref[...],
                       preferred_element_type=jnp.float32)

        # ---- residual branch (1x1 downsample fused when present) ----
        if has_down:
            if stride == 1:
                xr = x_ref[0, 1:1 + Ho, 1:1 + Wo, :]
            else:
                xr = x_ref[3, 0:Ho, 0:Wo, :]      # parity (1,1) == x[::2, ::2]
            res = jnp.dot(xr.reshape(M, Ci), wd_ref[...],
                          preferred_element_type=jnp.float32) + bd_ref[...]
        else:
            res = x_ref[0, 1:1 + Ho, 1:1 + Wo, :].reshape(M, Ci).astype(jnp.float32)

        pre = acc2 + b2_ref[...] + res
        out = jnp.maximum(pre, 0.0)
        o_ref[...] = out.reshape(Ho, Wo, Co).astype(o_ref.dtype)
        if is_last:
            pre_ref[...] = pre.reshape(Ho, Wo, Co).astype(pre_ref.dtype)

    return kernel


# ----------------------------------------------------------------------------
# Wrapper
# ----------------------------------------------------------------------------
def basic_block(x_nhwc, p):
    """Fused BasicBlock forward on an NHWC activation (one pallas_call).

    Returns out (f32 NHWC), or (out, preact) if p['is_last'].
    """
    N, H, W, Ci = x_nhwc.shape
    stride = p['stride']
    is_last = bool(p.get('is_last', False))
    has_down = 'wd' in p
    Co = p['w1'].shape[-1]
    assert H % stride == 0 and W % stride == 0
    Ho, Wo = H // stride, W // stride

    # Halo-pad once outside the kernel; stride-2 blocks additionally get a 2x2
    # parity-plane split so every in-kernel tap is a contiguous slice.
    xp = jnp.pad(x_nhwc.astype(jnp.bfloat16), ((0, 0), (1, 1), (1, 1), (0, 0)))
    if stride == 1:
        xt = xp.reshape(N, 1, H + 2, W + 2, Ci)
    else:
        Hp, Wp = H + 2, W + 2
        xt = xp.reshape(N, Hp // 2, 2, Wp // 2, 2, Ci)
        xt = jnp.transpose(xt, (0, 2, 4, 1, 3, 5)).reshape(N, 4, Hp // 2, Wp // 2, Ci)

    args = [xt, p['w1'], p['b1'], p['w2'], p['b2']]
    in_specs = [
        pl.BlockSpec((None,) + tuple(xt.shape[1:]), lambda n: (n, 0, 0, 0, 0)),
        pl.BlockSpec(p['w1'].shape, lambda n: (0, 0)),
        pl.BlockSpec(p['b1'].shape, lambda n: (0, 0)),
        pl.BlockSpec(p['w2'].shape, lambda n: (0, 0)),
        pl.BlockSpec(p['b2'].shape, lambda n: (0, 0)),
    ]
    if has_down:
        args += [p['wd'], p['bd']]
        in_specs += [pl.BlockSpec(p['wd'].shape, lambda n: (0, 0)),
                     pl.BlockSpec(p['bd'].shape, lambda n: (0, 0))]

    out_spec = pl.BlockSpec((None, Ho, Wo, Co), lambda n: (n, 0, 0, 0))
    o_shape = jax.ShapeDtypeStruct((N, Ho, Wo, Co), jnp.float32)
    if is_last:
        out_shape = (o_shape, jax.ShapeDtypeStruct((N, Ho, Wo, Co), jnp.float32))
        out_specs = (out_spec, out_spec)
    else:
        out_shape = o_shape
        out_specs = out_spec

    return pl.pallas_call(
        _make_block_kernel(stride, has_down, is_last),
        out_shape=out_shape,
        grid=(N,),
        in_specs=in_specs,
        out_specs=out_specs,
        scratch_shapes=[
            pltpu.VMEM((Ho + 2, Wo + 2, Co), jnp.bfloat16),
            pltpu.VMEM((Ho * Wo, 9 * Ci), jnp.bfloat16),
            pltpu.VMEM((Ho * Wo, 9 * Co), jnp.bfloat16),
        ],
        compiler_params=pltpu.CompilerParams(
            dimension_semantics=("parallel",)),
    )(*args)


# ----------------------------------------------------------------------------
# Parameters (torch-style init, eval-mode BN folded into conv weights)
# ----------------------------------------------------------------------------
def build_block_params(key, inplanes, planes, stride=1, is_last=False, eps=1e-5):
    k1, k2, k3 = jax.random.split(key, 3)

    def kaiming(k, co, ci, kh, kw):
        # kaiming_normal_(mode='fan_out', nonlinearity='relu')
        std = math.sqrt(2.0 / (co * kh * kw))
        return jax.random.normal(k, (co, ci, kh, kw), jnp.float32) * std

    def bn_fold(co):
        # TODO(synk): eval-mode BN (gamma=1, beta=0, mean=0, var=1, eps=1e-5),
        #             not training-mode batch statistics.
        gamma = jnp.ones((co,), jnp.float32)
        beta = jnp.zeros((co,), jnp.float32)
        mean = jnp.zeros((co,), jnp.float32)
        var = jnp.ones((co,), jnp.float32)
        s = gamma / jnp.sqrt(var + eps)
        return s, beta - mean * s

    w1 = kaiming(k1, planes, inplanes, 3, 3)
    s1, b1 = bn_fold(planes)
    w1 = jnp.transpose(w1 * s1[:, None, None, None], (2, 3, 1, 0)
                       ).reshape(9 * inplanes, planes)

    w2 = kaiming(k2, planes, planes, 3, 3)
    s2, b2 = bn_fold(planes)
    w2 = jnp.transpose(w2 * s2[:, None, None, None], (2, 3, 1, 0)
                       ).reshape(9 * planes, planes)

    p = {'stride': stride, 'is_last': is_last,
         'w1': w1.astype(jnp.bfloat16), 'b1': b1.reshape(1, -1),
         'w2': w2.astype(jnp.bfloat16), 'b2': b2.reshape(1, -1)}

    if stride != 1 or inplanes != planes:
        wd = kaiming(k3, planes, inplanes, 1, 1)[:, :, 0, 0]        # (Co, Ci)
        sd, bd = bn_fold(planes)
        p['wd'] = (wd * sd[:, None]).T.astype(jnp.bfloat16)          # (Ci, Co)
        p['bd'] = bd.reshape(1, -1)
    return p


# ----------------------------------------------------------------------------
# Pure-JAX reference (matches kernel numerics: bf16 operands, f32 accumulate)
# ----------------------------------------------------------------------------
def _ref_block(x_nhwc, p):
    x = x_nhwc.astype(jnp.bfloat16).astype(jnp.float32)

    def conv3x3(v, w_flat, stride):
        ci, co = v.shape[-1], w_flat.shape[-1]
        w = w_flat.astype(jnp.float32).reshape(3, 3, ci, co)
        return jax.lax.conv_general_dilated(
            v, w, (stride, stride), ((1, 1), (1, 1)),
            dimension_numbers=("NHWC", "HWIO", "NHWC"),
            precision=jax.lax.Precision.HIGHEST)

    o1 = jnp.maximum(conv3x3(x, p['w1'], p['stride']) + p['b1'].reshape(1, 1, 1, -1), 0.0)
    o1 = o1.astype(jnp.bfloat16).astype(jnp.float32)
    o2 = conv3x3(o1, p['w2'], 1) + p['b2'].reshape(1, 1, 1, -1)
    if 'wd' in p:
        xs = x[:, ::p['stride'], ::p['stride'], :]
        r = jnp.einsum('nhwc,cd->nhwd', xs, p['wd'].astype(jnp.float32),
                       precision=jax.lax.Precision.HIGHEST) + p['bd'].reshape(1, 1, 1, -1)
    else:
        r = x
    pre = o2 + r
    return jnp.maximum(pre, 0.0), pre


# ----------------------------------------------------------------------------
if __name__ == "__main__":
    root = jax.random.PRNGKey(0)
    k_in, k_a, k_b = jax.random.split(root, 3)

    # Small shapes consistent with the CIFAR ResNet-32x4 BasicBlock.
    N, Cin, H, W = 2, 32, 16, 16
    x = jax.random.normal(k_in, (N, Cin, H, W), dtype=jnp.float32)   # NCHW

    # Block A: 32 -> 64, stride 2, 1x1 downsample residual.
    blk_a = build_block_params(k_a, inplanes=32, planes=64, stride=2)
    # Block B: 64 -> 64, stride 1, identity residual, is_last=True (out, preact).
    blk_b = build_block_params(k_b, inplanes=64, planes=64, stride=1, is_last=True)

    @jax.jit
    def fwd(x_nchw):
        h = jnp.transpose(x_nchw, (0, 2, 3, 1))                      # NCHW -> NHWC
        h = basic_block(h, blk_a)
        out, pre = basic_block(h, blk_b)
        return (jnp.transpose(out, (0, 3, 1, 2)),                    # NHWC -> NCHW
                jnp.transpose(pre, (0, 3, 1, 2)))

    out, pre = fwd(x)
    jax.block_until_ready((out, pre))
    assert out.shape == (N, 64, H // 2, W // 2) and out.dtype == jnp.float32
    assert pre.shape == out.shape

    # Correctness check against the pure-JAX reference.
    h0 = jnp.transpose(x, (0, 2, 3, 1))
    ra, _ = _ref_block(h0, blk_a)
    rb, rpre = _ref_block(ra, blk_b)
    np.testing.assert_allclose(np.asarray(out),
                               np.asarray(jnp.transpose(rb, (0, 3, 1, 2))),
                               rtol=3e-2, atol=3e-2)
    np.testing.assert_allclose(np.asarray(pre),
                               np.asarray(jnp.transpose(rpre, (0, 3, 1, 2))),
                               rtol=3e-2, atol=3e-2)
    print("KERNEL_OK")
</pallas_src>

<mosaic_0001>
module attributes {stable_mosaic.version = 11 : i64} {
  func.func @kernel(%arg0: i32, %arg1: memref<1x4x9x9x32xbf16, #tpu.memory_space<vmem>>, %arg2: memref<288x64xbf16, #tpu.memory_space<vmem>>, %arg3: memref<1x64xf32, #tpu.memory_space<vmem>>, %arg4: memref<576x64xbf16, #tpu.memory_space<vmem>>, %arg5: memref<1x64xf32, #tpu.memory_space<vmem>>, %arg6: memref<32x64xbf16, #tpu.memory_space<vmem>>, %arg7: memref<1x64xf32, #tpu.memory_space<vmem>>, %arg8: memref<1x8x8x64xf32, #tpu.memory_space<vmem>>, %arg9: memref<10x10x64xbf16, #tpu.memory_space<vmem>>, %arg10: memref<64x288xbf16, #tpu.memory_space<vmem>>, %arg11: memref<64x576xbf16, #tpu.memory_space<vmem>>) attributes {dimension_semantics = [#tpu.dimension_semantics<parallel>], iteration_bounds = array<i64: 2>, scalar_prefetch = 0 : i64, scratch_operands = 3 : i64, tpu.core_type = #tpu.core_type<tc>, window_params = [{transform_indices = @transform_0, window_bounds = array<i64: 1, 4, 9, 9, 32>}, {pipeline_mode = #tpu.pipeline_mode<synchronous>, transform_indices = @transform_1, window_bounds = array<i64: 288, 64>}, {pipeline_mode = #tpu.pipeline_mode<synchronous>, transform_indices = @transform_2, window_bounds = array<i64: 1, 64>}, {pipeline_mode = #tpu.pipeline_mode<synchronous>, transform_indices = @transform_3, window_bounds = array<i64: 576, 64>}, {pipeline_mode = #tpu.pipeline_mode<synchronous>, transform_indices = @transform_4, window_bounds = array<i64: 1, 64>}, {pipeline_mode = #tpu.pipeline_mode<synchronous>, transform_indices = @transform_5, window_bounds = array<i64: 32, 64>}, {pipeline_mode = #tpu.pipeline_mode<synchronous>, transform_indices = @transform_6, window_bounds = array<i64: 1, 64>}, {transform_indices = @transform_7, window_bounds = array<i64: 1, 8, 8, 64>}]} {
    %c0 = arith.constant 0 : index
    %c0_0 = arith.constant 0 : index
    %c0_1 = arith.constant 0 : index
    %c0_2 = arith.constant 0 : index
    %c0_3 = arith.constant 0 : index
    %0 = vector.load %arg1[%c0, %c0_0, %c0_1, %c0_2, %c0_3] : memref<1x4x9x9x32xbf16, #tpu.memory_space<vmem>>, vector<1x1x8x8x32xbf16>
    %1 = vector.shape_cast %0 : vector<1x1x8x8x32xbf16> to vector<8x8x32xbf16>
    %2 = vector.shape_cast %1 : vector<8x8x32xbf16> to vector<64x32xbf16>
    %c0_4 = arith.constant 0 : index
    %c0_5 = arith.constant 0 : index
    %3 = vector.load %arg10[%c0_4, %c0_5] : memref<64x288xbf16, #tpu.memory_space<vmem>>, vector<64x32xbf16>
    tpu.vector_store %arg10[%c0_4, %c0_5], %2 {strides = array<i32>} : memref<64x288xbf16, #tpu.memory_space<vmem>>, vector<64x32xbf16>,
    %c0_6 = arith.constant 0 : index
    %c1 = arith.constant 1 : index
    %c0_7 = arith.constant 0 : index
    %c0_8 = arith.constant 0 : index
    %c0_9 = arith.constant 0 : index
    %4 = vector.load %arg1[%c0_6, %c1, %c0_7, %c0_8, %c0_9] : memref<1x4x9x9x32xbf16, #tpu.memory_space<vmem>>, vector<1x1x8x8x32xbf16>
    %5 = vector.shape_cast %4 : vector<1x1x8x8x32xbf16> to vector<8x8x32xbf16>
    %6 = vector.shape_cast %5 : vector<8x8x32xbf16> to vector<64x32xbf16>
    %c0_10 = arith.constant 0 : index
    %c32 = arith.constant 32 : index
    %7 = vector.load %arg10[%c0_10, %c32] : memref<64x288xbf16, #tpu.memory_space<vmem>>, vector<64x32xbf16>
    tpu.vector_store %arg10[%c0_10, %c32], %6 {strides = array<i32>} : memref<64x288xbf16, #tpu.memory_space<vmem>>, vector<64x32xbf16>,
    %c0_11 = arith.constant 0 : index
    %c0_12 = arith.constant 0 : index
    %c0_13 = arith.constant 0 : index
    %c1_14 = arith.constant 1 : index
    %c0_15 = arith.constant 0 : index
    %8 = vector.load %arg1[%c0_11, %c0_12, %c0_13, %c1_14, %c0_15] : memref<1x4x9x9x32xbf16, #tpu.memory_space<vmem>>, vector<1x1x8x8x32xbf16>
    %9 = vector.shape_cast %8 : vector<1x1x8x8x32xbf16> to vector<8x8x32xbf16>
    %10 = vector.shape_cast %9 : vector<8x8x32xbf16> to vector<64x32xbf16>
    %c0_16 = arith.constant 0 : index
    %c64 = arith.constant 64 : index
    %11 = vector.load %arg10[%c0_16, %c64] : memref<64x288xbf16, #tpu.memory_space<vmem>>, vector<64x32xbf16>
    tpu.vector_store %arg10[%c0_16, %c64], %10 {strides = array<i32>} : memref<64x288xbf16, #tpu.memory_space<vmem>>, vector<64x32xbf16>,
    %c0_17 = arith.constant 0 : index
    %c2 = arith.constant 2 : index
    %c0_18 = arith.constant 0 : index
    %c0_19 = arith.constant 0 : index
    %c0_20 = arith.constant 0 : index
    %12 = vector.load %arg1[%c0_17, %c2, %c0_18, %c0_19, %c0_20] : memref<1x4x9x9x32xbf16, #tpu.memory_space<vmem>>, vector<1x1x8x8x32xbf16>
    %13 = vector.shape_cast %12 : vector<1x1x8x8x32xbf16> to vector<8x8x32xbf16>
    %14 = vector.shape_cast %13 : vector<8x8x32xbf16> to vector<64x32xbf16>
    %c0_21 = arith.constant 0 : index
    %c96 = arith.constant 96 : index
    %15 = vector.load %arg10[%c0_21, %c96] : memref<64x288xbf16, #tpu.memory_space<vmem>>, vector<64x32xbf16>
    tpu.vector_store %arg10[%c0_21, %c96], %14 {strides = array<i32>} : memref<64x288xbf16, #tpu.memory_space<vmem>>, vector<64x32xbf16>,
    %c0_22 = arith.constant 0 : index
    %c3 = arith.constant 3 : index
    %c0_23 = arith.constant 0 : index
    %c0_24 = arith.constant 0 : index
    %c0_25 = arith.constant 0 : index
    %16 = vector.load %arg1[%c0_22, %c3, %c0_23, %c0_24, %c0_25] : memref<1x4x9x9x32xbf16, #tpu.memory_space<vmem>>, vector<1x1x8x8x32xbf16>
    %17 = vector.shape_cast %16 : vector<1x1x8x8x32xbf16> to vector<8x8x32xbf16>
    %18 = vector.shape_cast %17 : vector<8x8x32xbf16> to vector<64x32xbf16>
    %c0_26 = arith.constant 0 : index
    %c128 = arith.constant 128 : index
    %19 = vector.load %arg10[%c0_26, %c128] : memref<64x288xbf16, #tpu.memory_space<vmem>>, vector<64x32xbf16>
    tpu.vector_store %arg10[%c0_26, %c128], %18 {strides = array<i32>} : memref<64x288xbf16, #tpu.memory_space<vmem>>, vector<64x32xbf16>,
    %c0_27 = arith.constant 0 : index
    %c2_28 = arith.constant 2 : index
    %c0_29 = arith.constant 0 : index
    %c1_30 = arith.constant 1 : index
    %c0_31 = arith.constant 0 : index
    %20 = vector.load %arg1[%c0_27, %c2_28, %c0_29, %c1_30, %c0_31] : memref<1x4x9x9x32xbf16, #tpu.memory_space<vmem>>, vector<1x1x8x8x32xbf16>
    %21 = vector.shape_cast %20 : vector<1x1x8x8x32xbf16> to vector<8x8x32xbf16>
    %22 = vector.shape_cast %21 : vector<8x8x32xbf16> to vector<64x32xbf16>
    %c0_32 = arith.constant 0 : index
    %c160 = arith.constant 160 : index
    %23 = vector.load %arg10[%c0_32, %c160] : memref<64x288xbf16, #tpu.memory_space<vmem>>, vector<64x32xbf16>
    tpu.vector_store %arg10[%c0_32, %c160], %22 {strides = array<i32>} : memref<64x288xbf16, #tpu.memory_space<vmem>>, vector<64x32xbf16>,
    %c0_33 = arith.constant 0 : index
    %c0_34 = arith.constant 0 : index
    %c1_35 = arith.constant 1 : index
    %c0_36 = arith.constant 0 : index
    %c0_37 = arith.constant 0 : index
    %24 = vector.load %arg1[%c0_33, %c0_34, %c1_35, %c0_36, %c0_37] : memref<1x4x9x9x32xbf16, #tpu.memory_space<vmem>>, vector<1x1x8x8x32xbf16>
    %25 = vector.shape_cast %24 : vector<1x1x8x8x32xbf16> to vector<8x8x32xbf16>
    %26 = vector.shape_cast %25 : vector<8x8x32xbf16> to vector<64x32xbf16>
    %c0_38 = arith.constant 0 : index
    %c192 = arith.constant 192 : index
    %27 = vector.load %arg10[%c0_38, %c192] : memref<64x288xbf16, #tpu.memory_space<vmem>>, vector<64x32xbf16>
    tpu.vector_store %arg10[%c0_38, %c192], %26 {strides = array<i32>} : memref<64x288xbf16, #tpu.memory_space<vmem>>, vector<64x32xbf16>,
    %c0_39 = arith.constant 0 : index
    %c1_40 = arith.constant 1 : index
    %c1_41 = arith.constant 1 : index
    %c0_42 = arith.constant 0 : index
    %c0_43 = arith.constant 0 : index
    %28 = vector.load %arg1[%c0_39, %c1_40, %c1_41, %c0_42, %c0_43] : memref<1x4x9x9x32xbf16, #tpu.memory_space<vmem>>, vector<1x1x8x8x32xbf16>
    %29 = vector.shape_cast %28 : vector<1x1x8x8x32xbf16> to vector<8x8x32xbf16>
    %30 = vector.shape_cast %29 : vector<8x8x32xbf16> to vector<64x32xbf16>
    %c0_44 = arith.constant 0 : index
    %c224 = arith.constant 224 : index
    %31 = vector.load %arg10[%c0_44, %c224] : memref<64x288xbf16, #tpu.memory_space<vmem>>, vector<64x32xbf16>
    tpu.vector_store %arg10[%c0_44, %c224], %30 {strides = array<i32>} : memref<64x288xbf16, #tpu.memory_space<vmem>>, vector<64x32xbf16>,
    %c0_45 = arith.constant 0 : index
    %c0_46 = arith.constant 0 : index
    %c1_47 = arith.constant 1 : index
    %c1_48 = arith.constant 1 : index
    %c0_49 = arith.constant 0 : index
    %32 = vector.load %arg1[%c0_45, %c0_46, %c1_47, %c1_48, %c0_49] : memref<1x4x9x9x32xbf16, #tpu.memory_space<vmem>>, vector<1x1x8x8x32xbf16>
    %33 = vector.shape_cast %32 : vector<1x1x8x8x32xbf16> to vector<8x8x32xbf16>
    %34 = vector.shape_cast %33 : vector<8x8x32xbf16> to vector<64x32xbf16>
    %c0_50 = arith.constant 0 : index
    %c256 = arith.constant 256 : index
    %35 = vector.load %arg10[%c0_50, %c256] : memref<64x288xbf16, #tpu.memory_space<vmem>>, vector<64x32xbf16>
    tpu.vector_store %arg10[%c0_50, %c256], %34 {strides = array<i32>} : memref<64x288xbf16, #tpu.memory_space<vmem>>, vector<64x32xbf16>,
    %c0_51 = arith.constant 0 : index
    %c0_52 = arith.constant 0 : index
    %36 = vector.load %arg10[%c0_51, %c0_52] : memref<64x288xbf16, #tpu.memory_space<vmem>>, vector<64x288xbf16>
    %c0_53 = arith.constant 0 : index
    %c0_54 = arith.constant 0 : index
    %37 = vector.load %arg2[%c0_53, %c0_54] : memref<288x64xbf16, #tpu.memory_space<vmem>>, vector<288x64xbf16>
    %cst = arith.constant dense<0.000000e+00> : vector<64x64xf32>
    %38 = tpu.matmul %36, %37, %cst {dimension_numbers = #tpu.dot_dimension_numbers<[1], [0], [0], [1], [0, 0, 1, 1], [], []>} : vector<64x288xbf16>, vector<288x64xbf16>, vector<64x64xf32> -> vector<64x64xf32>
    %c0_55 = arith.constant 0 : index
    %c0_56 = arith.constant 0 : index
    %39 = vector.load %arg3[%c0_55, %c0_56] : memref<1x64xf32, #tpu.memory_space<vmem>>, vector<1x64xf32>
    %40 = vector.broadcast %39 : vector<1x64xf32> to vector<64x64xf32>
    %41 = arith.addf %38, %40 : vector<64x64xf32>
    %cst_57 = arith.constant 0.000000e+00 : f32
    %42 = vector.broadcast %cst_57 : f32 to vector<64x64xf32>
    %43 = arith.maximumf %41, %42 : vector<64x64xf32>
    %cst_58 = arith.constant 0.000000e+00 : bf16
    %44 = vector.broadcast %cst_58 : bf16 to vector<1x10x64xbf16>
    %cst_59 = arith.constant 0.000000e+00 : bf16
    %45 = vector.broadcast %cst_59 : bf16 to vector<10x1x64xbf16>
    %c0_60 = arith.constant 0 : index
    %c0_61 = arith.constant 0 : index
    %c0_62 = arith.constant 0 : index
    %46 = vector.load %arg9[%c0_60, %c0_61, %c0_62] : memref<10x10x64xbf16, #tpu.memory_space<vmem>>, vector<1x10x64xbf16>
    tpu.vector_store %arg9[%c0_60, %c0_61, %c0_62], %44 {strides = array<i32>} : memref<10x10x64xbf16, #tpu.memory_space<vmem>>, vector<1x10x64xbf16>,
    %c9 = arith.constant 9 : index
    %c0_63 = arith.constant 0 : index
    %c0_64 = arith.constant 0 : index
    %47 = vector.load %arg9[%c9, %c0_63, %c0_64] : memref<10x10x64xbf16, #tpu.memory_space<vmem>>, vector<1x10x64xbf16>
    tpu.vector_store %arg9[%c9, %c0_63, %c0_64], %44 {strides = array<i32>} : memref<10x10x64xbf16, #tpu.memory_space<vmem>>, vector<1x10x64xbf16>,
    %c0_65 = arith.constant 0 : index
    %c0_66 = arith.constant 0 : index
    %c0_67 = arith.constant 0 : index
    %48 = vector.load %arg9[%c0_65, %c0_66, %c0_67] : memref<10x10x64xbf16, #tpu.memory_space<vmem>>, vector<10x1x64xbf16>
    tpu.vector_store %arg9[%c0_65, %c0_66, %c0_67], %45 {strides = array<i32>} : memref<10x10x64xbf16, #tpu.memory_space<vmem>>, vector<10x1x64xbf16>,
    %c0_68 = arith.constant 0 : index
    %c9_69 = arith.constant 9 : index
    %c0_70 = arith.constant 0 : index
    %49 = vector.load %arg9[%c0_68, %c9_69, %c0_70] : memref<10x10x64xbf16, #tpu.memory_space<vmem>>, vector<10x1x64xbf16>
    tpu.vector_store %arg9[%c0_68, %c9_69, %c0_70], %45 {strides = array<i32>} : memref<10x10x64xbf16, #tpu.memory_space<vmem>>, vector<10x1x64xbf16>,
    %50 = vector.shape_cast %43 : vector<64x64xf32> to vector<8x8x64xf32>
    %51 = arith.truncf %50 : vector<8x8x64xf32> to vector<8x8x64xbf16>
    %c1_71 = arith.constant 1 : index
    %c1_72 = arith.constant 1 : index
    %c0_73 = arith.constant 0 : index
    %52 = vector.load %arg9[%c1_71, %c1_72, %c0_73] : memref<10x10x64xbf16, #tpu.memory_space<vmem>>, vector<8x8x64xbf16>
    tpu.vector_store %arg9[%c1_71, %c1_72, %c0_73], %51 {strides = array<i32>} : memref<10x10x64xbf16, #tpu.memory_space<vmem>>, vector<8x8x64xbf16>,
    %c0_74 = arith.constant 0 : index
    %c0_75 = arith.constant 0 : index
    %c0_76 = arith.constant 0 : index
    %53 = vector.load %arg9[%c0_74, %c0_75, %c0_76] : memref<10x10x64xbf16, #tpu.memory_space<vmem>>, vector<8x8x64xbf16>
    %54 = vector.shape_cast %53 : vector<8x8x64xbf16> to vector<64x64xbf16>
    %c0_77 = arith.constant 0 : index
    %c0_78 = arith.constant 0 : index
    %55 = vector.load %arg11[%c0_77, %c0_78] : memref<64x576xbf16, #tpu.memory_space<vmem>>, vector<64x64xbf16>
    tpu.vector_store %arg11[%c0_77, %c0_78], %54 {strides = array<i32>} : memref<64x576xbf16, #tpu.memory_space<vmem>>, vector<64x64xbf16>,
    %c0_79 = arith.constant 0 : index
    %c1_80 = arith.constant 1 : index
    %c0_81 = arith.constant 0 : index
    %56 = vector.load %arg9[%c0_79, %c1_80, %c0_81] : memref<10x10x64xbf16, #tpu.memory_space<vmem>>, vector<8x8x64xbf16>
    %57 = vector.shape_cast %56 : vector<8x8x64xbf16> to vector<64x64xbf16>
    %c0_82 = arith.constant 0 : index
    %c64_83 = arith.constant 64 : index
    %58 = vector.load %arg11[%c0_82, %c64_83] : memref<64x576xbf16, #tpu.memory_space<vmem>>, vector<64x64xbf16>
    tpu.vector_store %arg11[%c0_82, %c64_83], %57 {strides = array<i32>} : memref<64x576xbf16, #tpu.memory_space<vmem>>, vector<64x64xbf16>,
    %c0_84 = arith.constant 0 : index
    %c2_85 = arith.constant 2 : index
    %c0_86 = arith.constant 0 : index
    %59 = vector.load %arg9[%c0_84, %c2_85, %c0_86] : memref<10x10x64xbf16, #tpu.memory_space<vmem>>, vector<8x8x64xbf16>
    %60 = vector.shape_cast %59 : vector<8x8x64xbf16> to vector<64x64xbf16>
    %c0_87 = arith.constant 0 : index
    %c128_88 = arith.constant 128 : index
    %61 = vector.load %arg11[%c0_87, %c128_88] : memref<64x576xbf16, #tpu.memory_space<vmem>>, vector<64x64xbf16>
    tpu.vector_store %arg11[%c0_87, %c128_88], %60 {strides = array<i32>} : memref<64x576xbf16, #tpu.memory_space<vmem>>, vector<64x64xbf16>,
    %c1_89 = arith.constant 1 : index
    %c0_90 = arith.constant 0 : index
    %c0_91 = arith.constant 0 : index
    %62 = vector.load %arg9[%c1_89, %c0_90, %c0_91] : memref<10x10x64xbf16, #tpu.memory_space<vmem>>, vector<8x8x64xbf16>
    %63 = vector.shape_cast %62 : vector<8x8x64xbf16> to vector<64x64xbf16>
    %c0_92 = arith.constant 0 : index
    %c192_93 = arith.constant 192 : index
    %64 = vector.load %arg11[%c0_92, %c192_93] : memref<64x576xbf16, #tpu.memory_space<vmem>>, vector<64x64xbf16>
    tpu.vector_store %arg11[%c0_92, %c192_93], %63 {strides = array<i32>} : memref<64x576xbf16, #tpu.memory_space<vmem>>, vector<64x64xbf16>,
    %c1_94 = arith.constant 1 : index
    %c1_95 = arith.constant 1 : index
    %c0_96 = arith.constant 0 : index
    %65 = vector.load %arg9[%c1_94, %c1_95, %c0_96] : memref<10x10x64xbf16, #tpu.memory_space<vmem>>, vector<8x8x64xbf16>
    %66 = vector.shape_cast %65 : vector<8x8x64xbf16> to vector<64x64xbf16>
    %c0_97 = arith.constant 0 : index
    %c256_98 = arith.constant 256 : index
    %67 = vector.load %arg11[%c0_97, %c256_98] : memref<64x576xbf16, #tpu.memory_space<vmem>>, vector<64x64xbf16>
    tpu.vector_store %arg11[%c0_97, %c256_98], %66 {strides = array<i32>} : memref<64x576xbf16, #tpu.memory_space<vmem>>, vector<64x64xbf16>,
    %c1_99 = arith.constant 1 : index
    %c2_100 = arith.constant 2 : index
    %c0_101 = arith.constant 0 : index
    %68 = vector.load %arg9[%c1_99, %c2_100, %c0_101] : memref<10x10x64xbf16, #tpu.memory_space<vmem>>, vector<8x8x64xbf16>
    %69 = vector.shape_cast %68 : vector<8x8x64xbf16> to vector<64x64xbf16>
    %c0_102 = arith.constant 0 : index
    %c320 = arith.constant 320 : index
    %70 = vector.load %arg11[%c0_102, %c320] : memref<64x576xbf16, #tpu.memory_space<vmem>>, vector<64x64xbf16>
    tpu.vector_store %arg11[%c0_102, %c320], %69 {strides = array<i32>} : memref<64x576xbf16, #tpu.memory_space<vmem>>, vector<64x64xbf16>,
    %c2_103 = arith.constant 2 : index
    %c0_104 = arith.constant 0 : index
    %c0_105 = arith.constant 0 : index
    %71 = vector.load %arg9[%c2_103, %c0_104, %c0_105] : memref<10x10x64xbf16, #tpu.memory_space<vmem>>, vector<8x8x64xbf16>
    %72 = vector.shape_cast %71 : vector<8x8x64xbf16> to vector<64x64xbf16>
    %c0_106 = arith.constant 0 : index
    %c384 = arith.constant 384 : index
    %73 = vector.load %arg11[%c0_106, %c384] : memref<64x576xbf16, #tpu.memory_space<vmem>>, vector<64x64xbf16>
    tpu.vector_store %arg11[%c0_106, %c384], %72 {strides = array<i32>} : memref<64x576xbf16, #tpu.memory_space<vmem>>, vector<64x64xbf16>,
    %c2_107 = arith.constant 2 : index
    %c1_108 = arith.constant 1 : index
    %c0_109 = arith.constant 0 : index
    %74 = vector.load %arg9[%c2_107, %c1_108, %c0_109] : memref<10x10x64xbf16, #tpu.memory_space<vmem>>, vector<8x8x64xbf16>
    %75 = vector.shape_cast %74 : vector<8x8x64xbf16> to vector<64x64xbf16>
    %c0_110 = arith.constant 0 : index
    %c448 = arith.constant 448 : index
    %76 = vector.load %arg11[%c0_110, %c448] : memref<64x576xbf16, #tpu.memory_space<vmem>>, vector<64x64xbf16>
    tpu.vector_store %arg11[%c0_110, %c448], %75 {strides = array<i32>} : memref<64x576xbf16, #tpu.memory_space<vmem>>, vector<64x64xbf16>,
    %c2_111 = arith.constant 2 : index
    %c2_112 = arith.constant 2 : index
    %c0_113 = arith.constant 0 : index
    %77 = vector.load %arg9[%c2_111, %c2_112, %c0_113] : memref<10x10x64xbf16, #tpu.memory_space<vmem>>, vector<8x8x64xbf16>
    %78 = vector.shape_cast %77 : vector<8x8x64xbf16> to vector<64x64xbf16>
    %c0_114 = arith.constant 0 : index
    %c512 = arith.constant 512 : index
    %79 = vector.load %arg11[%c0_114, %c512] : memref<64x576xbf16, #tpu.memory_space<vmem>>, vector<64x64xbf16>
    tpu.vector_store %arg11[%c0_114, %c512], %78 {strides = array<i32>} : memref<64x576xbf16, #tpu.memory_space<vmem>>, vector<64x64xbf16>,
    %c0_115 = arith.constant 0 : index
    %c0_116 = arith.constant 0 : index
    %80 = vector.load %arg11[%c0_115, %c0_116] : memref<64x576xbf16, #tpu.memory_space<vmem>>, vector<64x576xbf16>
    %c0_117 = arith.constant 0 : index
    %c0_118 = arith.constant 0 : index
    %81 = vector.load %arg4[%c0_117, %c0_118] : memref<576x64xbf16, #tpu.memory_space<vmem>>, vector<576x64xbf16>
    %cst_119 = arith.constant dense<0.000000e+00> : vector<64x64xf32>
    %82 = tpu.matmul %80, %81, %cst_119 {dimension_numbers = #tpu.dot_dimension_numbers<[1], [0], [0], [1], [0, 0, 1, 1], [], []>} : vector<64x576xbf16>, vector<576x64xbf16>, vector<64x64xf32> -> vector<64x64xf32>
    %c0_120 = arith.constant 0 : index
    %c3_121 = arith.constant 3 : index
    %c0_122 = arith.constant 0 : index
    %c0_123 = arith.constant 0 : index
    %c0_124 = arith.constant 0 : index
    %83 = vector.load %arg1[%c0_120, %c3_121, %c0_122, %c0_123, %c0_124] : memref<1x4x9x9x32xbf16, #tpu.memory_space<vmem>>, vector<1x1x8x8x32xbf16>
    %84 = vector.shape_cast %83 : vector<1x1x8x8x32xbf16> to vector<8x8x32xbf16>
    %85 = vector.shape_cast %84 : vector<8x8x32xbf16> to vector<64x32xbf16>
    %c0_125 = arith.constant 0 : index
    %c0_126 = arith.constant 0 : index
    %86 = vector.load %arg6[%c0_125, %c0_126] : memref<32x64xbf16, #tpu.memory_space<vmem>>, vector<32x64xbf16>
    %cst_127 = arith.constant dense<0.000000e+00> : vector<64x64xf32>
    %87 = tpu.matmul %85, %86, %cst_127 {dimension_numbers = #tpu.dot_dimension_numbers<[1], [0], [0], [1], [0, 0, 1, 1], [], []>} : vector<64x32xbf16>, vector<32x64xbf16>, vector<64x64xf32> -> vector<64x64xf32>
    %c0_128 = arith.constant 0 : index
    %c0_129 = arith.constant 0 : index
    %88 = vector.load %arg7[%c0_128, %c0_129] : memref<1x64xf32, #tpu.memory_space<vmem>>, vector<1x64xf32>
    %89 = vector.broadcast %88 : vector<1x64xf32> to vector<64x64xf32>
    %90 = arith.addf %87, %89 : vector<64x64xf32>
    %c0_130 = arith.constant 0 : index
    %c0_131 = arith.constant 0 : index
    %91 = vector.load %arg5[%c0_130, %c0_131] : memref<1x64xf32, #tpu.memory_space<vmem>>, vector<1x64xf32>
    %92 = vector.broadcast %91 : vector<1x64xf32> to vector<64x64xf32>
    %93 = arith.addf %82, %92 : vector<64x64xf32>
    %94 = arith.addf %93, %90 : vector<64x64xf32>
    %cst_132 = arith.constant 0.000000e+00 : f32
    %95 = vector.broadcast %cst_132 : f32 to vector<64x64xf32>
    %96 = arith.maximumf %94, %95 : vector<64x64xf32>
    %97 = vector.shape_cast %96 : vector<64x64xf32> to vector<8x8x64xf32>
    %c0_133 = arith.constant 0 : index
    %c0_134 = arith.constant 0 : index
    %c0_135 = arith.constant 0 : index
    %c0_136 = arith.constant 0 : index
    %98 = vector.load %arg8[%c0_133, %c0_134, %c0_135, %c0_136] : memref<1x8x8x64xf32, #tpu.memory_space<vmem>>, vector<1x8x8x64xf32>
    %99 = vector.shape_cast %98 : vector<1x8x8x64xf32> to vector<8x8x64xf32>
    %100 = vector.shape_cast %97 : vector<8x8x64xf32> to vector<1x8x8x64xf32>
    tpu.vector_store %arg8[%c0_133, %c0_134, %c0_135, %c0_136], %100 {strides = array<i32>} : memref<1x8x8x64xf32, #tpu.memory_space<vmem>>, vector<1x8x8x64xf32>,
    return
  }
  func.func @transform_0(%arg0: i32) -> (i32, i32, i32, i32, i32) {
    %c0_i32 = arith.constant 0 : i32
    %c0_i32_0 = arith.constant 0 : i32
    %c0_i32_1 = arith.constant 0 : i32
    %c0_i32_2 = arith.constant 0 : i32
    %c0_i32_3 = arith.constant 0 : i32
    return %arg0, %c0_i32, %c0_i32_0, %c0_i32_1, %c0_i32_2 : i32, i32, i32, i32, i32
  }
  func.func @transform_1(%arg0: i32) -> (i32, i32) {
    %c0_i32 = arith.constant 0 : i32
    %c0_i32_0 = arith.constant 0 : i32
    %c0_i32_1 = arith.constant 0 : i32
    return %c0_i32, %c0_i32_0 : i32, i32
  }
  func.func @transform_2(%arg0: i32) -> (i32, i32) {
    %c0_i32 = arith.constant 0 : i32
    %c0_i32_0 = arith.constant 0 : i32
    %c0_i32_1 = arith.constant 0 : i32
    return %c0_i32, %c0_i32_0 : i32, i32
  }
  func.func @transform_3(%arg0: i32) -> (i32, i32) {
    %c0_i32 = arith.constant 0 : i32
    %c0_i32_0 = arith.constant 0 : i32
    %c0_i32_1 = arith.constant 0 : i32
    return %c0_i32, %c0_i32_0 : i32, i32
  }
  func.func @transform_4(%arg0: i32) -> (i32, i32) {
    %c0_i32 = arith.constant 0 : i32
    %c0_i32_0 = arith.constant 0 : i32
    %c0_i32_1 = arith.constant 0 : i32
    return %c0_i32, %c0_i32_0 : i32, i32
  }
  func.func @transform_5(%arg0: i32) -> (i32, i32) {
    %c0_i32 = arith.constant 0 : i32
    %c0_i32_0 = arith.constant 0 : i32
    %c0_i32_1 = arith.constant 0 : i32
    return %c0_i32, %c0_i32_0 : i32, i32
  }
  func.func @transform_6(%arg0: i32) -> (i32, i32) {
    %c0_i32 = arith.constant 0 : i32
    %c0_i32_0 = arith.constant 0 : i32
    %c0_i32_1 = arith.constant 0 : i32
    return %c0_i32, %c0_i32_0 : i32, i32
  }
  func.func @transform_7(%arg0: i32) -> (i32, i32, i32, i32) {
    %c0_i32 = arith.constant 0 : i32
    %c0_i32_0 = arith.constant 0 : i32
    %c0_i32_1 = arith.constant 0 : i32
    %c0_i32_2 = arith.constant 0 : i32
    return %arg0, %c0_i32, %c0_i32_0, %c0_i32_1 : i32, i32, i32, i32
  }
}

module attributes {stable_mosaic.version = 11 : i64} {
  func.func @kernel(%arg0: i32, %arg1: memref<1x1x10x10x64xbf16, #tpu.memory_space<vmem>>, %arg2: memref<576x64xbf16, #tpu.memory_space<vmem>>, %arg3: memref<1x64xf32, #tpu.memory_space<vmem>>, %arg4: memref<576x64xbf16, #tpu.memory_space<vmem>>, %arg5: memref<1x64xf32, #tpu.memory_space<vmem>>, %arg6: memref<1x8x8x64xf32, #tpu.memory_space<vmem>>, %arg7: memref<1x8x8x64xf32, #tpu.memory_space<vmem>>, %arg8: memref<10x10x64xbf16, #tpu.memory_space<vmem>>, %arg9: memref<64x576xbf16, #tpu.memory_space<vmem>>, %arg10: memref<64x576xbf16, #tpu.memory_space<vmem>>) attributes {dimension_semantics = [#tpu.dimension_semantics<parallel>], iteration_bounds = array<i64: 2>, scalar_prefetch = 0 : i64, scratch_operands = 3 : i64, tpu.core_type = #tpu.core_type<tc>, window_params = [{transform_indices = @transform_0, window_bounds = array<i64: 1, 1, 10, 10, 64>}, {pipeline_mode = #tpu.pipeline_mode<synchronous>, transform_indices = @transform_1, window_bounds = array<i64: 576, 64>}, {pipeline_mode = #tpu.pipeline_mode<synchronous>, transform_indices = @transform_2, window_bounds = array<i64: 1, 64>}, {pipeline_mode = #tpu.pipeline_mode<synchronous>, transform_indices = @transform_3, window_bounds = array<i64: 576, 64>}, {pipeline_mode = #tpu.pipeline_mode<synchronous>, transform_indices = @transform_4, window_bounds = array<i64: 1, 64>}, {transform_indices = @transform_5, window_bounds = array<i64: 1, 8, 8, 64>}, {transform_indices = @transform_6, window_bounds = array<i64: 1, 8, 8, 64>}]} {
    %c0 = arith.constant 0 : index
    %c0_0 = arith.constant 0 : index
    %c0_1 = arith.constant 0 : index
    %c0_2 = arith.constant 0 : index
    %c0_3 = arith.constant 0 : index
    %0 = vector.load %arg1[%c0, %c0_0, %c0_1, %c0_2, %c0_3] : memref<1x1x10x10x64xbf16, #tpu.memory_space<vmem>>, vector<1x1x8x8x64xbf16>
    %1 = vector.shape_cast %0 : vector<1x1x8x8x64xbf16> to vector<8x8x64xbf16>
    %2 = vector.shape_cast %1 : vector<8x8x64xbf16> to vector<64x64xbf16>
    %c0_4 = arith.constant 0 : index
    %c0_5 = arith.constant 0 : index
    %3 = vector.load %arg9[%c0_4, %c0_5] : memref<64x576xbf16, #tpu.memory_space<vmem>>, vector<64x64xbf16>
    tpu.vector_store %arg9[%c0_4, %c0_5], %2 {strides = array<i32>} : memref<64x576xbf16, #tpu.memory_space<vmem>>, vector<64x64xbf16>,
    %c0_6 = arith.constant 0 : index
    %c0_7 = arith.constant 0 : index
    %c0_8 = arith.constant 0 : index
    %c1 = arith.constant 1 : index
    %c0_9 = arith.constant 0 : index
    %4 = vector.load %arg1[%c0_6, %c0_7, %c0_8, %c1, %c0_9] : memref<1x1x10x10x64xbf16, #tpu.memory_space<vmem>>, vector<1x1x8x8x64xbf16>
    %5 = vector.shape_cast %4 : vector<1x1x8x8x64xbf16> to vector<8x8x64xbf16>
    %6 = vector.shape_cast %5 : vector<8x8x64xbf16> to vector<64x64xbf16>
    %c0_10 = arith.constant 0 : index
    %c64 = arith.constant 64 : index
    %7 = vector.load %arg9[%c0_10, %c64] : memref<64x576xbf16, #tpu.memory_space<vmem>>, vector<64x64xbf16>
    tpu.vector_store %arg9[%c0_10, %c64], %6 {strides = array<i32>} : memref<64x576xbf16, #tpu.memory_space<vmem>>, vector<64x64xbf16>,
    %c0_11 = arith.constant 0 : index
    %c0_12 = arith.constant 0 : index
    %c0_13 = arith.constant 0 : index
    %c2 = arith.constant 2 : index
    %c0_14 = arith.constant 0 : index
    %8 = vector.load %arg1[%c0_11, %c0_12, %c0_13, %c2, %c0_14] : memref<1x1x10x10x64xbf16, #tpu.memory_space<vmem>>, vector<1x1x8x8x64xbf16>
    %9 = vector.shape_cast %8 : vector<1x1x8x8x64xbf16> to vector<8x8x64xbf16>
    %10 = vector.shape_cast %9 : vector<8x8x64xbf16> to vector<64x64xbf16>
    %c0_15 = arith.constant 0 : index
    %c128 = arith.constant 128 : index
    %11 = vector.load %arg9[%c0_15, %c128] : memref<64x576xbf16, #tpu.memory_space<vmem>>, vector<64x64xbf16>
    tpu.vector_store %arg9[%c0_15, %c128], %10 {strides = array<i32>} : memref<64x576xbf16, #tpu.memory_space<vmem>>, vector<64x64xbf16>,
    %c0_16 = arith.constant 0 : index
    %c0_17 = arith.constant 0 : index
    %c1_18 = arith.constant 1 : index
    %c0_19 = arith.constant 0 : index
    %c0_20 = arith.constant 0 : index
    %12 = vector.load %arg1[%c0_16, %c0_17, %c1_18, %c0_19, %c0_20] : memref<1x1x10x10x64xbf16, #tpu.memory_space<vmem>>, vector<1x1x8x8x64xbf16>
    %13 = vector.shape_cast %12 : vector<1x1x8x8x64xbf16> to vector<8x8x64xbf16>
    %14 = vector.shape_cast %13 : vector<8x8x64xbf16> to vector<64x64xbf16>
    %c0_21 = arith.constant 0 : index
    %c192 = arith.constant 192 : index
    %15 = vector.load %arg9[%c0_21, %c192] : memref<64x576xbf16, #tpu.memory_space<vmem>>, vector<64x64xbf16>
    tpu.vector_store %arg9[%c0_21, %c192], %14 {strides = array<i32>} : memref<64x576xbf16, #tpu.memory_space<vmem>>, vector<64x64xbf16>,
    %c0_22 = arith.constant 0 : index
    %c0_23 = arith.constant 0 : index
    %c1_24 = arith.constant 1 : index
    %c1_25 = arith.constant 1 : index
    %c0_26 = arith.constant 0 : index
    %16 = vector.load %arg1[%c0_22, %c0_23, %c1_24, %c1_25, %c0_26] : memref<1x1x10x10x64xbf16, #tpu.memory_space<vmem>>, vector<1x1x8x8x64xbf16>
    %17 = vector.shape_cast %16 : vector<1x1x8x8x64xbf16> to vector<8x8x64xbf16>
    %18 = vector.shape_cast %17 : vector<8x8x64xbf16> to vector<64x64xbf16>
    %c0_27 = arith.constant 0 : index
    %c256 = arith.constant 256 : index
    %19 = vector.load %arg9[%c0_27, %c256] : memref<64x576xbf16, #tpu.memory_space<vmem>>, vector<64x64xbf16>
    tpu.vector_store %arg9[%c0_27, %c256], %18 {strides = array<i32>} : memref<64x576xbf16, #tpu.memory_space<vmem>>, vector<64x64xbf16>,
    %c0_28 = arith.constant 0 : index
    %c0_29 = arith.constant 0 : index
    %c1_30 = arith.constant 1 : index
    %c2_31 = arith.constant 2 : index
    %c0_32 = arith.constant 0 : index
    %20 = vector.load %arg1[%c0_28, %c0_29, %c1_30, %c2_31, %c0_32] : memref<1x1x10x10x64xbf16, #tpu.memory_space<vmem>>, vector<1x1x8x8x64xbf16>
    %21 = vector.shape_cast %20 : vector<1x1x8x8x64xbf16> to vector<8x8x64xbf16>
    %22 = vector.shape_cast %21 : vector<8x8x64xbf16> to vector<64x64xbf16>
    %c0_33 = arith.constant 0 : index
    %c320 = arith.constant 320 : index
    %23 = vector.load %arg9[%c0_33, %c320] : memref<64x576xbf16, #tpu.memory_space<vmem>>, vector<64x64xbf16>
    tpu.vector_store %arg9[%c0_33, %c320], %22 {strides = array<i32>} : memref<64x576xbf16, #tpu.memory_space<vmem>>, vector<64x64xbf16>,
    %c0_34 = arith.constant 0 : index
    %c0_35 = arith.constant 0 : index
    %c2_36 = arith.constant 2 : index
    %c0_37 = arith.constant 0 : index
    %c0_38 = arith.constant 0 : index
    %24 = vector.load %arg1[%c0_34, %c0_35, %c2_36, %c0_37, %c0_38] : memref<1x1x10x10x64xbf16, #tpu.memory_space<vmem>>, vector<1x1x8x8x64xbf16>
    %25 = vector.shape_cast %24 : vector<1x1x8x8x64xbf16> to vector<8x8x64xbf16>
    %26 = vector.shape_cast %25 : vector<8x8x64xbf16> to vector<64x64xbf16>
    %c0_39 = arith.constant 0 : index
    %c384 = arith.constant 384 : index
    %27 = vector.load %arg9[%c0_39, %c384] : memref<64x576xbf16, #tpu.memory_space<vmem>>, vector<64x64xbf16>
    tpu.vector_store %arg9[%c0_39, %c384], %26 {strides = array<i32>} : memref<64x576xbf16, #tpu.memory_space<vmem>>, vector<64x64xbf16>,
    %c0_40 = arith.constant 0 : index
    %c0_41 = arith.constant 0 : index
    %c2_42 = arith.constant 2 : index
    %c1_43 = arith.constant 1 : index
    %c0_44 = arith.constant 0 : index
    %28 = vector.load %arg1[%c0_40, %c0_41, %c2_42, %c1_43, %c0_44] : memref<1x1x10x10x64xbf16, #tpu.memory_space<vmem>>, vector<1x1x8x8x64xbf16>
    %29 = vector.shape_cast %28 : vector<1x1x8x8x64xbf16> to vector<8x8x64xbf16>
    %30 = vector.shape_cast %29 : vector<8x8x64xbf16> to vector<64x64xbf16>
    %c0_45 = arith.constant 0 : index
    %c448 = arith.constant 448 : index
    %31 = vector.load %arg9[%c0_45, %c448] : memref<64x576xbf16, #tpu.memory_space<vmem>>, vector<64x64xbf16>
    tpu.vector_store %arg9[%c0_45, %c448], %30 {strides = array<i32>} : memref<64x576xbf16, #tpu.memory_space<vmem>>, vector<64x64xbf16>,
    %c0_46 = arith.constant 0 : index
    %c0_47 = arith.constant 0 : index
    %c2_48 = arith.constant 2 : index
    %c2_49 = arith.constant 2 : index
    %c0_50 = arith.constant 0 : index
    %32 = vector.load %arg1[%c0_46, %c0_47, %c2_48, %c2_49, %c0_50] : memref<1x1x10x10x64xbf16, #tpu.memory_space<vmem>>, vector<1x1x8x8x64xbf16>
    %33 = vector.shape_cast %32 : vector<1x1x8x8x64xbf16> to vector<8x8x64xbf16>
    %34 = vector.shape_cast %33 : vector<8x8x64xbf16> to vector<64x64xbf16>
    %c0_51 = arith.constant 0 : index
    %c512 = arith.constant 512 : index
    %35 = vector.load %arg9[%c0_51, %c512] : memref<64x576xbf16, #tpu.memory_space<vmem>>, vector<64x64xbf16>
    tpu.vector_store %arg9[%c0_51, %c512], %34 {strides = array<i32>} : memref<64x576xbf16, #tpu.memory_space<vmem>>, vector<64x64xbf16>,
    %c0_52 = arith.constant 0 : index
    %c0_53 = arith.constant 0 : index
    %36 = vector.load %arg9[%c0_52, %c0_53] : memref<64x576xbf16, #tpu.memory_space<vmem>>, vector<64x576xbf16>
    %c0_54 = arith.constant 0 : index
    %c0_55 = arith.constant 0 : index
    %37 = vector.load %arg2[%c0_54, %c0_55] : memref<576x64xbf16, #tpu.memory_space<vmem>>, vector<576x64xbf16>
    %cst = arith.constant dense<0.000000e+00> : vector<64x64xf32>
    %38 = tpu.matmul %36, %37, %cst {dimension_numbers = #tpu.dot_dimension_numbers<[1], [0], [0], [1], [0, 0, 1, 1], [], []>} : vector<64x576xbf16>, vector<576x64xbf16>, vector<64x64xf32> -> vector<64x64xf32>
    %c0_56 = arith.constant 0 : index
    %c0_57 = arith.constant 0 : index
    %39 = vector.load %arg3[%c0_56, %c0_57] : memref<1x64xf32, #tpu.memory_space<vmem>>, vector<1x64xf32>
    %40 = vector.broadcast %39 : vector<1x64xf32> to vector<64x64xf32>
    %41 = arith.addf %38, %40 : vector<64x64xf32>
    %cst_58 = arith.constant 0.000000e+00 : f32
    %42 = vector.broadcast %cst_58 : f32 to vector<64x64xf32>
    %43 = arith.maximumf %41, %42 : vector<64x64xf32>
    %cst_59 = arith.constant 0.000000e+00 : bf16
    %44 = vector.broadcast %cst_59 : bf16 to vector<1x10x64xbf16>
    %cst_60 = arith.constant 0.000000e+00 : bf16
    %45 = vector.broadcast %cst_60 : bf16 to vector<10x1x64xbf16>
    %c0_61 = arith.constant 0 : index
    %c0_62 = arith.constant 0 : index
    %c0_63 = arith.constant 0 : index
    %46 = vector.load %arg8[%c0_61, %c0_62, %c0_63] : memref<10x10x64xbf16, #tpu.memory_space<vmem>>, vector<1x10x64xbf16>
    tpu.vector_store %arg8[%c0_61, %c0_62, %c0_63], %44 {strides = array<i32>} : memref<10x10x64xbf16, #tpu.memory_space<vmem>>, vector<1x10x64xbf16>,
    %c9 = arith.constant 9 : index
    %c0_64 = arith.constant 0 : index
    %c0_65 = arith.constant 0 : index
    %47 = vector.load %arg8[%c9, %c0_64, %c0_65] : memref<10x10x64xbf16, #tpu.memory_space<vmem>>, vector<1x10x64xbf16>
    tpu.vector_store %arg8[%c9, %c0_64, %c0_65], %44 {strides = array<i32>} : memref<10x10x64xbf16, #tpu.memory_space<vmem>>, vector<1x10x64xbf16>,
    %c0_66 = arith.constant 0 : index
    %c0_67 = arith.constant 0 : index
    %c0_68 = arith.constant 0 : index
    %48 = vector.load %arg8[%c0_66, %c0_67, %c0_68] : memref<10x10x64xbf16, #tpu.memory_space<vmem>>, vector<10x1x64xbf16>
    tpu.vector_store %arg8[%c0_66, %c0_67, %c0_68], %45 {strides = array<i32>} : memref<10x10x64xbf16, #tpu.memory_space<vmem>>, vector<10x1x64xbf16>,
    %c0_69 = arith.constant 0 : index
    %c9_70 = arith.constant 9 : index
    %c0_71 = arith.constant 0 : index
    %49 = vector.load %arg8[%c0_69, %c9_70, %c0_71] : memref<10x10x64xbf16, #tpu.memory_space<vmem>>, vector<10x1x64xbf16>
    tpu.vector_store %arg8[%c0_69, %c9_70, %c0_71], %45 {strides = array<i32>} : memref<10x10x64xbf16, #tpu.memory_space<vmem>>, vector<10x1x64xbf16>,
    %50 = vector.shape_cast %43 : vector<64x64xf32> to vector<8x8x64xf32>
    %51 = arith.truncf %50 : vector<8x8x64xf32> to vector<8x8x64xbf16>
    %c1_72 = arith.constant 1 : index
    %c1_73 = arith.constant 1 : index
    %c0_74 = arith.constant 0 : index
    %52 = vector.load %arg8[%c1_72, %c1_73, %c0_74] : memref<10x10x64xbf16, #tpu.memory_space<vmem>>, vector<8x8x64xbf16>
    tpu.vector_store %arg8[%c1_72, %c1_73, %c0_74], %51 {strides = array<i32>} : memref<10x10x64xbf16, #tpu.memory_space<vmem>>, vector<8x8x64xbf16>,
    %c0_75 = arith.constant 0 : index
    %c0_76 = arith.constant 0 : index
    %c0_77 = arith.constant 0 : index
    %53 = vector.load %arg8[%c0_75, %c0_76, %c0_77] : memref<10x10x64xbf16, #tpu.memory_space<vmem>>, vector<8x8x64xbf16>
    %54 = vector.shape_cast %53 : vector<8x8x64xbf16> to vector<64x64xbf16>
    %c0_78 = arith.constant 0 : index
    %c0_79 = arith.constant 0 : index
    %55 = vector.load %arg10[%c0_78, %c0_79] : memref<64x576xbf16, #tpu.memory_space<vmem>>, vector<64x64xbf16>
    tpu.vector_store %arg10[%c0_78, %c0_79], %54 {strides = array<i32>} : memref<64x576xbf16, #tpu.memory_space<vmem>>, vector<64x64xbf16>,
    %c0_80 = arith.constant 0 : index
    %c1_81 = arith.constant 1 : index
    %c0_82 = arith.constant 0 : index
    %56 = vector.load %arg8[%c0_80, %c1_81, %c0_82] : memref<10x10x64xbf16, #tpu.memory_space<vmem>>, vector<8x8x64xbf16>
    %57 = vector.shape_cast %56 : vector<8x8x64xbf16> to vector<64x64xbf16>
    %c0_83 = arith.constant 0 : index
    %c64_84 = arith.constant 64 : index
    %58 = vector.load %arg10[%c0_83, %c64_84] : memref<64x576xbf16, #tpu.memory_space<vmem>>, vector<64x64xbf16>
    tpu.vector_store %arg10[%c0_83, %c64_84], %57 {strides = array<i32>} : memref<64x576xbf16, #tpu.memory_space<vmem>>, vector<64x64xbf16>,
    %c0_85 = arith.constant 0 : index
    %c2_86 = arith.constant 2 : index
    %c0_87 = arith.constant 0 : index
    %59 = vector.load %arg8[%c0_85, %c2_86, %c0_87] : memref<10x10x64xbf16, #tpu.memory_space<vmem>>, vector<8x8x64xbf16>
    %60 = vector.shape_cast %59 : vector<8x8x64xbf16> to vector<64x64xbf16>
    %c0_88 = arith.constant 0 : index
    %c128_89 = arith.constant 128 : index
    %61 = vector.load %arg10[%c0_88, %c128_89] : memref<64x576xbf16, #tpu.memory_space<vmem>>, vector<64x64xbf16>
    tpu.vector_store %arg10[%c0_88, %c128_89], %60 {strides = array<i32>} : memref<64x576xbf16, #tpu.memory_space<vmem>>, vector<64x64xbf16>,
    %c1_90 = arith.constant 1 : index
    %c0_91 = arith.constant 0 : index
    %c0_92 = arith.constant 0 : index
    %62 = vector.load %arg8[%c1_90, %c0_91, %c0_92] : memref<10x10x64xbf16, #tpu.memory_space<vmem>>, vector<8x8x64xbf16>
    %63 = vector.shape_cast %62 : vector<8x8x64xbf16> to vector<64x64xbf16>
    %c0_93 = arith.constant 0 : index
    %c192_94 = arith.constant 192 : index
    %64 = vector.load %arg10[%c0_93, %c192_94] : memref<64x576xbf16, #tpu.memory_space<vmem>>, vector<64x64xbf16>
    tpu.vector_store %arg10[%c0_93, %c192_94], %63 {strides = array<i32>} : memref<64x576xbf16, #tpu.memory_space<vmem>>, vector<64x64xbf16>,
    %c1_95 = arith.constant 1 : index
    %c1_96 = arith.constant 1 : index
    %c0_97 = arith.constant 0 : index
    %65 = vector.load %arg8[%c1_95, %c1_96, %c0_97] : memref<10x10x64xbf16, #tpu.memory_space<vmem>>, vector<8x8x64xbf16>
    %66 = vector.shape_cast %65 : vector<8x8x64xbf16> to vector<64x64xbf16>
    %c0_98 = arith.constant 0 : index
    %c256_99 = arith.constant 256 : index
    %67 = vector.load %arg10[%c0_98, %c256_99] : memref<64x576xbf16, #tpu.memory_space<vmem>>, vector<64x64xbf16>
    tpu.vector_store %arg10[%c0_98, %c256_99], %66 {strides = array<i32>} : memref<64x576xbf16, #tpu.memory_space<vmem>>, vector<64x64xbf16>,
    %c1_100 = arith.constant 1 : index
    %c2_101 = arith.constant 2 : index
    %c0_102 = arith.constant 0 : index
    %68 = vector.load %arg8[%c1_100, %c2_101, %c0_102] : memref<10x10x64xbf16, #tpu.memory_space<vmem>>, vector<8x8x64xbf16>
    %69 = vector.shape_cast %68 : vector<8x8x64xbf16> to vector<64x64xbf16>
    %c0_103 = arith.constant 0 : index
    %c320_104 = arith.constant 320 : index
    %70 = vector.load %arg10[%c0_103, %c320_104] : memref<64x576xbf16, #tpu.memory_space<vmem>>, vector<64x64xbf16>
    tpu.vector_store %arg10[%c0_103, %c320_104], %69 {strides = array<i32>} : memref<64x576xbf16, #tpu.memory_space<vmem>>, vector<64x64xbf16>,
    %c2_105 = arith.constant 2 : index
    %c0_106 = arith.constant 0 : index
    %c0_107 = arith.constant 0 : index
    %71 = vector.load %arg8[%c2_105, %c0_106, %c0_107] : memref<10x10x64xbf16, #tpu.memory_space<vmem>>, vector<8x8x64xbf16>
    %72 = vector.shape_cast %71 : vector<8x8x64xbf16> to vector<64x64xbf16>
    %c0_108 = arith.constant 0 : index
    %c384_109 = arith.constant 384 : index
    %73 = vector.load %arg10[%c0_108, %c384_109] : memref<64x576xbf16, #tpu.memory_space<vmem>>, vector<64x64xbf16>
    tpu.vector_store %arg10[%c0_108, %c384_109], %72 {strides = array<i32>} : memref<64x576xbf16, #tpu.memory_space<vmem>>, vector<64x64xbf16>,
    %c2_110 = arith.constant 2 : index
    %c1_111 = arith.constant 1 : index
    %c0_112 = arith.constant 0 : index
    %74 = vector.load %arg8[%c2_110, %c1_111, %c0_112] : memref<10x10x64xbf16, #tpu.memory_space<vmem>>, vector<8x8x64xbf16>
    %75 = vector.shape_cast %74 : vector<8x8x64xbf16> to vector<64x64xbf16>
    %c0_113 = arith.constant 0 : index
    %c448_114 = arith.constant 448 : index
    %76 = vector.load %arg10[%c0_113, %c448_114] : memref<64x576xbf16, #tpu.memory_space<vmem>>, vector<64x64xbf16>
    tpu.vector_store %arg10[%c0_113, %c448_114], %75 {strides = array<i32>} : memref<64x576xbf16, #tpu.memory_space<vmem>>, vector<64x64xbf16>,
    %c2_115 = arith.constant 2 : index
    %c2_116 = arith.constant 2 : index
    %c0_117 = arith.constant 0 : index
    %77 = vector.load %arg8[%c2_115, %c2_116, %c0_117] : memref<10x10x64xbf16, #tpu.memory_space<vmem>>, vector<8x8x64xbf16>
    %78 = vector.shape_cast %77 : vector<8x8x64xbf16> to vector<64x64xbf16>
    %c0_118 = arith.constant 0 : index
    %c512_119 = arith.constant 512 : index
    %79 = vector.load %arg10[%c0_118, %c512_119] : memref<64x576xbf16, #tpu.memory_space<vmem>>, vector<64x64xbf16>
    tpu.vector_store %arg10[%c0_118, %c512_119], %78 {strides = array<i32>} : memref<64x576xbf16, #tpu.memory_space<vmem>>, vector<64x64xbf16>,
    %c0_120 = arith.constant 0 : index
    %c0_121 = arith.constant 0 : index
    %80 = vector.load %arg10[%c0_120, %c0_121] : memref<64x576xbf16, #tpu.memory_space<vmem>>, vector<64x576xbf16>
    %c0_122 = arith.constant 0 : index
    %c0_123 = arith.constant 0 : index
    %81 = vector.load %arg4[%c0_122, %c0_123] : memref<576x64xbf16, #tpu.memory_space<vmem>>, vector<576x64xbf16>
    %cst_124 = arith.constant dense<0.000000e+00> : vector<64x64xf32>
    %82 = tpu.matmul %80, %81, %cst_124 {dimension_numbers = #tpu.dot_dimension_numbers<[1], [0], [0], [1], [0, 0, 1, 1], [], []>} : vector<64x576xbf16>, vector<576x64xbf16>, vector<64x64xf32> -> vector<64x64xf32>
    %c0_125 = arith.constant 0 : index
    %c0_126 = arith.constant 0 : index
    %c1_127 = arith.constant 1 : index
    %c1_128 = arith.constant 1 : index
    %c0_129 = arith.constant 0 : index
    %83 = vector.load %arg1[%c0_125, %c0_126, %c1_127, %c1_128, %c0_129] : memref<1x1x10x10x64xbf16, #tpu.memory_space<vmem>>, vector<1x1x8x8x64xbf16>
    %84 = vector.shape_cast %83 : vector<1x1x8x8x64xbf16> to vector<8x8x64xbf16>
    %85 = vector.shape_cast %84 : vector<8x8x64xbf16> to vector<64x64xbf16>
    %86 = arith.extf %85 : vector<64x64xbf16> to vector<64x64xf32>
    %c0_130 = arith.constant 0 : index
    %c0_131 = arith.constant 0 : index
    %87 = vector.load %arg5[%c0_130, %c0_131] : memref<1x64xf32, #tpu.memory_space<vmem>>, vector<1x64xf32>
    %88 = vector.broadcast %87 : vector<1x64xf32> to vector<64x64xf32>
    %89 = arith.addf %82, %88 : vector<64x64xf32>
    %90 = arith.addf %89, %86 : vector<64x64xf32>
    %cst_132 = arith.constant 0.000000e+00 : f32
    %91 = vector.broadcast %cst_132 : f32 to vector<64x64xf32>
    %92 = arith.maximumf %90, %91 : vector<64x64xf32>
    %93 = vector.shape_cast %92 : vector<64x64xf32> to vector<8x8x64xf32>
    %c0_133 = arith.constant 0 : index
    %c0_134 = arith.constant 0 : index
    %c0_135 = arith.constant 0 : index
    %c0_136 = arith.constant 0 : index
    %94 = vector.load %arg6[%c0_133, %c0_134, %c0_135, %c0_136] : memref<1x8x8x64xf32, #tpu.memory_space<vmem>>, vector<1x8x8x64xf32>
    %95 = vector.shape_cast %94 : vector<1x8x8x64xf32> to vector<8x8x64xf32>
    %96 = vector.shape_cast %93 : vector<8x8x64xf32> to vector<1x8x8x64xf32>
    tpu.vector_store %arg6[%c0_133, %c0_134, %c0_135, %c0_136], %96 {strides = array<i32>} : memref<1x8x8x64xf32, #tpu.memory_space<vmem>>, vector<1x8x8x64xf32>,
    %97 = vector.shape_cast %90 : vector<64x64xf32> to vector<8x8x64xf32>
    %c0_137 = arith.constant 0 : index
    %c0_138 = arith.constant 0 : index
    %c0_139 = arith.constant 0 : index
    %c0_140 = arith.constant 0 : index
    %98 = vector.load %arg7[%c0_137, %c0_138, %c0_139, %c0_140] : memref<1x8x8x64xf32, #tpu.memory_space<vmem>>, vector<1x8x8x64xf32>
    %99 = vector.shape_cast %98 : vector<1x8x8x64xf32> to vector<8x8x64xf32>
    %100 = vector.shape_cast %97 : vector<8x8x64xf32> to vector<1x8x8x64xf32>
    tpu.vector_store %arg7[%c0_137, %c0_138, %c0_139, %c0_140], %100 {strides = array<i32>} : memref<1x8x8x64xf32, #tpu.memory_space<vmem>>, vector<1x8x8x64xf32>,
    return
  }
  func.func @transform_0(%arg0: i32) -> (i32, i32, i32, i32, i32) {
    %c0_i32 = arith.constant 0 : i32
    %c0_i32_0 = arith.constant 0 : i32
    %c0_i32_1 = arith.constant 0 : i32
    %c0_i32_2 = arith.constant 0 : i32
    %c0_i32_3 = arith.constant 0 : i32
    return %arg0, %c0_i32, %c0_i32_0, %c0_i32_1, %c0_i32_2 : i32, i32, i32, i32, i32
  }
  func.func @transform_1(%arg0: i32) -> (i32, i32) {
    %c0_i32 = arith.constant 0 : i32
    %c0_i32_0 = arith.constant 0 : i32
    %c0_i32_1 = arith.constant 0 : i32
    return %c0_i32, %c0_i32_0 : i32, i32
  }
  func.func @transform_2(%arg0: i32) -> (i32, i32) {
    %c0_i32 = arith.constant 0 : i32
    %c0_i32_0 = arith.constant 0 : i32
    %c0_i32_1 = arith.constant 0 : i32
    return %c0_i32, %c0_i32_0 : i32, i32
  }
  func.func @transform_3(%arg0: i32) -> (i32, i32) {
    %c0_i32 = arith.constant 0 : i32
    %c0_i32_0 = arith.constant 0 : i32
    %c0_i32_1 = arith.constant 0 : i32
    return %c0_i32, %c0_i32_0 : i32, i32
  }
  func.func @transform_4(%arg0: i32) -> (i32, i32) {
    %c0_i32 = arith.constant 0 : i32
    %c0_i32_0 = arith.constant 0 : i32
    %c0_i32_1 = arith.constant 0 : i32
    return %c0_i32, %c0_i32_0 : i32, i32
  }
  func.func @transform_5(%arg0: i32) -> (i32, i32, i32, i32) {
    %c0_i32 = arith.constant 0 : i32
    %c0_i32_0 = arith.constant 0 : i32
    %c0_i32_1 = arith.constant 0 : i32
    %c0_i32_2 = arith.constant 0 : i32
    return %arg0, %c0_i32, %c0_i32_0, %c0_i32_1 : i32, i32, i32, i32
  }
  func.func @transform_6(%arg0: i32) -> (i32, i32, i32, i32) {
    %c0_i32 = arith.constant 0 : i32
    %c0_i32_0 = arith.constant 0 : i32
    %c0_i32_1 = arith.constant 0 : i32
    %c0_i32_2 = arith.constant 0 : i32
    return %arg0, %c0_i32, %c0_i32_0, %c0_i32_1 : i32, i32, i32, i32
  }
}

</mosaic_0001>

<bundles_post_ra>
// kernel: fwd.2
= control target key start
LH: loop header
LB: loop body
LE: loop exit
PB: predicated region body
PF: predicated region fallthrough
CT: control target
= control target key end

     0   :  { %s3727_s24 = smov 0   ;;  %s4620_s0 = inlined_call_operand.vmem [shape: bf16[2,4,9,9,32], index: 0, kind: input, shape index: {}]   ;;  %s4621_s1 = inlined_call_operand.vmem [shape: bf16[288,64], index: 1, kind: input, shape index: {}]   ;;  %s4622_s2 = inlined_call_operand.vmem [shape: f32[1,64], index: 2, kind: input, shape index: {}, may-alias: {2,4,6}]   ;;  %s4623_s3 = inlined_call_operand.vmem [shape: bf16[576,64], index: 3, kind: input, shape index: {}]   ;;  %s4624_s4 = inlined_call_operand.vmem [shape: f32[1,64], index: 4, kind: input, shape index: {}, may-alias: {2,4,6}]   ;;  %s4625_s5 = inlined_call_operand.vmem [shape: bf16[32,64], index: 5, kind: input, shape index: {}]   ;;  %s4626_s6 = inlined_call_operand.vmem [shape: f32[1,64], index: 6, kind: input, shape index: {}, may-alias: {2,4,6}]   ;;  %s4627_s7 = inlined_call_operand.vmem [shape: f32[2,8,8,64], index: 7, kind: output, shape index: {}]  }
   0x1 LB: > { %s3070_s25 = sadd.s32 4294967295, %s3681_s24   ;;  %p3074_p0 = scmp.ge.s32.totalorder %s3681_s24, 1  ;;  %s3681_s24 = sphi %s3727_s24, %s17_s24  }
   0x2   : > { %p237_p1 = scmp.lt.s32.totalorder %s3681_s24, 3 }
   0x4   : > { %p238_p2 = pnand %p3074_p0, %p237_p1 }
   0x5   : > { %p269_p3 = scmp.lt.s32.totalorder (!%p238_p2), %s3070_s25, 1  ;;  %s3683_s30 = smov (!%p238_p2), 32  }
   0x6   : > { %241 = sbr.rel (%p238_p2) target bundleno = 766 (0x2fe), region = 48  ;;  %s3684_s8 = smov (!%p238_p2), 96  }
   0x7   : > { %s3685_s9 = smov (!%p238_p2), 64  }
   0xb   : > { %s4639_s25 = smov (!%p269_p3, %s3070_s25), 1  ;;  %vm363_vm0 = vsmask.f32 3328  ;;  %vm364_vm1 = vsmask.f32 7440  ;;  %vm288_vm3 = vcmask 257024  }
   0xc   : > { %s3659_s26 = smul.u32 288, %s4639_s25  ;;  %vm3754_vm2 = vmor %vm363_vm0, %vm364_vm1  ;;  %vm338_vm4 = vcmask 519424   ;;  %vm502_vm5 = vcmask 781824   ;;  %vm552_vm6 = vcmask 1044224   ;;  %vm1204_vm7 = vcmask 261120   ;;  %v3624_v20 = vld [vmem:[%s4623_s3 + $0x48] sm:$0xff] }
   0xd   : > { %vm1314_vm8 = vcmask 516096   ;;  %vm1320_vm9 = vsmask.f32 256  ;;  %vm1352_vm10 = vsmask.f32 7938  ;;  %vm1312_vm13 = vcmask 519168  }
   0xe   : > { %s3741_s29 = scalar_lea.vmem %s4620_s0, %s3659_s26  ;;  %vm4077_vm11 = vmand %vm1314_vm8, %vm1320_vm9  ;;  %vm1732_vm15 = vcmask 1042432   ;;  %vm1733_vm0 = vcmask 1046532   ;;  %s3564_s12 = sshll.u32 %s4639_s25, 6 }
   0xf   : > { %v3078_v0 = vld [vmem:[%s3741_s29 + $0x48] sm:$0xf]  ;;  %v347_v1 = vld [vmem:[%s3741_s29] sm:$0xf]  ;;  %v348_v2 = vld [vmem:[%s3741_s29 + $0x4] sm:$0x1]  ;;  %s4578_s15 = scalar_lea.vmem %s4627_s7, %s3564_s12 }
  0x10   : > { %314 = vrot.lane.b32.xlu0 %v3078_v0, %s3683_s30  ;;  %v367_v3 = vshrl.u32 %v347_v1, 16  ;;  %v370_v4 = vshll.u32 %v347_v1, 16  ;;  %v376_v5 = vshll.u32 %v348_v2, 16  ;;  %v349_v6 = vld [vmem:[%s3741_s29 + $0x8] sm:$0xf]  ;;  %vm4084_vm12 = vmand %vm1314_vm8, %vm1352_vm10 }
  0x11   : > { %v350_v7 = vld [vmem:[%s3741_s29 + $0xc] sm:$0x1]  ;;  %v3102_v8 = vld [vmem:[%s3741_s29 + $0x90] sm:$0xf]  ;;  %v381_v11 = vshrl.u32 %v349_v6, 16  ;;  %v384_v13 = vshll.u32 %v349_v6, 16  ;;  %vm4118_vm14 = vmand %vm1312_vm13, %vm1352_vm10 }
  0x12   : > { %v369_v9 = vrot.slane %v367_v3, 4  ;;  %v372_v10 = vrot.slane %v370_v4, 5  ;;  %v3103_v12 = vld [vmem:[%s3741_s29 + $0x94] sm:$0x1]  ;;  %v595_v14 = vshrl.u32 %v3102_v8, 16  ;;  %v598_v15 = vshll.u32 %v3102_v8, 16  ;;  %vm4144_vm1 = vmor %vm1732_vm15, %vm1733_vm0 }
  0x13   : > { %v3104_v16 = vld [vmem:[%s3741_s29 + $0x98] sm:$0xf]  ;;  %v378_v18 = vrot.slane %v376_v5, 5  ;;  %v383_v19 = vrot.slane %v381_v11, 4  ;;  %v3079_v21 = vld [vmem:[%s3741_s29 + $0x50] sm:$0xf] }
  0x14   : > { %v373_v17 = vor.u32 %v372_v10, %v369_v9  ;;  %v386_v22 = vrot.slane %v384_v13, 5  ;;  %v597_v23 = vrot.slane %v595_v14, 4  ;;  %v600_v24 = vrot.slane %v598_v15, 5  ;;  %v3086_v30 = vld [vmem:[%s3741_s29 + $0x90] sm:$0xf] }
  0x15   : > { %v604_v25 = vshll.u32 %v3103_v12, 16  ;;  %v390_v27 = vshll.u32 %v350_v7, 16  ;;  %v609_v28 = vshrl.u32 %v3104_v16, 16  ;;  %v612_v29 = vshll.u32 %v3104_v16, 16  ;;  %528 = vrot.lane.b32.xlu2 %v3086_v30, %s3684_s8  ;;  %v3105_v40 = vld [vmem:[%s3741_s29 + $0x9c] sm:$0x1] }
  0x16   : > { %v374_v26 = vrot.slane %v373_v17, 4  ;;  %v387_v31 = vor.u32 %v386_v22, %v383_v19  ;;  %v601_v32 = vor.u32 %v600_v24, %v597_v23  ;;  %v3087_v41 = vld [vmem:[%s3741_s29 + $0x98] sm:$0xf]  ;;  %v618_v45 = vshll.u32 %v3105_v40, 16  ;;  %v3118_v49 = vld [vmem:[%s3741_s29 + $0x8] sm:$0xf] }
  0x17   : > { %v606_v35 = vrot.slane %v604_v25, 5  ;;  %v392_v37 = vrot.slane %v390_v27, 5  ;;  %v611_v38 = vrot.slane %v609_v28, 4  ;;  %v614_v39 = vrot.slane %v612_v29, 5  ;;  %v353_v48 = vld [vmem:[%s3741_s29 + $0x18] sm:$0xf] }
  0x18   : > { %v379_v33 = vsel %vm3754_vm2, %v374_v26, %v378_v18  ;;  %316 = vrot.lane.b32.xlu0 %v3079_v21, %s3683_s30  ;;  %v602_v34 = vrot.slane %v601_v32, 4  ;;  %v388_v36 = vrot.slane %v387_v31, 4  ;;  %v620_v47 = vrot.slane %v618_v45, 5  ;;  %v3119_v50 = vld [vmem:[%s3741_s29 + $0x10] sm:$0xf] }
  0x19   : > { %478 = vrot.lane.b32.xlu1 %v379_v33, %s3685_s9  ;;  %v615_v44 = vor.u32 %v614_v39, %v611_v38  ;;  %v409_v51 = vshrl.u32 %v353_v48, 16  ;;  %v412_v52 = vshll.u32 %v353_v48, 16  ;;  %v351_v54 = vld [vmem:[%s3741_s29 + $0x10] sm:$0xf]  ;;  %v352_v59 = vld [vmem:[%s3741_s29 + $0x14] sm:$0x1] }
  0x1a   : > { %v607_v42 = vsel %vm3754_vm2, %v602_v34, %v606_v35  ;;  %v393_v43 = vsel %vm3754_vm2, %v388_v36, %v392_v37  ;;  %v395_v55 = vshrl.u32 %v351_v54, 16  ;;  %v398_v56 = vshll.u32 %v351_v54, 16  ;;  %v354_v60 = vld [vmem:[%s3741_s29 + $0x1c] sm:$0x1]  ;;  %v3106_v61 = vld [vmem:[%s3741_s29 + $0xa0] sm:$0xf] }
  0x1b   : > { %v616_v46 = vrot.slane %v615_v44, 4  ;;  %v411_v57 = vrot.slane %v409_v51, 4  ;;  %v414_v58 = vrot.slane %v412_v52, 5  ;;  %v3127_v0 = vld [vmem:[%s3741_s29 + $0x58] sm:$0xf]  ;;  %v404_v2 = vshll.u32 %v352_v59, 16 }
  0x1c   : > { %v397_v62 = vrot.slane %v395_v55, 4  ;;  %v400_v63 = vrot.slane %v398_v56, 5  ;;  %v3080_v3 = vld [vmem:[%s3741_s29 + $0x58] sm:$0xf]  ;;  %v418_v5 = vshll.u32 %v354_v60, 16  ;;  %v623_v6 = vshrl.u32 %v3106_v61, 16 }
  0x1d   : > { %530 = vrot.lane.b32.xlu2 %v3087_v41, %s3684_s8  ;;  %v621_v53 = vsel %vm3754_vm2, %v616_v46, %v620_v47  ;;  %v415_v4 = vor.u32 %v414_v58, %v411_v57  ;;  %v626_v7 = vshll.u32 %v3106_v61, 16  ;;  %v3126_v8 = vld [vmem:[%s3741_s29 + $0x50] sm:$0xf]  ;;  %v406_v10 = vrot.slane %v404_v2, 5  ;;  %v3107_v15 = vld [vmem:[%s3741_s29 + $0xa4] sm:$0x1] }
  0x1e   : > { %v401_v1 = vor.u32 %v400_v63, %v397_v62  ;;  %v420_v12 = vrot.slane %v418_v5, 5  ;;  %v625_v13 = vrot.slane %v623_v6, 4  ;;  %v3108_v16 = vld [vmem:[%s3741_s29 + $0xa8] sm:$0xf]  ;;  %v632_v21 = vshll.u32 %v3107_v15, 16  ;;  %v3584_v15 = vld [vmem:[%s4621_s1 + $0x38] sm:$0xff] }
  0x1f   : > { %v416_v11 = vrot.slane %v415_v4, 4  ;;  %v628_v14 = vrot.slane %v626_v7, 5  ;;  %v3081_v22 = vld [vmem:[%s3741_s29 + $0x60] sm:$0xf]  ;;  %v637_v23 = vshrl.u32 %v3108_v16, 16  ;;  %v640_v24 = vshll.u32 %v3108_v16, 16  ;;  %1217 = vmatpush.bf16.msra.mxu0 %v3584_v15 }
  0x20   : > { %706 = vrot.lane.b32.xlu0 %v607_v42, %s3683_s30  ;;  %v402_v9 = vrot.slane %v401_v1, 4  ;;  %v634_v26 = vrot.slane %v632_v21, 5  ;;  %v3109_v29 = vld [vmem:[%s3741_s29 + $0xac] sm:$0x1]  ;;  %v3089_v30 = vld [vmem:[%s3741_s29 + $0xa8] sm:$0xf] }
  0x21   : > { %480 = vrot.lane.b32.xlu1 %v393_v43, %s3685_s9  ;;  %v421_v18 = vsel %vm3754_vm2, %v416_v11, %v420_v12  ;;  %v629_v19 = vor.u32 %v628_v14, %v625_v13  ;;  %v639_v27 = vrot.slane %v637_v23, 4  ;;  %v642_v28 = vrot.slane %v640_v24, 5  ;;  %v3088_v32 = vld [vmem:[%s3741_s29 + $0xa0] sm:$0xf]  ;;  %v357_v37 = vld [vmem:[%s3741_s29 + $0x28] sm:$0xf] }
  0x22   : > { %v407_v17 = vsel %vm3754_vm2, %v402_v9, %v406_v10  ;;  %v646_v34 = vshll.u32 %v3109_v29, 16  ;;  %v3120_v38 = vld [vmem:[%s3741_s29 + $0x18] sm:$0xf]  ;;  %v3121_v39 = vld [vmem:[%s3741_s29 + $0x20] sm:$0xf]  ;;  %v437_v40 = vshrl.u32 %v357_v37, 16 }
  0x23   : > { %v630_v25 = vrot.slane %v629_v19, 4  ;;  %v643_v33 = vor.u32 %v642_v28, %v639_v27  ;;  %v440_v41 = vshll.u32 %v357_v37, 16  ;;  %v355_v43 = vld [vmem:[%s3741_s29 + $0x20] sm:$0xf]  ;;  %v356_v48 = vld [vmem:[%s3741_s29 + $0x24] sm:$0x1] }
  0x24   : > { %v648_v36 = vrot.slane %v646_v34, 5  ;;  %v423_v44 = vshrl.u32 %v355_v43, 16  ;;  %v426_v45 = vshll.u32 %v355_v43, 16  ;;  %v439_v46 = vrot.slane %v437_v40, 4  ;;  %v3082_v56 = vld [vmem:[%s3741_s29 + $0x68] sm:$0xf] }
  0x25   : > { %755 = vrot.lane.b32.xlu2 %v3118_v49, %s3685_s9  ;;  %v635_v31 = vsel %vm3754_vm2, %v630_v25, %v634_v26  ;;  %v644_v35 = vrot.slane %v643_v33, 4  ;;  %v442_v47 = vrot.slane %v440_v41, 5  ;;  %v358_v49 = vld [vmem:[%s3741_s29 + $0x2c] sm:$0x1]  ;;  %v432_v55 = vshll.u32 %v356_v48, 16  ;;  %v3583_v26 = vld [vmem:[%s4621_s1 + $0x30] sm:$0xff] }
  0x26   : > { %v425_v51 = vrot.slane %v423_v44, 4  ;;  %v428_v52 = vrot.slane %v426_v45, 5  ;;  %v446_v58 = vshll.u32 %v358_v49, 16  ;;  %v3128_v61 = vld [vmem:[%s3741_s29 + $0x60] sm:$0xf]  ;;  %1218 = vmatpush.bf16.msra.mxu0 %v3583_v26  ;;  %v3582_v29 = vld [vmem:[%s4621_s1 + $0x28] sm:$0xff] }
  0x27   : > { %v649_v42 = vsel %vm3754_vm2, %v644_v35, %v648_v36  ;;  %v443_v57 = vor.u32 %v442_v47, %v439_v46  ;;  %v434_v63 = vrot.slane %v432_v55, 5  ;;  %v3111_v4 = vld [vmem:[%s3741_s29 + $0xb4] sm:$0x1]  ;;  %v3112_v5 = vld [vmem:[%s3741_s29 + $0xb8] sm:$0xf]  ;;  %v3581_v43 = vld [vmem:[%s4621_s1 + $0x20] sm:$0xff] }
  0x28   : > { %757 = vrot.lane.b32.xlu0 %v3119_v50, %s3685_s9  ;;  %v3110_v50 = vld [vmem:[%s3741_s29 + $0xb0] sm:$0xf]  ;;  %v429_v54 = vor.u32 %v428_v52, %v425_v51  ;;  %v448_v1 = vrot.slane %v446_v58, 5  ;;  %v660_v9 = vshll.u32 %v3111_v4, 16  ;;  %v665_v11 = vshrl.u32 %v3112_v5, 16  ;;  %v3592_v55 = vld [vmem:[%s4621_s1 + $0x78] sm:$0xff] }
  0x29   : > { %708 = vrot.lane.b32.xlu1 %v621_v53, %s3683_s30  ;;  %v3129_v53 = vld [vmem:[%s3741_s29 + $0x68] sm:$0xf]  ;;  %v651_v59 = vshrl.u32 %v3110_v50, 16  ;;  %v654_v60 = vshll.u32 %v3110_v50, 16  ;;  %v3083_v10 = vld [vmem:[%s3741_s29 + $0x70] sm:$0xf]  ;;  %1246 = vmatpush.bf16.msra.mxu1 %v3592_v55 }
  0x2a   : > { %v430_v62 = vrot.slane %v429_v54, 4  ;;  %v668_v12 = vshll.u32 %v3112_v5, 16  ;;  %v662_v14 = vrot.slane %v660_v9, 5  ;;  %v667_v16 = vrot.slane %v665_v11, 4  ;;  %v3091_v19 = vld [vmem:[%s3741_s29 + $0xb8] sm:$0xf]  ;;  %1219 = vmatpush.bf16.msra.mxu0 %v3582_v29 }
  0x2b   : > { %v653_v2 = vrot.slane %v651_v59, 4  ;;  %v361_v25 = vld [vmem:[%s3741_s29 + $0x38] sm:$0xf]  ;;  %v3123_v33 = vld [vmem:[%s3741_s29 + $0x30] sm:$0xf] }
  0x2c   : > { %v435_v6 = vsel %vm3754_vm2, %v430_v62, %v434_v63  ;;  %v359_v35 = vld [vmem:[%s3741_s29 + $0x30] sm:$0xf]  ;;  %v362_v36 = vld [vmem:[%s3741_s29 + $0x3c] sm:$0x1]  ;;  %v3114_v41 = vld [vmem:[%s3741_s29 + $0xc0] sm:$0xf] }
  0x2d   : > { %806 = vrot.lane.b32.xlu2 %v3127_v0, %s3684_s8  ;;  %v444_v0 = vrot.slane %v443_v57, 4  ;;  %v454_v40 = vshll.u32 %v359_v35, 16  ;;  %v360_v46 = vld [vmem:[%s3741_s29 + $0x34] sm:$0x1]  ;;  %v474_v48 = vshll.u32 %v362_v36, 16  ;;  %v682_v54 = vshll.u32 %v3114_v41, 16 }
  0x2e   : > { %v3131_v49 = vld [vmem:[%s3741_s29 + $0x78] sm:$0xf]  ;;  %1220 = vmatpush.bf16.msra.mxu0 %v3581_v43  ;;  %v460_v51 = vshll.u32 %v360_v46, 16  ;;  %v3130_v57 = vld [vmem:[%s3741_s29 + $0x70] sm:$0xf] }
  0x2f   : > { %v449_v7 = vsel %vm3754_vm2, %v444_v0, %v448_v1  ;;  %v456_v45 = vrot.slane %v454_v40, 5  ;;  %v3084_v52 = vld [vmem:[%s3741_s29 + $0x78] sm:$0xf]  ;;  %v476_v59 = vrot.slane %v474_v48, 5  ;;  %v684_v0 = vrot.slane %v682_v54, 5  ;;  %v3579_v5 = vld [vmem:[%s4621_s1 + $0x10] sm:$0xff] }
  0x30   : > { %318 = vrot.lane.b32.xlu0 %v3080_v3, %s3683_s30  ;;  %v656_v3 = vrot.slane %v654_v60, 5  ;;  %v3116_v60 = vld [vmem:[%s3741_s29 + $0xc8] sm:$0xf]  ;;  %v462_v62 = vrot.slane %v460_v51, 5  ;;  %v3115_v4 = vld [vmem:[%s3741_s29 + $0xc4] sm:$0x1] }
  0x31   : > { %804 = vrot.lane.b32.xlu1 %v3126_v8, %s3684_s8  ;;  %v693_v11 = vshrl.u32 %v3116_v60, 16  ;;  %v3094_v15 = vld [vmem:[%s3741_s29 + $0xd8] sm:$0xf]  ;;  %v3092_v46 = vld [vmem:[%s3741_s29 + $0xc0] sm:$0xf]  ;;  %v3594_v51 = vld [vmem:[%s4621_s1 + $0x88] sm:$0xff] }
  0x32   : > { %v657_v8 = vor.u32 %v656_v3, %v653_v2  ;;  %v281_v2 = vld [vmem:[%s3741_s29 + $0x8] sm:$0xf]  ;;  %v3591_v3 = vld [vmem:[%s4621_s1 + $0x70] sm:$0xff]  ;;  %570 = vst.msk [vmem:[#allocation3 + $0x4] sm:$0xf] %vm288_vm3, %v3094_v15  ;;  %1281 = vmatpush.bf16.msra.mxu2 %v3594_v51  ;;  %3657 = vmatpush.bf16.msra.mxu3 %v3594_v51 }
  0x33   : > { %290 = vst.msk [vmem:[#allocation3 + $0xc] sm:$0xf] %vm288_vm3, %v281_v2  ;;  %1247 = vmatpush.bf16.msra.mxu1 %v3591_v3  ;;  %v3585_v3 = vld [vmem:[%s4621_s1 + $0x40] sm:$0xff] }
  0x34   : > { %v658_v13 = vrot.slane %v657_v8, 4 }
  0x35   : > { %482 = vrot.lane.b32.xlu2 %v407_v17, %s3685_s9  ;;  %v670_v17 = vrot.slane %v668_v12, 5  ;;  %v696_v12 = vshll.u32 %v3116_v60, 16  ;;  %v3124_v60 = vld [vmem:[%s3741_s29 + $0x38] sm:$0xf] }
  0x36   : > { %v663_v21 = vsel %vm3754_vm2, %v658_v13, %v662_v14  ;;  %v3590_v13 = vld [vmem:[%s4621_s1 + $0x68] sm:$0xff] }
  0x37   : > { %v671_v23 = vor.u32 %v670_v17, %v667_v16  ;;  %v3578_v14 = vld [vmem:[%s4621_s1 + $0x8] sm:$0xff]  ;;  %v3589_v16 = vld [vmem:[%s4621_s1 + $0x60] sm:$0xff]  ;;  %1248 = vmatpush.bf16.msra.mxu1 %v3590_v13 }
  0x38   : > { %484 = vrot.lane.b32.xlu0 %v421_v18, %s3685_s9  ;;  %v3113_v18 = vld [vmem:[%s3741_s29 + $0xbc] sm:$0x1]  ;;  %v3095_v17 = vld [vmem:[%s3741_s29 + $0xe0] sm:$0xf] }
  0x39   : > { %320 = vrot.lane.b32.xlu1 %v3081_v22, %s3683_s30  ;;  %v3090_v22 = vld [vmem:[%s3741_s29 + $0xb0] sm:$0xf]  ;;  %v674_v24 = vshll.u32 %v3113_v18, 16  ;;  %v672_v27 = vrot.slane %v671_v23, 4  ;;  %v3134_v18 = vld [vmem:[%s3741_s29 + $0x8] sm:$0xf] }
  0x3a   : > { %571 = vst.msk [vmem:[#allocation3 + $0x10] sm:$0xf] %vm288_vm3, %v3095_v17  ;;  %v3138_v17 = vld [vmem:[%s3741_s29 + $0x18] sm:$0xf] }
  0x3b   : > { %v676_v28 = vrot.slane %v674_v24, 5  ;;  %1249 = vmatpush.bf16.msra.mxu1 %v3589_v16  ;;  %v3096_v16 = vld [vmem:[%s3741_s29 + $0xe8] sm:$0xf] }
  0x3c   : > { %572 = vst.msk [vmem:[#allocation3 + $0x1c] sm:$0xf] %vm288_vm3, %v3096_v16 }
  0x3d   : > { %534 = vrot.lane.b32.xlu2 %v3089_v30, %s3684_s8  ;;  %v465_v30 = vshrl.u32 %v361_v25, 16  ;;  %v677_v34 = vsel %vm3754_vm2, %v672_v27, %v676_v28  ;;  %v695_v27 = vrot.slane %v693_v11, 4  ;;  %v698_v28 = vrot.slane %v696_v12, 5  ;;  %v3132_v12 = vld [vmem:[%s3741_s29 + $0x80] sm:$0xf] }
  0x3f   : > { %v467_v37 = vrot.slane %v465_v30, 4  ;;  %v3577_v30 = vld [vmem:[%s4621_s1] sm:$0xff] }
  0x40   : > { %710 = vrot.lane.b32.xlu0 %v635_v31, %s3683_s30  ;;  %v468_v31 = vshll.u32 %v361_v25, 16 }
  0x41   : > { %532 = vrot.lane.b32.xlu1 %v3088_v32, %s3684_s8  ;;  %v3122_v32 = vld [vmem:[%s3741_s29 + $0x28] sm:$0xf] }
  0x45   : > { %759 = vrot.lane.b32.xlu2 %v3120_v38, %s3685_s9  ;;  %v470_v38 = vrot.slane %v468_v31, 5  ;;  %v3135_v31 = vld [vmem:[%s3741_s29 + $0xc] sm:$0x1] }
  0x46   : > { %v862_v36 = vshll.u32 %v3135_v31, 16  ;;  %v3141_v31 = vld [vmem:[%s3741_s29 + $0x24] sm:$0x1] }
  0x47   : > { %v471_v47 = vor.u32 %v470_v38, %v467_v37 }
  0x48   : > { %761 = vrot.lane.b32.xlu0 %v3121_v39, %s3685_s9  ;;  %v451_v39 = vshrl.u32 %v359_v35, 16 }
  0x49   : > { %712 = vrot.lane.b32.xlu1 %v649_v42, %s3683_s30  ;;  %v280_v42 = vld [vmem:[%s3741_s29] sm:$0xf]  ;;  %v472_v58 = vrot.slane %v471_v47, 4  ;;  %v699_v47 = vor.u32 %v698_v28, %v695_v27 }
  0x4a   : > { %289 = vst.msk [vmem:[#allocation3] sm:$0xf] %vm288_vm3, %v280_v42  ;;  %v453_v44 = vrot.slane %v451_v39, 4  ;;  %v3093_v39 = vld [vmem:[%s3741_s29 + $0xc8] sm:$0xf]  ;;  %v3588_v42 = vld [vmem:[%s4621_s1 + $0x58] sm:$0xff] }
  0x4b   : > { %1250 = vmatpush.bf16.msra.mxu1 %v3588_v42 }
  0x4c   : > { %v457_v50 = vor.u32 %v456_v45, %v453_v44  ;;  %v864_v44 = vrot.slane %v862_v36, 5  ;;  %v904_v36 = vshll.u32 %v3141_v31, 16 }
  0x4d   : > { %810 = vrot.lane.b32.xlu2 %v3129_v53, %s3684_s8  ;;  %v679_v53 = vshrl.u32 %v3114_v41, 16 }
  0x4f   : > { %v681_v63 = vrot.slane %v679_v53, 4 }
  0x50   : > { %322 = vrot.lane.b32.xlu0 %v3082_v56, %s3683_s30  ;;  %v3580_v56 = vld [vmem:[%s4621_s1 + $0x18] sm:$0xff] }
  0x51   : > { %808 = vrot.lane.b32.xlu1 %v3128_v61, %s3684_s8  ;;  %1221 = vmatpush.bf16.msra.mxu0 %v3580_v56  ;;  %v458_v61 = vrot.slane %v457_v50, 4  ;;  %v685_v9 = vor.u32 %v684_v0, %v681_v63  ;;  %v3587_v50 = vld [vmem:[%s4621_s1 + $0x50] sm:$0xff]  ;;  %v3125_v63 = vld [vmem:[%s3741_s29 + $0x40] sm:$0xf] }
  0x52   : > { %1251 = vmatpush.bf16.msra.mxu1 %v3587_v50  ;;  %v282_v0 = vld [vmem:[%s3741_s29 + $0x10] sm:$0xf] }
  0x53   : > { %v463_v8 = vsel %vm3754_vm2, %v458_v61, %v462_v62  ;;  %v686_v25 = vrot.slane %v685_v9, 4  ;;  %v3586_v61 = vld [vmem:[%s4621_s1 + $0x48] sm:$0xff]  ;;  %v3593_v62 = vld [vmem:[%s4621_s1 + $0x80] sm:$0xff]  ;;  %291 = vst.msk [vmem:[#allocation3 + $0x18] sm:$0xf] %vm288_vm3, %v282_v0 }
  0x54   : > { %1282 = vmatpush.bf16.msra.mxu2 %v3593_v62  ;;  %3658 = vmatpush.bf16.msra.mxu3 %v3593_v62  ;;  %v283_v9 = vld [vmem:[%s3741_s29 + $0x18] sm:$0xf]  ;;  %v3099_v0 = vld [vmem:[%s3741_s29 + $0x100] sm:$0xf] }
  0x55   : > { %486 = vrot.lane.b32.xlu2 %v435_v6, %s3685_s9  ;;  %v3085_v6 = vld [vmem:[%s3741_s29 + $0x80] sm:$0xf]  ;;  %1222 = vmatpush.bf16.msra.mxu0 %v3579_v5  ;;  %292 = vst.msk [vmem:[#allocation3 + $0x24] sm:$0xf] %vm288_vm3, %v283_v9  ;;  %v3098_v62 = vld [vmem:[%s3741_s29 + $0xf8] sm:$0xf] }
  0x56   : > { %1252 = vmatpush.bf16.msra.mxu1 %v3586_v61  ;;  %574 = vst.msk [vmem:[#allocation3 + $0x34] sm:$0xf] %vm288_vm3, %v3098_v62  ;;  %v3100_v62 = vld [vmem:[%s3741_s29 + $0x108] sm:$0xf] }
  0x57   : > { %575 = vst.msk [vmem:[#allocation3 + $0x40] sm:$0xf] %vm288_vm3, %v3099_v0 }
  0x58   : > { %488 = vrot.lane.b32.xlu0 %v449_v7, %s3685_s9  ;;  %v477_v7 = vsel %vm3754_vm2, %v472_v58, %v476_v59  ;;  %576 = vst.msk [vmem:[#allocation3 + $0x4c] sm:$0xf] %vm288_vm3, %v3100_v62 }
  0x59   : > { %324 = vrot.lane.b32.xlu1 %v3083_v10, %s3683_s30  ;;  %v688_v10 = vshll.u32 %v3115_v4, 16  ;;  %1223 = vmatpush.bf16.msra.mxu0 %v3578_v14 }
  0x5a   : > { %1253 = vmatpush.bf16.msra.mxu1 %v3585_v3  ;;  %v3144_v3 = vld [vmem:[%s3741_s29 + $0x30] sm:$0xf] }
  0x5b   : > { %v690_v26 = vrot.slane %v688_v10, 5  ;;  %v3133_v10 = vld [vmem:[%s3741_s29 + $0x88] sm:$0xf] }
  0x5d   : > { %538 = vrot.lane.b32.xlu2 %v3091_v19, %s3684_s8  ;;  %v3136_v19 = vld [vmem:[%s3741_s29 + $0x10] sm:$0xf]  ;;  %1224 = vmatpush.bf16.msra.mxu0 %v3577_v30  ;;  %v691_v41 = vsel %vm3754_vm2, %v686_v25, %v690_v26  ;;  %v3139_v30 = vld [vmem:[%s3741_s29 + $0x1c] sm:$0x1] }
  0x5e   : > { %v867_v23 = vshrl.u32 %v3136_v19, 16  ;;  %v870_v24 = vshll.u32 %v3136_v19, 16  ;;  %v881_v19 = vshrl.u32 %v3138_v17, 16 }
  0x60   : > { %714 = vrot.lane.b32.xlu0 %v663_v21, %s3683_s30  ;;  %v853_v21 = vshrl.u32 %v3134_v18, 16  ;;  %v869_v37 = vrot.slane %v867_v23, 4  ;;  %v872_v38 = vrot.slane %v870_v24, 5  ;;  %v883_v25 = vrot.slane %v881_v19, 4 }
  0x61   : > { %536 = vrot.lane.b32.xlu1 %v3090_v22, %s3684_s8  ;;  %v856_v22 = vshll.u32 %v3134_v18, 16  ;;  %v3140_v18 = vld [vmem:[%s3741_s29 + $0x20] sm:$0xf] }
  0x62   : > { %v873_v45 = vor.u32 %v872_v38, %v869_v37  ;;  %v898_v23 = vshll.u32 %v3140_v18, 16 }
  0x63   : > { %v858_v35 = vrot.slane %v856_v22, 5  ;;  %v895_v22 = vshrl.u32 %v3140_v18, 16 }
  0x64   : > { %v874_v53 = vrot.slane %v873_v45, 4  ;;  %v900_v28 = vrot.slane %v898_v23, 5 }
  0x65   : > { %763 = vrot.lane.b32.xlu2 %v3122_v32, %s3685_s9  ;;  %v3137_v32 = vld [vmem:[%s3741_s29 + $0x14] sm:$0x1]  ;;  %v897_v27 = vrot.slane %v895_v22, 4 }
  0x66   : > { %v876_v40 = vshll.u32 %v3137_v32, 16 }
  0x68   : > { %765 = vrot.lane.b32.xlu0 %v3123_v33, %s3685_s9  ;;  %v855_v33 = vrot.slane %v853_v21, 4  ;;  %v884_v21 = vshll.u32 %v3138_v17, 16 }
  0x69   : > { %716 = vrot.lane.b32.xlu1 %v677_v34, %s3683_s30  ;;  %v3117_v34 = vld [vmem:[%s3741_s29 + $0xcc] sm:$0x1] }
  0x6a   : > { %v859_v43 = vor.u32 %v858_v35, %v855_v33  ;;  %v702_v48 = vshll.u32 %v3117_v34, 16  ;;  %v886_v26 = vrot.slane %v884_v21, 5  ;;  %v890_v34 = vshll.u32 %v3139_v30, 16 }
  0x6b   : > { %v901_v35 = vor.u32 %v900_v28, %v897_v27 }
  0x6c   : > { %v704_v58 = vrot.slane %v702_v48, 5  ;;  %v887_v33 = vor.u32 %v886_v26, %v883_v25 }
  0x6d   : > { %814 = vrot.lane.b32.xlu2 %v3131_v49, %s3684_s8  ;;  %v878_v49 = vrot.slane %v876_v40, 5  ;;  %v902_v42 = vrot.slane %v901_v35, 4 }
  0x6e   : > { %v888_v40 = vrot.slane %v887_v33, 4 }
  0x6f   : > { %v3885_v1 = vpop.permute.xlu2 %528  ;;  %v879_v56 = vsel %vm3754_vm2, %v874_v53, %v878_v49  ;;  %v284_v49 = vld [vmem:[%s3741_s29 + $0x20] sm:$0xf] }
  0x70   : > { %326 = vrot.lane.b32.xlu0 %v3084_v52, %s3683_s30  ;;  %v860_v52 = vrot.slane %v859_v43, 4  ;;  %973 = vst.msk [vmem:[#allocation3 + $0x14] sm:$0xf] %vm288_vm3, %v879_v56  ;;  %v906_v43 = vrot.slane %v904_v36, 5 }
  0x71   : > { %812 = vrot.lane.b32.xlu1 %v3130_v57, %s3684_s8  ;;  %v700_v57 = vrot.slane %v699_v47, 4  ;;  %293 = vst.msk [vmem:[#allocation3 + $0x30] sm:$0xf] %vm288_vm3, %v284_v49 }
  0x72   : > { %v865_v55 = vsel %vm3754_vm2, %v860_v52, %v864_v44  ;;  %v907_v45 = vsel %vm3754_vm2, %v902_v42, %v906_v43  ;;  %v3146_v43 = vld [vmem:[%s3741_s29 + $0x38] sm:$0xf] }
  0x73   : > { %972 = vst.msk [vmem:[#allocation3 + $0x8] sm:$0xf] %vm288_vm3, %v865_v55  ;;  %v705_v2 = vsel %vm3754_vm2, %v700_v57, %v704_v58  ;;  %v285_v55 = vld [vmem:[%s3741_s29 + $0x28] sm:$0xf] }
  0x74   : > { %975 = vst.msk [vmem:[#allocation3 + $0x2c] sm:$0xf] %vm288_vm3, %v907_v45  ;;  %v937_v45 = vshrl.u32 %v3146_v43, 16 }
  0x75   : > { %490 = vrot.lane.b32.xlu2 %v463_v8, %s3685_s9  ;;  %294 = vst.msk [vmem:[#allocation3 + $0x3c] sm:$0xf] %vm288_vm3, %v285_v55  ;;  %v3149_v55 = vld [vmem:[%s3741_s29 + $0x44] sm:$0x1] }
  0x76   : > { %v939_v49 = vrot.slane %v937_v45, 4 }
  0x77   : > { %v3919_v29 = vpop.permute.xlu2 %530  ;;  %v3567_v8 = vld [vmem:[#allocation3 + $0x10] sm:$0xf0] }
  0x78   : > { %492 = vrot.lane.b32.xlu0 %v477_v7, %s3685_s9 }
  0x79   : > { %328 = vrot.lane.b32.xlu1 %v3085_v6, %s3683_s30 }
  0x7a   : > { %v3160_v5 = vld [vmem:[#allocation3 + $0x8] sm:$0xf] }
  0x7b   : > { %v3161_v11 = vor.u32 %v3567_v8, %v3160_v5  ;;  %v3570_v51 = vld [vmem:[#allocation3 + $0x28] sm:$0xf0] }
  0x7d   : > { %542 = vrot.lane.b32.xlu2 %v3093_v39, %s3684_s8  ;;  %3270 = vmatmul.msk.bf16.vlgmr.msra.gmra.mxu2 %vm1204_vm7, %v3161_v11 }
  0x7f   : > { %v756_v54 = vpop.permute.xlu2 %755 }
  0x80   : > { %718 = vrot.lane.b32.xlu0 %v691_v41, %s3683_s30  ;;  %v892_v41 = vrot.slane %v890_v34, 5 }
  0x81   : > { %540 = vrot.lane.b32.xlu1 %v3092_v46, %s3684_s8 }
  0x82   : > { %v315_v59 = vpop.permute.xlu0 %314  ;;  %v893_v44 = vsel %vm3754_vm2, %v888_v40, %v892_v41 }
  0x83   : > { %339 = vst.msk [vmem:[#allocation3] sm:$0xf] %vm338_vm4, %v315_v59 }
  0x84   : > { %974 = vst.msk [vmem:[#allocation3 + $0x20] sm:$0xf] %vm288_vm3, %v893_v44  ;;  %v3148_v44 = vld [vmem:[%s3741_s29 + $0x40] sm:$0xf] }
  0x85   : > { %767 = vrot.lane.b32.xlu2 %v3124_v60, %s3685_s9 }
  0x87   : > { %v807_v4 = vpop.permute.xlu2 %806 }
  0x88   : > { %769 = vrot.lane.b32.xlu0 %v3125_v63, %s3685_s9 }
  0x89   : > { %720 = vrot.lane.b32.xlu1 %v705_v2, %s3683_s30  ;;  %v3142_v2 = vld [vmem:[%s3741_s29 + $0x28] sm:$0xf] }
  0x8a   : > { %v317_v6 = vpop.permute.xlu0 %316  ;;  %v912_v5 = vshll.u32 %v3142_v2, 16 }
  0x8b   : > { %v479_v7 = vpop.permute.xlu1 %478  ;;  %340 = vst.msk [vmem:[#allocation3 + $0xc] sm:$0xf] %vm338_vm4, %v317_v6  ;;  %v3172_v50 = vld [vmem:[#allocation3 + $0x20] sm:$0xf]  ;;  %v923_v6 = vshrl.u32 %v3144_v3, 16 }
  0x8c   : > { %503 = vst.msk [vmem:[#allocation3] sm:$0xf] %vm502_vm5, %v479_v7  ;;  %v3173_v53 = vor.u32 %v3570_v51, %v3172_v50  ;;  %v926_v7 = vshll.u32 %v3144_v3, 16 }
  0x8d   : > { %553 = vst.msk [vmem:[#allocation3] sm:$0xf] %vm552_vm6, %v3885_v1  ;;  %818 = vrot.lane.b32.xlu2 %v3133_v10, %s3684_s8  ;;  %v3097_v1 = vld [vmem:[%s3741_s29 + $0xf0] sm:$0xf]  ;;  %v914_v10 = vrot.slane %v912_v5, 5  ;;  %v925_v11 = vrot.slane %v923_v6, 4 }
  0x8e   : > { %573 = vst.msk [vmem:[#allocation3 + $0x28] sm:$0xf] %vm288_vm3, %v3097_v1  ;;  %3271 = vmatmul.msk.bf16.gmra.mxu2 %vm1204_vm7, %v3173_v53 }
  0x8f   : > { %v483_v13 = vpop.permute.xlu2 %482 }
  0x91   : > { %816 = vrot.lane.b32.xlu1 %v3132_v12, %s3684_s8  ;;  %v928_v12 = vrot.slane %v926_v7, 5 }
  0x92   : > { %v707_v14 = vpop.permute.xlu0 %706 }
  0x93   : > { %v481_v15 = vpop.permute.xlu1 %480  ;;  %730 = vst.msk [vmem:[#allocation3 + $0x4] sm:$0xf] %vm338_vm4, %v707_v14  ;;  %v3143_v14 = vld [vmem:[%s3741_s29 + $0x2c] sm:$0x1]  ;;  %v929_v19 = vor.u32 %v928_v12, %v925_v11 }
  0x94   : > { %504 = vst.msk [vmem:[#allocation3 + $0xc] sm:$0xf] %vm502_vm5, %v481_v15  ;;  %v3152_v37 = vld [vmem:[#allocation3] sm:$0xf]  ;;  %v3145_v15 = vld [vmem:[%s3741_s29 + $0x34] sm:$0x1] }
  0x95   : > { %554 = vst.msk [vmem:[#allocation3 + $0xc] sm:$0xf] %vm552_vm6, %v3919_v29  ;;  %v918_v18 = vshll.u32 %v3143_v14, 16  ;;  %v932_v21 = vshll.u32 %v3145_v15, 16  ;;  %v930_v25 = vrot.slane %v929_v19, 4 }
  0x96   : > { %779 = vst.msk [vmem:[#allocation3 + $0x4] sm:$0xf] %vm502_vm5, %v756_v54 }
  0x97   : > { %v535_v24 = vpop.permute.xlu2 %534  ;;  %v934_v26 = vrot.slane %v932_v21, 5 }
  0x9a   : > { %v758_v29 = vpop.permute.xlu0 %757 }
  0x9b   : > { %v709_v32 = vpop.permute.xlu1 %708 }
  0x9c   : > { %731 = vst.msk [vmem:[#allocation3 + $0x10] sm:$0xf] %vm338_vm4, %v709_v32  ;;  %v3566_v38 = vld [vmem:[#allocation3 + $0x8] sm:$0xf0]  ;;  %v286_v32 = vld [vmem:[%s3741_s29 + $0x30] sm:$0xf] }
  0x9d   : > { %v3153_v39 = vor.u32 %v3566_v38, %v3152_v37  ;;  %780 = vst.msk [vmem:[#allocation3 + $0x10] sm:$0xf] %vm502_vm5, %v758_v29  ;;  %v935_v29 = vsel %vm3754_vm2, %v930_v25, %v934_v26 }
  0x9e   : > { %829 = vst.msk [vmem:[#allocation3 + $0x10] sm:$0xf] %vm552_vm6, %v807_v4  ;;  %v909_v4 = vshrl.u32 %v3142_v2, 16 }
  0x9f   : > { %1225 = vmatmul.bf16.vlgmr.msra.gmra.mxu0 %v3153_v39  ;;  %v760_v46 = vpop.permute.xlu2 %759  ;;  %977 = vst.msk [vmem:[#allocation3 + $0x44] sm:$0xf] %vm288_vm3, %v935_v29  ;;  %v287_v39 = vld [vmem:[%s3741_s29 + $0x38] sm:$0xf] }
  0xa0   : > { %v911_v9 = vrot.slane %v909_v4, 4  ;;  %295 = vst.msk [vmem:[#allocation3 + $0x48] sm:$0xf] %vm288_vm3, %v286_v32 }
  0xa1   : > { %296 = vst.msk [vmem:[#allocation3 + $0x54] sm:$0xf] %vm288_vm3, %v287_v39  ;;  %v1357_v39 = vld [vmem:[#allocation2 + $0xc] sm:$0x1] }
  0xa2   : > { %v319_v47 = vpop.permute.xlu0 %318  ;;  %v915_v17 = vor.u32 %v914_v10, %v911_v9 }
  0xa3   : > { %v805_v48 = vpop.permute.xlu1 %804  ;;  %341 = vst.msk [vmem:[#allocation3 + $0x18] sm:$0xf] %vm338_vm4, %v319_v47  ;;  %v951_v47 = vshrl.u32 %v3148_v44, 16 }
  0xa4   : > { %828 = vst.msk [vmem:[#allocation3 + $0x4] sm:$0xf] %vm552_vm6, %v805_v48  ;;  %v916_v23 = vrot.slane %v915_v17, 4  ;;  %v954_v48 = vshll.u32 %v3148_v44, 16 }
  0xa5   : > { %505 = vst.msk [vmem:[#allocation3 + $0x18] sm:$0xf] %vm502_vm5, %v483_v13  ;;  %v3154_v52 = vld [vmem:[#allocation3 + $0xc] sm:$0xf0]  ;;  %v953_v51 = vrot.slane %v951_v47, 4 }
  0xa6   : > { %v3573_v34 = vld [vmem:[#allocation3 + $0x40] sm:$0xf0]  ;;  %v1328_v47 = vld [vmem:[#allocation2 + $0x10] sm:$0x1] }
  0xa7   : > { %v811_v58 = vpop.permute.xlu2 %810 }
  0xaa   : > { %v485_v54 = vpop.permute.xlu0 %484 }
  0xab   : > { %v321_v56 = vpop.permute.xlu1 %320  ;;  %v3565_v57 = vld [vmem:[#allocation3 + $0x4] sm:$0xf] }
  0xac   : > { %342 = vst.msk [vmem:[#allocation3 + $0x24] sm:$0xf] %vm338_vm4, %v321_v56  ;;  %v3157_v59 = vor.u32 %v3565_v57, %v3154_v52  ;;  %v956_v52 = vrot.slane %v954_v48, 5 }
  0xad   : > { %506 = vst.msk [vmem:[#allocation3 + $0x24] sm:$0xf] %vm502_vm5, %v485_v54  ;;  %v3147_v54 = vld [vmem:[%s3741_s29 + $0x3c] sm:$0x1] }
  0xae   : > { %1254 = vmatmul.bf16.vlgmr.msra.gmra.mxu1 %v3157_v59  ;;  %556 = vst.msk [vmem:[#allocation3 + $0x24] sm:$0xf] %vm552_vm6, %v535_v24  ;;  %v920_v24 = vrot.slane %v918_v18, 5  ;;  %v946_v59 = vshll.u32 %v3147_v54, 16 }
  0xaf   : > { %v487_v63 = vpop.permute.xlu2 %486 }
  0xb0   : > { %v921_v28 = vsel %vm3754_vm2, %v916_v23, %v920_v24  ;;  %v948_v2 = vrot.slane %v946_v59, 5 }
  0xb1   : > { %976 = vst.msk [vmem:[#allocation3 + $0x38] sm:$0xf] %vm288_vm3, %v921_v28 }
  0xb2   : > { %v711_v60 = vpop.permute.xlu0 %710 }
  0xb3   : > { %v533_v61 = vpop.permute.xlu1 %532  ;;  %732 = vst.msk [vmem:[#allocation3 + $0x1c] sm:$0xf] %vm338_vm4, %v711_v60  ;;  %v957_v60 = vor.u32 %v956_v52, %v953_v51 }
  0xb4   : > { %555 = vst.msk [vmem:[#allocation3 + $0x18] sm:$0xf] %vm552_vm6, %v533_v61  ;;  %v960_v61 = vshll.u32 %v3149_v55, 16 }
  0xb5   : > { %781 = vst.msk [vmem:[#allocation3 + $0x1c] sm:$0xf] %vm502_vm5, %v760_v46  ;;  %v3569_v8 = vld [vmem:[#allocation3 + $0x20] sm:$0xf0]  ;;  %v940_v46 = vshll.u32 %v3146_v43, 16  ;;  %v958_v3 = vrot.slane %v957_v60, 4 }
  0xb6   : > { %v962_v4 = vrot.slane %v960_v61, 5  ;;  %v1358_v43 = vsel %vm4084_vm12, 0, %v1357_v39 }
  0xb7   : > { %v539_v27 = vpop.permute.xlu2 %538  ;;  %v942_v50 = vrot.slane %v940_v46, 5  ;;  %1359 = vst [vmem:[#allocation2 + $0xc] sm:$0x1] %v1358_v43 }
  0xb8   : > { %v3184_v33 = vld [vmem:[#allocation3 + $0x38] sm:$0xf]  ;;  %v963_v6 = vsel %vm3754_vm2, %v958_v3, %v962_v4 }
  0xb9   : > { %v3185_v37 = vor.u32 %v3573_v34, %v3184_v33  ;;  %979 = vst.msk [vmem:[#allocation3 + $0x5c] sm:$0xf] %vm288_vm3, %v963_v6 }
  0xba   : > { %v762_v13 = vpop.permute.xlu0 %761 }
  0xbb   : > { %v713_v16 = vpop.permute.xlu1 %712  ;;  %v3164_v1 = vld [vmem:[#allocation3 + $0x18] sm:$0xf]  ;;  %3272 = vmatmul.msk.bf16.vlgmr.msra.gmra.mxu3 %vm1204_vm7, %v3185_v37 }
  0xbc   : > { %733 = vst.msk [vmem:[#allocation3 + $0x28] sm:$0xf] %vm338_vm4, %v713_v16  ;;  %v3165_v22 = vor.u32 %v3569_v8, %v3164_v1 }
  0xbd   : > { %782 = vst.msk [vmem:[#allocation3 + $0x28] sm:$0xf] %vm502_vm5, %v762_v13 }
  0xbe   : > { %1230 = vmatmul.bf16.gmra.mxu0 %v3165_v22  ;;  %831 = vst.msk [vmem:[#allocation3 + $0x28] sm:$0xf] %vm552_vm6, %v811_v58  ;;  %v943_v58 = vor.u32 %v942_v50, %v939_v49  ;;  %v1329_v49 = vsel %vm4077_vm11, 0, %v1328_v47  ;;  %v1360_v50 = vld [vmem:[#allocation2 + $0x14] sm:$0x1] }
  0xbf   : > { %v764_v36 = vpop.permute.xlu2 %763  ;;  %1330 = vst [vmem:[#allocation2 + $0x10] sm:$0x1] %v1329_v49  ;;  %v1361_v51 = vsel %vm4084_vm12, 0, %v1360_v50 }
  0xc0   : > { %v944_v0 = vrot.slane %v943_v58, 4  ;;  %v3576_v14 = vld [vmem:[#allocation3 + $0x58] sm:$0xf0]  ;;  %1362 = vst [vmem:[#allocation2 + $0x14] sm:$0x1] %v1361_v51 }
  0xc2   : > { %v323_v30 = vpop.permute.xlu0 %322  ;;  %v949_v5 = vsel %vm3754_vm2, %v944_v0, %v948_v2 }
  0xc3   : > { %v809_v31 = vpop.permute.xlu1 %808  ;;  %343 = vst.msk [vmem:[#allocation3 + $0x30] sm:$0xf] %vm338_vm4, %v323_v30 }
  0xc4   : > { %830 = vst.msk [vmem:[#allocation3 + $0x1c] sm:$0xf] %vm552_vm6, %v809_v31 }
  0xc5   : > { %507 = vst.msk [vmem:[#allocation3 + $0x30] sm:$0xf] %vm502_vm5, %v487_v63  ;;  %v3166_v35 = vld [vmem:[#allocation3 + $0x24] sm:$0xf0]  ;;  %v3101_v63 = vld [vmem:[%s3741_s29 + $0x110] sm:$0xf] }
  0xc6   : > { %577 = vst.msk [vmem:[#allocation3 + $0x58] sm:$0xf] %vm288_vm3, %v3101_v63 }
  0xc7   : > { %v815_v57 = vpop.permute.xlu2 %814  ;;  %978 = vst.msk [vmem:[#allocation3 + $0x50] sm:$0xf] %vm288_vm3, %v949_v5  ;;  %v1484_v43 = vld [vmem:[#allocation2 + $0x14] sm:$0x1]  ;;  %vm1691_vm3 = vcmask 1043968  }
  0xca   : > { %v489_v38 = vpop.permute.xlu0 %488 }
  0xcb   : > { %v325_v40 = vpop.permute.xlu1 %324  ;;  %v3568_v41 = vld [vmem:[#allocation3 + $0x1c] sm:$0xf] }
  0xcc   : > { %344 = vst.msk [vmem:[#allocation3 + $0x3c] sm:$0xf] %vm338_vm4, %v325_v40  ;;  %v3169_v42 = vor.u32 %v3568_v41, %v3166_v35  ;;  %v3686_v40 = vmov 0  }
  0xcd   : > { %508 = vst.msk [vmem:[#allocation3 + $0x3c] sm:$0xf] %vm502_vm5, %v489_v38  ;;  %v1325_v38 = vld [vmem:[#allocation2 + $0x8] sm:$0x1] }
  0xce   : > { %1259 = vmatmul.bf16.gmra.mxu1 %v3169_v42  ;;  %558 = vst.msk [vmem:[#allocation3 + $0x3c] sm:$0xf] %vm552_vm6, %v539_v27  ;;  %v3196_v13 = vld [vmem:[#allocation3 + $0x50] sm:$0xf]  ;;  %v1326_v41 = vsel %vm4077_vm11, 0, %v1325_v38 }
  0xcf   : > { %v491_v12 = vpop.permute.xlu2 %490  ;;  %v3197_v16 = vor.u32 %v3576_v14, %v3196_v13  ;;  %1315 = vst.msk [vmem:[#allocation2 + $0x4] sm:$0x1] %vm1314_vm8, %v3686_v40 }
  0xd0   : > { %1318 = vst.msk [vmem:[#allocation2 + $0x4c] sm:$0x1] %vm1314_vm8, %v3686_v40 }
  0xd1   : > { %3273 = vmatmul.msk.bf16.gmra.mxu3 %vm1204_vm7, %v3197_v16  ;;  %1327 = vst [vmem:[#allocation2 + $0x8] sm:$0x1] %v1326_v41  ;;  %v1481_v41 = vld [vmem:[#allocation2 + $0x10] sm:$0xf] }
  0xd2   : > { %v715_v53 = vpop.permute.xlu0 %714  ;;  %1313 = vst.msk [vmem:[#allocation2] sm:$0xf] %vm1312_vm13, %v3686_v40 }
  0xd3   : > { %v537_v56 = vpop.permute.xlu1 %536  ;;  %734 = vst.msk [vmem:[#allocation3 + $0x34] sm:$0xf] %vm338_vm4, %v715_v53 }
  0xd4   : > { %557 = vst.msk [vmem:[#allocation3 + $0x30] sm:$0xf] %vm552_vm6, %v537_v56  ;;  %v4105_v56 = vld [vmem:[%s4622_s2] ss:$0 sm:$0xff] }
  0xd5   : > { %783 = vst.msk [vmem:[#allocation3 + $0x34] sm:$0xf] %vm502_vm5, %v764_v36  ;;  %v3572_v7 = vld [vmem:[#allocation3 + $0x38] sm:$0xf0] }
  0xd6   : > { %1317 = vst.msk [vmem:[#allocation2 + $0x48] sm:$0xf] %vm1312_vm13, %v3686_v40  ;;  %v1354_v44 = vld [vmem:[#allocation2 + $0x4] sm:$0x1] }
  0xd7   : > { %v543_v17 = vpop.permute.xlu2 %542  ;;  %v1355_v45 = vsel %vm4084_vm12, 0, %v1354_v44  ;;  %v1381_v46 = vld [vmem:[#allocation2 + $0x4c] sm:$0x1] }
  0xd8   : > { %1356 = vst [vmem:[#allocation2 + $0x4] sm:$0x1] %v1355_v45  ;;  %v1382_v48 = vsel %vm4084_vm12, 0, %v1381_v46 }
  0xd9   : > { %1383 = vst [vmem:[#allocation2 + $0x4c] sm:$0x1] %v1382_v48  ;;  %v1322_v52 = vld [vmem:[#allocation2] sm:$0x1] }
  0xda   : > { %v766_v8 = vpop.permute.xlu0 %765  ;;  %v1323_v53 = vsel %vm4077_vm11, 0, %v1322_v52 }
  0xdb   : > { %v717_v9 = vpop.permute.xlu1 %716  ;;  %v3176_v10 = vld [vmem:[#allocation3 + $0x30] sm:$0xf]  ;;  %1324 = vst [vmem:[#allocation2] sm:$0x1] %v1323_v53 }
  0xdc   : > { %735 = vst.msk [vmem:[#allocation3 + $0x40] sm:$0xf] %vm338_vm4, %v717_v9  ;;  %v3177_v11 = vor.u32 %v3572_v7, %v3176_v10 }
  0xdd   : > { %784 = vst.msk [vmem:[#allocation3 + $0x40] sm:$0xf] %vm502_vm5, %v766_v8 }
  0xde   : > { %1235 = vmatmul.bf16.gmra.mxu0 %v3177_v11  ;;  %833 = vst.msk [vmem:[#allocation3 + $0x40] sm:$0xf] %vm552_vm6, %v815_v57  ;;  %v1331_v11 = vld [vmem:[#allocation2 + $0x18] sm:$0x1] }
  0xdf   : > { %v768_v24 = vpop.permute.xlu2 %767  ;;  %v1540_v59 = vld [vmem:[#allocation2 + $0x4] sm:$0x1]  ;;  %v1332_v13 = vsel %vm4077_vm11, 0, %v1331_v11 }
  0xe0   : > { %v1565_v62 = vshll.u32 %v1540_v59, 16  ;;  %1333 = vst [vmem:[#allocation2 + $0x18] sm:$0x1] %v1332_v13 }
  0xe2   : > { %v327_v15 = vpop.permute.xlu0 %326  ;;  %v1539_v55 = vld [vmem:[#allocation2] sm:$0xf]  ;;  %v1567_v3 = vrot.slane %v1565_v62, 5 }
  0xe3   : > { %v813_v1 = vpop.permute.xlu1 %812  ;;  %345 = vst.msk [vmem:[#allocation3 + $0x48] sm:$0xf] %vm338_vm4, %v327_v15  ;;  %v1556_v57 = vshrl.u32 %v1539_v55, 16  ;;  %v1559_v58 = vshll.u32 %v1539_v55, 16 }
  0xe4   : > { %832 = vst.msk [vmem:[#allocation3 + $0x34] sm:$0xf] %vm552_vm6, %v813_v1 }
  0xe5   : > { %509 = vst.msk [vmem:[#allocation3 + $0x48] sm:$0xf] %vm502_vm5, %v491_v12  ;;  %v3178_v18 = vld [vmem:[#allocation3 + $0x3c] sm:$0xf0]  ;;  %v1558_v60 = vrot.slane %v1556_v57, 4  ;;  %v1561_v61 = vrot.slane %v1559_v58, 5 }
  0xe6   : > { %v1363_v12 = vld [vmem:[#allocation2 + $0x1c] sm:$0x1] }
  0xe7   : > { %v819_v31 = vpop.permute.xlu2 %818  ;;  %v1562_v2 = vor.u32 %v1561_v61, %v1558_v60  ;;  %v1364_v14 = vsel %vm4084_vm12, 0, %v1363_v12 }
  0xe8   : > { %1365 = vst [vmem:[#allocation2 + $0x1c] sm:$0x1] %v1364_v14 }
  0xe9   : > { %v1563_v6 = vrot.slane %v1562_v2, 4 }
  0xea   : > { %v493_v19 = vpop.permute.xlu0 %492 }
  0xeb   : > { %v329_v21 = vpop.permute.xlu1 %328  ;;  %v3571_v22 = vld [vmem:[#allocation3 + $0x34] sm:$0xf]  ;;  %v1568_v8 = vsel %vm3754_vm2, %v1563_v6, %v1567_v3 }
  0xec   : > { %346 = vst.msk [vmem:[#allocation3 + $0x54] sm:$0xf] %vm338_vm4, %v329_v21  ;;  %v3181_v23 = vor.u32 %v3571_v22, %v3178_v18  ;;  %1667 = vrot.lane.b32.xlu0 %v1568_v8, %s3685_s9 }
  0xed   : > { %510 = vst.msk [vmem:[#allocation3 + $0x54] sm:$0xf] %vm502_vm5, %v493_v19 }
  0xee   : > { %1264 = vmatmul.bf16.gmra.mxu1 %v3181_v23  ;;  %560 = vst.msk [vmem:[#allocation3 + $0x54] sm:$0xf] %vm552_vm6, %v543_v17 }
  0xf2   : > { %v719_v25 = vpop.permute.xlu0 %718 }
  0xf3   : > { %v541_v26 = vpop.permute.xlu1 %540  ;;  %736 = vst.msk [vmem:[#allocation3 + $0x4c] sm:$0xf] %vm338_vm4, %v719_v25  ;;  %v1475_v25 = vld [vmem:[#allocation2 + $0x8] sm:$0xf] }
  0xf4   : > { %559 = vst.msk [vmem:[#allocation3 + $0x48] sm:$0xf] %vm552_vm6, %v541_v26  ;;  %v1478_v26 = vld [vmem:[#allocation2 + $0xc] sm:$0x1] }
  0xf5   : > { %785 = vst.msk [vmem:[#allocation3 + $0x4c] sm:$0xf] %vm502_vm5, %v768_v24  ;;  %v3575_v27 = vld [vmem:[#allocation3 + $0x50] sm:$0xf0] }
  0xfa   : > { %v770_v28 = vpop.permute.xlu0 %769 }
  0xfb   : > { %v721_v29 = vpop.permute.xlu1 %720  ;;  %v3188_v30 = vld [vmem:[#allocation3 + $0x48] sm:$0xf] }
  0xfc   : > { %737 = vst.msk [vmem:[#allocation3 + $0x58] sm:$0xf] %vm338_vm4, %v721_v29  ;;  %v3189_v32 = vor.u32 %v3575_v27, %v3188_v30  ;;  %v1334_v30 = vld [vmem:[#allocation2 + $0x20] sm:$0x1] }
  0xfd   : > { %786 = vst.msk [vmem:[#allocation3 + $0x58] sm:$0xf] %vm502_vm5, %v770_v28 }
  0xfe   : > { %1240 = vmatmul.bf16.gmra.mxu0 %v3189_v32  ;;  %835 = vst.msk [vmem:[#allocation3 + $0x58] sm:$0xf] %vm552_vm6, %v819_v31  ;;  %v1366_v31 = vld [vmem:[#allocation2 + $0x24] sm:$0x1] }
 0x100   : > { %v1284_v63 = vpop.f32.mrf.mxu2 }
 0x103   : > { %v817_v33 = vpop.permute.xlu1 %816 }
 0x104   : > { %834 = vst.msk [vmem:[#allocation3 + $0x4c] sm:$0xf] %vm552_vm6, %v817_v33 }
 0x105   : > { %v3190_v34 = vld [vmem:[#allocation3 + $0x54] sm:$0xf0] }
 0x108   : > { %v1286_v17 = vpop.f32.mrf.mxu2 }
 0x10b   : > { %v3574_v35 = vld [vmem:[#allocation3 + $0x4c] sm:$0xf] }
 0x10c   : > { %v3193_v36 = vor.u32 %v3574_v35, %v3190_v34  ;;  %v1335_v35 = vsel %vm4077_vm11, 0, %v1334_v30 }
 0x10d   : > { %1336 = vst [vmem:[#allocation2 + $0x20] sm:$0x1] %v1335_v35 }
 0x10e   : > { %1269 = vmatmul.bf16.gmra.mxu1 %v3193_v36  ;;  %v1367_v36 = vsel %vm4084_vm12, 0, %v1366_v31 }
 0x10f   : > { %1368 = vst [vmem:[#allocation2 + $0x24] sm:$0x1] %v1367_v36 }
 0x111   : > { %v1289_v62 = vpop.f32.mrf.mxu2 }
 0x11c   : > { %v1226_v54 = vpop.f32.mrf.mxu0 }
 0x11d   : > { %v1227_v0 = vadd.f32 %v4105_v56, %v1226_v54 }
 0x124   : > { %v1228_v9 = vpop.f32.mrf.mxu0 }
 0x125   : > { %v1229_v15 = vadd.f32 %v4105_v56, %v1228_v9 }
 0x12b   : > { %v1255_v4 = vpop.f32.mrf.mxu1 }
 0x12c   : > { %v1256_v5 = vadd.f32 %v1255_v4, %v1227_v0 }
 0x12e   : > { %v1285_v7 = vadd.f32 %v1284_v63, %v1256_v5 }
 0x130   : > { %v1304_v10 = vmax.f32 %v1285_v7, 0.0 }
 0x132   : > { %v1384_v16 = vpack.c.bf16 %v1304_v10, %v1304_v10 }
 0x133   : > { %v1257_v1 = vpop.f32.mrf.mxu1 }
 0x134   : > { %v1393_v18 = vshrl.u32 %v1384_v16, 16  ;;  %v1258_v19 = vadd.f32 %v1257_v1, %v1229_v15  ;;  %v1396_v22 = vshll.u32 %v1384_v16, 16 }
 0x136   : > { %v1395_v21 = vrot.slane %v1393_v18, 7  ;;  %v1287_v23 = vadd.f32 %v1286_v17, %v1258_v19 }
 0x138   : > { %v1398_v27 = vor.u32 %v1396_v22, %v1395_v21  ;;  %v1399_v28 = vrot.slane %v1395_v21, 4  ;;  %v1305_v29 = vmax.f32 %v1287_v23, 0.0  ;;  %v3649_v21 = vld [vmem:[%s4623_s3 + $0x110] sm:$0xff] }
 0x13a   : > { %v1476_v32 = vsel %vm4118_vm14, %v1398_v27, %v1475_v25  ;;  %v1479_v33 = vsel %vm4077_vm11, %v1399_v28, %v1478_v26  ;;  %v1385_v34 = vpack.c.bf16 %v1305_v29, %v1305_v29  ;;  %v1337_v28 = vld [vmem:[#allocation2 + $0x28] sm:$0x1]  ;;  %v1369_v29 = vld [vmem:[#allocation2 + $0x2c] sm:$0x1] }
 0x13b   : > { %1477 = vst [vmem:[#allocation2 + $0x8] sm:$0xf] %v1476_v32  ;;  %v1231_v49 = vpop.f32.mrf.mxu0 }
 0x13c   : > { %1480 = vst [vmem:[#allocation2 + $0xc] sm:$0x1] %v1479_v33  ;;  %v1401_v38 = vshrl.u32 %v1385_v34, 16  ;;  %v1404_v40 = vshll.u32 %v1385_v34, 16  ;;  %v1232_v63 = vadd.f32 %v4105_v56, %v1231_v49  ;;  %v1338_v33 = vsel %vm4077_vm11, 0, %v1337_v28 }
 0x13d   : > { %v1370_v34 = vsel %vm4084_vm12, 0, %v1369_v29  ;;  %1339 = vst [vmem:[#allocation2 + $0x28] sm:$0x1] %v1338_v33  ;;  %v1493_v28 = vld [vmem:[#allocation2 + $0x20] sm:$0xf] }
 0x13e   : > { %v1403_v39 = vrot.slane %v1401_v38, 7  ;;  %1371 = vst [vmem:[#allocation2 + $0x2c] sm:$0x1] %v1370_v34  ;;  %v1496_v29 = vld [vmem:[#allocation2 + $0x24] sm:$0x1] }
 0x140   : > { %v1406_v44 = vor.u32 %v1404_v40, %v1403_v39  ;;  %v1407_v45 = vrot.slane %v1403_v39, 4 }
 0x142   : > { %v1482_v46 = vsel %vm4118_vm14, %v1406_v44, %v1481_v41  ;;  %v1485_v47 = vsel %vm4077_vm11, %v1407_v45, %v1484_v43  ;;  %v1541_v48 = vld [vmem:[#allocation2 + $0x8] sm:$0xf]  ;;  %v1291_v44 = vpop.f32.mrf.mxu2 }
 0x143   : > { %1483 = vst [vmem:[#allocation2 + $0x10] sm:$0xf] %v1482_v46  ;;  %v1542_v50 = vld [vmem:[#allocation2 + $0xc] sm:$0x1]  ;;  %v1570_v51 = vshrl.u32 %v1541_v48, 16  ;;  %v1573_v52 = vshll.u32 %v1541_v48, 16  ;;  %v1233_v12 = vpop.f32.mrf.mxu0 }
 0x144   : > { %1486 = vst [vmem:[#allocation2 + $0x14] sm:$0x1] %v1485_v47  ;;  %v1579_v55 = vshll.u32 %v1542_v50, 16  ;;  %v1524_v57 = vld [vmem:[#allocation2 + $0x8] sm:$0xf]  ;;  %v1234_v25 = vadd.f32 %v4105_v56, %v1233_v12 }
 0x145   : > { %v1572_v53 = vrot.slane %v1570_v51, 4  ;;  %v1575_v54 = vrot.slane %v1573_v52, 5  ;;  %1532 = vst.msk [vmem:[#allocation4 + $0x14] sm:$0xf] %vm1312_vm13, %v1524_v57  ;;  %v1831_v59 = vld [vmem:[#allocation2 + $0x8] sm:$0xf] }
 0x146   : > { %v1581_v61 = vrot.slane %v1579_v55, 5  ;;  %v1702_v2 = vld [vmem:[#allocation2 + $0x8] sm:$0xe]  ;;  %v1703_v3 = vld [vmem:[#allocation2 + $0xc] sm:$0x1]  ;;  %v1848_v8 = vshrl.u32 %v1831_v59, 16 }
 0x147   : > { %v1576_v58 = vor.u32 %v1575_v54, %v1572_v53  ;;  %v1851_v11 = vshll.u32 %v1831_v59, 16  ;;  %v3275_v14 = vrot.slane %v1702_v2, 9  ;;  %v1741_v15 = vrot.slane %v1703_v3, 5  ;;  %v1832_v41 = vld [vmem:[#allocation2 + $0xc] sm:$0x1] }
 0x148   : > { %v1850_v23 = vrot.slane %v1848_v8, 4  ;;  %v1487_v55 = vld [vmem:[#allocation2 + $0x18] sm:$0xf]  ;;  %v1490_v2 = vld [vmem:[#allocation2 + $0x1c] sm:$0x1] }
 0x149   : > { %v1577_v60 = vrot.slane %v1576_v58, 4  ;;  %v1853_v30 = vrot.slane %v1851_v11, 5  ;;  %v1742_v40 = vsel %vm4144_vm1, %v3275_v14, %v1741_v15 }
 0x14a   : > { %v1543_v0 = vld [vmem:[#allocation2 + $0x10] sm:$0xf]  ;;  %1776 = vst.msk [vmem:[#allocation4 + $0x18] sm:$0xf] %vm1312_vm13, %v1742_v40 }
 0x14b   : > { %v1260_v4 = vpop.f32.mrf.mxu1  ;;  %v1582_v5 = vsel %vm3754_vm2, %v1577_v60, %v1581_v61  ;;  %v1544_v6 = vld [vmem:[#allocation2 + $0x14] sm:$0x1]  ;;  %v1584_v7 = vshrl.u32 %v1543_v0, 16  ;;  %v1587_v10 = vshll.u32 %v1543_v0, 16  ;;  %v4139_v16 = vld [vmem:[#allocation2 + $0x10] sm:$0xe]  ;;  %v1854_v53 = vor.u32 %v1853_v30, %v1850_v23 }
 0x14c   : > { %v1261_v9 = vadd.f32 %v1260_v4, %v1232_v63  ;;  %1669 = vrot.lane.b32.xlu1 %v1582_v5, %s3685_s9  ;;  %v4141_v1 = vld [vmem:[#allocation2 + $0x14] sm:$0x1]  ;;  %v1593_v19 = vshll.u32 %v1544_v6, 16  ;;  %v1525_v22 = vld [vmem:[#allocation2 + $0x10] sm:$0xf]  ;;  %v3290_v31 = vrot.slane %v4139_v16, 9 }
 0x14d   : > { %v1586_v13 = vrot.slane %v1584_v7, 4  ;;  %v1589_v18 = vrot.slane %v1587_v10, 5  ;;  %v2282_v32 = vrot.slane %v4141_v1, 5  ;;  %1533 = vst.msk [vmem:[#allocation4 + $0x28] sm:$0xf] %vm1312_vm13, %v1525_v22  ;;  %v1857_v4 = vshll.u32 %v1832_v41, 16 }
 0x14e   : > { %v1290_v17 = vadd.f32 %v1289_v62, %v1261_v9  ;;  %v1595_v38 = vrot.slane %v1593_v19, 5  ;;  %v1833_v39 = vld [vmem:[#allocation2 + $0x10] sm:$0xf]  ;;  %v1834_v45 = vld [vmem:[#allocation2 + $0x14] sm:$0x1]  ;;  %v1855_v11 = vrot.slane %v1854_v53, 4 }
 0x14f   : > { %v1590_v27 = vor.u32 %v1589_v18, %v1586_v13  ;;  %v1862_v46 = vshrl.u32 %v1833_v39, 16  ;;  %v1865_v47 = vshll.u32 %v1833_v39, 16  ;;  %v1704_v51 = vld [vmem:[#allocation2 + $0x10] sm:$0xe]  ;;  %v1705_v52 = vld [vmem:[#allocation2 + $0x14] sm:$0x1]  ;;  %v2283_v12 = vsel %vm4144_vm1, %v3290_v31, %v2282_v32 }
 0x150   : > { %v1306_v26 = vmax.f32 %v1290_v17, 0.0  ;;  %v1871_v59 = vshll.u32 %v1834_v45, 16  ;;  %v3276_v62 = vrot.slane %v1704_v51, 9  ;;  %v1745_v63 = vrot.slane %v1705_v52, 5  ;;  %v2072_v0 = vld [vmem:[#allocation2 + $0x10] sm:$0xf] }
 0x151   : > { %v1591_v36 = vrot.slane %v1590_v27, 4  ;;  %v1864_v57 = vrot.slane %v1862_v46, 4  ;;  %v1867_v58 = vrot.slane %v1865_v47, 5  ;;  %2080 = vst.msk [vmem:[#allocation4 + $0xc] sm:$0xf] %vm1312_vm13, %v2072_v0  ;;  %v1859_v19 = vrot.slane %v1857_v4, 5  ;;  %v1294_v46 = vpop.f32.mrf.mxu3 }
 0x152   : > { %v1386_v35 = vpack.c.bf16 %v1306_v26, %v1306_v26  ;;  %v1746_v8 = vsel %vm4144_vm1, %v3276_v62, %v1745_v63  ;;  %v1873_v10 = vrot.slane %v1871_v59, 5  ;;  %v1340_v16 = vld [vmem:[#allocation2 + $0x30] sm:$0x1]  ;;  %v1372_v1 = vld [vmem:[#allocation2 + $0x34] sm:$0x1] }
 0x153   : > { %v1262_v43 = vpop.f32.mrf.mxu1  ;;  %v1596_v50 = vsel %vm3754_vm2, %v1591_v36, %v1595_v38  ;;  %v1868_v3 = vor.u32 %v1867_v58, %v1864_v57  ;;  %1777 = vst.msk [vmem:[#allocation4 + $0x2c] sm:$0xf] %vm1312_vm13, %v1746_v8  ;;  %v1341_v17 = vsel %vm4077_vm11, 0, %v1340_v16  ;;  %v1373_v18 = vsel %vm4084_vm12, 0, %v1372_v1  ;;  %v1343_v4 = vld [vmem:[#allocation2 + $0x38] sm:$0x1] }
 0x154   : > { %v1409_v48 = vshrl.u32 %v1386_v35, 16  ;;  %v1263_v49 = vadd.f32 %v1262_v43, %v1234_v25  ;;  %v1412_v54 = vshll.u32 %v1386_v35, 16  ;;  %1671 = vrot.lane.b32.xlu2 %v1596_v50, %s3685_s9  ;;  %2320 = vst.msk [vmem:[#allocation4 + $0x10] sm:$0xf] %vm1312_vm13, %v2283_v12  ;;  %v1860_v25 = vsel %vm3754_vm2, %v1855_v11, %v1859_v19 }
 0x155   : > { %v1869_v9 = vrot.slane %v1868_v3, 4  ;;  %1342 = vst [vmem:[#allocation2 + $0x30] sm:$0x1] %v1341_v17  ;;  %v1344_v8 = vsel %vm4077_vm11, 0, %v1343_v4 }
 0x156   : > { %v1411_v60 = vrot.slane %v1409_v48, 7  ;;  %v1292_v61 = vadd.f32 %v1291_v44, %v1263_v49  ;;  %1374 = vst [vmem:[#allocation2 + $0x34] sm:$0x1] %v1373_v18 }
 0x157   : > { %v1874_v23 = vsel %vm3754_vm2, %v1869_v9, %v1873_v10  ;;  %1967 = vst.msk [vmem:[#allocation4 + $0x8] sm:$0xf] %vm1312_vm13, %v1860_v25 }
 0x158   : > { %v1414_v5 = vor.u32 %v1412_v54, %v1411_v60  ;;  %v1415_v6 = vrot.slane %v1411_v60, 4  ;;  %v1307_v7 = vmax.f32 %v1292_v61, 0.0  ;;  %1968 = vst.msk [vmem:[#allocation4 + $0x1c] sm:$0xf] %vm1312_vm13, %v1874_v23 }
 0x159   : > { %1345 = vst [vmem:[#allocation2 + $0x38] sm:$0x1] %v1344_v8  ;;  %v1296_v17 = vpop.f32.mrf.mxu3 }
 0x15a   : > { %v1488_v13 = vsel %vm4118_vm14, %v1414_v5, %v1487_v55  ;;  %v1491_v14 = vsel %vm4077_vm11, %v1415_v6, %v1490_v2  ;;  %v1387_v15 = vpack.c.bf16 %v1307_v7, %v1307_v7  ;;  %v1375_v5 = vld [vmem:[#allocation2 + $0x3c] sm:$0x1] }
 0x15b   : > { %1489 = vst [vmem:[#allocation2 + $0x18] sm:$0xf] %v1488_v13  ;;  %v1236_v39 = vpop.f32.mrf.mxu0  ;;  %v1376_v9 = vsel %vm4084_vm12, 0, %v1375_v5 }
 0x15c   : > { %1492 = vst [vmem:[#allocation2 + $0x1c] sm:$0x1] %v1491_v14  ;;  %v1417_v22 = vshrl.u32 %v1387_v15, 16  ;;  %v1420_v27 = vshll.u32 %v1387_v15, 16  ;;  %v1237_v47 = vadd.f32 %v4105_v56, %v1236_v39  ;;  %v1505_v5 = vld [vmem:[#allocation2 + $0x30] sm:$0xf] }
 0x15d   : > { %1377 = vst [vmem:[#allocation2 + $0x3c] sm:$0x1] %v1376_v9 }
 0x15e   : > { %v1419_v26 = vrot.slane %v1417_v22, 7 }
 0x160   : > { %v1422_v30 = vor.u32 %v1420_v27, %v1419_v26  ;;  %v1423_v31 = vrot.slane %v1419_v26, 4 }
 0x162   : > { %v1494_v32 = vsel %vm4118_vm14, %v1422_v30, %v1493_v28  ;;  %v1497_v33 = vsel %vm4077_vm11, %v1423_v31, %v1496_v29  ;;  %v1545_v34 = vld [vmem:[#allocation2 + $0x18] sm:$0xf]  ;;  %v1499_v29 = vld [vmem:[#allocation2 + $0x28] sm:$0xf]  ;;  %v1502_v30 = vld [vmem:[#allocation2 + $0x2c] sm:$0x1] }
 0x163   : > { %1495 = vst [vmem:[#allocation2 + $0x20] sm:$0xf] %v1494_v32  ;;  %v1598_v35 = vshrl.u32 %v1545_v34, 16  ;;  %v1546_v36 = vld [vmem:[#allocation2 + $0x1c] sm:$0x1]  ;;  %v1601_v38 = vshll.u32 %v1545_v34, 16  ;;  %v1238_v63 = vpop.f32.mrf.mxu0 }
 0x164   : > { %1498 = vst [vmem:[#allocation2 + $0x24] sm:$0x1] %v1497_v33  ;;  %v1607_v43 = vshll.u32 %v1546_v36, 16  ;;  %v1526_v45 = vld [vmem:[#allocation2 + $0x18] sm:$0xf]  ;;  %v1239_v12 = vadd.f32 %v4105_v56, %v1238_v63 }
 0x165   : > { %v1600_v40 = vrot.slane %v1598_v35, 4  ;;  %v1603_v41 = vrot.slane %v1601_v38, 5  ;;  %1534 = vst.msk [vmem:[#allocation4 + $0x3c] sm:$0xf] %vm1312_vm13, %v1526_v45  ;;  %v2250_v11 = vld [vmem:[#allocation2 + $0x18] sm:$0xe] }
 0x166   : > { %v1609_v49 = vrot.slane %v1607_v43, 5  ;;  %v2251_v22 = vld [vmem:[#allocation2 + $0x1c] sm:$0x1]  ;;  %v1706_v27 = vld [vmem:[#allocation2 + $0x18] sm:$0xe] }
 0x167   : > { %v1604_v44 = vor.u32 %v1603_v41, %v1600_v40  ;;  %v1707_v34 = vld [vmem:[#allocation2 + $0x1c] sm:$0x1]  ;;  %v2073_v40 = vld [vmem:[#allocation2 + $0x18] sm:$0xf]  ;;  %v3291_v41 = vrot.slane %v2250_v11, 9 }
 0x168   : > { %v1749_v45 = vrot.slane %v1707_v34, 5  ;;  %2081 = vst.msk [vmem:[#allocation4 + $0x20] sm:$0xf] %vm1312_vm13, %v2073_v40  ;;  %v4232_v34 = vld [vmem:[#allocation2 + $0x10] sm:$0xe] }
 0x169   : > { %v1605_v48 = vrot.slane %v1604_v44, 4  ;;  %v3277_v44 = vrot.slane %v1706_v27, 9  ;;  %v1836_v27 = vld [vmem:[#allocation2 + $0x1c] sm:$0x1] }
 0x16a   : > { %v1547_v50 = vld [vmem:[#allocation2 + $0x20] sm:$0xf] }
 0x16b   : > { %v1265_v51 = vpop.f32.mrf.mxu1  ;;  %v1548_v52 = vld [vmem:[#allocation2 + $0x24] sm:$0x1]  ;;  %v1612_v53 = vshrl.u32 %v1547_v50, 16  ;;  %v1615_v54 = vshll.u32 %v1547_v50, 16  ;;  %v1610_v57 = vsel %vm3754_vm2, %v1605_v48, %v1609_v49  ;;  %v1527_v62 = vld [vmem:[#allocation2 + $0x20] sm:$0xf] }
 0x16c   : > { %v1266_v55 = vadd.f32 %v1265_v51, %v1237_v47  ;;  %1673 = vrot.lane.b32.xlu0 %v1610_v57, %s3685_s9  ;;  %v1621_v60 = vshll.u32 %v1548_v52, 16  ;;  %1535 = vst.msk [vmem:[#allocation4 + $0x50] sm:$0xf] %vm1312_vm13, %v1527_v62  ;;  %v1837_v2 = vld [vmem:[#allocation2 + $0x20] sm:$0xf]  ;;  %v2286_v50 = vrot.slane %v2251_v22, 5 }
 0x16d   : > { %v1614_v58 = vrot.slane %v1612_v53, 4  ;;  %v1617_v59 = vrot.slane %v1615_v54, 5  ;;  %v1838_v10 = vld [vmem:[#allocation2 + $0x24] sm:$0x1]  ;;  %v1890_v14 = vshrl.u32 %v1837_v2, 16  ;;  %v1893_v18 = vshll.u32 %v1837_v2, 16 }
 0x16e   : > { %v1295_v61 = vadd.f32 %v1294_v46, %v1266_v55  ;;  %v1623_v7 = vrot.slane %v1621_v60, 5  ;;  %v1708_v15 = vld [vmem:[#allocation2 + $0x20] sm:$0xe]  ;;  %v1709_v19 = vld [vmem:[#allocation2 + $0x24] sm:$0x1]  ;;  %v1899_v26 = vshll.u32 %v1838_v10, 16  ;;  %v1750_v53 = vsel %vm4144_vm1, %v3277_v44, %v1749_v45 }
 0x16f   : > { %v1618_v0 = vor.u32 %v1617_v59, %v1614_v58  ;;  %v1892_v31 = vrot.slane %v1890_v14, 4  ;;  %v1895_v32 = vrot.slane %v1893_v18, 5  ;;  %v3278_v33 = vrot.slane %v1708_v15, 9  ;;  %v2074_v39 = vld [vmem:[#allocation2 + $0x20] sm:$0xf] }
 0x170   : > { %v1308_v3 = vmax.f32 %v1295_v61, 0.0  ;;  %v1753_v38 = vrot.slane %v1709_v19, 5  ;;  %2082 = vst.msk [vmem:[#allocation4 + $0x34] sm:$0xf] %vm1312_vm13, %v2074_v39  ;;  %v1901_v52 = vrot.slane %v1899_v26, 5  ;;  %v2287_v2 = vsel %vm4144_vm1, %v3291_v41, %v2286_v50 }
 0x171   : > { %v1619_v6 = vrot.slane %v1618_v0, 4  ;;  %v1896_v43 = vor.u32 %v1895_v32, %v1892_v31  ;;  %v1346_v58 = vld [vmem:[#allocation2 + $0x40] sm:$0x1]  ;;  %v1378_v59 = vld [vmem:[#allocation2 + $0x44] sm:$0x1] }
 0x172   : > { %v1388_v13 = vpack.c.bf16 %v1308_v3, %v1308_v3  ;;  %v1754_v49 = vsel %vm4144_vm1, %v3278_v33, %v1753_v38  ;;  %1778 = vst.msk [vmem:[#allocation4 + $0x40] sm:$0xf] %vm1312_vm13, %v1750_v53  ;;  %v1347_v60 = vsel %vm4077_vm11, 0, %v1346_v58  ;;  %v1379_v61 = vsel %vm4084_vm12, 0, %v1378_v59  ;;  %v1835_v0 = vld [vmem:[#allocation2 + $0x18] sm:$0xf] }
 0x173   : > { %v1267_v16 = vpop.f32.mrf.mxu1  ;;  %v1624_v1 = vsel %vm3754_vm2, %v1619_v6, %v1623_v7  ;;  %v1897_v51 = vrot.slane %v1896_v43, 4  ;;  %1779 = vst.msk [vmem:[#allocation4 + $0x54] sm:$0xf] %vm1312_vm13, %v1754_v49  ;;  %v1508_v6 = vld [vmem:[#allocation2 + $0x34] sm:$0x1]  ;;  %v1876_v8 = vshrl.u32 %v1835_v0, 16 }
 0x174   : > { %v1425_v23 = vshrl.u32 %v1388_v13, 16  ;;  %v1268_v25 = vadd.f32 %v1267_v16, %v1239_v12  ;;  %1675 = vrot.lane.b32.xlu1 %v1624_v1, %s3685_s9  ;;  %v1428_v28 = vshll.u32 %v1388_v13, 16  ;;  %1348 = vst [vmem:[#allocation2 + $0x40] sm:$0x1] %v1347_v60  ;;  %v1879_v9 = vshll.u32 %v1835_v0, 16  ;;  %v3622_v1 = vld [vmem:[%s4623_s3 + $0x38] sm:$0xff] }
 0x175   : > { %v1902_v63 = vsel %vm3754_vm2, %v1897_v51, %v1901_v52  ;;  %1380 = vst [vmem:[#allocation2 + $0x44] sm:$0x1] %v1379_v61  ;;  %2846 = vmatpush.bf16.msrb.mxu2 %v3622_v1  ;;  %v3621_v52 = vld [vmem:[%s4623_s3 + $0x30] sm:$0xff]  ;;  %v1982_v24 = vld [vmem:[#allocation2 + $0x24] sm:$0x1] }
 0x176   : > { %v1427_v35 = vrot.slane %v1425_v23, 7  ;;  %v1297_v36 = vadd.f32 %v1296_v17, %v1268_v25  ;;  %1970 = vst.msk [vmem:[#allocation4 + $0x44] sm:$0xf] %vm1312_vm13, %v1902_v63  ;;  %v1878_v17 = vrot.slane %v1876_v8, 4  ;;  %v1881_v18 = vrot.slane %v1879_v9, 5 }
 0x177   : > { %2321 = vst.msk [vmem:[#allocation4 + $0x24] sm:$0xf] %vm1312_vm13, %v2287_v2  ;;  %v4247_v63 = vld [vmem:[#allocation2 + $0x20] sm:$0xe] }
 0x178   : > { %v1430_v46 = vor.u32 %v1428_v28, %v1427_v35  ;;  %v1431_v47 = vrot.slane %v1427_v35, 4  ;;  %v1309_v48 = vmax.f32 %v1297_v36, 0.0  ;;  %v2088_v28 = vld [vmem:[#allocation2 + $0x10] sm:$0xf]  ;;  %v1885_v35 = vshll.u32 %v1836_v27, 16  ;;  %v1299_v36 = vpop.f32.mrf.mxu3 }
 0x179   : > { %v2105_v44 = vshrl.u32 %v2088_v28, 16  ;;  %2847 = vmatpush.bf16.msrb.mxu2 %v3621_v52 }
 0x17a   : > { %v1500_v54 = vsel %vm4118_vm14, %v1430_v46, %v1499_v29  ;;  %v1503_v55 = vsel %vm4077_vm11, %v1431_v47, %v1502_v30  ;;  %v1389_v57 = vpack.c.bf16 %v1309_v48, %v1309_v48  ;;  %v1882_v29 = vor.u32 %v1881_v18, %v1878_v17  ;;  %v4237_v46 = vld [vmem:[#allocation2 + $0x14] sm:$0x1] }
 0x17b   : > { %1501 = vst [vmem:[#allocation2 + $0x28] sm:$0xf] %v1500_v54  ;;  %v1241_v16 = vpop.f32.mrf.mxu0  ;;  %v2108_v47 = vshll.u32 %v2088_v28, 16  ;;  %v1887_v59 = vrot.slane %v1885_v35, 5  ;;  %v2013_v61 = vrot.slane %v4237_v46, 5  ;;  %v3292_v28 = vrot.slane %v4247_v63, 9 }
 0x17c   : > { %1504 = vst [vmem:[#allocation2 + $0x2c] sm:$0x1] %v1503_v55  ;;  %v1433_v62 = vshrl.u32 %v1389_v57, 16  ;;  %v1436_v4 = vshll.u32 %v1389_v57, 16  ;;  %v1242_v32 = vadd.f32 %v4105_v56, %v1241_v16  ;;  %v1883_v48 = vrot.slane %v1882_v29, 4 }
 0x17d   : > { %v3283_v55 = vrot.slane %v4232_v34, 9  ;;  %v4249_v2 = vrot.slane %v2108_v47, 5 }
 0x17e   : > { %v1435_v3 = vrot.slane %v1433_v62, 7  ;;  %v4244_v62 = vrot.slane %v2105_v44, 4  ;;  %v3618_v44 = vld [vmem:[%s4623_s3 + $0x18] sm:$0xff] }
 0x180   : > { %v1438_v7 = vor.u32 %v1436_v4, %v1435_v3  ;;  %v1439_v42 = vrot.slane %v1435_v3, 4  ;;  %v3620_v3 = vld [vmem:[%s4623_s3 + $0x28] sm:$0xff] }
 0x181   : > { %2848 = vmatpush.bf16.msrb.mxu2 %v3620_v3 }
 0x182   : > { %v1506_v10 = vsel %vm4118_vm14, %v1438_v7, %v1505_v5  ;;  %v1509_v11 = vsel %vm4077_vm11, %v1439_v42, %v1508_v6  ;;  %v1549_v12 = vld [vmem:[#allocation2 + $0x28] sm:$0xf]  ;;  %v1888_v7 = vsel %vm3754_vm2, %v1883_v48, %v1887_v59  ;;  %v4256_v42 = vld [vmem:[#allocation2 + $0x24] sm:$0x1] }
 0x183   : > { %1507 = vst [vmem:[#allocation2 + $0x30] sm:$0xf] %v1506_v10  ;;  %v1550_v13 = vld [vmem:[#allocation2 + $0x2c] sm:$0x1]  ;;  %v1626_v14 = vshrl.u32 %v1549_v12, 16  ;;  %v1629_v15 = vshll.u32 %v1549_v12, 16  ;;  %v1243_v53 = vpop.f32.mrf.mxu0 }
 0x184   : > { %1510 = vst [vmem:[#allocation2 + $0x34] sm:$0x1] %v1509_v11  ;;  %v1635_v23 = vshll.u32 %v1550_v13, 16  ;;  %v1528_v26 = vld [vmem:[#allocation2 + $0x28] sm:$0xf]  ;;  %v1244_v8 = vadd.f32 %v4105_v56, %v1243_v53 }
 0x185   : > { %v1628_v19 = vrot.slane %v1626_v14, 4  ;;  %v1631_v22 = vrot.slane %v1629_v15, 5  ;;  %1536 = vst.msk [vmem:[#allocation4 + $0x64] sm:$0xf] %vm1312_vm13, %v1528_v26  ;;  %v1710_v6 = vld [vmem:[#allocation2 + $0x28] sm:$0xe] }
 0x186   : > { %v1637_v31 = vrot.slane %v1635_v23, 5  ;;  %v1783_v11 = vld [vmem:[#allocation2 + $0x8] sm:$0xf]  ;;  %v1711_v13 = vld [vmem:[#allocation2 + $0x2c] sm:$0x1]  ;;  %v3279_v35 = vrot.slane %v1710_v6, 9 }
 0x187   : > { %v1632_v25 = vor.u32 %v1631_v22, %v1628_v19  ;;  %1969 = vst.msk [vmem:[#allocation4 + $0x30] sm:$0xf] %vm1312_vm13, %v1888_v7  ;;  %v2075_v47 = vld [vmem:[#allocation2 + $0x28] sm:$0xf]  ;;  %v1784_v53 = vld [vmem:[#allocation2 + $0x10] sm:$0xf] }
 0x188   : > { %v1839_v48 = vld [vmem:[#allocation2 + $0x28] sm:$0xf]  ;;  %2083 = vst.msk [vmem:[#allocation4 + $0x48] sm:$0xf] %vm1312_vm13, %v2075_v47  ;;  %v2255_v46 = vld [vmem:[#allocation2 + $0x2c] sm:$0x1] }
 0x189   : > { %v1633_v30 = vrot.slane %v1632_v25, 4  ;;  %v1907_v59 = vshll.u32 %v1839_v48, 16 }
 0x18a   : > { %v1551_v33 = vld [vmem:[#allocation2 + $0x30] sm:$0xf] }
 0x18b   : > { %v1270_v38 = vpop.f32.mrf.mxu1  ;;  %v1638_v39 = vsel %vm3754_vm2, %v1633_v30, %v1637_v31  ;;  %v1552_v40 = vld [vmem:[#allocation2 + $0x34] sm:$0x1]  ;;  %v1640_v41 = vshrl.u32 %v1551_v33, 16  ;;  %v1643_v43 = vshll.u32 %v1551_v33, 16  ;;  %v1529_v57 = vld [vmem:[#allocation2 + $0x30] sm:$0xf]  ;;  %v1301_v31 = vpop.f32.mrf.mxu3 }
 0x18c   : > { %v1271_v45 = vadd.f32 %v1270_v38, %v1242_v32  ;;  %1677 = vrot.lane.b32.xlu2 %v1638_v39, %s3685_s9  ;;  %v1649_v51 = vshll.u32 %v1552_v40, 16  ;;  %v1841_v58 = vld [vmem:[#allocation2 + $0x30] sm:$0xf]  ;;  %1537 = vst.msk [vmem:[#allocation4 + $0x78] sm:$0xf] %vm1312_vm13, %v1529_v57  ;;  %v3619_v32 = vld [vmem:[%s4623_s3 + $0x20] sm:$0xff] }
 0x18d   : > { %v1642_v49 = vrot.slane %v1640_v41, 4  ;;  %v1645_v50 = vrot.slane %v1643_v43, 5  ;;  %v1842_v4 = vld [vmem:[#allocation2 + $0x34] sm:$0x1]  ;;  %v1918_v5 = vshrl.u32 %v1841_v58, 16  ;;  %v1921_v16 = vshll.u32 %v1841_v58, 16  ;;  %2849 = vmatpush.bf16.msrb.mxu2 %v3619_v32 }
 0x18e   : > { %v1300_v54 = vadd.f32 %v1299_v36, %v1271_v45  ;;  %v1651_v10 = vrot.slane %v1649_v51, 5  ;;  %v1712_v12 = vld [vmem:[#allocation2 + $0x30] sm:$0xe]  ;;  %v1927_v1 = vshll.u32 %v1842_v4, 16  ;;  %v1713_v17 = vld [vmem:[#allocation2 + $0x34] sm:$0x1] }
 0x18f   : > { %v1646_v60 = vor.u32 %v1645_v50, %v1642_v49  ;;  %v1920_v15 = vrot.slane %v1918_v5, 4  ;;  %v3280_v22 = vrot.slane %v1712_v12, 9  ;;  %v1761_v23 = vrot.slane %v1713_v17, 5  ;;  %v2076_v25 = vld [vmem:[#allocation2 + $0x30] sm:$0xf] }
 0x190   : > { %v1310_v0 = vmax.f32 %v1300_v54, 0.0  ;;  %v1923_v27 = vrot.slane %v1921_v16, 5  ;;  %2084 = vst.msk [vmem:[#allocation4 + $0x5c] sm:$0xf] %vm1312_vm13, %v2076_v25  ;;  %v1511_v30 = vld [vmem:[#allocation2 + $0x38] sm:$0xf]  ;;  %v2014_v54 = vsel %vm4144_vm1, %v3283_v55, %v2013_v61  ;;  %v2111_v55 = vor.u32 %v4249_v2, %v4244_v62 }
 0x191   : > { %v1647_v9 = vrot.slane %v1646_v60, 4  ;;  %v1762_v33 = vsel %vm4144_vm1, %v3280_v22, %v1761_v23  ;;  %v2290_v36 = vrot.slane %v4256_v42, 5  ;;  %v1514_v39 = vld [vmem:[#allocation2 + $0x3c] sm:$0x1]  ;;  %v1757_v43 = vrot.slane %v1711_v13, 5  ;;  %2850 = vmatpush.bf16.msrb.mxu2 %v3618_v44  ;;  %v3617_v62 = vld [vmem:[%s4623_s3 + $0x10] sm:$0xff] }
 0x192   : > { %v1390_v14 = vpack.c.bf16 %v1310_v0, %v1310_v0  ;;  %v1924_v41 = vor.u32 %v1923_v27, %v1920_v15  ;;  %1781 = vst.msk [vmem:[#allocation4 + $0x7c] sm:$0xf] %vm1312_vm13, %v1762_v33  ;;  %v1929_v45 = vrot.slane %v1927_v1, 5  ;;  %v1904_v58 = vshrl.u32 %v1839_v48, 16  ;;  %v2254_v60 = vld [vmem:[#allocation2 + $0x28] sm:$0xe]  ;;  %v1668_v27 = vpop.permute.xlu0 %1667 }
 0x193   : > { %v1272_v18 = vpop.f32.mrf.mxu1  ;;  %v1652_v19 = vsel %vm3754_vm2, %v1647_v9, %v1651_v10  ;;  %v1758_v57 = vsel %vm4144_vm1, %v3279_v35, %v1757_v43  ;;  %v2089_v4 = vld [vmem:[#allocation2 + $0x14] sm:$0x1]  ;;  %v1909_v5 = vrot.slane %v1907_v59, 5  ;;  %v3293_v6 = vrot.slane %v2254_v60, 9  ;;  %v2092_v42 = vld [vmem:[#allocation2 + $0x20] sm:$0xf] }
 0x194   : > { %v1441_v56 = vshrl.u32 %v1390_v14, 16  ;;  %v1273_v26 = vadd.f32 %v1272_v18, %v1244_v8  ;;  %1679 = vrot.lane.b32.xlu0 %v1652_v19, %s3685_s9  ;;  %1799 = vrot.lane.b32.xlu2 %v1783_v11, %s3685_s9  ;;  %v1444_v29 = vshll.u32 %v1390_v14, 16  ;;  %v1925_v52 = vrot.slane %v1924_v41, 4  ;;  %1780 = vst.msk [vmem:[#allocation4 + $0x68] sm:$0xf] %vm1312_vm13, %v1758_v57  ;;  %v3616_v18 = vld [vmem:[%s4623_s3 + $0x8] sm:$0xff] }
 0x195   : > { %v1906_v61 = vrot.slane %v1904_v58, 4  ;;  %v1840_v8 = vld [vmem:[#allocation2 + $0x2c] sm:$0x1]  ;;  %v2291_v9 = vsel %vm4144_vm1, %v3292_v28, %v2290_v36  ;;  %v2294_v10 = vrot.slane %v2255_v46, 5  ;;  %v2114_v11 = vshll.u32 %v2089_v4, 16  ;;  %2851 = vmatpush.bf16.msrb.mxu2 %v3617_v62 }
 0x196   : > { %v1443_v38 = vrot.slane %v1441_v56, 7  ;;  %v1302_v40 = vadd.f32 %v1301_v31, %v1273_v26  ;;  %v1930_v34 = vsel %vm3754_vm2, %v1925_v52, %v1929_v45  ;;  %v1523_v2 = vld [vmem:[#allocation2] sm:$0xf]  ;;  %v1520_v1 = vld [vmem:[#allocation2 + $0x44] sm:$0x1]  ;;  %v2112_v17 = vrot.slane %v2111_v55, 4 }
 0x197   : > { %1972 = vst.msk [vmem:[#allocation4 + $0x6c] sm:$0xf] %vm1312_vm13, %v1930_v34  ;;  %v1517_v14 = vld [vmem:[#allocation2 + $0x40] sm:$0xf]  ;;  %v1910_v15 = vor.u32 %v1909_v5, %v1906_v61  ;;  %v2295_v16 = vsel %vm4144_vm1, %v3293_v6, %v2294_v10  ;;  %v1913_v23 = vshll.u32 %v1840_v8, 16  ;;  %v2116_v25 = vrot.slane %v2114_v11, 5 }
 0x198   : > { %v1446_v49 = vor.u32 %v1444_v29, %v1443_v38  ;;  %v1447_v50 = vrot.slane %v1443_v38, 4  ;;  %v1311_v51 = vmax.f32 %v1302_v40, 0.0  ;;  %1531 = vst.msk [vmem:[#allocation4] sm:$0xf] %vm1312_vm13, %v1523_v2  ;;  %v1785_v56 = vld [vmem:[#allocation2 + $0x18] sm:$0xf] }
 0x199   : > { %2322 = vst.msk [vmem:[#allocation4 + $0x38] sm:$0xf] %vm1312_vm13, %v2291_v9  ;;  %v2133_v26 = vshrl.u32 %v2092_v42, 16  ;;  %v2136_v32 = vshll.u32 %v2092_v42, 16  ;;  %v1911_v33 = vrot.slane %v1910_v15, 4  ;;  %v2117_v35 = vsel %vm3754_vm2, %v2112_v17, %v2116_v25  ;;  %2852 = vmatpush.bf16.msrb.mxu2 %v3616_v18  ;;  %v3615_v45 = vld [vmem:[%s4623_s3] sm:$0xff] }
 0x19a   : > { %v1512_v63 = vsel %vm4118_vm14, %v1446_v49, %v1511_v30  ;;  %v1515_v0 = vsel %vm4077_vm11, %v1447_v50, %v1514_v39  ;;  %v1391_v3 = vpack.c.bf16 %v1311_v51, %v1311_v51  ;;  %2323 = vst.msk [vmem:[#allocation4 + $0x4c] sm:$0xf] %vm1312_vm13, %v2295_v16  ;;  %v1981_v30 = vld [vmem:[#allocation2 + $0x20] sm:$0xe]  ;;  %v1915_v40 = vrot.slane %v1913_v23, 5  ;;  %v3656_v42 = vld [vmem:[%s4625_s5 + $0x8] sm:$0xff] }
 0x19b   : > { %1513 = vst [vmem:[#allocation2 + $0x38] sm:$0xf] %v1512_v63  ;;  %v2135_v47 = vrot.slane %v2133_v26, 4  ;;  %v2138_v48 = vrot.slane %v2136_v32, 5  ;;  %v3285_v50 = vrot.slane %v1981_v30, 9  ;;  %v2021_v51 = vrot.slane %v1982_v24, 5  ;;  %2490 = vmatpush.bf16.msrb.mxu3 %v3656_v42 }
 0x19c   : > { %1516 = vst [vmem:[#allocation2 + $0x3c] sm:$0x1] %v1515_v0  ;;  %v1449_v7 = vshrl.u32 %v1391_v3, 16  ;;  %1801 = vrot.lane.b32.xlu0 %v1784_v53, %s3685_s9  ;;  %2041 = vrot.lane.b32.xlu2 %v2014_v54, %s3685_s9  ;;  %v1452_v13 = vshll.u32 %v1391_v3, 16  ;;  %v1916_v49 = vsel %vm3754_vm2, %v1911_v33, %v1915_v40  ;;  %v1975_v54 = vld [vmem:[#allocation2 + $0x8] sm:$0xe] }
 0x19d   : > { %1692 = vst.msk [vmem:[#allocation4] sm:$0xf] %vm1691_vm3, %v1668_v27  ;;  %2853 = vmatpush.bf16.msrb.mxu2 %v3615_v45  ;;  %v2090_v59 = vld [vmem:[#allocation2 + $0x18] sm:$0xf]  ;;  %v2093_v60 = vld [vmem:[#allocation2 + $0x24] sm:$0x1]  ;;  %v2139_v63 = vor.u32 %v2138_v48, %v2135_v47  ;;  %v2022_v3 = vsel %vm4144_vm1, %v3285_v50, %v2021_v51 }
 0x19e   : > { %v1451_v12 = vrot.slane %v1449_v7, 7  ;;  %1971 = vst.msk [vmem:[#allocation4 + $0x58] sm:$0xf] %vm1312_vm13, %v1916_v49  ;;  %v1786_v0 = vld [vmem:[#allocation2 + $0x20] sm:$0xf]  ;;  %v3282_v46 = vrot.slane %v1975_v54, 9 }
 0x19f   : > { %v1976_v34 = vld [vmem:[#allocation2 + $0xc] sm:$0x1]  ;;  %v2119_v55 = vshrl.u32 %v2090_v59, 16  ;;  %v2122_v61 = vshll.u32 %v2090_v59, 16  ;;  %v2096_v5 = vld [vmem:[#allocation2 + $0x30] sm:$0xf] }
 0x1a0   : > { %v1454_v19 = vor.u32 %v1452_v13, %v1451_v12  ;;  %v1455_v22 = vrot.slane %v1451_v12, 4  ;;  %v2142_v7 = vshll.u32 %v2093_v60, 16  ;;  %v2140_v11 = vrot.slane %v2139_v63, 4  ;;  %v1787_v25 = vld [vmem:[#allocation2 + $0x28] sm:$0xf]  ;;  %v3655_v48 = vld [vmem:[%s4625_s5] sm:$0xff] }
 0x1a1   : > { %v2009_v62 = vrot.slane %v1976_v34, 5  ;;  %v2121_v17 = vrot.slane %v2119_v55, 4  ;;  %v2124_v18 = vrot.slane %v2122_v61, 5  ;;  %v2164_v26 = vshll.u32 %v2096_v5, 16  ;;  %v1985_v30 = vld [vmem:[#allocation2 + $0x30] sm:$0xe]  ;;  %2491 = vmatpush.bf16.msrb.mxu3 %v3655_v48 }
 0x1a2   : > { %v1518_v28 = vsel %vm4118_vm14, %v1454_v19, %v1517_v14  ;;  %v1521_v29 = vsel %vm4077_vm11, %v1455_v22, %v1520_v1  ;;  %v1553_v31 = vld [vmem:[#allocation2 + $0x38] sm:$0xf]  ;;  %v2161_v19 = vshrl.u32 %v2096_v5, 16  ;;  %v2144_v23 = vrot.slane %v2142_v7, 5  ;;  %v3651_v50 = vld [vmem:[%s3741_s29 + $0xdc] sm:$0xf0] }
 0x1a3   : > { %1519 = vst [vmem:[#allocation2 + $0x40] sm:$0xf] %v1518_v28  ;;  %v1554_v36 = vld [vmem:[#allocation2 + $0x3c] sm:$0x1]  ;;  %v1654_v38 = vshrl.u32 %v1553_v31, 16  ;;  %v1657_v39 = vshll.u32 %v1553_v31, 16 }
 0x1a4   : > { %1522 = vst [vmem:[#allocation2 + $0x44] sm:$0x1] %v1521_v29  ;;  %2216 = vrot.lane.b32.xlu0 %v2117_v35, %s3685_s9  ;;  %1803 = vrot.lane.b32.xlu2 %v1785_v56, %s3685_s9  ;;  %v1663_v44 = vshll.u32 %v1554_v36, 16  ;;  %v1530_v53 = vld [vmem:[#allocation2 + $0x38] sm:$0xf]  ;;  %v2145_v36 = vsel %vm3754_vm2, %v2140_v11, %v2144_v23  ;;  %v2166_v47 = vrot.slane %v2164_v26, 5 }
 0x1a5   : > { %v1656_v41 = vrot.slane %v1654_v38, 4  ;;  %v1659_v43 = vrot.slane %v1657_v39, 5  ;;  %1538 = vst.msk [vmem:[#allocation4 + $0x8c] sm:$0xf] %vm1312_vm13, %v1530_v53  ;;  %v1714_v2 = vld [vmem:[#allocation2 + $0x38] sm:$0xe]  ;;  %v2010_v38 = vsel %vm4144_vm1, %v3282_v46, %v2009_v62 }
 0x1a6   : > { %v1665_v58 = vrot.slane %v1663_v44, 5  ;;  %v1715_v12 = vld [vmem:[#allocation2 + $0x3c] sm:$0x1]  ;;  %v3281_v1 = vrot.slane %v1714_v2, 9  ;;  %v2256_v28 = vld [vmem:[#allocation2 + $0x30] sm:$0xe] }
 0x1a7   : > { %v1660_v52 = vor.u32 %v1659_v43, %v1656_v41  ;;  %v1765_v22 = vrot.slane %v1715_v12, 5  ;;  %v2091_v56 = vld [vmem:[#allocation2 + $0x1c] sm:$0x1]  ;;  %v2257_v29 = vld [vmem:[#allocation2 + $0x34] sm:$0x1]  ;;  %v3294_v33 = vrot.slane %v2256_v28, 9  ;;  %v2125_v43 = vor.u32 %v2124_v18, %v2121_v17 }
 0x1a8   : > { %v2094_v31 = vld [vmem:[#allocation2 + $0x28] sm:$0xf]  ;;  %v2298_v35 = vrot.slane %v2257_v29, 5  ;;  %v1986_v41 = vld [vmem:[#allocation2 + $0x34] sm:$0x1]  ;;  %v2163_v44 = vrot.slane %v2161_v19, 4 }
 0x1a9   : > { %v1661_v57 = vrot.slane %v1660_v52, 4  ;;  %v1766_v32 = vsel %vm4144_vm1, %v3281_v1, %v1765_v22  ;;  %v3308_v49 = vld [vmem:[%s3741_s29 + $0xd8] sm:$0xf]  ;;  %v2128_v52 = vshll.u32 %v2091_v56, 16  ;;  %v2147_v53 = vshrl.u32 %v2094_v31, 16 }
 0x1aa   : > { %v1845_v6 = vld [vmem:[#allocation2 + $0x40] sm:$0xf]  ;;  %1782 = vst.msk [vmem:[#allocation4 + $0x90] sm:$0xf] %vm1312_vm13, %v1766_v32  ;;  %v2299_v45 = vsel %vm4144_vm1, %v3294_v33, %v2298_v35  ;;  %v2150_v54 = vshll.u32 %v2094_v31, 16  ;;  %v2029_v59 = vrot.slane %v1986_v41, 5 }
 0x1ab   : > { %v1666_v4 = vsel %vm3754_vm2, %v1661_v57, %v1665_v58  ;;  %v1846_v8 = vld [vmem:[#allocation2 + $0x44] sm:$0x1]  ;;  %v1946_v9 = vshrl.u32 %v1845_v6, 16  ;;  %v1949_v10 = vshll.u32 %v1845_v6, 16  ;;  %v2078_v40 = vld [vmem:[#allocation2 + $0x40] sm:$0xf]  ;;  %v3309_v57 = vor.u32 %v3651_v50, %v3308_v49 }
 0x1ac   : > { %1805 = vrot.lane.b32.xlu0 %v1786_v0, %s3685_s9  ;;  %2045 = vrot.lane.b32.xlu2 %v2022_v3, %s3685_s9  ;;  %v1955_v16 = vshll.u32 %v1846_v8, 16  ;;  %2086 = vst.msk [vmem:[#allocation4 + $0x84] sm:$0xf] %vm1312_vm13, %v2078_v40  ;;  %v3287_v58 = vrot.slane %v1985_v30, 9  ;;  %v2126_v60 = vrot.slane %v2125_v43, 4  ;;  %v2167_v3 = vor.u32 %v2166_v47, %v2163_v44 }
 0x1ad   : > { %1681 = vrot.lane.b32.xlu1 %v1666_v4, %s3685_s9  ;;  %v1948_v14 = vrot.slane %v1946_v9, 4  ;;  %v1951_v15 = vrot.slane %v1949_v10, 5  ;;  %2324 = vst.msk [vmem:[#allocation4 + $0x60] sm:$0xf] %vm1312_vm13, %v2299_v45  ;;  %v2097_v63 = vld [vmem:[#allocation2 + $0x34] sm:$0x1]  ;;  %3330 = vmatmul.msk.bf16.vlgmr.msrb.gmra.mxu3 %vm1204_vm7, %v3309_v57 }
 0x1ae   : > { %v1672_v13 = vpop.permute.xlu2 %1671  ;;  %v1957_v24 = vrot.slane %v1955_v16, 5  ;;  %v1979_v0 = vld [vmem:[#allocation2 + $0x18] sm:$0xe]  ;;  %v2130_v4 = vrot.slane %v2128_v52, 5  ;;  %v1980_v34 = vld [vmem:[#allocation2 + $0x1c] sm:$0x1]  ;;  %v2030_v5 = vsel %vm4144_vm1, %v3287_v58, %v2029_v59 }
 0x1af   : > { %1694 = vst.msk [vmem:[#allocation4 + $0x28] sm:$0xf] %vm1691_vm3, %v1672_v13  ;;  %v1952_v27 = vor.u32 %v1951_v15, %v1948_v14  ;;  %v2149_v46 = vrot.slane %v2147_v53, 4  ;;  %v2152_v55 = vrot.slane %v2150_v54, 5  ;;  %v1788_v61 = vld [vmem:[#allocation2 + $0x30] sm:$0xf] }
 0x1b0   : > { %v2170_v6 = vshll.u32 %v2097_v63, 16  ;;  %v3284_v7 = vrot.slane %v1979_v0, 9  ;;  %v2131_v42 = vsel %vm3754_vm2, %v2126_v60, %v2130_v4  ;;  %v4366_v8 = vld [vmem:[#allocation2 + $0x2c] sm:$0x1]  ;;  %v2077_v9 = vld [vmem:[#allocation2 + $0x38] sm:$0xf] }
 0x1b1   : > { %v1953_v39 = vrot.slane %v1952_v27, 4  ;;  %v1843_v10 = vld [vmem:[#allocation2 + $0x38] sm:$0xf]  ;;  %v1844_v11 = vld [vmem:[#allocation2 + $0x3c] sm:$0x1]  ;;  %v2168_v62 = vrot.slane %v2167_v3, 4  ;;  %v2153_v16 = vor.u32 %v2152_v55, %v2149_v46 }
 0x1b2   : > { %v2017_v2 = vrot.slane %v1980_v34, 5  ;;  %2085 = vst.msk [vmem:[#allocation4 + $0x70] sm:$0xf] %vm1312_vm13, %v2077_v9  ;;  %v1932_v12 = vshrl.u32 %v1843_v10, 16  ;;  %v1935_v13 = vshll.u32 %v1843_v10, 16  ;;  %v1941_v22 = vshll.u32 %v1844_v11, 16 }
 0x1b3   : > { %v1958_v51 = vsel %vm3754_vm2, %v1953_v39, %v1957_v24  ;;  %v1989_v15 = vld [vmem:[#allocation2 + $0x40] sm:$0xe]  ;;  %v2258_v1 = vld [vmem:[#allocation2 + $0x38] sm:$0xe]  ;;  %v2259_v17 = vld [vmem:[#allocation2 + $0x3c] sm:$0x1] }
 0x1b4   : > { %2220 = vrot.lane.b32.xlu0 %v2145_v36, %s3685_s9  ;;  %1807 = vrot.lane.b32.xlu2 %v1787_v25, %s3685_s9  ;;  %1974 = vst.msk [vmem:[#allocation4 + $0x94] sm:$0xf] %vm1312_vm13, %v1958_v51  ;;  %v1934_v18 = vrot.slane %v1932_v12, 4  ;;  %v1937_v19 = vrot.slane %v1935_v13, 5  ;;  %v3295_v23 = vrot.slane %v2258_v1, 9  ;;  %v2172_v25 = vrot.slane %v2170_v6, 5 }
 0x1b5   : > { %2039 = vrot.lane.b32.xlu1 %v2010_v38, %s3685_s9  ;;  %v2100_v56 = vld [vmem:[#allocation2 + $0x40] sm:$0xf]  ;;  %v1349_v26 = vld [vmem:[#allocation2 + $0x48] sm:$0x1]  ;;  %v2302_v27 = vrot.slane %v2259_v17, 5  ;;  %v2156_v29 = vshll.u32 %v4366_v8, 16  ;;  %v2018_v37 = vsel %vm4144_vm1, %v3284_v7, %v2017_v2 }
 0x1b6   : > { %v1789_v28 = vld [vmem:[#allocation2 + $0x38] sm:$0xf]  ;;  %v1350_v30 = vsel %vm4077_vm11, 0, %v1349_v26  ;;  %v1938_v31 = vor.u32 %v1937_v19, %v1934_v18  ;;  %v2173_v32 = vsel %vm3754_vm2, %v2168_v62, %v2172_v25  ;;  %v3336_v33 = vld [vmem:[#allocation4] sm:$0xf]  ;;  %v3289_v36 = vrot.slane %v1989_v15, 9 }
 0x1b7   : > { %v1990_v35 = vld [vmem:[#allocation2 + $0x44] sm:$0x1]  ;;  %v2154_v38 = vrot.slane %v2153_v16, 4  ;;  %1351 = vst [vmem:[#allocation2 + $0x48] sm:$0x1] %v1350_v30  ;;  %v2303_v39 = vsel %vm4144_vm1, %v3295_v23, %v2302_v27  ;;  %v2189_v24 = vshrl.u32 %v2100_v56, 16 }
 0x1b8   : > { %v2192_v40 = vshll.u32 %v2100_v56, 16  ;;  %v1939_v41 = vrot.slane %v1938_v31, 4  ;;  %v1943_v43 = vrot.slane %v1941_v22, 5  ;;  %2325 = vst.msk [vmem:[#allocation4 + $0x74] sm:$0xf] %vm1312_vm13, %v2303_v39  ;;  %v2037_v54 = vrot.slane %v1990_v35, 5 }
 0x1b9   : > { %v2260_v44 = vld [vmem:[#allocation2 + $0x40] sm:$0xe]  ;;  %v2261_v45 = vld [vmem:[#allocation2 + $0x44] sm:$0x1]  ;;  %v2262_v47 = vld [vmem:[#allocation2 + $0x48] sm:$0xe] }
 0x1ba   : > { %v1944_v48 = vsel %vm3754_vm2, %v1939_v41, %v1943_v43  ;;  %v2263_v49 = vld [vmem:[#allocation2 + $0x4c] sm:$0x1]  ;;  %v3296_v50 = vrot.slane %v2260_v44, 9  ;;  %v2306_v51 = vrot.slane %v2261_v45, 5  ;;  %v3297_v52 = vrot.slane %v2262_v47, 9  ;;  %v3630_v1 = vld [vmem:[%s4623_s3 + $0x78] sm:$0xff] }
 0x1bb   : > { %1973 = vst.msk [vmem:[#allocation4 + $0x80] sm:$0xf] %vm1312_vm13, %v1944_v48  ;;  %v2310_v57 = vrot.slane %v2263_v49, 5  ;;  %v2191_v59 = vrot.slane %v2189_v24, 4  ;;  %v2194_v60 = vrot.slane %v2192_v40, 5  ;;  %v2158_v55 = vrot.slane %v2156_v29, 5  ;;  %2875 = vmatpush.bf16.msra.mxu3 %v3630_v1 }
 0x1bc   : > { %1809 = vrot.lane.b32.xlu0 %v1788_v61, %s3685_s9  ;;  %2049 = vrot.lane.b32.xlu2 %v2030_v5, %s3685_s9  ;;  %v2307_v63 = vsel %vm4144_vm1, %v3296_v50, %v2306_v51  ;;  %v3312_v0 = vld [vmem:[%s3741_s29 + $0xe8] sm:$0xf]  ;;  %v3652_v3 = vld [vmem:[%s3741_s29 + $0xec] sm:$0xf0]  ;;  %v2098_v34 = vld [vmem:[#allocation2 + $0x38] sm:$0xf]  ;;  %v2038_v6 = vsel %vm4144_vm1, %v3289_v36, %v2037_v54 }
 0x1bd   : > { %2218 = vrot.lane.b32.xlu1 %v2131_v42, %s3685_s9  ;;  %v2311_v4 = vsel %vm4144_vm1, %v3297_v52, %v2310_v57  ;;  %2326 = vst.msk [vmem:[#allocation4 + $0x88] sm:$0xf] %vm1312_vm13, %v2307_v63  ;;  %v3313_v46 = vor.u32 %v3652_v3, %v3312_v0  ;;  %v2101_v61 = vld [vmem:[#allocation2 + $0x44] sm:$0x1]  ;;  %v1790_v5 = vld [vmem:[#allocation2 + $0x40] sm:$0xf]  ;;  %v2195_v7 = vor.u32 %v2194_v60, %v2191_v59 }
 0x1be   : > { %v1670_v14 = vpop.permute.xlu1 %1669  ;;  %2327 = vst.msk [vmem:[#allocation4 + $0x9c] sm:$0xf] %vm1312_vm13, %v2311_v4  ;;  %v2159_v42 = vsel %vm3754_vm2, %v2154_v38, %v2158_v55  ;;  %v1983_v8 = vld [vmem:[#allocation2 + $0x28] sm:$0xe]  ;;  %v1984_v9 = vld [vmem:[#allocation2 + $0x2c] sm:$0x1] }
 0x1bf   : > { %1693 = vst.msk [vmem:[#allocation4 + $0x14] sm:$0xf] %vm1691_vm3, %v1670_v14  ;;  %3331 = vmatmul.msk.bf16.gmra.mxu3 %vm1204_vm7, %v3313_v46  ;;  %v2175_v10 = vshrl.u32 %v2098_v34, 16  ;;  %v2178_v11 = vshll.u32 %v2098_v34, 16  ;;  %v2198_v62 = vshll.u32 %v2101_v61, 16  ;;  %v2196_v15 = vrot.slane %v2195_v7, 4 }
 0x1c0   : > { %v1700_v2 = vld [vmem:[#allocation2] sm:$0xe]  ;;  %v1701_v12 = vld [vmem:[#allocation2 + $0x4] sm:$0x1]  ;;  %v3286_v16 = vrot.slane %v1983_v8, 9  ;;  %v2025_v17 = vrot.slane %v1984_v9, 5 }
 0x1c1   : > { %v3274_v13 = vrot.slane %v1700_v2, 9  ;;  %v1737_v14 = vrot.slane %v1701_v12, 5  ;;  %v2177_v18 = vrot.slane %v2175_v10, 4  ;;  %v2180_v19 = vrot.slane %v2178_v11, 5  ;;  %v2099_v56 = vld [vmem:[#allocation2 + $0x3c] sm:$0x1] }
 0x1c2   : > { %v2200_v23 = vrot.slane %v2198_v62, 5  ;;  %v2026_v26 = vsel %vm4144_vm1, %v3286_v16, %v2025_v17  ;;  %v2102_v29 = vld [vmem:[#allocation2 + $0x48] sm:$0xf]  ;;  %v3316_v30 = vld [vmem:[%s3741_s29 + $0xf8] sm:$0xf]  ;;  %v3629_v24 = vld [vmem:[%s4623_s3 + $0x70] sm:$0xff] }
 0x1c3   : > { %v1738_v22 = vsel %vm4144_vm1, %v3274_v13, %v1737_v14  ;;  %v2181_v27 = vor.u32 %v2180_v19, %v2177_v18  ;;  %v3653_v31 = vld [vmem:[%s3741_s29 + $0xfc] sm:$0xf0]  ;;  %v2203_v36 = vshrl.u32 %v2102_v29, 16  ;;  %v2206_v38 = vshll.u32 %v2102_v29, 16  ;;  %v3650_v39 = vld [vmem:[%s4623_s3 + $0x118] sm:$0xff]  ;;  %2876 = vmatpush.bf16.msra.mxu3 %v3629_v24  ;;  %v3628_v50 = vld [vmem:[%s4623_s3 + $0x68] sm:$0xff] }
 0x1c4   : > { %2224 = vrot.lane.b32.xlu0 %v2173_v32, %s3685_s9  ;;  %1811 = vrot.lane.b32.xlu2 %v1789_v28, %s3685_s9  ;;  %1775 = vst.msk [vmem:[#allocation4 + $0x4] sm:$0xf] %vm1312_vm13, %v1738_v22  ;;  %v2201_v25 = vsel %vm3754_vm2, %v2196_v15, %v2200_v23  ;;  %v2184_v28 = vshll.u32 %v2099_v56, 16  ;;  %v3638_v40 = vld [vmem:[%s4623_s3 + $0xb8] sm:$0xff]  ;;  %v2103_v45 = vld [vmem:[#allocation2 + $0x4c] sm:$0x1] }
 0x1c5   : > { %2043 = vrot.lane.b32.xlu1 %v2018_v37, %s3685_s9  ;;  %v2182_v32 = vrot.slane %v2181_v27, 4  ;;  %v3646_v41 = vld [vmem:[%s4623_s3 + $0xf8] sm:$0xff]  ;;  %2966 = vmatpush.bf16.msra.mxu2 %v3650_v39  ;;  %v2205_v47 = vrot.slane %v2203_v36, 4  ;;  %v2208_v48 = vrot.slane %v2206_v38, 5  ;;  %v3637_v51 = vld [vmem:[%s4623_s3 + $0xb0] sm:$0xff]  ;;  %v3627_v57 = vld [vmem:[%s4623_s3 + $0x60] sm:$0xff] }
 0x1c6   : > { %v3597_v53 = vld [vmem:[#allocation4 + $0x10] sm:$0xf0]  ;;  %v2186_v35 = vrot.slane %v2184_v28, 5  ;;  %v1987_v37 = vld [vmem:[#allocation2 + $0x38] sm:$0xe]  ;;  %2904 = vmatpush.bf16.msrb.mxu0 %v3638_v40  ;;  %2933 = vmatpush.bf16.msrb.mxu1 %v3646_v41  ;;  %v3645_v52 = vld [vmem:[%s4623_s3 + $0xf0] sm:$0xff] }
 0x1c7   : > { %v3337_v58 = vor.u32 %v3597_v53, %v3336_v33  ;;  %v3317_v33 = vor.u32 %v3653_v31, %v3316_v30  ;;  %v1988_v44 = vld [vmem:[#allocation2 + $0x3c] sm:$0x1]  ;;  %v3288_v53 = vrot.slane %v1987_v37, 9  ;;  %2877 = vmatpush.bf16.msra.mxu3 %v3628_v50  ;;  %v2212_v59 = vshll.u32 %v2103_v45, 16  ;;  %v3356_v34 = vld [vmem:[#allocation4 + $0x28] sm:$0xf] }
 0x1c8   : > { %v2187_v43 = vsel %vm3754_vm2, %v2182_v32, %v2186_v35  ;;  %v2033_v54 = vrot.slane %v1988_v44, 5  ;;  %v3320_v61 = vld [vmem:[%s3741_s29 + $0x108] sm:$0xf]  ;;  %v3626_v7 = vld [vmem:[%s4623_s3 + $0x58] sm:$0xff]  ;;  %v3625_v10 = vld [vmem:[%s4623_s3 + $0x50] sm:$0xff] }
 0x1c9   : > { %2854 = vmatmul.bf16.vlgmr.msrb.gmra.mxu2 %v3337_v58  ;;  %v2209_v58 = vor.u32 %v2208_v48, %v2205_v47  ;;  %v2214_v4 = vrot.slane %v2212_v59, 5  ;;  %v3644_v9 = vld [vmem:[%s4623_s3 + $0xe8] sm:$0xff]  ;;  %v3635_v62 = vld [vmem:[%s4623_s3 + $0xa0] sm:$0xff]  ;;  %v3634_v17 = vld [vmem:[%s4623_s3 + $0x98] sm:$0xff] }
 0x1ca   : > { %2905 = vmatpush.bf16.msrb.mxu0 %v3637_v51  ;;  %2934 = vmatpush.bf16.msrb.mxu1 %v3645_v52  ;;  %v2034_v60 = vsel %vm4144_vm1, %v3288_v53, %v2033_v54  ;;  %v3643_v2 = vld [vmem:[%s4623_s3 + $0xe0] sm:$0xff]  ;;  %v3648_v1 = vld [vmem:[%s4623_s3 + $0x108] sm:$0xff]  ;;  %v3642_v18 = vld [vmem:[%s4623_s3 + $0xd8] sm:$0xff] }
 0x1cb   : > { %2878 = vmatpush.bf16.msra.mxu3 %v3627_v57  ;;  %v2210_v3 = vrot.slane %v2209_v58, 4  ;;  %2967 = vmatpush.bf16.msra.mxu2 %v3649_v21  ;;  %v3623_v12 = vld [vmem:[%s4623_s3 + $0x40] sm:$0xff]  ;;  %v3633_v22 = vld [vmem:[%s4623_s3 + $0x90] sm:$0xff]  ;;  %v3632_v27 = vld [vmem:[%s4623_s3 + $0x88] sm:$0xff] }
 0x1cc   : > { %1813 = vrot.lane.b32.xlu0 %v1790_v5, %s3685_s9  ;;  %2053 = vrot.lane.b32.xlu2 %v2038_v6, %s3685_s9  ;;  %v3654_v5 = vld [vmem:[%s3741_s29 + $0x10c] sm:$0xf0]  ;;  %v3640_v28 = vld [vmem:[%s4623_s3 + $0xc8] sm:$0xff] }
 0x1cd   : > { %2222 = vrot.lane.b32.xlu1 %v2159_v42, %s3685_s9  ;;  %v3321_v6 = vor.u32 %v3654_v5, %v3320_v61  ;;  %v3636_v42 = vld [vmem:[%s4623_s3 + $0xa8] sm:$0xff]  ;;  %v2215_v8 = vsel %vm3754_vm2, %v2210_v3, %v2214_v4  ;;  %v3641_v23 = vld [vmem:[%s4623_s3 + $0xd0] sm:$0xff]  ;;  %v3631_v29 = vld [vmem:[%s4623_s3 + $0x80] sm:$0xff]  ;;  %vm2833_vm2 = vcmask 523264  }
 0x1ce   : > { %2906 = vmatpush.bf16.msrb.mxu0 %v3636_v42  ;;  %2935 = vmatpush.bf16.msrb.mxu1 %v3644_v9  ;;  %v3639_v32 = vld [vmem:[%s4623_s3 + $0xc0] sm:$0xff] }
 0x1cf   : > { %3332 = vmatmul.msk.bf16.gmra.mxu3 %vm1204_vm7, %v3317_v33  ;;  %2968 = vmatpush.bf16.msra.mxu2 %v3648_v1  ;;  %v3352_v61 = vld [vmem:[#allocation4 + $0x10] sm:$0xf] }
 0x1d0   : > { %2879 = vmatpush.bf16.msra.mxu3 %v3626_v7 }
 0x1d2   : > { %2907 = vmatpush.bf16.msrb.mxu0 %v3635_v62  ;;  %2936 = vmatpush.bf16.msrb.mxu1 %v3643_v2  ;;  %v3604_v62 = vld [vmem:[#allocation4 + $0x48] sm:$0xf0] }
 0x1d4   : > { %2228 = vrot.lane.b32.xlu0 %v2201_v25, %s3685_s9  ;;  %2880 = vmatpush.bf16.msra.mxu3 %v3625_v10 }
 0x1d5   : > { %2047 = vrot.lane.b32.xlu1 %v2026_v26, %s3685_s9  ;;  %v3647_v26 = vld [vmem:[%s4623_s3 + $0x100] sm:$0xff] }
 0x1d6   : > { %2908 = vmatpush.bf16.msrb.mxu0 %v3634_v17  ;;  %2937 = vmatpush.bf16.msrb.mxu1 %v3642_v18 }
 0x1d7   : > { %2969 = vmatpush.bf16.msra.mxu2 %v3647_v26 }
 0x1d8   : > { %2881 = vmatpush.bf16.msra.mxu3 %v3624_v20 }
 0x1da   : > { %2909 = vmatpush.bf16.msrb.mxu0 %v3633_v22  ;;  %2938 = vmatpush.bf16.msrb.mxu1 %v3641_v23  ;;  %v3609_v23 = vld [vmem:[#allocation4 + $0x70] sm:$0xf0] }
 0x1dc   : > { %2882 = vmatpush.bf16.msra.mxu3 %v3623_v12 }
 0x1dd   : > { %2226 = vrot.lane.b32.xlu1 %v2187_v43, %s3685_s9 }
 0x1de   : > { %v1674_v49 = vpop.permute.xlu0 %1673  ;;  %2910 = vmatpush.bf16.msrb.mxu0 %v3632_v27  ;;  %2939 = vmatpush.bf16.msrb.mxu1 %v3640_v28  ;;  %v3392_v28 = vld [vmem:[#allocation4 + $0x60] sm:$0xf] }
 0x1df   : > { %1695 = vst.msk [vmem:[#allocation4 + $0x3c] sm:$0xf] %vm1691_vm3, %v1674_v49  ;;  %3333 = vmatmul.msk.bf16.gmra.mxu3 %vm1204_vm7, %v3321_v6  ;;  %v2079_v6 = vld [vmem:[#allocation2 + $0x48] sm:$0xf] }
 0x1e0   : > { %2087 = vst.msk [vmem:[#allocation4 + $0x98] sm:$0xf] %vm1312_vm13, %v2079_v6 }
 0x1e2   : > { %2911 = vmatpush.bf16.msrb.mxu0 %v3631_v29  ;;  %2940 = vmatpush.bf16.msrb.mxu1 %v3639_v32 }
 0x1e5   : > { %2051 = vrot.lane.b32.xlu1 %v2034_v60, %s3685_s9 }
 0x1e6   : > { %v1678_v63 = vpop.permute.xlu2 %1677  ;;  %v1676_v0 = vpop.permute.xlu1 %1675  ;;  %v3602_v46 = vld [vmem:[#allocation4 + $0x38] sm:$0xf0] }
 0x1e7   : > { %1697 = vst.msk [vmem:[#allocation4 + $0x64] sm:$0xf] %vm1691_vm3, %v1678_v63  ;;  %v3357_v55 = vor.u32 %v3602_v46, %v3356_v34 }
 0x1e8   : > { %1696 = vst.msk [vmem:[#allocation4 + $0x50] sm:$0xf] %vm1691_vm3, %v1676_v0  ;;  %v3599_v0 = vld [vmem:[#allocation4 + $0x20] sm:$0xf0] }
 0x1e9   : > { %2859 = vmatmul.bf16.gmra.mxu2 %v3357_v55  ;;  %v3353_v5 = vor.u32 %v3599_v0, %v3352_v61  ;;  %v4562_v0 = vld [vmem:[%s4624_s4] ss:$0 sm:$0xff] }
 0x1ea   : > { %v4570_v61 = vld [vmem:[%s4626_s6] ss:$0 sm:$0xff] }
 0x1ed   : > { %2230 = vrot.lane.b32.xlu1 %v2215_v8, %s3685_s9 }
 0x1ee   : > { %v1800_v11 = vpop.permute.xlu2 %1799  ;;  %v3607_v14 = vld [vmem:[#allocation4 + $0x60] sm:$0xf0] }
 0x1ef   : > { %1823 = vst.msk [vmem:[#allocation4 + $0x4] sm:$0xf] %vm1691_vm3, %v1800_v11  ;;  %v3376_v13 = vld [vmem:[#allocation4 + $0x50] sm:$0xf] }
 0x1f0   : > { %v3377_v16 = vor.u32 %v3607_v14, %v3376_v13 }
 0x1f6   : > { %v2042_v15 = vpop.permute.xlu2 %2041  ;;  %v3595_v36 = vld [vmem:[#allocation4 + $0x4] sm:$0xf] }
 0x1f7   : > { %2064 = vst.msk [vmem:[#allocation4 + $0x1c] sm:$0xf] %vm1691_vm3, %v2042_v15 }
 0x1f9   : > { %2864 = vmatmul.bf16.gmra.mxu2 %v3377_v16  ;;  %v3372_v16 = vld [vmem:[#allocation4 + $0x38] sm:$0xf] }
 0x1fa   : > { %v3373_v1 = vor.u32 %v3604_v62, %v3372_v16 }
 0x1fe   : > { %v1804_v19 = vpop.permute.xlu2 %1803  ;;  %v3598_v57 = vld [vmem:[#allocation4 + $0x18] sm:$0xf0] }
 0x1ff   : > { %1825 = vst.msk [vmem:[#allocation4 + $0x2c] sm:$0xf] %vm1691_vm3, %v1804_v19 }
 0x206   : > { %v1680_v25 = vpop.permute.xlu0 %1679  ;;  %v2046_v56 = vpop.permute.xlu2 %2045  ;;  %v3600_v44 = vld [vmem:[#allocation4 + $0x2c] sm:$0xf] }
 0x207   : > { %1698 = vst.msk [vmem:[#allocation4 + $0x78] sm:$0xf] %vm1691_vm3, %v1680_v25 }
 0x208   : > { %2066 = vst.msk [vmem:[#allocation4 + $0x44] sm:$0xf] %vm1691_vm3, %v2046_v56 }
 0x20e   : > { %v1802_v30 = vpop.permute.xlu0 %1801  ;;  %v1808_v31 = vpop.permute.xlu2 %1807  ;;  %v3396_v49 = vld [vmem:[#allocation4 + $0x78] sm:$0xf] }
 0x20f   : > { %1824 = vst.msk [vmem:[#allocation4 + $0x18] sm:$0xf] %vm1691_vm3, %v1802_v30  ;;  %v3603_v8 = vld [vmem:[#allocation4 + $0x40] sm:$0xf0]  ;;  %v3393_v30 = vor.u32 %v3609_v23, %v3392_v28 }
 0x210   : > { %1827 = vst.msk [vmem:[#allocation4 + $0x54] sm:$0xf] %vm1691_vm3, %v1808_v31 }
 0x216   : > { %v2217_v33 = vpop.permute.xlu0 %2216  ;;  %v2050_v35 = vpop.permute.xlu2 %2049  ;;  %v3338_v38 = vld [vmem:[#allocation4 + $0x14] sm:$0xf0] }
 0x217   : > { %2240 = vst.msk [vmem:[#allocation4 + $0xc] sm:$0xf] %vm1691_vm3, %v2217_v33  ;;  %v3341_v39 = vor.u32 %v3595_v36, %v3338_v38  ;;  %v3605_v60 = vld [vmem:[#allocation4 + $0x54] sm:$0xf]  ;;  %v3412_v38 = vld [vmem:[#allocation4 + $0x88] sm:$0xf] }
 0x218   : > { %2068 = vst.msk [vmem:[#allocation4 + $0x6c] sm:$0xf] %vm1691_vm3, %v2050_v35 }
 0x219   : > { %2883 = vmatmul.bf16.vlgmr.msra.gmra.mxu3 %v3341_v39  ;;  %v3614_v39 = vld [vmem:[#allocation4 + $0x98] sm:$0xf0] }
 0x21e   : > { %v1806_v24 = vpop.permute.xlu0 %1805  ;;  %v1812_v40 = vpop.permute.xlu2 %1811  ;;  %v3596_v34 = vld [vmem:[#allocation4 + $0xc] sm:$0xf] }
 0x21f   : > { %1826 = vst.msk [vmem:[#allocation4 + $0x40] sm:$0xf] %vm1691_vm3, %v1806_v24  ;;  %v1682_v41 = vpop.permute.xlu1 %1681  ;;  %v3608_v19 = vld [vmem:[#allocation4 + $0x68] sm:$0xf0] }
 0x220   : > { %1829 = vst.msk [vmem:[#allocation4 + $0x7c] sm:$0xf] %vm1691_vm3, %v1812_v40 }
 0x221   : > { %1699 = vst.msk [vmem:[#allocation4 + $0x8c] sm:$0xf] %vm1691_vm3, %v1682_v41 }
 0x226   : > { %v2221_v43 = vpop.permute.xlu0 %2220  ;;  %v2054_v37 = vpop.permute.xlu2 %2053  ;;  %v3358_v45 = vld [vmem:[#allocation4 + $0x3c] sm:$0xf0] }
 0x227   : > { %2242 = vst.msk [vmem:[#allocation4 + $0x34] sm:$0xf] %vm1691_vm3, %v2221_v43  ;;  %v2040_v47 = vpop.permute.xlu1 %2039  ;;  %v3361_v48 = vor.u32 %v3600_v44, %v3358_v45  ;;  %v3610_v11 = vld [vmem:[#allocation4 + $0x7c] sm:$0xf]  ;;  %v3413_v43 = vor.u32 %v3614_v39, %v3412_v38 }
 0x228   : > { %2070 = vst.msk [vmem:[#allocation4 + $0x94] sm:$0xf] %vm1691_vm3, %v2054_v37  ;;  %v3612_v50 = vld [vmem:[#allocation4 + $0x88] sm:$0xf0] }
 0x229   : > { %2063 = vst.msk [vmem:[#allocation4 + $0x8] sm:$0xf] %vm1691_vm3, %v2040_v47  ;;  %v3397_v51 = vor.u32 %v3612_v50, %v3396_v49  ;;  %2888 = vmatmul.bf16.gmra.mxu3 %v3361_v48 }
 0x22b   : > { %2869 = vmatmul.bf16.gmra.mxu2 %v3397_v51 }
 0x22e   : > { %v1810_v52 = vpop.permute.xlu0 %1809  ;;  %v3601_v13 = vld [vmem:[#allocation4 + $0x34] sm:$0xf] }
 0x22f   : > { %1828 = vst.msk [vmem:[#allocation4 + $0x68] sm:$0xf] %vm1691_vm3, %v1810_v52  ;;  %v2219_v53 = vpop.permute.xlu1 %2218  ;;  %v3613_v33 = vld [vmem:[#allocation4 + $0x90] sm:$0xf0] }
 0x230   : > { %2241 = vst.msk [vmem:[#allocation4 + $0x20] sm:$0xf] %vm1691_vm3, %v2219_v53  ;;  %v3344_v54 = vld [vmem:[#allocation4 + $0x8] sm:$0xf]  ;;  %v2493_v29 = vpop.f32.mrf.mxu3 }
 0x231   : > { %v3345_v58 = vor.u32 %v3598_v57, %v3344_v54 }
 0x233   : > { %2912 = vmatmul.bf16.vlgmr.msrb.gmra.mxu0 %v3345_v58 }
 0x236   : > { %v2225_v59 = vpop.permute.xlu0 %2224  ;;  %v3378_v63 = vld [vmem:[#allocation4 + $0x64] sm:$0xf0] }
 0x237   : > { %2244 = vst.msk [vmem:[#allocation4 + $0x5c] sm:$0xf] %vm1691_vm3, %v2225_v59  ;;  %v2044_v3 = vpop.permute.xlu1 %2043  ;;  %v3381_v4 = vor.u32 %v3605_v60, %v3378_v63  ;;  %v3346_v46 = vld [vmem:[#allocation4 + $0x1c] sm:$0xf0] }
 0x238   : > { %2065 = vst.msk [vmem:[#allocation4 + $0x30] sm:$0xf] %vm1691_vm3, %v2044_v3  ;;  %v3349_v55 = vor.u32 %v3596_v34, %v3346_v46  ;;  %v2495_v36 = vpop.f32.mrf.mxu3 }
 0x239   : > { %2893 = vmatmul.bf16.gmra.mxu3 %v3381_v4  ;;  %v2496_v16 = vadd.f32 %v4570_v61, %v2495_v36 }
 0x23a   : > { %2941 = vmatmul.bf16.vlgmr.msrb.gmra.mxu1 %v3349_v55 }
 0x23b   : > { %3558 = vmatmul.msk.bf16.vlgmr.msra.gmra.mxu2 %vm2833_vm2, %v3353_v5 }
 0x23e   : > { %v1814_v21 = vpop.permute.xlu0 %1813  ;;  %v3606_v56 = vld [vmem:[#allocation4 + $0x5c] sm:$0xf] }
 0x23f   : > { %1830 = vst.msk [vmem:[#allocation4 + $0x90] sm:$0xf] %vm1691_vm3, %v1814_v21  ;;  %v2223_v7 = vpop.permute.xlu1 %2222  ;;  %v3364_v42 = vld [vmem:[#allocation4 + $0x30] sm:$0xf] }
 0x240   : > { %2243 = vst.msk [vmem:[#allocation4 + $0x48] sm:$0xf] %vm1691_vm3, %v2223_v7  ;;  %v3365_v9 = vor.u32 %v3603_v8, %v3364_v42  ;;  %v2494_v8 = vadd.f32 %v4570_v61, %v2493_v29 }
 0x242   : > { %v2498_v37 = vpop.f32.mrf.mxu3 }
 0x243   : > { %2917 = vmatmul.bf16.gmra.mxu0 %v3365_v9  ;;  %v2499_v28 = vadd.f32 %v4570_v61, %v2498_v37 }
 0x246   : > { %v2229_v10 = vpop.permute.xlu0 %2228  ;;  %v3398_v20 = vld [vmem:[#allocation4 + $0x8c] sm:$0xf0] }
 0x247   : > { %2246 = vst.msk [vmem:[#allocation4 + $0x84] sm:$0xf] %vm1691_vm3, %v2229_v10  ;;  %v2048_v2 = vpop.permute.xlu1 %2047  ;;  %v3401_v12 = vor.u32 %v3610_v11, %v3398_v20  ;;  %v3366_v14 = vld [vmem:[#allocation4 + $0x44] sm:$0xf0] }
 0x248   : > { %2067 = vst.msk [vmem:[#allocation4 + $0x58] sm:$0xf] %vm1691_vm3, %v2048_v2  ;;  %v3369_v15 = vor.u32 %v3601_v13, %v3366_v14 }
 0x249   : > { %2898 = vmatmul.bf16.gmra.mxu3 %v3401_v12 }
 0x24a   : > { %2946 = vmatmul.bf16.gmra.mxu1 %v3369_v15  ;;  %v4545_v45 = vpop.f32.mrf.mxu3 }
 0x24b   : > { %3559 = vmatmul.msk.bf16.gmra.mxu2 %vm2833_vm2, %v3373_v1 }
 0x24c   : > { %v2855_v44 = vpop.f32.mrf.mxu2 }
 0x24d   : > { %v2856_v4 = vadd.f32 %v4562_v0, %v2855_v44 }
 0x24e   : > { %v3611_v24 = vld [vmem:[#allocation4 + $0x84] sm:$0xf] }
 0x24f   : > { %v2227_v17 = vpop.permute.xlu1 %2226  ;;  %v3384_v18 = vld [vmem:[#allocation4 + $0x58] sm:$0xf] }
 0x250   : > { %2245 = vst.msk [vmem:[#allocation4 + $0x70] sm:$0xf] %vm1691_vm3, %v2227_v17  ;;  %v3385_v22 = vor.u32 %v3608_v19, %v3384_v18 }
 0x252   : > { %v4547_v48 = vpop.f32.mrf.mxu3 }
 0x253   : > { %2922 = vmatmul.bf16.gmra.mxu0 %v3385_v22 }
 0x254   : > { %v2857_v47 = vpop.f32.mrf.mxu2 }
 0x255   : > { %v2858_v42 = vadd.f32 %v4562_v0, %v2857_v47 }
 0x257   : > { %v2052_v25 = vpop.permute.xlu1 %2051  ;;  %v3386_v26 = vld [vmem:[#allocation4 + $0x6c] sm:$0xf0] }
 0x258   : > { %2069 = vst.msk [vmem:[#allocation4 + $0x80] sm:$0xf] %vm1691_vm3, %v2052_v25  ;;  %v3389_v27 = vor.u32 %v3606_v56, %v3386_v26 }
 0x25a   : > { %2951 = vmatmul.bf16.gmra.mxu1 %v3389_v27  ;;  %v4549_v50 = vpop.f32.mrf.mxu3 }
 0x25b   : > { %3560 = vmatmul.msk.bf16.gmra.mxu2 %vm2833_vm2, %v3393_v30 }
 0x25f   : > { %v2231_v31 = vpop.permute.xlu1 %2230  ;;  %v3404_v32 = vld [vmem:[#allocation4 + $0x80] sm:$0xf] }
 0x260   : > { %2247 = vst.msk [vmem:[#allocation4 + $0x98] sm:$0xf] %vm1691_vm3, %v2231_v31  ;;  %v3405_v35 = vor.u32 %v3613_v33, %v3404_v32 }
 0x262   : > { %v4551_v52 = vpop.f32.mrf.mxu3 }
 0x263   : > { %2927 = vmatmul.bf16.gmra.mxu0 %v3405_v35 }
 0x267   : > { %v3406_v40 = vld [vmem:[#allocation4 + $0x94] sm:$0xf0] }
 0x268   : > { %v3409_v41 = vor.u32 %v3611_v24, %v3406_v40 }
 0x26a   : > { %2956 = vmatmul.bf16.gmra.mxu1 %v3409_v41  ;;  %v4553_v54 = vpop.f32.mrf.mxu3  ;;  %v2501_v41 = vadd.f32 %v4570_v61, %v4545_v45 }
 0x26b   : > { %3561 = vmatmul.msk.bf16.gmra.mxu2 %vm2833_vm2, %v3413_v43 }
 0x26c   : > { %v2860_v49 = vpop.f32.mrf.mxu2 }
 0x26d   : > { %v2861_v1 = vadd.f32 %v4562_v0, %v2860_v49 }
 0x274   : > { %v2862_v51 = vpop.f32.mrf.mxu2 }
 0x275   : > { %v2863_v29 = vadd.f32 %v4562_v0, %v2862_v51 }
 0x27c   : > { %v2865_v53 = vpop.f32.mrf.mxu2 }
 0x27d   : > { %v2866_v43 = vadd.f32 %v4562_v0, %v2865_v53 }
 0x284   : > { %v4555_v57 = vpop.f32.mrf.mxu2 }
 0x285   : > { %v2868_v45 = vadd.f32 %v4562_v0, %v4555_v57 }
 0x29c   : > { %v2884_v58 = vpop.f32.mrf.mxu3 }
 0x29d   : > { %v2885_v55 = vadd.f32 %v2884_v58, %v2856_v4 }
 0x2a4   : > { %v2886_v63 = vpop.f32.mrf.mxu3 }
 0x2a5   : > { %v2887_v20 = vadd.f32 %v2886_v63, %v2858_v42 }
 0x2ac   : > { %v2889_v6 = vpop.f32.mrf.mxu3 }
 0x2ad   : > { %v2890_v22 = vadd.f32 %v2889_v6, %v2861_v1  ;;  %v2509_v1 = vadd.f32 %v4570_v61, %v4551_v52 }
 0x2ae   : > { %v4557_v59 = vpop.f32.mrf.mxu2 }
 0x2b0   : > { %v2913_v60 = vpop.f32.mrf.mxu0 }
 0x2b1   : > { %v2914_v5 = vadd.f32 %v2913_v60, %v2885_v55 }
 0x2b4   : > { %v2891_v14 = vpop.f32.mrf.mxu3 }
 0x2b5   : > { %v2892_v33 = vadd.f32 %v2891_v14, %v2863_v29 }
 0x2b6   : > { %v4564_v3 = vpop.f32.mrf.mxu2 }
 0x2b7   : > { %v2942_v34 = vpop.f32.mrf.mxu1 }
 0x2b8   : > { %v2915_v46 = vpop.f32.mrf.mxu0  ;;  %v2943_v21 = vadd.f32 %v2942_v34, %v2914_v5 }
 0x2b9   : > { %v2916_v2 = vadd.f32 %v2915_v46, %v2887_v20  ;;  %v2504_v46 = vadd.f32 %v4570_v61, %v4547_v48  ;;  %v2871_v48 = vadd.f32 %v4562_v0, %v4557_v59 }
 0x2bc   : > { %v2894_v32 = vpop.f32.mrf.mxu3 }
 0x2bd   : > { %v2895_v47 = vadd.f32 %v2894_v32, %v2866_v43 }
 0x2be   : > { %v2971_v7 = vpop.f32.mrf.mxu2 }
 0x2bf   : > { %v2972_v9 = vadd.f32 %v2971_v7, %v2943_v21  ;;  %v2944_v10 = vpop.f32.mrf.mxu1 }
 0x2c0   : > { %v2918_v11 = vpop.f32.mrf.mxu0  ;;  %v2945_v13 = vadd.f32 %v2944_v10, %v2916_v2 }
 0x2c1   : > { %v2991_v62 = vadd.f32 %v2972_v9, %v2494_v8  ;;  %v2919_v25 = vadd.f32 %v2918_v11, %v2890_v22  ;;  %v2506_v11 = vadd.f32 %v4570_v61, %v4549_v50  ;;  %v2873_v50 = vadd.f32 %v4562_v0, %v4564_v3 }
 0x2c3   : > { %v2999_v12 = vmax.f32 %v2991_v62, 0.0 }
 0x2c4   : > { %v2896_v51 = vpop.f32.mrf.mxu3 }
 0x2c5   : > { %3007 = vst.msk [vmem:[%s4578_s15] sm:$0xff] %vm2833_vm2, %v2999_v12  ;;  %v2897_v5 = vadd.f32 %v2896_v51, %v2868_v45 }
 0x2c6   : > { %v2973_v15 = vpop.f32.mrf.mxu2 }
 0x2c7   : > { %v2974_v17 = vadd.f32 %v2973_v15, %v2945_v13  ;;  %v2947_v18 = vpop.f32.mrf.mxu1 }
 0x2c8   : > { %v2920_v19 = vpop.f32.mrf.mxu0  ;;  %v2948_v26 = vadd.f32 %v2947_v18, %v2919_v25 }
 0x2c9   : > { %v2992_v23 = vadd.f32 %v2974_v17, %v2496_v16  ;;  %v2921_v38 = vadd.f32 %v2920_v19, %v2892_v33 }
 0x2cb   : > { %v3000_v56 = vmax.f32 %v2992_v23, 0.0 }
 0x2cc   : > { %v2899_v42 = vpop.f32.mrf.mxu3 }
 0x2cd   : > { %3008 = vst.msk [vmem:[%s4578_s15 + $0x8] sm:$0xff] %vm2833_vm2, %v3000_v56  ;;  %v2900_v62 = vadd.f32 %v2899_v42, %v2871_v48 }
 0x2ce   : > { %v2976_v27 = vpop.f32.mrf.mxu2 }
 0x2cf   : > { %v2977_v30 = vadd.f32 %v2976_v27, %v2948_v26  ;;  %v2949_v31 = vpop.f32.mrf.mxu1  ;;  %v2511_v27 = vadd.f32 %v4570_v61, %v4553_v54 }
 0x2d0   : > { %v2923_v36 = vpop.f32.mrf.mxu0  ;;  %v2950_v24 = vadd.f32 %v2949_v31, %v2921_v38 }
 0x2d1   : > { %v2993_v35 = vadd.f32 %v2977_v30, %v2499_v28  ;;  %v2924_v58 = vadd.f32 %v2923_v36, %v2895_v47 }
 0x2d3   : > { %v3001_v39 = vmax.f32 %v2993_v35, 0.0 }
 0x2d4   : > { %v2901_v15 = vpop.f32.mrf.mxu3 }
 0x2d5   : > { %3009 = vst.msk [vmem:[%s4578_s15 + $0x10] sm:$0xff] %vm2833_vm2, %v3001_v39  ;;  %v2902_v18 = vadd.f32 %v2901_v15, %v2873_v50 }
 0x2d6   : > { %v2978_v40 = vpop.f32.mrf.mxu2 }
 0x2d7   : > { %v2979_v37 = vadd.f32 %v2978_v40, %v2950_v24  ;;  %v2952_v44 = vpop.f32.mrf.mxu1 }
 0x2d8   : > { %v2925_v63 = vpop.f32.mrf.mxu0  ;;  %v2953_v4 = vadd.f32 %v2952_v44, %v2924_v58 }
 0x2d9   : > { %v2994_v49 = vadd.f32 %v2979_v37, %v2501_v41  ;;  %v2926_v21 = vadd.f32 %v2925_v63, %v2897_v5 }
 0x2db   : > { %v3002_v60 = vmax.f32 %v2994_v49, 0.0 }
 0x2dd   : > { %3010 = vst.msk [vmem:[%s4578_s15 + $0x18] sm:$0xff] %vm2833_vm2, %v3002_v60 }
 0x2de   : > { %v2981_v34 = vpop.f32.mrf.mxu2 }
 0x2df   : > { %v2982_v53 = vadd.f32 %v2981_v34, %v2953_v4  ;;  %v2954_v55 = vpop.f32.mrf.mxu1 }
 0x2e0   : > { %v2955_v8 = vadd.f32 %v2954_v55, %v2926_v21  ;;  %v2928_v9 = vpop.f32.mrf.mxu0 }
 0x2e1   : > { %v2995_v6 = vadd.f32 %v2982_v53, %v2504_v46  ;;  %v2929_v12 = vadd.f32 %v2928_v9, %v2900_v62 }
 0x2e3   : > { %v3003_v7 = vmax.f32 %v2995_v6, 0.0 }
 0x2e5   : > { %3011 = vst.msk [vmem:[%s4578_s15 + $0x20] sm:$0xff] %vm2833_vm2, %v3003_v7 }
 0x2e6   : > { %v2983_v10 = vpop.f32.mrf.mxu2 }
 0x2e7   : > { %v2984_v57 = vadd.f32 %v2983_v10, %v2955_v8  ;;  %v2957_v20 = vpop.f32.mrf.mxu1 }
 0x2e8   : > { %v2958_v14 = vadd.f32 %v2957_v20, %v2929_v12  ;;  %v2930_v17 = vpop.f32.mrf.mxu0 }
 0x2e9   : > { %v2996_v2 = vadd.f32 %v2984_v57, %v2506_v11  ;;  %v2931_v23 = vadd.f32 %v2930_v17, %v2902_v18 }
 0x2eb   : > { %v3004_v13 = vmax.f32 %v2996_v2, 0.0 }
 0x2ed   : > { %3012 = vst.msk [vmem:[%s4578_s15 + $0x28] sm:$0xff] %vm2833_vm2, %v3004_v13 }
 0x2ee   : > { %v2986_v16 = vpop.f32.mrf.mxu2 }
 0x2ef   : > { %v2987_v59 = vadd.f32 %v2986_v16, %v2958_v14  ;;  %v2959_v22 = vpop.f32.mrf.mxu1 }
 0x2f0   : > { %v2960_v56 = vadd.f32 %v2959_v22, %v2931_v23 }
 0x2f1   : > { %v2997_v19 = vadd.f32 %v2987_v59, %v2509_v1 }
 0x2f3   : > { %v3005_v25 = vmax.f32 %v2997_v19, 0.0 }
 0x2f5   : > { %3013 = vst.msk [vmem:[%s4578_s15 + $0x30] sm:$0xff] %vm2833_vm2, %v3005_v25 }
 0x2f6   : > { %v2988_v26 = vpop.f32.mrf.mxu2 }
 0x2f7   : > { %v2989_v28 = vadd.f32 %v2988_v26, %v2960_v56 }
 0x2f9   : > { %v2998_v52 = vadd.f32 %v2989_v28, %v2511_v27 }
 0x2fb   : > { %v3006_v29 = vmax.f32 %v2998_v52, 0.0 }
 0x2fd   : > { %3014 = vst.msk [vmem:[%s4578_s15 + $0x38] sm:$0xff] %vm2833_vm2, %v3006_v29 }
 0x2fe PF: > { %s17_s24 = sadd.s32 1, %s3681_s24  }
 0x2ff   : > { %p14_p4 = scmp.ge.s32.totalorder %s17_s24, 4  }
 0x301   :  { %16 = sbr.rel (!%p14_p4) target bundleno = 1 (0x1), region = 86 }

// kernel: fwd.3
= control target key start
LH: loop header
LB: loop body
LE: loop exit
PB: predicated region body
PF: predicated region fallthrough
CT: control target
= control target key end

     0   :  { %s5738_s0 = inlined_call_operand.vmem [shape: bf16[2,1,10,10,64], index: 0, kind: input, shape index: {}]   ;;  %s5739_s1 = inlined_call_operand.vmem [shape: bf16[576,64], index: 1, kind: input, shape index: {}]   ;;  %s5740_s2 = inlined_call_operand.vmem [shape: f32[1,64], index: 2, kind: input, shape index: {}, may-alias: {2,4}]   ;;  %s5741_s3 = inlined_call_operand.vmem [shape: bf16[576,64], index: 3, kind: input, shape index: {}]   ;;  %s5742_s4 = inlined_call_operand.vmem [shape: f32[1,64], index: 4, kind: input, shape index: {}, may-alias: {2,4}]   ;;  %s5743_s5 = inlined_call_operand.hbm [shape: f32[2,8,8,64], index: 5, kind: output, shape index: {0}]   ;;  %s5744_s6 = inlined_call_operand.hbm [shape: f32[2,8,8,64], index: 6, kind: output, shape index: {1}]  }
   0x1   :  { %5745 = sst [smem:[#allocation11_spill]] %s5738_s0 }
   0x2   :  { %12 = vsyncpa [#allocation6], 0 }
   0x3   :  { %14 = vsyncpa [#allocation6 + $0x1], 0 }
   0x4   :  { %15 = vsyncpa [#allocation8], 0 }
   0x5   :  { %17 = vsyncpa [#allocation8 + $0x1], 0  ;;  %s4478_s21 = smov 0   ;;  %s4480_s22 = smov 0  }
   0x6   :  { %s4482_s23 = smov 0   ;;  %s4484_s24 = smov 0  }
   0x7 LB: > { %s4499_s25 = sadd.s32 4294967295, %s4437_s24   ;;  %s3547_s26 = sadd.s32 4294967294, %s4437_s24   ;;  %s4437_s24 = sphi %s4484_s24, %s5762_s24   ;;  %s4433_s23 = sphi %s4482_s23, %s5761_s23   ;;  %s4429_s22 = sphi %s4480_s22, %s5760_s22   ;;  %s4425_s21 = sphi %s4478_s21, %s5759_s21  }
   0x8   : > { %s4503_s27 = sadd.s32 1, %s4437_s24   ;;  %s140_s28 = sadd.s32 1, %s4433_s23 }
   0x9   : > { %s137_s29 = ssub.s32 %s4437_s24, %s4503_s27  ;;  %p150_p0 = scmp.ne.s32.totalorder %s4433_s23, %s4429_s22 }
   0xa   : > { %p138_p1 = scmp.eq.s32.totalorder %s137_s29, 0  ;;  %p151_p2 = scmp.eq.s32.totalorder %s4499_s25, 1 }
   0xb   : > { %p156_p3 = scmp.ne.s32.totalorder %s4429_s22, %s4425_s21  ;;  %p157_p4 = scmp.eq.s32.totalorder %s3547_s26, 1 }
   0xc   : > { %s4514_s30 = scalar_select %p138_p1, %s4433_s23, %s140_s28  }
   0xd   : > { %p4516_p5 = por %p151_p2, %p150_p0  ;;  %p4520_p6 = por %p157_p4, %p156_p3 }
   0xe   : > { %p3550_p7 = scmp.ge.s32.totalorder %s4437_s24, 1  ;;  %p221_p8 = scmp.lt.s32.totalorder %s4437_s24, 3 }
  0x10   : > { %p222_p9 = pnand %p3550_p7, %p221_p8 }
  0x11   : > { %p256_p10 = scmp.lt.s32.totalorder (!%p222_p9), %s4499_s25, 1  ;;  %s5748_s0 = sld [smem:[#allocation11_spill]] (!%p222_p9) }
  0x12   : > { %225 = sbr.rel (%p222_p9) target bundleno = 764 (0x2fc), region = 40  ;;  %s4439_s14 = smov (!%p222_p9), 64  }
  0x13   : > { %s5604_s18 = sand.u32 (!%p222_p9), 1, %s4429_s22  }
  0x14   : > { %s3551_s19 = sshll.u32 (!%p222_p9), %s5604_s18, 6  ;;  %s3420_s17 = scalar_lea.sflag (!%p222_p9), [#allocation8], %s5604_s18 }
  0x15   : > { %s5618_s20 = scalar_lea.vmem (!%p222_p9), [#allocation5], %s3551_s19 }
  0x16   : > { %s3432_s15 = sshll.u32 (!%p222_p9), %s5618_s20, 4  ;;  %s5690_s15 = int_to_ptr.vmem [resolvable:$true] %s3432_s15 }
  0x17   : > { %s257_s9 = scalar_select %p256_p10, %s4499_s25, 1  ;;  %vm295_vm0 = vsmask.f32 3328  ;;  %vm296_vm1 = vsmask.f32 7440  ;;  %vm475_vm3 = vcmask 1042432  }
  0x18   : > { %vm4545_vm2 = vmor %vm295_vm0, %vm296_vm1  ;;  %vm476_vm4 = vcmask 1046532   ;;  %vm270_vm6 = vcmask 519168   ;;  %vm434_vm7 = vcmask 1043968   ;;  %vm1488_vm8 = vcmask 523264  }
  0x19   : > { %s4292_s10 = smul.u32 80, %s257_s9  ;;  %vm4583_vm5 = vmor %vm475_vm3, %vm476_vm4  ;;  %vm1655_vm9 = vcmask 516096   ;;  %vm1661_vm10 = vsmask.f32 256  ;;  %vm1693_vm11 = vsmask.f32 7938 }
  0x1a   : > { %vm4983_vm12 = vmand %vm1655_vm9, %vm1661_vm10 }
  0x1b   : > { %s4531_s13 = scalar_lea.vmem %s5748_s0, %s4292_s10  ;;  %vm4994_vm13 = vmand %vm1655_vm9, %vm1693_vm11 }
  0x1c   : > { %v3566_v0 = vld [vmem:[%s4531_s13 + $0x28] sm:$0xf]  ;;  %v287_v1 = vld [vmem:[%s4531_s13 + $0x20] sm:$0xf]  ;;  %v288_v2 = vld [vmem:[%s4531_s13 + $0x24] sm:$0x1] }
  0x1d   : > { %551 = vrot.lane.b32.xlu1 %v3566_v0, %s4439_s14  ;;  %v355_v3 = vshrl.u32 %v287_v1, 16  ;;  %v358_v4 = vshll.u32 %v287_v1, 16  ;;  %v293_v5 = vld [vmem:[%s4531_s13 + $0x38] sm:$0xf]  ;;  %v364_v6 = vshll.u32 %v288_v2, 16  ;;  %vm5047_vm14 = vmand %vm270_vm6, %vm1693_vm11 }
  0x1e   : > { %v294_v7 = vld [vmem:[%s4531_s13 + $0x3c] sm:$0x1]  ;;  %v397_v8 = vshrl.u32 %v293_v5, 16  ;;  %v400_v9 = vshll.u32 %v293_v5, 16  ;;  %v289_v13 = vld [vmem:[%s4531_s13 + $0x28] sm:$0xf] }
  0x1f   : > { %v357_v10 = vrot.slane %v355_v3, 4  ;;  %v360_v11 = vrot.slane %v358_v4, 5  ;;  %v406_v12 = vshll.u32 %v294_v7, 16  ;;  %v3567_v14 = vld [vmem:[%s4531_s13 + $0x30] sm:$0xf]  ;;  %v369_v18 = vshrl.u32 %v289_v13, 16 }
  0x20   : > { %v399_v15 = vrot.slane %v397_v8, 4  ;;  %v402_v16 = vrot.slane %v400_v9, 5  ;;  %v290_v17 = vld [vmem:[%s4531_s13 + $0x2c] sm:$0x1]  ;;  %v366_v20 = vrot.slane %v364_v6, 5  ;;  %v372_v21 = vshll.u32 %v289_v13, 16 }
  0x21   : > { %v361_v19 = vor.u32 %v360_v11, %v357_v10  ;;  %v378_v22 = vshll.u32 %v290_v17, 16  ;;  %v279_v23 = vld [vmem:[%s4531_s13] sm:$0xf]  ;;  %v371_v26 = vrot.slane %v369_v18, 4  ;;  %v280_v27 = vld [vmem:[%s4531_s13 + $0x4] sm:$0x1] }
  0x22   : > { %v403_v25 = vor.u32 %v402_v16, %v399_v15  ;;  %v299_v28 = vshrl.u32 %v279_v23, 16  ;;  %v302_v29 = vshll.u32 %v279_v23, 16  ;;  %v408_v31 = vrot.slane %v406_v12, 5  ;;  %v283_v34 = vld [vmem:[%s4531_s13 + $0x10] sm:$0xf] }
  0x23   : > { %v362_v30 = vrot.slane %v361_v19, 4  ;;  %v374_v32 = vrot.slane %v372_v21, 5  ;;  %v308_v33 = vshll.u32 %v280_v27, 16  ;;  %v380_v35 = vrot.slane %v378_v22, 5  ;;  %v291_v43 = vld [vmem:[%s4531_s13 + $0x30] sm:$0xf] }
  0x24   : > { %v301_v36 = vrot.slane %v299_v28, 4  ;;  %v304_v37 = vrot.slane %v302_v29, 5  ;;  %v327_v38 = vshrl.u32 %v283_v34, 16  ;;  %v404_v40 = vrot.slane %v403_v25, 4  ;;  %v284_v46 = vld [vmem:[%s4531_s13 + $0x14] sm:$0x1] }
  0x25   : > { %553 = vrot.lane.b32.xlu1 %v3567_v14, %s4439_s14  ;;  %v367_v39 = vsel %vm4545_vm2, %v362_v30, %v366_v20  ;;  %v375_v41 = vor.u32 %v374_v32, %v371_v26  ;;  %v330_v42 = vshll.u32 %v283_v34, 16  ;;  %v310_v45 = vrot.slane %v308_v33, 5  ;;  %v281_v48 = vld [vmem:[%s4531_s13 + $0x8] sm:$0xf]  ;;  %v292_v54 = vld [vmem:[%s4531_s13 + $0x34] sm:$0x1] }
  0x26   : > { %418 = vrot.lane.b32.xlu0 %v367_v39, %s4439_s14  ;;  %v305_v44 = vor.u32 %v304_v37, %v301_v36  ;;  %v329_v47 = vrot.slane %v327_v38, 4  ;;  %v383_v51 = vshrl.u32 %v291_v43, 16  ;;  %v386_v52 = vshll.u32 %v291_v43, 16  ;;  %v282_v55 = vld [vmem:[%s4531_s13 + $0xc] sm:$0x1]  ;;  %v4246_v28 = vld [vmem:[%s5741_s3 + $0x40] sm:$0xff] }
  0x27   : > { %v376_v49 = vrot.slane %v375_v41, 4  ;;  %v332_v50 = vrot.slane %v330_v42, 5  ;;  %v313_v56 = vshrl.u32 %v281_v48, 16  ;;  %v409_v57 = vsel %vm4545_vm2, %v404_v40, %v408_v31  ;;  %v285_v10 = vld [vmem:[%s4531_s13 + $0x18] sm:$0xf] }
  0x28   : > { %v306_v53 = vrot.slane %v305_v44, 4  ;;  %v336_v58 = vshll.u32 %v284_v46, 16  ;;  %v385_v59 = vrot.slane %v383_v51, 4  ;;  %v388_v60 = vrot.slane %v386_v52, 5  ;;  %v3588_v19 = vld [vmem:[%s4531_s13 + $0x10] sm:$0xe] }
  0x29   : > { %v333_v62 = vor.u32 %v332_v50, %v329_v47  ;;  %v315_v63 = vrot.slane %v313_v56, 4  ;;  %v316_v0 = vshll.u32 %v281_v48, 16  ;;  %v381_v1 = vsel %vm4545_vm2, %v376_v49, %v380_v35  ;;  %v3589_v20 = vld [vmem:[%s4531_s13 + $0x14] sm:$0x1]  ;;  %v286_v23 = vld [vmem:[%s4531_s13 + $0x1c] sm:$0x1] }
  0x2a   : > { %v311_v61 = vsel %vm4545_vm2, %v306_v53, %v310_v45  ;;  %v389_v2 = vor.u32 %v388_v60, %v385_v59  ;;  %v392_v3 = vshll.u32 %v292_v54, 16  ;;  %v322_v4 = vshll.u32 %v282_v55, 16  ;;  %v3618_v25 = vld [vmem:[%s4531_s13 + $0x10] sm:$0xf]  ;;  %v3568_v29 = vld [vmem:[%s4531_s13 + $0x38] sm:$0xf] }
  0x2b   : > { %410 = vrot.lane.b32.xlu2 %v311_v61, %s4439_s14  ;;  %v318_v5 = vrot.slane %v316_v0, 5  ;;  %v334_v6 = vrot.slane %v333_v62, 4  ;;  %v338_v7 = vrot.slane %v336_v58, 5  ;;  %v341_v14 = vshrl.u32 %v285_v10, 16  ;;  %v3620_v32 = vld [vmem:[%s4531_s13 + $0x18] sm:$0xf] }
  0x2c   : > { %v324_v9 = vrot.slane %v322_v4, 5  ;;  %v390_v11 = vrot.slane %v389_v2, 4  ;;  %v394_v12 = vrot.slane %v392_v3, 5  ;;  %v344_v15 = vshll.u32 %v285_v10, 16  ;;  %v3569_v36 = vld [vmem:[%s4531_s13 + $0x40] sm:$0xf] }
  0x2d   : > { %424 = vrot.lane.b32.xlu1 %v409_v57, %s4439_s14  ;;  %v319_v8 = vor.u32 %v318_v5, %v315_v63  ;;  %v339_v16 = vsel %vm4545_vm2, %v334_v6, %v338_v7  ;;  %v343_v21 = vrot.slane %v341_v14, 4  ;;  %v3603_v26 = vrot.slane %v3588_v19, 9  ;;  %v3586_v37 = vld [vmem:[%s4531_s13 + $0x8] sm:$0xe]  ;;  %v3587_v40 = vld [vmem:[%s4531_s13 + $0xc] sm:$0x1] }
  0x2e   : > { %420 = vrot.lane.b32.xlu0 %v381_v1, %s4439_s14  ;;  %v395_v18 = vsel %vm4545_vm2, %v390_v11, %v394_v12  ;;  %v346_v22 = vrot.slane %v344_v15, 5  ;;  %v757_v27 = vrot.slane %v3589_v20, 5  ;;  %v350_v31 = vshll.u32 %v286_v23, 16  ;;  %v3619_v45 = vld [vmem:[%s4531_s13 + $0x14] sm:$0x1] }
  0x2f   : > { %v320_v13 = vrot.slane %v319_v8, 4  ;;  %v849_v33 = vshrl.u32 %v3618_v25, 16  ;;  %v852_v34 = vshll.u32 %v3618_v25, 16  ;;  %v863_v38 = vshrl.u32 %v3620_v32, 16  ;;  %v3621_v51 = vld [vmem:[%s4531_s13 + $0x1c] sm:$0x1] }
  0x30   : > { %v347_v30 = vor.u32 %v346_v22, %v343_v21  ;;  %v758_v35 = vsel %vm4583_vm5, %v3603_v26, %v757_v27  ;;  %v866_v39 = vshll.u32 %v3620_v32, 16  ;;  %v352_v42 = vrot.slane %v350_v31, 5  ;;  %v3562_v54 = vld [vmem:[%s4531_s13 + $0x8] sm:$0xf]  ;;  %v3592_v56 = vld [vmem:[%s4531_s13 + $0x20] sm:$0xe] }
  0x31   : > { %v325_v17 = vsel %vm4545_vm2, %v320_v13, %v324_v9  ;;  %v851_v43 = vrot.slane %v849_v33, 4  ;;  %v854_v44 = vrot.slane %v852_v34, 5  ;;  %v3602_v46 = vrot.slane %v3586_v37, 9  ;;  %v3593_v57 = vld [vmem:[%s4531_s13 + $0x24] sm:$0x1]  ;;  %v4197_v37 = vld [vmem:[%s5739_s1 + $0x78] sm:$0xff] }
  0x32   : > { %v348_v41 = vrot.slane %v347_v30, 4  ;;  %v753_v47 = vrot.slane %v3587_v40, 5  ;;  %v865_v48 = vrot.slane %v863_v38, 4  ;;  %v868_v49 = vrot.slane %v866_v39, 5  ;;  %v3622_v62 = vld [vmem:[%s4531_s13 + $0x20] sm:$0xf]  ;;  %4284 = vmatpush.bf16.msra.mxu3 %v4197_v37  ;;  %1530 = vmatpush.bf16.msra.mxu1 %v4197_v37 }
  0x33   : > { %412 = vrot.lane.b32.xlu2 %v325_v17, %s4439_s14  ;;  %v855_v52 = vor.u32 %v854_v44, %v851_v43  ;;  %v858_v53 = vshll.u32 %v3619_v45, 16  ;;  %v872_v59 = vshll.u32 %v3621_v51, 16  ;;  %v3605_v63 = vrot.slane %v3592_v56, 9  ;;  %v3624_v4 = vld [vmem:[%s4531_s13 + $0x28] sm:$0xf]  ;;  %v4188_v44 = vld [vmem:[%s5739_s1 + $0x30] sm:$0xff] }
  0x34   : > { %v353_v50 = vsel %vm4545_vm2, %v348_v41, %v352_v42  ;;  %v754_v55 = vsel %vm4583_vm5, %v3602_v46, %v753_v47  ;;  %v869_v58 = vor.u32 %v868_v49, %v865_v48  ;;  %v765_v0 = vrot.slane %v3593_v57, 5  ;;  %v3590_v11 = vld [vmem:[%s4531_s13 + $0x18] sm:$0xe]  ;;  %v3591_v12 = vld [vmem:[%s4531_s13 + $0x1c] sm:$0x1]  ;;  %v4196_v47 = vld [vmem:[%s5739_s1 + $0x70] sm:$0xff] }
  0x35   : > { %414 = vrot.lane.b32.xlu1 %v339_v16, %s4439_s14  ;;  %v856_v60 = vrot.slane %v855_v52, 4  ;;  %v860_v61 = vrot.slane %v858_v53, 5  ;;  %v874_v2 = vrot.slane %v872_v59, 5  ;;  %v877_v5 = vshrl.u32 %v3622_v62, 16  ;;  %v3623_v15 = vld [vmem:[%s4531_s13 + $0x24] sm:$0x1] }
  0x36   : > { %422 = vrot.lane.b32.xlu0 %v395_v18, %s4439_s14  ;;  %v870_v1 = vrot.slane %v869_v58, 4  ;;  %v880_v6 = vshll.u32 %v3622_v62, 16  ;;  %v766_v7 = vsel %vm4583_vm5, %v3605_v63, %v765_v0  ;;  %v891_v9 = vshrl.u32 %v3624_v4, 16  ;;  %v3563_v20 = vld [vmem:[%s4531_s13 + $0x10] sm:$0xf]  ;;  %4285 = vmatpush.bf16.msra.mxu3 %v4196_v47 }
  0x37   : > { %v861_v3 = vsel %vm4545_vm2, %v856_v60, %v860_v61  ;;  %v894_v10 = vshll.u32 %v3624_v4, 16  ;;  %v879_v13 = vrot.slane %v877_v5, 4  ;;  %v3604_v16 = vrot.slane %v3590_v11, 9  ;;  %v3625_v21 = vld [vmem:[%s4531_s13 + $0x2c] sm:$0x1]  ;;  %1531 = vmatpush.bf16.msra.mxu1 %v4196_v47 }
  0x38   : > { %v875_v8 = vsel %vm4545_vm2, %v870_v1, %v874_v2  ;;  %v882_v14 = vrot.slane %v880_v6, 5  ;;  %v761_v17 = vrot.slane %v3591_v12, 5  ;;  %v893_v18 = vrot.slane %v891_v9, 4  ;;  %v3564_v25 = vld [vmem:[%s4531_s13 + $0x18] sm:$0xf]  ;;  %v4187_v60 = vld [vmem:[%s5739_s1 + $0x28] sm:$0xff] }
  0x39   : > { %v896_v19 = vrot.slane %v894_v10, 5  ;;  %v886_v23 = vshll.u32 %v3623_v15, 16  ;;  %v3596_v30 = vld [vmem:[%s4531_s13 + $0x30] sm:$0xe]  ;;  %v3597_v31 = vld [vmem:[%s4531_s13 + $0x34] sm:$0x1] }
  0x3a   : > { %v883_v22 = vor.u32 %v882_v14, %v879_v13  ;;  %v762_v26 = vsel %vm4583_vm5, %v3604_v16, %v761_v17  ;;  %v3607_v34 = vrot.slane %v3596_v30, 9  ;;  %v3632_v40 = vld [vmem:[%s4531_s13 + $0x48] sm:$0xf]  ;;  %v3626_v41 = vld [vmem:[%s4531_s13 + $0x30] sm:$0xf]  ;;  %v4186_v13 = vld [vmem:[%s5739_s1 + $0x20] sm:$0xff] }
  0x3b   : > { %555 = vrot.lane.b32.xlu2 %v3568_v29, %s4439_s14  ;;  %v897_v27 = vor.u32 %v896_v19, %v893_v18  ;;  %v900_v29 = vshll.u32 %v3625_v21, 16  ;;  %v888_v33 = vrot.slane %v886_v23, 5  ;;  %v3628_v43 = vld [vmem:[%s4531_s13 + $0x38] sm:$0xf]  ;;  %v905_v45 = vshrl.u32 %v3626_v41, 16  ;;  %v4195_v61 = vld [vmem:[%s5739_s1 + $0x68] sm:$0xff] }
  0x3c   : > { %v884_v32 = vrot.slane %v883_v22, 4  ;;  %v908_v46 = vshll.u32 %v3626_v41, 16  ;;  %v3594_v48 = vld [vmem:[%s4531_s13 + $0x28] sm:$0xe]  ;;  %v3595_v49 = vld [vmem:[%s4531_s13 + $0x2c] sm:$0x1]  ;;  %4286 = vmatpush.bf16.msra.mxu3 %v4195_v61  ;;  %1532 = vmatpush.bf16.msra.mxu1 %v4195_v61 }
  0x3d   : > { %785 = vrot.lane.b32.xlu1 %v758_v35, %s4439_s14  ;;  %v773_v35 = vrot.slane %v3597_v31, 5  ;;  %v898_v38 = vrot.slane %v897_v27, 4  ;;  %v902_v39 = vrot.slane %v900_v29, 5  ;;  %v947_v51 = vshrl.u32 %v3632_v40, 16  ;;  %v3598_v56 = vld [vmem:[%s4531_s13 + $0x38] sm:$0xe] }
  0x3e   : > { %557 = vrot.lane.b32.xlu0 %v3569_v36, %s4439_s14  ;;  %v4189_v36 = vld [vmem:[%s5739_s1 + $0x38] sm:$0xff]  ;;  %v889_v42 = vsel %vm4545_vm2, %v884_v32, %v888_v33  ;;  %v950_v52 = vshll.u32 %v3632_v40, 16  ;;  %v907_v58 = vrot.slane %v905_v45, 4  ;;  %v910_v59 = vrot.slane %v908_v46, 5  ;;  %v3627_v0 = vld [vmem:[%s4531_s13 + $0x34] sm:$0x1] }
  0x3f   : > { %1501 = vmatpush.bf16.msra.mxu0 %v4189_v36  ;;  %4276 = vmatpush.bf16.msra.mxu2 %v4189_v36  ;;  %v903_v53 = vsel %vm4545_vm2, %v898_v38, %v902_v39  ;;  %v3599_v57 = vld [vmem:[%s4531_s13 + $0x3c] sm:$0x1]  ;;  %v3606_v62 = vrot.slane %v3594_v48, 9  ;;  %v769_v63 = vrot.slane %v3595_v49, 5  ;;  %v3608_v1 = vrot.slane %v3598_v56, 9  ;;  %v4194_v29 = vld [vmem:[%s5739_s1 + $0x60] sm:$0xff] }
  0x40   : > { %v777_v2 = vrot.slane %v3599_v57, 5  ;;  %v952_v4 = vrot.slane %v950_v52, 5  ;;  %v3629_v5 = vld [vmem:[%s4531_s13 + $0x3c] sm:$0x1]  ;;  %v3565_v9 = vld [vmem:[%s4531_s13 + $0x20] sm:$0xf]  ;;  %v911_v11 = vor.u32 %v910_v59, %v907_v58  ;;  %4287 = vmatpush.bf16.msra.mxu3 %v4194_v29  ;;  %1533 = vmatpush.bf16.msra.mxu1 %v4194_v29 }
  0x41   : > { %v3630_v10 = vld [vmem:[%s4531_s13 + $0x40] sm:$0xf]  ;;  %v914_v12 = vshll.u32 %v3627_v0, 16  ;;  %v770_v14 = vsel %vm4583_vm5, %v3606_v62, %v769_v63  ;;  %v928_v15 = vshll.u32 %v3629_v5, 16  ;;  %v3601_v41 = vld [vmem:[%s4531_s13 + $0x44] sm:$0x1] }
  0x42   : > { %v778_v16 = vsel %vm4583_vm5, %v3608_v1, %v777_v2  ;;  %v936_v21 = vshll.u32 %v3630_v10, 16  ;;  %v912_v22 = vrot.slane %v911_v11, 4  ;;  %v3600_v40 = vld [vmem:[%s4531_s13 + $0x40] sm:$0xe]  ;;  %v452_v47 = vld [vmem:[%s4531_s13 + $0x24] sm:$0x1] }
  0x43   : > { %416 = vrot.lane.b32.xlu2 %v353_v50, %s4439_s14  ;;  %v774_v50 = vsel %vm4583_vm5, %v3607_v34, %v773_v35  ;;  %1502 = vmatpush.bf16.msra.mxu0 %v4188_v44  ;;  %v916_v23 = vrot.slane %v914_v12, 5  ;;  %v930_v31 = vrot.slane %v928_v15, 5  ;;  %v3631_v34 = vld [vmem:[%s4531_s13 + $0x44] sm:$0x1]  ;;  %v451_v46 = vld [vmem:[%s4531_s13 + $0x20] sm:$0xe] }
  0x44   : > { %4277 = vmatpush.bf16.msra.mxu2 %v4188_v44  ;;  %v938_v33 = vrot.slane %v936_v21, 5  ;;  %v942_v39 = vshll.u32 %v3631_v34, 16  ;;  %v3558_v48 = vrot.slane %v451_v46, 9  ;;  %v496_v49 = vrot.slane %v452_v47, 5  ;;  %v4193_v52 = vld [vmem:[%s5739_s1 + $0x58] sm:$0xff]  ;;  %v4192_v56 = vld [vmem:[%s5739_s1 + $0x50] sm:$0xff] }
  0x45   : > { %543 = vrot.lane.b32.xlu1 %v3562_v54, %s4439_s14  ;;  %v919_v54 = vshrl.u32 %v3628_v43, 16  ;;  %v917_v35 = vsel %vm4545_vm2, %v912_v22, %v916_v23  ;;  %4288 = vmatpush.bf16.msra.mxu3 %v4193_v52  ;;  %v453_v58 = vld [vmem:[%s4531_s13 + $0x28] sm:$0xe]  ;;  %v454_v59 = vld [vmem:[%s4531_s13 + $0x2c] sm:$0x1]  ;;  %v4182_v2 = vld [vmem:[%s5739_s1] sm:$0xff] }
  0x46   : > { %783 = vrot.lane.b32.xlu0 %v754_v55, %s4439_s14  ;;  %v922_v55 = vshll.u32 %v3628_v43, 16  ;;  %v781_v43 = vrot.slane %v3601_v41, 5  ;;  %v944_v45 = vrot.slane %v942_v39, 5  ;;  %v500_v61 = vrot.slane %v454_v59, 5  ;;  %1534 = vmatpush.bf16.msra.mxu1 %v4193_v52  ;;  %v266_v63 = vld [vmem:[%s4531_s13 + $0x20] sm:$0xf] }
  0x47   : > { %v921_v6 = vrot.slane %v919_v54, 4  ;;  %1503 = vmatpush.bf16.msra.mxu0 %v4187_v60  ;;  %v497_v54 = vsel %vm4583_vm5, %v3558_v48, %v496_v49  ;;  %275 = vst.msk [vmem:[#allocation3 + $0x50] sm:$0xf] %vm270_vm6, %v266_v63  ;;  %v4183_v0 = vld [vmem:[%s5739_s1 + $0x8] sm:$0xff]  ;;  %v264_v12 = vld [vmem:[%s4531_s13 + $0x10] sm:$0xf] }
  0x48   : > { %4278 = vmatpush.bf16.msra.mxu2 %v4187_v60  ;;  %522 = vst.msk [vmem:[#allocation3 + $0x54] sm:$0xf] %vm270_vm6, %v497_v54  ;;  %v3559_v60 = vrot.slane %v453_v58, 9  ;;  %v4191_v1 = vld [vmem:[%s5739_s1 + $0x48] sm:$0xff]  ;;  %v4205_v15 = vld [vmem:[%s5739_s1 + $0xb8] sm:$0xff] }
  0x49   : > { %4289 = vmatpush.bf16.msra.mxu3 %v4192_v56  ;;  %v267_v5 = vld [vmem:[%s4531_s13 + $0x28] sm:$0xf]  ;;  %273 = vst.msk [vmem:[#allocation3 + $0x28] sm:$0xf] %vm270_vm6, %v264_v12  ;;  %v457_v23 = vld [vmem:[%s4531_s13 + $0x38] sm:$0xe] }
  0x4a   : > { %v501_v62 = vsel %vm4583_vm5, %v3559_v60, %v500_v61  ;;  %1535 = vmatpush.bf16.msra.mxu1 %v4192_v56  ;;  %276 = vst.msk [vmem:[#allocation3 + $0x64] sm:$0xf] %vm270_vm6, %v267_v5  ;;  %v4211_v41 = vld [vmem:[%s5739_s1 + $0xe8] sm:$0xff]  ;;  %v443_v46 = vld [vmem:[%s4531_s13] sm:$0xe] }
  0x4b   : > { %960 = vrot.lane.b32.xlu2 %v861_v3, %s4439_s14  ;;  %v949_v3 = vrot.slane %v947_v51, 4  ;;  %1504 = vmatpush.bf16.msra.mxu0 %v4186_v13  ;;  %v4185_v51 = vld [vmem:[%s5739_s1 + $0x18] sm:$0xff]  ;;  %523 = vst.msk [vmem:[#allocation3 + $0x68] sm:$0xf] %vm270_vm6, %v501_v62  ;;  %v444_v47 = vld [vmem:[%s4531_s13 + $0x4] sm:$0x1] }
  0x4c   : > { %4279 = vmatpush.bf16.msra.mxu2 %v4186_v13  ;;  %v265_v13 = vld [vmem:[%s4531_s13 + $0x18] sm:$0xf]  ;;  %v3554_v48 = vrot.slane %v443_v46, 9  ;;  %v445_v49 = vld [vmem:[%s4531_s13 + $0x8] sm:$0xe]  ;;  %v480_v52 = vrot.slane %v444_v47, 5 }
  0x4d   : > { %789 = vrot.lane.b32.xlu1 %v766_v7, %s4439_s14  ;;  %v924_v7 = vrot.slane %v922_v55, 5  ;;  %v953_v17 = vor.u32 %v952_v4, %v949_v3  ;;  %v4184_v55 = vld [vmem:[%s5739_s1 + $0x10] sm:$0xff]  ;;  %4290 = vmatpush.bf16.msra.mxu3 %v4191_v1  ;;  %v4190_v3 = vld [vmem:[%s5739_s1 + $0x40] sm:$0xff]  ;;  %v269_v4 = vld [vmem:[%s4531_s13 + $0x38] sm:$0xf]  ;;  %v3555_v54 = vrot.slane %v445_v49, 9 }
  0x4e   : > { %962 = vrot.lane.b32.xlu0 %v875_v8, %s4439_s14  ;;  %v3633_v8 = vld [vmem:[%s4531_s13 + $0x4c] sm:$0x1]  ;;  %1536 = vmatpush.bf16.msra.mxu1 %v4191_v1  ;;  %278 = vst.msk [vmem:[#allocation3 + $0x8c] sm:$0xf] %vm270_vm6, %v269_v4  ;;  %v481_v61 = vsel %vm4583_vm5, %v3554_v48, %v480_v52  ;;  %v4210_v62 = vld [vmem:[%s5739_s1 + $0xe0] sm:$0xff] }
  0x4f   : > { %v956_v18 = vshll.u32 %v3633_v8, 16  ;;  %v925_v19 = vor.u32 %v924_v7, %v921_v6  ;;  %1505 = vmatpush.bf16.msra.mxu0 %v4185_v51  ;;  %v455_v6 = vld [vmem:[%s4531_s13 + $0x30] sm:$0xe]  ;;  %v456_v7 = vld [vmem:[%s4531_s13 + $0x34] sm:$0x1]  ;;  %v4206_v49 = vld [vmem:[%s5739_s1 + $0xc0] sm:$0xff] }
  0x50   : > { %4280 = vmatpush.bf16.msra.mxu2 %v4185_v51  ;;  %v3560_v8 = vrot.slane %v455_v6, 9  ;;  %274 = vst.msk [vmem:[#allocation3 + $0x3c] sm:$0xf] %vm270_vm6, %v265_v13  ;;  %v4201_v6 = vld [vmem:[%s5739_s1 + $0x98] sm:$0xff]  ;;  %v3577_v12 = vld [vmem:[%s4531_s13 + $0x24] sm:$0x1] }
  0x51   : > { %v958_v27 = vrot.slane %v956_v18, 5  ;;  %v926_v30 = vrot.slane %v925_v19, 4  ;;  %4291 = vmatpush.bf16.msra.mxu3 %v4190_v3  ;;  %v3573_v18 = vld [vmem:[%s4531_s13 + $0x14] sm:$0x1]  ;;  %518 = vst.msk [vmem:[#allocation3 + $0x4] sm:$0xf] %vm270_vm6, %v481_v61 }
  0x52   : > { %1537 = vmatpush.bf16.msra.mxu1 %v4190_v3  ;;  %v4204_v19 = vld [vmem:[%s5739_s1 + $0xb0] sm:$0xff]  ;;  %v615_v22 = vshll.u32 %v3573_v18, 16  ;;  %v643_v18 = vshll.u32 %v3577_v12, 16  ;;  %v450_v48 = vld [vmem:[%s4531_s13 + $0x1c] sm:$0x1] }
  0x53   : > { %545 = vrot.lane.b32.xlu2 %v3563_v20, %s4439_s14  ;;  %v933_v20 = vshrl.u32 %v3630_v10, 16  ;;  %v931_v37 = vsel %vm4545_vm2, %v926_v30, %v930_v31  ;;  %1506 = vmatpush.bf16.msra.mxu0 %v4184_v55  ;;  %v4212_v31 = vld [vmem:[%s5739_s1 + $0xf0] sm:$0xff] }
  0x54   : > { %4281 = vmatpush.bf16.msra.mxu2 %v4184_v55  ;;  %v3571_v55 = vld [vmem:[%s4531_s13 + $0xc] sm:$0x1] }
  0x55   : > { %547 = vrot.lane.b32.xlu1 %v3564_v25, %s4439_s14  ;;  %v262_v25 = vld [vmem:[%s4531_s13] sm:$0xf]  ;;  %v935_v32 = vrot.slane %v933_v20, 4  ;;  %v601_v63 = vshll.u32 %v3571_v55, 16  ;;  %v3575_v55 = vld [vmem:[%s4531_s13 + $0x1c] sm:$0x1] }
  0x56   : > { %787 = vrot.lane.b32.xlu0 %v762_v26, %s4439_s14  ;;  %v954_v26 = vrot.slane %v953_v17, 4  ;;  %271 = vst.msk [vmem:[#allocation3] sm:$0xf] %vm270_vm6, %v262_v25  ;;  %v3572_v17 = vld [vmem:[%s4531_s13 + $0x10] sm:$0xf] }
  0x57   : > { %v939_v38 = vor.u32 %v938_v33, %v935_v32  ;;  %1507 = vmatpush.bf16.msra.mxu0 %v4183_v0  ;;  %v606_v20 = vshrl.u32 %v3572_v17, 16  ;;  %v609_v21 = vshll.u32 %v3572_v17, 16  ;;  %v617_v33 = vrot.slane %v615_v22, 5 }
  0x58   : > { %v959_v36 = vsel %vm4545_vm2, %v954_v26, %v958_v27  ;;  %4282 = vmatpush.bf16.msra.mxu2 %v4183_v0  ;;  %v458_v26 = vld [vmem:[%s4531_s13 + $0x3c] sm:$0x1]  ;;  %v3561_v27 = vrot.slane %v457_v23, 9  ;;  %v603_v5 = vrot.slane %v601_v63, 5 }
  0x59   : > { %v940_v44 = vrot.slane %v939_v38, 4  ;;  %v608_v29 = vrot.slane %v606_v20, 4  ;;  %v611_v30 = vrot.slane %v609_v21, 5  ;;  %v508_v34 = vrot.slane %v458_v26, 5  ;;  %v4208_v21 = vld [vmem:[%s5739_s1 + $0xd0] sm:$0xff] }
  0x5b   : > { %964 = vrot.lane.b32.xlu2 %v889_v42, %s4439_s14  ;;  %v3609_v42 = vrot.slane %v3600_v40, 9  ;;  %v945_v57 = vsel %vm4545_vm2, %v940_v44, %v944_v45  ;;  %1508 = vmatpush.bf16.msra.mxu0 %v4182_v2  ;;  %v509_v39 = vsel %vm4583_vm5, %v3561_v27, %v508_v34  ;;  %v4203_v40 = vld [vmem:[%s5739_s1 + $0xa8] sm:$0xff]  ;;  %v4202_v45 = vld [vmem:[%s5739_s1 + $0xa0] sm:$0xff] }
  0x5c   : > { %4283 = vmatpush.bf16.msra.mxu2 %v4182_v2  ;;  %525 = vst.msk [vmem:[#allocation3 + $0x90] sm:$0xf] %vm270_vm6, %v509_v39  ;;  %v4199_v34 = vld [vmem:[%s5739_s1 + $0x88] sm:$0xff] }
  0x5d   : > { %793 = vrot.lane.b32.xlu1 %v774_v50, %s4439_s14  ;;  %v782_v50 = vsel %vm4583_vm5, %v3609_v42, %v781_v43  ;;  %v4217_v42 = vld [vmem:[%s5739_s1 + $0x118] sm:$0xff] }
  0x5e   : > { %966 = vrot.lane.b32.xlu0 %v903_v53, %s4439_s14  ;;  %v263_v53 = vld [vmem:[%s4531_s13 + $0x8] sm:$0xf] }
  0x5f   : > { %272 = vst.msk [vmem:[#allocation3 + $0x14] sm:$0xf] %vm270_vm6, %v263_v53  ;;  %1621 = vmatpush.bf16.msrb.mxu0 %v4217_v42  ;;  %v446_v53 = vld [vmem:[%s4531_s13 + $0xc] sm:$0x1] }
  0x60   : > { %1559 = vmatpush.bf16.msrb.mxu2 %v4205_v15  ;;  %v484_v58 = vrot.slane %v446_v53, 5 }
  0x62   : > { %v485_v1 = vsel %vm4583_vm5, %v3555_v54, %v484_v58  ;;  %v492_v54 = vrot.slane %v450_v48, 5 }
  0x63   : > { %549 = vrot.lane.b32.xlu2 %v3565_v9, %s4439_s14  ;;  %v504_v9 = vrot.slane %v456_v7, 5  ;;  %519 = vst.msk [vmem:[#allocation3 + $0x18] sm:$0xf] %vm270_vm6, %v485_v1  ;;  %v4209_v7 = vld [vmem:[%s5739_s1 + $0xd8] sm:$0xff]  ;;  %v3635_v1 = vld [vmem:[%s4531_s13 + $0x14] sm:$0x1] }
  0x64   : > { %1560 = vmatpush.bf16.msrb.mxu2 %v4204_v19 }
  0x65   : > { %795 = vrot.lane.b32.xlu1 %v778_v16, %s4439_s14  ;;  %v505_v10 = vsel %vm4583_vm5, %v3560_v8, %v504_v9  ;;  %v4213_v16 = vld [vmem:[%s5739_s1 + $0xf8] sm:$0xff]  ;;  %v4216_v9 = vld [vmem:[%s5739_s1 + $0x110] sm:$0xff] }
  0x66   : > { %791 = vrot.lane.b32.xlu0 %v770_v14, %s4439_s14  ;;  %524 = vst.msk [vmem:[#allocation3 + $0x7c] sm:$0xf] %vm270_vm6, %v505_v10  ;;  %v268_v14 = vld [vmem:[%s4531_s13 + $0x30] sm:$0xf]  ;;  %1588 = vmatpush.bf16.msrb.mxu3 %v4213_v16  ;;  %v3576_v10 = vld [vmem:[%s4531_s13 + $0x20] sm:$0xf] }
  0x67   : > { %277 = vst.msk [vmem:[#allocation3 + $0x78] sm:$0xf] %vm270_vm6, %v268_v14  ;;  %v634_v13 = vshrl.u32 %v3576_v10, 16  ;;  %v637_v14 = vshll.u32 %v3576_v10, 16  ;;  %1622 = vmatpush.bf16.msrb.mxu0 %v4216_v9  ;;  %v3613_v10 = vld [vmem:[%s4531_s13 + $0x28] sm:$0xf] }
  0x68   : > { %1561 = vmatpush.bf16.msrb.mxu2 %v4203_v40  ;;  %827 = vst.msk [vmem:[#allocation3 + $0x48] sm:$0xf] %vm270_vm6, %v3613_v10  ;;  %v3582_v10 = vld [vmem:[%s4531_s13 + $0x38] sm:$0xf] }
  0x69   : > { %v636_v19 = vrot.slane %v634_v13, 4  ;;  %v639_v20 = vrot.slane %v637_v14, 5 }
  0x6a   : > { %1589 = vmatpush.bf16.msrb.mxu3 %v4212_v31  ;;  %v3611_v31 = vld [vmem:[%s4531_s13 + $0x18] sm:$0xf] }
  0x6b   : > { %968 = vrot.lane.b32.xlu2 %v917_v35, %s4439_s14  ;;  %v612_v35 = vor.u32 %v611_v30, %v608_v29  ;;  %v640_v27 = vor.u32 %v639_v20, %v636_v19  ;;  %v645_v29 = vrot.slane %v643_v18, 5  ;;  %v3612_v30 = vld [vmem:[%s4531_s13 + $0x20] sm:$0xf]  ;;  %825 = vst.msk [vmem:[#allocation3 + $0x20] sm:$0xf] %vm270_vm6, %v3611_v31 }
  0x6c   : > { %1562 = vmatpush.bf16.msrb.mxu2 %v4202_v45  ;;  %826 = vst.msk [vmem:[#allocation3 + $0x34] sm:$0xf] %vm270_vm6, %v3612_v30  ;;  %v3578_v20 = vld [vmem:[%s4531_s13 + $0x28] sm:$0xf] }
  0x6d   : > { %974 = vrot.lane.b32.xlu1 %v959_v36, %s4439_s14  ;;  %v3610_v36 = vld [vmem:[%s4531_s13 + $0x10] sm:$0xf]  ;;  %v613_v44 = vrot.slane %v612_v35, 4  ;;  %v4207_v35 = vld [vmem:[%s5739_s1 + $0xc8] sm:$0xff] }
  0x6e   : > { %970 = vrot.lane.b32.xlu0 %v931_v37, %s4439_s14  ;;  %v3570_v37 = vld [vmem:[%s4531_s13 + $0x8] sm:$0xf]  ;;  %824 = vst.msk [vmem:[#allocation3 + $0xc] sm:$0xf] %vm270_vm6, %v3610_v36  ;;  %1590 = vmatpush.bf16.msrb.mxu3 %v4211_v41  ;;  %v448_v41 = vld [vmem:[%s4531_s13 + $0x14] sm:$0x1] }
  0x6f   : > { %v592_v43 = vshrl.u32 %v3570_v37, 16  ;;  %v618_v51 = vsel %vm4545_vm2, %v613_v44, %v617_v33  ;;  %v595_v59 = vshll.u32 %v3570_v37, 16  ;;  %v641_v33 = vrot.slane %v640_v27, 4  ;;  %v4215_v36 = vld [vmem:[%s5739_s1 + $0x108] sm:$0xff]  ;;  %v4198_v37 = vld [vmem:[%s5739_s1 + $0x80] sm:$0xff] }
  0x70   : > { %712 = vst.msk [vmem:[#allocation3 + $0x1c] sm:$0xf] %vm270_vm6, %v618_v51  ;;  %1563 = vmatpush.bf16.msrb.mxu2 %v4201_v6  ;;  %1623 = vmatpush.bf16.msrb.mxu0 %v4215_v36  ;;  %v488_v46 = vrot.slane %v448_v41, 5  ;;  %v3637_v6 = vld [vmem:[%s4531_s13 + $0x1c] sm:$0x1] }
  0x71   : > { %v597_v2 = vrot.slane %v595_v59, 5  ;;  %v646_v40 = vsel %vm4545_vm2, %v641_v33, %v645_v29  ;;  %v629_v59 = vshll.u32 %v3575_v55, 16  ;;  %v1030_v9 = vrot.slane %v3637_v6, 5 }
  0x72   : > { %1591 = vmatpush.bf16.msrb.mxu3 %v4210_v62  ;;  %714 = vst.msk [vmem:[#allocation3 + $0x44] sm:$0xf] %vm270_vm6, %v646_v40 }
  0x73   : > { %797 = vrot.lane.b32.xlu2 %v782_v50, %s4439_s14  ;;  %v594_v50 = vrot.slane %v592_v43, 4  ;;  %v449_v43 = vld [vmem:[%s4531_s13 + $0x18] sm:$0xe] }
  0x74   : > { %v3557_v47 = vrot.slane %v449_v43, 9  ;;  %v3640_v43 = vld [vmem:[%s4531_s13 + $0x28] sm:$0xe] }
  0x75   : > { %v598_v4 = vor.u32 %v597_v2, %v594_v50  ;;  %v631_v2 = vrot.slane %v629_v59, 5  ;;  %v3653_v48 = vrot.slane %v3640_v43, 9 }
  0x76   : > { %972 = vrot.lane.b32.xlu0 %v945_v57, %s4439_s14  ;;  %1592 = vmatpush.bf16.msrb.mxu3 %v4209_v7  ;;  %v493_v62 = vsel %vm4583_vm5, %v3557_v47, %v492_v54  ;;  %v1026_v7 = vrot.slane %v3635_v1, 5  ;;  %v3615_v1 = vld [vmem:[%s4531_s13 + $0x38] sm:$0xf] }
  0x77   : > { %v599_v8 = vrot.slane %v598_v4, 4  ;;  %521 = vst.msk [vmem:[#allocation3 + $0x40] sm:$0xf] %vm270_vm6, %v493_v62 }
  0x78   : > { %829 = vst.msk [vmem:[#allocation3 + $0x70] sm:$0xf] %vm270_vm6, %v3615_v1  ;;  %v3647_v1 = vld [vmem:[%s4531_s13 + $0x44] sm:$0x1] }
  0x79   : > { %v604_v17 = vsel %vm4545_vm2, %v599_v8, %v603_v5 }
  0x7a   : > { %711 = vst.msk [vmem:[#allocation3 + $0x8] sm:$0xf] %vm270_vm6, %v604_v17  ;;  %1593 = vmatpush.bf16.msrb.mxu3 %v4208_v21  ;;  %v3638_v21 = vld [vmem:[%s4531_s13 + $0x20] sm:$0xe] }
  0x7e   : > { %1594 = vmatpush.bf16.msrb.mxu3 %v4207_v35  ;;  %v3581_v35 = vld [vmem:[%s4531_s13 + $0x34] sm:$0x1] }
  0x82   : > { %1595 = vmatpush.bf16.msrb.mxu3 %v4206_v49 }
  0x85   : > { %v411_v11 = vpop.permute.xlu2 %410 }
  0x86   : > { %435 = vst.msk [vmem:[#allocation3] sm:$0xf] %vm434_vm7, %v411_v11  ;;  %v4200_v11 = vld [vmem:[%s5739_s1 + $0x90] sm:$0xff] }
  0x87   : > { %1564 = vmatpush.bf16.msrb.mxu2 %v4200_v11 }
  0x8b   : > { %1565 = vmatpush.bf16.msrb.mxu2 %v4199_v34 }
  0x8d   : > { %v413_v25 = vpop.permute.xlu2 %412  ;;  %v3660_v38 = vld [vmem:[#allocation3] sm:$0xf] }
  0x8e   : > { %436 = vst.msk [vmem:[#allocation3 + $0x14] sm:$0xf] %vm434_vm7, %v413_v25 }
  0x8f   : > { %v552_v32 = vpop.permute.xlu1 %551  ;;  %1566 = vmatpush.bf16.msrb.mxu2 %v4198_v37 }
  0x90   : > { %571 = vst.msk [vmem:[#allocation3 + $0x54] sm:$0xf] %vm434_vm7, %v552_v32  ;;  %v3574_v32 = vld [vmem:[%s4531_s13 + $0x18] sm:$0xf] }
  0x91   : > { %v620_v39 = vshrl.u32 %v3574_v32, 16  ;;  %v623_v44 = vshll.u32 %v3574_v32, 16 }
  0x93   : > { %v622_v50 = vrot.slane %v620_v39, 4 }
  0x95   : > { %v556_v56 = vpop.permute.xlu2 %555  ;;  %v4164_v57 = vld [vmem:[#allocation3 + $0x10] sm:$0xf0] }
  0x96   : > { %573 = vst.msk [vmem:[#allocation3 + $0x7c] sm:$0xf] %vm434_vm7, %v556_v56  ;;  %v3661_v60 = vor.u32 %v4164_v57, %v3660_v38  ;;  %v447_v38 = vld [vmem:[%s4531_s13 + $0x10] sm:$0xe]  ;;  %v625_v56 = vrot.slane %v623_v44, 5  ;;  %v3652_v44 = vrot.slane %v3638_v21, 9 }
  0x97   : > { %v554_v0 = vpop.permute.xlu1 %553  ;;  %v4172_v15 = vld [vmem:[#allocation3 + $0x54] sm:$0xf]  ;;  %v3556_v42 = vrot.slane %v447_v38, 9 }
  0x98   : > { %572 = vst.msk [vmem:[#allocation3 + $0x68] sm:$0xf] %vm434_vm7, %v554_v0  ;;  %v419_v3 = vpop.permute.xlu0 %418  ;;  %1509 = vmatmul.bf16.vlgmr.msra.gmra.mxu0 %v3661_v60  ;;  %v4214_v60 = vld [vmem:[%s5739_s1 + $0x100] sm:$0xff]  ;;  %v626_v63 = vor.u32 %v625_v56, %v622_v50  ;;  %v3634_v0 = vld [vmem:[%s4531_s13 + $0x10] sm:$0xe] }
  0x99   : > { %439 = vst.msk [vmem:[#allocation3 + $0x50] sm:$0xf] %vm434_vm7, %v419_v3  ;;  %v489_v53 = vsel %vm4583_vm5, %v3556_v42, %v488_v46  ;;  %1624 = vmatpush.bf16.msrb.mxu0 %v4214_v60  ;;  %v3636_v3 = vld [vmem:[%s4531_s13 + $0x18] sm:$0xe]  ;;  %v3650_v4 = vrot.slane %v3634_v0, 9  ;;  %v671_v42 = vshll.u32 %v3581_v35, 16 }
  0x9a   : > { %520 = vst.msk [vmem:[#allocation3 + $0x2c] sm:$0xf] %vm270_vm6, %v489_v53  ;;  %v627_v5 = vrot.slane %v626_v63, 4  ;;  %v3651_v8 = vrot.slane %v3636_v3, 9  ;;  %v3639_v38 = vld [vmem:[%s4531_s13 + $0x24] sm:$0x1] }
  0x9b   : > { %v3641_v46 = vld [vmem:[%s4531_s13 + $0x2c] sm:$0x1]  ;;  %v1034_v47 = vrot.slane %v3639_v38, 5  ;;  %v3644_v38 = vld [vmem:[%s4531_s13 + $0x38] sm:$0xe] }
  0x9c   : > { %v632_v13 = vsel %vm4545_vm2, %v627_v5, %v631_v2  ;;  %v1031_v19 = vsel %vm4583_vm5, %v3651_v8, %v1030_v9  ;;  %v1038_v53 = vrot.slane %v3641_v46, 5 }
  0x9d   : > { %v417_v16 = vpop.permute.xlu2 %416  ;;  %713 = vst.msk [vmem:[#allocation3 + $0x30] sm:$0xf] %vm270_vm6, %v632_v13  ;;  %v4177_v50 = vld [vmem:[#allocation3 + $0x7c] sm:$0xf]  ;;  %v1035_v60 = vsel %vm4583_vm5, %v3652_v44, %v1034_v47  ;;  %v679_v13 = vshll.u32 %v3582_v10, 16 }
  0x9e   : > { %438 = vst.msk [vmem:[#allocation3 + $0x3c] sm:$0xf] %vm434_vm7, %v417_v16  ;;  %v1027_v16 = vsel %vm4583_vm5, %v3650_v4, %v1026_v7  ;;  %v1039_v62 = vsel %vm4583_vm5, %v3653_v48, %v1038_v53  ;;  %v3614_v7 = vld [vmem:[%s4531_s13 + $0x30] sm:$0xf]  ;;  %v3645_v44 = vld [vmem:[%s4531_s13 + $0x3c] sm:$0x1] }
  0x9f   : > { %v425_v22 = vpop.permute.xlu1 %424  ;;  %v3702_v23 = vld [vmem:[#allocation3 + $0x64] sm:$0xf0]  ;;  %1064 = vst.msk [vmem:[#allocation3 + $0x10] sm:$0xf] %vm270_vm6, %v1027_v16  ;;  %v3655_v48 = vrot.slane %v3644_v38, 9 }
  0xa0   : > { %442 = vst.msk [vmem:[#allocation3 + $0x8c] sm:$0xf] %vm434_vm7, %v425_v22  ;;  %v421_v25 = vpop.permute.xlu0 %420  ;;  %v3705_v26 = vor.u32 %v4172_v15, %v3702_v23  ;;  %v3700_v52 = vld [vmem:[#allocation3 + $0x50] sm:$0xf]  ;;  %v648_v22 = vshrl.u32 %v3578_v20, 16  ;;  %v651_v23 = vshll.u32 %v3578_v20, 16 }
  0xa1   : > { %440 = vst.msk [vmem:[#allocation3 + $0x64] sm:$0xf] %vm434_vm7, %v421_v25  ;;  %v3580_v25 = vld [vmem:[%s4531_s13 + $0x30] sm:$0xf]  ;;  %v3616_v53 = vld [vmem:[%s4531_s13 + $0x40] sm:$0xf] }
  0xa2   : > { %1548 = vmatmul.bf16.vlgmr.msra.gmra.mxu3 %v3705_v26  ;;  %v3579_v26 = vld [vmem:[%s4531_s13 + $0x2c] sm:$0x1]  ;;  %v662_v27 = vshrl.u32 %v3580_v25, 16  ;;  %v665_v29 = vshll.u32 %v3580_v25, 16  ;;  %1065 = vst.msk [vmem:[#allocation3 + $0x24] sm:$0xf] %vm270_vm6, %v1031_v19 }
  0xa3   : > { %v650_v30 = vrot.slane %v648_v22, 4  ;;  %v653_v31 = vrot.slane %v651_v23, 5  ;;  %v657_v32 = vshll.u32 %v3579_v26, 16  ;;  %1066 = vst.msk [vmem:[#allocation3 + $0x38] sm:$0xf] %vm270_vm6, %v1035_v60 }
  0xa4   : > { %v664_v36 = vrot.slane %v662_v27, 4  ;;  %v667_v37 = vrot.slane %v665_v29, 5  ;;  %1067 = vst.msk [vmem:[#allocation3 + $0x4c] sm:$0xf] %vm270_vm6, %v1039_v62  ;;  %v3585_v19 = vld [vmem:[%s4531_s13 + $0x44] sm:$0x1] }
  0xa5   : > { %v961_v45 = vpop.permute.xlu2 %960  ;;  %v4169_v12 = vld [vmem:[#allocation3 + $0x38] sm:$0xf0]  ;;  %v654_v40 = vor.u32 %v653_v31, %v650_v30  ;;  %v659_v41 = vrot.slane %v657_v32, 5  ;;  %828 = vst.msk [vmem:[#allocation3 + $0x5c] sm:$0xf] %vm270_vm6, %v3614_v7  ;;  %v699_v23 = vshll.u32 %v3585_v19, 16 }
  0xa6   : > { %984 = vst.msk [vmem:[#allocation3 + $0xc] sm:$0xf] %vm434_vm7, %v961_v45  ;;  %v668_v45 = vor.u32 %v667_v37, %v664_v36  ;;  %v3676_v63 = vld [vmem:[#allocation3 + $0x10] sm:$0xf]  ;;  %v3642_v29 = vld [vmem:[%s4531_s13 + $0x30] sm:$0xe] }
  0xa7   : > { %v415_v51 = vpop.permute.xlu1 %414  ;;  %v4179_v34 = vld [vmem:[#allocation3 + $0x88] sm:$0xf0]  ;;  %v3643_v30 = vld [vmem:[%s4531_s13 + $0x34] sm:$0x1]  ;;  %v701_v37 = vrot.slane %v699_v23, 5 }
  0xa8   : > { %437 = vst.msk [vmem:[#allocation3 + $0x28] sm:$0xf] %vm434_vm7, %v415_v51  ;;  %v423_v57 = vpop.permute.xlu0 %422  ;;  %v4174_v58 = vld [vmem:[#allocation3 + $0x60] sm:$0xf0]  ;;  %v655_v51 = vrot.slane %v654_v40, 4  ;;  %v669_v56 = vrot.slane %v668_v45, 4 }
  0xa9   : > { %441 = vst.msk [vmem:[#allocation3 + $0x78] sm:$0xf] %vm434_vm7, %v423_v57  ;;  %v3701_v61 = vor.u32 %v4174_v58, %v3700_v52  ;;  %v673_v52 = vrot.slane %v671_v42, 5  ;;  %v4166_v0 = vld [vmem:[#allocation3 + $0x20] sm:$0xf0] }
  0xaa   : > { %v660_v59 = vsel %vm4545_vm2, %v655_v51, %v659_v41  ;;  %v3677_v4 = vor.u32 %v4166_v0, %v3676_v63  ;;  %v1046_v51 = vrot.slane %v3645_v44, 5  ;;  %830 = vst.msk [vmem:[#allocation3 + $0x84] sm:$0xf] %vm270_vm6, %v3616_v53  ;;  %v3646_v62 = vld [vmem:[%s4531_s13 + $0x40] sm:$0xe] }
  0xab   : > { %1519 = vmatmul.bf16.vlgmr.msra.gmra.mxu2 %v3701_v61  ;;  %715 = vst.msk [vmem:[#allocation3 + $0x58] sm:$0xf] %vm270_vm6, %v660_v59  ;;  %v674_v61 = vsel %vm4545_vm2, %v669_v56, %v673_v52  ;;  %v4171_v52 = vld [vmem:[#allocation3 + $0x48] sm:$0xf0]  ;;  %v3617_v59 = vld [vmem:[%s4531_s13 + $0x48] sm:$0xf] }
  0xac   : > { %716 = vst.msk [vmem:[#allocation3 + $0x6c] sm:$0xf] %vm270_vm6, %v674_v61 }
  0xad   : > { %v546_v11 = vpop.permute.xlu2 %545  ;;  %v4163_v31 = vld [vmem:[#allocation3 + $0xc] sm:$0xf]  ;;  %831 = vst.msk [vmem:[#allocation3 + $0x98] sm:$0xf] %vm270_vm6, %v3617_v59  ;;  %v1701_v59 = vld [vmem:[#allocation2 + $0x14] sm:$0x1] }
  0xae   : > { %568 = vst.msk [vmem:[#allocation3 + $0x18] sm:$0xf] %vm434_vm7, %v546_v11  ;;  %v3583_v11 = vld [vmem:[%s4531_s13 + $0x3c] sm:$0x1] }
  0xaf   : > { %v786_v14 = vpop.permute.xlu1 %785  ;;  %v3680_v15 = vld [vmem:[#allocation3 + $0x28] sm:$0xf] }
  0xb0   : > { %808 = vst.msk [vmem:[#allocation3 + $0x1c] sm:$0xf] %vm434_vm7, %v786_v14  ;;  %v558_v17 = vpop.permute.xlu0 %557  ;;  %v3681_v18 = vor.u32 %v4169_v12, %v3680_v15  ;;  %v3720_v33 = vld [vmem:[#allocation3 + $0x78] sm:$0xf]  ;;  %v676_v12 = vshrl.u32 %v3582_v10, 16  ;;  %v685_v14 = vshll.u32 %v3583_v11, 16 }
  0xb1   : > { %574 = vst.msk [vmem:[#allocation3 + $0x90] sm:$0xf] %vm434_vm7, %v558_v17  ;;  %v3721_v57 = vor.u32 %v4179_v34, %v3720_v33  ;;  %v3584_v15 = vld [vmem:[%s4531_s13 + $0x40] sm:$0xf]  ;;  %v3654_v34 = vrot.slane %v3642_v29, 9 }
  0xb2   : > { %1514 = vmatmul.bf16.gmra.mxu0 %v3681_v18  ;;  %v678_v17 = vrot.slane %v676_v12, 4  ;;  %v681_v18 = vrot.slane %v679_v13, 5  ;;  %v690_v21 = vshrl.u32 %v3584_v15, 16  ;;  %v693_v22 = vshll.u32 %v3584_v15, 16 }
  0xb3   : > { %v687_v27 = vrot.slane %v685_v14, 5 }
  0xb4   : > { %v682_v26 = vor.u32 %v681_v18, %v678_v17  ;;  %v692_v32 = vrot.slane %v690_v21, 4  ;;  %v695_v33 = vrot.slane %v693_v22, 5 }
  0xb5   : > { %v965_v39 = vpop.permute.xlu2 %964  ;;  %v3662_v2 = vld [vmem:[#allocation3 + $0x14] sm:$0xf0] }
  0xb6   : > { %986 = vst.msk [vmem:[#allocation3 + $0x34] sm:$0xf] %vm434_vm7, %v965_v39  ;;  %v683_v36 = vrot.slane %v682_v26, 4  ;;  %v1042_v39 = vrot.slane %v3643_v30, 5  ;;  %v696_v43 = vor.u32 %v695_v33, %v692_v32 }
  0xb7   : > { %v544_v49 = vpop.permute.xlu1 %543  ;;  %v4165_v16 = vld [vmem:[#allocation3 + $0x18] sm:$0xf0] }
  0xb8   : > { %567 = vst.msk [vmem:[#allocation3 + $0x4] sm:$0xf] %vm434_vm7, %v544_v49  ;;  %v784_v54 = vpop.permute.xlu0 %783  ;;  %v3722_v55 = vld [vmem:[#allocation3 + $0x8c] sm:$0xf0]  ;;  %v688_v46 = vsel %vm4545_vm2, %v683_v36, %v687_v27  ;;  %v1043_v47 = vsel %vm4583_vm5, %v3654_v34, %v1042_v39  ;;  %v3696_v49 = vld [vmem:[#allocation3 + $0x38] sm:$0xf] }
  0xb9   : > { %807 = vst.msk [vmem:[#allocation3 + $0x8] sm:$0xf] %vm434_vm7, %v784_v54  ;;  %v3725_v58 = vor.u32 %v4177_v50, %v3722_v55  ;;  %v697_v50 = vrot.slane %v696_v43, 4  ;;  %v1047_v55 = vsel %vm4583_vm5, %v3655_v48, %v1046_v51  ;;  %v1698_v48 = vld [vmem:[#allocation2 + $0xc] sm:$0x1]  ;;  %v4440_v51 = vmov 0  }
  0xba   : > { %717 = vst.msk [vmem:[#allocation3 + $0x80] sm:$0xf] %vm270_vm6, %v688_v46 }
  0xbb   : > { %1524 = vmatmul.bf16.gmra.mxu2 %v3721_v57  ;;  %1553 = vmatmul.bf16.gmra.mxu3 %v3725_v58  ;;  %1068 = vst.msk [vmem:[#allocation3 + $0x60] sm:$0xf] %vm270_vm6, %v1043_v47  ;;  %v702_v54 = vsel %vm4545_vm2, %v697_v50, %v701_v37  ;;  %v3697_v58 = vor.u32 %v4171_v52, %v3696_v49  ;;  %v1666_v47 = vld [vmem:[#allocation2 + $0x8] sm:$0x1] }
  0xbc   : > { %718 = vst.msk [vmem:[#allocation3 + $0x94] sm:$0xf] %vm270_vm6, %v702_v54  ;;  %v1667_v52 = vsel %vm4983_vm12, 0, %v1666_v47  ;;  %v1699_v54 = vsel %vm4994_vm13, 0, %v1698_v48 }
  0xbd   : > { %v550_v3 = vpop.permute.xlu2 %549  ;;  %1069 = vst.msk [vmem:[#allocation3 + $0x74] sm:$0xf] %vm270_vm6, %v1047_v55 }
  0xbe   : > { %570 = vst.msk [vmem:[#allocation3 + $0x40] sm:$0xf] %vm434_vm7, %v550_v3  ;;  %v3649_v3 = vld [vmem:[%s4531_s13 + $0x4c] sm:$0x1] }
  0xbf   : > { %v790_v5 = vpop.permute.xlu1 %789  ;;  %v4162_v6 = vld [vmem:[#allocation3 + $0x4] sm:$0xf]  ;;  %v1054_v7 = vrot.slane %v3649_v3, 5  ;;  %1656 = vst.msk [vmem:[#allocation2 + $0x4] sm:$0x1] %vm1655_vm9, %v4440_v51 }
  0xc0   : > { %810 = vst.msk [vmem:[#allocation3 + $0x44] sm:$0xf] %vm434_vm7, %v790_v5  ;;  %v963_v8 = vpop.permute.xlu0 %962  ;;  %v3665_v9 = vor.u32 %v4162_v6, %v3662_v2  ;;  %v3668_v20 = vld [vmem:[#allocation3 + $0x8] sm:$0xf]  ;;  %v3648_v2 = vld [vmem:[%s4531_s13 + $0x48] sm:$0xe] }
  0xc1   : > { %985 = vst.msk [vmem:[#allocation3 + $0x20] sm:$0xf] %vm434_vm7, %v963_v8  ;;  %v3669_v41 = vor.u32 %v4165_v16, %v3668_v20  ;;  %v1050_v5 = vrot.slane %v3647_v1, 5  ;;  %v3657_v6 = vrot.slane %v3648_v2, 9  ;;  %v1672_v2 = vld [vmem:[#allocation2 + $0x18] sm:$0x1] }
  0xc2   : > { %1538 = vmatmul.bf16.vlgmr.msra.gmra.mxu1 %v3665_v9  ;;  %3882 = vmatmul.msk.bf16.vlgmr.msrb.gmra.mxu0 %vm1488_vm8, %v3677_v4  ;;  %v3656_v4 = vrot.slane %v3646_v62, 9  ;;  %v4168_v9 = vld [vmem:[#allocation3 + $0x34] sm:$0xf]  ;;  %v3716_v18 = vld [vmem:[#allocation3 + $0x60] sm:$0xf] }
  0xc3   : > { %v1055_v10 = vsel %vm4583_vm5, %v3657_v6, %v1054_v7  ;;  %1659 = vst.msk [vmem:[#allocation2 + $0x4c] sm:$0x1] %vm1655_vm9, %v4440_v51  ;;  %v1704_v3 = vld [vmem:[#allocation2 + $0x1c] sm:$0x1] }
  0xc4   : > { %v1051_v8 = vsel %vm4583_vm5, %v3656_v4, %v1050_v5  ;;  %1071 = vst.msk [vmem:[#allocation3 + $0x9c] sm:$0xf] %vm270_vm6, %v1055_v10  ;;  %v4176_v19 = vld [vmem:[#allocation3 + $0x70] sm:$0xf0]  ;;  %v5019_v4 = vld [vmem:[%s5740_s2] ss:$0 sm:$0xff] }
  0xc5   : > { %v969_v25 = vpop.permute.xlu2 %968  ;;  %v3682_v56 = vld [vmem:[#allocation3 + $0x3c] sm:$0xf0]  ;;  %1070 = vst.msk [vmem:[#allocation3 + $0x88] sm:$0xf] %vm270_vm6, %v1051_v8  ;;  %v3717_v20 = vor.u32 %v4176_v19, %v3716_v18  ;;  %v1673_v5 = vsel %vm4983_vm12, 0, %v1672_v2  ;;  %v1705_v6 = vsel %vm4994_vm13, 0, %v1704_v3 }
  0xc6   : > { %988 = vst.msk [vmem:[#allocation3 + $0x5c] sm:$0xf] %vm434_vm7, %v969_v25  ;;  %v1695_v10 = vld [vmem:[#allocation2 + $0x4] sm:$0x1] }
  0xc7   : > { %v548_v35 = vpop.permute.xlu1 %547  ;;  %v4170_v12 = vld [vmem:[#allocation3 + $0x40] sm:$0xf0]  ;;  %1668 = vst [vmem:[#allocation2 + $0x8] sm:$0x1] %v1667_v52  ;;  %v1707_v18 = vld [vmem:[#allocation2 + $0x24] sm:$0x1] }
  0xc8   : > { %569 = vst.msk [vmem:[#allocation3 + $0x2c] sm:$0xf] %vm434_vm7, %v548_v35  ;;  %v788_v40 = vpop.permute.xlu0 %787  ;;  %v3670_v42 = vld [vmem:[#allocation3 + $0x1c] sm:$0xf0] }
  0xc9   : > { %809 = vst.msk [vmem:[#allocation3 + $0x30] sm:$0xf] %vm434_vm7, %v788_v40  ;;  %v3673_v45 = vor.u32 %v4163_v31, %v3670_v42 }
  0xca   : > { %1700 = vst [vmem:[#allocation2 + $0xc] sm:$0x1] %v1699_v54 }
  0xcb   : > { %1567 = vmatmul.bf16.vlgmr.msrb.gmra.mxu2 %v3669_v41  ;;  %1596 = vmatmul.bf16.vlgmr.msrb.gmra.mxu3 %v3673_v45  ;;  %v4181_v33 = vld [vmem:[#allocation3 + $0x98] sm:$0xf0]  ;;  %1654 = vst.msk [vmem:[#allocation2] sm:$0xf] %vm270_vm6, %v4440_v51 }
  0xcc   : > { %v3736_v32 = vld [vmem:[#allocation3 + $0x88] sm:$0xf]  ;;  %1658 = vst.msk [vmem:[#allocation2 + $0x48] sm:$0xf] %vm270_vm6, %v4440_v51 }
  0xcd   : > { %v798_v57 = vpop.permute.xlu2 %797  ;;  %v4173_v26 = vld [vmem:[#allocation3 + $0x5c] sm:$0xf]  ;;  %v3737_v34 = vor.u32 %v4181_v33, %v3736_v32  ;;  %1674 = vst [vmem:[#allocation2 + $0x18] sm:$0x1] %v1673_v5 }
  0xce   : > { %814 = vst.msk [vmem:[#allocation3 + $0x94] sm:$0xf] %vm434_vm7, %v798_v57 }
  0xcf   : > { %v4167_v60 = vld [vmem:[#allocation3 + $0x2c] sm:$0xf]  ;;  %v794_v61 = vpop.permute.xlu1 %793  ;;  %1706 = vst [vmem:[#allocation2 + $0x1c] sm:$0x1] %v1705_v6  ;;  %v1816_v6 = vld [vmem:[#allocation2 + $0x8] sm:$0xf] }
  0xd0   : > { %v967_v63 = vpop.permute.xlu0 %966  ;;  %v3685_v0 = vor.u32 %v4167_v60, %v3682_v56  ;;  %812 = vst.msk [vmem:[#allocation3 + $0x6c] sm:$0xf] %vm434_vm7, %v794_v61  ;;  %v3688_v11 = vld [vmem:[#allocation3 + $0x30] sm:$0xf]  ;;  %v1702_v61 = vsel %vm4994_vm13, 0, %v1701_v59 }
  0xd1   : > { %987 = vst.msk [vmem:[#allocation3 + $0x48] sm:$0xf] %vm434_vm7, %v967_v63  ;;  %v3689_v16 = vor.u32 %v4170_v12, %v3688_v11  ;;  %v1696_v11 = vsel %vm4994_vm13, 0, %v1695_v10 }
  0xd2   : > { %1543 = vmatmul.bf16.gmra.mxu1 %v3685_v0  ;;  %3883 = vmatmul.msk.bf16.gmra.mxu0 %vm1488_vm8, %v3697_v58  ;;  %v1669_v58 = vld [vmem:[#allocation2 + $0x10] sm:$0x1]  ;;  %1703 = vst [vmem:[#allocation2 + $0x14] sm:$0x1] %v1702_v61  ;;  %v1663_v7 = vld [vmem:[#allocation2] sm:$0x1] }
  0xd3   : > { %v1670_v60 = vsel %vm4983_vm12, 0, %v1669_v58  ;;  %v1664_v8 = vsel %vm4983_vm12, 0, %v1663_v7  ;;  %1697 = vst [vmem:[#allocation2 + $0x4] sm:$0x1] %v1696_v11  ;;  %v1819_v7 = vld [vmem:[#allocation2 + $0xc] sm:$0x1] }
  0xd4   : > { %1671 = vst [vmem:[#allocation2 + $0x10] sm:$0x1] %v1670_v60 }
  0xd5   : > { %v4180_v38 = vld [vmem:[#allocation3 + $0x90] sm:$0xf0]  ;;  %1665 = vst [vmem:[#allocation2] sm:$0x1] %v1664_v8 }
  0xd7   : > { %v796_v13 = vpop.permute.xlu1 %795  ;;  %v4175_v25 = vld [vmem:[#allocation3 + $0x68] sm:$0xf0] }
  0xd8   : > { %v792_v14 = vpop.permute.xlu0 %791  ;;  %v3690_v15 = vld [vmem:[#allocation3 + $0x44] sm:$0xf0]  ;;  %813 = vst.msk [vmem:[#allocation3 + $0x80] sm:$0xf] %vm434_vm7, %v796_v13 }
  0xd9   : > { %811 = vst.msk [vmem:[#allocation3 + $0x58] sm:$0xf] %vm434_vm7, %v792_v14  ;;  %v3693_v17 = vor.u32 %v4168_v9, %v3690_v15 }
  0xdb   : > { %1572 = vmatmul.bf16.gmra.mxu2 %v3689_v16  ;;  %1601 = vmatmul.bf16.gmra.mxu3 %v3693_v17  ;;  %v1675_v17 = vld [vmem:[#allocation2 + $0x20] sm:$0x1] }
  0xdf   : > { %v975_v21 = vpop.permute.xlu1 %974  ;;  %v3728_v37 = vld [vmem:[#allocation3 + $0x80] sm:$0xf] }
  0xe0   : > { %v971_v22 = vpop.permute.xlu0 %970  ;;  %991 = vst.msk [vmem:[#allocation3 + $0x98] sm:$0xf] %vm434_vm7, %v975_v21  ;;  %v3708_v23 = vld [vmem:[#allocation3 + $0x58] sm:$0xf]  ;;  %v3729_v40 = vor.u32 %v4180_v38, %v3728_v37  ;;  %v1708_v21 = vsel %vm4994_vm13, 0, %v1707_v18 }
  0xe1   : > { %989 = vst.msk [vmem:[#allocation3 + $0x70] sm:$0xf] %vm434_vm7, %v971_v22  ;;  %v3709_v30 = vor.u32 %v4175_v25, %v3708_v23  ;;  %v1880_v23 = vld [vmem:[#allocation2] sm:$0xf]  ;;  %v1678_v38 = vld [vmem:[#allocation2 + $0x28] sm:$0x1] }
  0xe2   : > { %3884 = vmatmul.msk.bf16.gmra.mxu0 %vm1488_vm8, %v3717_v20  ;;  %v1676_v20 = vsel %vm4983_vm12, 0, %v1675_v17  ;;  %1709 = vst [vmem:[#allocation2 + $0x24] sm:$0x1] %v1708_v21  ;;  %v1897_v25 = vshrl.u32 %v1880_v23, 16  ;;  %v1679_v51 = vsel %vm4983_vm12, 0, %v1678_v38 }
  0xe3   : > { %1677 = vst [vmem:[#allocation2 + $0x20] sm:$0x1] %v1676_v20 }
  0xe4   : > { %1680 = vst [vmem:[#allocation2 + $0x28] sm:$0x1] %v1679_v51 }
  0xe7   : > { %v3730_v36 = vld [vmem:[#allocation3 + $0x94] sm:$0xf0] }
  0xe8   : > { %v3710_v27 = vld [vmem:[#allocation3 + $0x6c] sm:$0xf0]  ;;  %v973_v29 = vpop.permute.xlu0 %972 }
  0xe9   : > { %v3713_v31 = vor.u32 %v4173_v26, %v3710_v27  ;;  %990 = vst.msk [vmem:[#allocation3 + $0x84] sm:$0xf] %vm434_vm7, %v973_v29  ;;  %v1900_v26 = vshll.u32 %v1880_v23, 16 }
  0xeb   : > { %1577 = vmatmul.bf16.gmra.mxu2 %v3709_v30  ;;  %1606 = vmatmul.bf16.gmra.mxu3 %v3713_v31  ;;  %v1881_v30 = vld [vmem:[#allocation2 + $0x4] sm:$0x1]  ;;  %v1899_v31 = vrot.slane %v1897_v25, 4  ;;  %v1902_v32 = vrot.slane %v1900_v26, 5 }
  0xf0   : > { %v4178_v35 = vld [vmem:[#allocation3 + $0x84] sm:$0xf] }
  0xf1   : > { %v3733_v39 = vor.u32 %v4178_v35, %v3730_v36  ;;  %v1906_v35 = vshll.u32 %v1881_v30, 16 }
  0xf2   : > { %3885 = vmatmul.msk.bf16.gmra.mxu0 %vm1488_vm8, %v3737_v34 }
  0xf3   : > { %v1908_v58 = vrot.slane %v1906_v35, 5 }
  0xfb   : > { %1582 = vmatmul.bf16.gmra.mxu2 %v3729_v40  ;;  %1611 = vmatmul.bf16.gmra.mxu3 %v3733_v39  ;;  %v1710_v39 = vld [vmem:[#allocation2 + $0x2c] sm:$0x1]  ;;  %v1903_v40 = vor.u32 %v1902_v32, %v1899_v31  ;;  %v1822_v31 = vld [vmem:[#allocation2 + $0x10] sm:$0xf]  ;;  %v1825_v32 = vld [vmem:[#allocation2 + $0x14] sm:$0x1] }
  0xfd   : > { %v1904_v54 = vrot.slane %v1903_v40, 4 }
  0xff   : > { %v1909_v61 = vsel %vm4545_vm2, %v1904_v54, %v1908_v58 }
 0x100   : > { %2008 = vrot.lane.b32.xlu2 %v1909_v61, %s4439_s14 }
 0x115   : > { %v1510_v41 = vpop.f32.mrf.mxu0 }
 0x116   : > { %v1511_v9 = vadd.f32 %v5019_v4, %v1510_v41 }
 0x11d   : > { %v4975_v42 = vpop.f32.mrf.mxu0 }
 0x11e   : > { %v1513_v27 = vadd.f32 %v5019_v4, %v4975_v42  ;;  %v1711_v42 = vsel %vm4994_vm13, 0, %v1710_v39 }
 0x11f   : > { %1712 = vst [vmem:[#allocation2 + $0x2c] sm:$0x1] %v1711_v42 }
 0x125   : > { %v4977_v43 = vpop.f32.mrf.mxu3 }
 0x12d   : > { %v4987_v49 = vpop.f32.mrf.mxu3 }
 0x12e   : > { %v4979_v44 = vpop.f32.mrf.mxu2 }
 0x12f   : > { %v4981_v45 = vpop.f32.mrf.mxu0 }
 0x136   : > { %v4989_v50 = vpop.f32.mrf.mxu2 }
 0x137   : > { %v5001_v55 = vpop.f32.mrf.mxu0 }
 0x138   : > { %v1518_v26 = vadd.f32 %v5019_v4, %v5001_v55 }
 0x13e   : > { %v5004_v56 = vpop.f32.mrf.mxu2  ;;  %v5006_v57 = vpop.f32.mrf.mxu3 }
 0x13f   : > { %v1539_v62 = vpop.f32.mrf.mxu1  ;;  %v1626_v63 = vpop.f32.mrf.mxu0 }
 0x140   : > { %v1540_v12 = vadd.f32 %v1539_v62, %v1511_v9  ;;  %v1516_v62 = vadd.f32 %v5019_v4, %v4981_v45  ;;  %v1681_v45 = vld [vmem:[#allocation2 + $0x30] sm:$0x1] }
 0x146   : > { %v5012_v0 = vpop.f32.mrf.mxu2  ;;  %v5014_v1 = vpop.f32.mrf.mxu3 }
 0x147   : > { %v1541_v13 = vpop.f32.mrf.mxu1  ;;  %v1628_v14 = vpop.f32.mrf.mxu0 }
 0x148   : > { %v1542_v33 = vadd.f32 %v1541_v13, %v1513_v27 }
 0x14e   : > { %v1568_v15 = vpop.f32.mrf.mxu2  ;;  %v1597_v16 = vpop.f32.mrf.mxu3 }
 0x14f   : > { %v1569_v19 = vadd.f32 %v1568_v15, %v1540_v12  ;;  %v1631_v48 = vpop.f32.mrf.mxu0  ;;  %v1544_v52 = vpop.f32.mrf.mxu1  ;;  %v1713_v15 = vld [vmem:[#allocation2 + $0x34] sm:$0x1] }
 0x150   : > { %v1545_v10 = vadd.f32 %v1544_v52, %v1516_v62  ;;  %v1714_v20 = vsel %vm4994_vm13, 0, %v1713_v15  ;;  %v1521_v52 = vadd.f32 %v5019_v4, %v4979_v44 }
 0x151   : > { %v1598_v22 = vadd.f32 %v1597_v16, %v1569_v19  ;;  %v1682_v19 = vsel %vm4983_vm12, 0, %v1681_v45  ;;  %1715 = vst [vmem:[#allocation2 + $0x34] sm:$0x1] %v1714_v20 }
 0x152   : > { %1683 = vst [vmem:[#allocation2 + $0x30] sm:$0x1] %v1682_v19  ;;  %v1550_v15 = vadd.f32 %v4977_v43, %v1521_v52 }
 0x153   : > { %v1627_v29 = vadd.f32 %v1626_v63, %v1598_v22 }
 0x155   : > { %v1646_v34 = vmax.f32 %v1627_v29, 0.0 }
 0x156   : > { %v1570_v36 = vpop.f32.mrf.mxu2  ;;  %v1599_v37 = vpop.f32.mrf.mxu3 }
 0x157   : > { %v1725_v41 = vpack.c.bf16 %v1646_v34, %v1646_v34  ;;  %v1571_v47 = vadd.f32 %v1570_v36, %v1542_v33  ;;  %v1633_v23 = vpop.f32.mrf.mxu0  ;;  %v1546_v25 = vpop.f32.mrf.mxu1 }
 0x158   : > { %v1547_v35 = vadd.f32 %v1546_v25, %v1518_v26  ;;  %v1523_v26 = vadd.f32 %v5019_v4, %v4989_v50 }
 0x159   : > { %v1734_v59 = vshrl.u32 %v1725_v41, 16  ;;  %v1600_v60 = vadd.f32 %v1599_v37, %v1571_v47  ;;  %v1737_v2 = vshll.u32 %v1725_v41, 16 }
 0x15a   : > { %v1552_v52 = vadd.f32 %v4987_v49, %v1523_v26 }
 0x15b   : > { %v1736_v63 = vrot.slane %v1734_v59, 7  ;;  %v1629_v3 = vadd.f32 %v1628_v14, %v1600_v60 }
 0x15d   : > { %v1739_v8 = vor.u32 %v1737_v2, %v1736_v63  ;;  %v1740_v9 = vrot.slane %v1736_v63, 4  ;;  %v1647_v11 = vmax.f32 %v1629_v3, 0.0 }
 0x15e   : > { %v1573_v12 = vpop.f32.mrf.mxu2  ;;  %v1602_v13 = vpop.f32.mrf.mxu3 }
 0x15f   : > { %v1817_v14 = vsel %vm5047_vm14, %v1739_v8, %v1816_v6  ;;  %v1820_v16 = vsel %vm4983_vm12, %v1740_v9, %v1819_v7  ;;  %v1726_v17 = vpack.c.bf16 %v1647_v11, %v1647_v11  ;;  %v1574_v18 = vadd.f32 %v1573_v12, %v1545_v10  ;;  %v1636_v3 = vpop.f32.mrf.mxu0  ;;  %v1684_v6 = vld [vmem:[#allocation2 + $0x38] sm:$0x1]  ;;  %v1716_v7 = vld [vmem:[#allocation2 + $0x3c] sm:$0x1] }
 0x160   : > { %1818 = vst [vmem:[#allocation2 + $0x8] sm:$0xf] %v1817_v14  ;;  %v1828_v8 = vld [vmem:[#allocation2 + $0x18] sm:$0xf]  ;;  %v1831_v9 = vld [vmem:[#allocation2 + $0x1c] sm:$0x1] }
 0x161   : > { %1821 = vst [vmem:[#allocation2 + $0xc] sm:$0x1] %v1820_v16  ;;  %v1742_v21 = vshrl.u32 %v1726_v17, 16  ;;  %v1603_v22 = vadd.f32 %v1602_v13, %v1574_v18  ;;  %v1745_v29 = vshll.u32 %v1726_v17, 16  ;;  %v1685_v11 = vsel %vm4983_vm12, 0, %v1684_v6 }
 0x162   : > { %v1717_v44 = vsel %vm4994_vm13, 0, %v1716_v7  ;;  %1686 = vst [vmem:[#allocation2 + $0x38] sm:$0x1] %v1685_v11  ;;  %v1526_v7 = vadd.f32 %v5019_v4, %v5004_v56 }
 0x163   : > { %v1744_v27 = vrot.slane %v1742_v21, 7  ;;  %v1632_v30 = vadd.f32 %v1631_v48, %v1603_v22  ;;  %1718 = vst [vmem:[#allocation2 + $0x3c] sm:$0x1] %v1717_v44 }
 0x164   : > { %v1555_v56 = vadd.f32 %v5006_v57, %v1526_v7 }
 0x165   : > { %v1747_v33 = vor.u32 %v1745_v29, %v1744_v27  ;;  %v1748_v34 = vrot.slane %v1744_v27, 4  ;;  %v1648_v36 = vmax.f32 %v1632_v30, 0.0  ;;  %v1834_v30 = vld [vmem:[#allocation2 + $0x20] sm:$0xf] }
 0x166   : > { %v1575_v37 = vpop.f32.mrf.mxu2  ;;  %v1604_v38 = vpop.f32.mrf.mxu3 }
 0x167   : > { %v1823_v39 = vsel %vm5047_vm14, %v1747_v33, %v1822_v31  ;;  %v1826_v40 = vsel %vm4983_vm12, %v1748_v34, %v1825_v32  ;;  %v1727_v41 = vpack.c.bf16 %v1648_v36, %v1648_v36  ;;  %v1576_v55 = vadd.f32 %v1575_v37, %v1547_v35  ;;  %v1882_v47 = vld [vmem:[#allocation2 + $0x8] sm:$0xf]  ;;  %v1837_v31 = vld [vmem:[#allocation2 + $0x24] sm:$0x1]  ;;  %v1687_v35 = vld [vmem:[#allocation2 + $0x40] sm:$0x1] }
 0x168   : > { %1824 = vst [vmem:[#allocation2 + $0x10] sm:$0xf] %v1823_v39  ;;  %v1883_v48 = vld [vmem:[#allocation2 + $0xc] sm:$0x1]  ;;  %v1911_v51 = vshrl.u32 %v1882_v47, 16  ;;  %v1914_v42 = vshll.u32 %v1882_v47, 16 }
 0x169   : > { %1827 = vst [vmem:[#allocation2 + $0x14] sm:$0x1] %v1826_v40  ;;  %v1750_v54 = vshrl.u32 %v1727_v41, 16  ;;  %v1605_v58 = vadd.f32 %v1604_v38, %v1576_v55  ;;  %v1920_v61 = vshll.u32 %v1883_v48, 16  ;;  %v1753_v63 = vshll.u32 %v1727_v41, 16 }
 0x16a   : > { %v1913_v59 = vrot.slane %v1911_v51, 4  ;;  %v1916_v60 = vrot.slane %v1914_v42, 5  ;;  %v1688_v39 = vsel %vm4983_vm12, 0, %v1687_v35  ;;  %v1719_v40 = vld [vmem:[#allocation2 + $0x44] sm:$0x1]  ;;  %v1638_v42 = vpop.f32.mrf.mxu0 }
 0x16b   : > { %v1752_v62 = vrot.slane %v1750_v54, 7  ;;  %v1634_v2 = vadd.f32 %v1633_v23, %v1605_v58  ;;  %v1922_v18 = vrot.slane %v1920_v61, 5  ;;  %1689 = vst [vmem:[#allocation2 + $0x40] sm:$0x1] %v1688_v39  ;;  %v1720_v55 = vsel %vm4994_vm13, 0, %v1719_v40 }
 0x16c   : > { %v1917_v10 = vor.u32 %v1916_v60, %v1913_v59  ;;  %1721 = vst [vmem:[#allocation2 + $0x44] sm:$0x1] %v1720_v55  ;;  %v5106_v55 = vld [vmem:[#allocation2 + $0xc] sm:$0x1] }
 0x16d   : > { %v1755_v12 = vor.u32 %v1753_v63, %v1752_v62  ;;  %v1756_v13 = vrot.slane %v1752_v62, 4  ;;  %v1649_v45 = vmax.f32 %v1634_v2, 0.0  ;;  %v2346_v7 = vrot.slane %v5106_v55, 5 }
 0x16e   : > { %v1578_v14 = vpop.f32.mrf.mxu2  ;;  %v1607_v16 = vpop.f32.mrf.mxu3  ;;  %v1918_v17 = vrot.slane %v1917_v10, 4 }
 0x16f   : > { %v1829_v19 = vsel %vm5047_vm14, %v1755_v12, %v1828_v8  ;;  %v1832_v20 = vsel %vm4983_vm12, %v1756_v13, %v1831_v9  ;;  %v1728_v21 = vpack.c.bf16 %v1649_v45, %v1649_v45  ;;  %v1579_v22 = vadd.f32 %v1578_v14, %v1550_v15  ;;  %v1884_v23 = vld [vmem:[#allocation2 + $0x10] sm:$0xf]  ;;  %v1840_v14 = vld [vmem:[#allocation2 + $0x28] sm:$0xf] }
 0x170   : > { %1830 = vst [vmem:[#allocation2 + $0x18] sm:$0xf] %v1829_v19  ;;  %v1923_v25 = vsel %vm4545_vm2, %v1918_v17, %v1922_v18  ;;  %v1925_v43 = vshrl.u32 %v1884_v23, 16  ;;  %v1885_v32 = vld [vmem:[#allocation2 + $0x14] sm:$0x1]  ;;  %v1928_v34 = vshll.u32 %v1884_v23, 16 }
 0x171   : > { %1833 = vst [vmem:[#allocation2 + $0x1c] sm:$0x1] %v1832_v20  ;;  %v1758_v27 = vshrl.u32 %v1728_v21, 16  ;;  %v1608_v29 = vadd.f32 %v1607_v16, %v1579_v22  ;;  %2010 = vrot.lane.b32.xlu0 %v1923_v25, %s4439_s14  ;;  %v1761_v37 = vshll.u32 %v1728_v21, 16  ;;  %v1934_v50 = vshll.u32 %v1885_v32, 16 }
 0x172   : > { %v1927_v33 = vrot.slane %v1925_v43, 4  ;;  %v1930_v41 = vrot.slane %v1928_v34, 5  ;;  %v1843_v16 = vld [vmem:[#allocation2 + $0x2c] sm:$0x1]  ;;  %v1528_v32 = vadd.f32 %v5019_v4, %v5012_v0  ;;  %v1641_v57 = vpop.f32.mrf.mxu0 }
 0x173   : > { %v1760_v36 = vrot.slane %v1758_v27, 7  ;;  %v1637_v38 = vadd.f32 %v1636_v3, %v1608_v29  ;;  %v1936_v6 = vrot.slane %v1934_v50, 5  ;;  %v5104_v50 = vld [vmem:[#allocation2 + $0x8] sm:$0xe] }
 0x174   : > { %v1931_v59 = vor.u32 %v1930_v41, %v1927_v33 }
 0x175   : > { %v1763_v47 = vor.u32 %v1761_v37, %v1760_v36  ;;  %v1764_v48 = vrot.slane %v1760_v36, 4  ;;  %v1650_v51 = vmax.f32 %v1637_v38, 0.0 }
 0x176   : > { %v1580_v54 = vpop.f32.mrf.mxu2  ;;  %v1609_v58 = vpop.f32.mrf.mxu3  ;;  %v1932_v3 = vrot.slane %v1931_v59, 4 }
 0x177   : > { %v1835_v60 = vsel %vm5047_vm14, %v1763_v47, %v1834_v30  ;;  %v1838_v61 = vsel %vm4983_vm12, %v1764_v48, %v1837_v31  ;;  %v1729_v62 = vpack.c.bf16 %v1650_v51, %v1650_v51  ;;  %v1581_v63 = vadd.f32 %v1580_v54, %v1552_v52  ;;  %v1886_v2 = vld [vmem:[#allocation2 + $0x18] sm:$0xf]  ;;  %v5108_v47 = vld [vmem:[#allocation2 + $0x10] sm:$0xe]  ;;  %v1849_v54 = vld [vmem:[#allocation2 + $0x34] sm:$0x1] }
 0x178   : > { %1836 = vst [vmem:[#allocation2 + $0x20] sm:$0xf] %v1835_v60  ;;  %v1937_v9 = vsel %vm4545_vm2, %v1932_v3, %v1936_v6  ;;  %v1887_v10 = vld [vmem:[#allocation2 + $0x1c] sm:$0x1]  ;;  %v1939_v11 = vshrl.u32 %v1886_v2, 16  ;;  %v1942_v44 = vshll.u32 %v1886_v2, 16 }
 0x179   : > { %1839 = vst [vmem:[#allocation2 + $0x24] sm:$0x1] %v1838_v61  ;;  %v1766_v49 = vshrl.u32 %v1729_v62, 16  ;;  %v1610_v8 = vadd.f32 %v1609_v58, %v1581_v63  ;;  %v1769_v13 = vshll.u32 %v1729_v62, 16  ;;  %2012 = vrot.lane.b32.xlu1 %v1937_v9, %s4439_s14  ;;  %v1948_v15 = vshll.u32 %v1887_v10, 16 }
 0x17a   : > { %v1941_v17 = vrot.slane %v1939_v11, 4  ;;  %v1944_v18 = vrot.slane %v1942_v44, 5  ;;  %v1846_v52 = vld [vmem:[#allocation2 + $0x30] sm:$0xf]  ;;  %v3902_v62 = vrot.slane %v5108_v47, 9  ;;  %v3894_v6 = vrot.slane %v5104_v50, 9 }
 0x17b   : > { %v1768_v12 = vrot.slane %v1766_v49, 7  ;;  %v1639_v45 = vadd.f32 %v1638_v42, %v1610_v8  ;;  %v1950_v43 = vrot.slane %v1948_v15, 5  ;;  %v1557_v42 = vadd.f32 %v5014_v1, %v1528_v32  ;;  %v2425_v3 = vld [vmem:[#allocation2 + $0x10] sm:$0xf]  ;;  %v4245_v50 = vld [vmem:[%s5741_s3 + $0x38] sm:$0xff] }
 0x17c   : > { %v1945_v25 = vor.u32 %v1944_v18, %v1941_v17  ;;  %v1643_v17 = vpop.f32.mrf.mxu0  ;;  %3237 = vmatpush.bf16.msrb.mxu1 %v4245_v50 }
 0x17d   : > { %v1771_v19 = vor.u32 %v1769_v13, %v1768_v12  ;;  %v1772_v20 = vrot.slane %v1768_v12, 4  ;;  %v1651_v21 = vmax.f32 %v1639_v45, 0.0 }
 0x17e   : > { %v1583_v22 = vpop.f32.mrf.mxu2  ;;  %v1612_v23 = vpop.f32.mrf.mxu3  ;;  %v1946_v33 = vrot.slane %v1945_v25, 4 }
 0x17f   : > { %v1841_v26 = vsel %vm5047_vm14, %v1771_v19, %v1840_v14  ;;  %v1844_v27 = vsel %vm4983_vm12, %v1772_v20, %v1843_v16  ;;  %v1730_v29 = vpack.c.bf16 %v1651_v21, %v1651_v21  ;;  %v1584_v30 = vadd.f32 %v1583_v22, %v1555_v56  ;;  %v1888_v31 = vld [vmem:[#allocation2 + $0x20] sm:$0xf]  ;;  %v1865_v21 = vld [vmem:[#allocation2 + $0x8] sm:$0xf]  ;;  %v5121_v22 = vld [vmem:[#allocation2 + $0x14] sm:$0x1] }
 0x180   : > { %1842 = vst [vmem:[#allocation2 + $0x28] sm:$0xf] %v1841_v26  ;;  %v1889_v34 = vld [vmem:[#allocation2 + $0x24] sm:$0x1]  ;;  %v1953_v35 = vshrl.u32 %v1888_v31, 16  ;;  %v1956_v38 = vshll.u32 %v1888_v31, 16  ;;  %v1951_v39 = vsel %vm4545_vm2, %v1946_v33, %v1950_v43 }
 0x181   : > { %1845 = vst [vmem:[#allocation2 + $0x2c] sm:$0x1] %v1844_v27  ;;  %v1774_v36 = vshrl.u32 %v1730_v29, 16  ;;  %v1613_v37 = vadd.f32 %v1612_v23, %v1584_v30  ;;  %v1962_v41 = vshll.u32 %v1889_v34, 16  ;;  %v1777_v4 = vshll.u32 %v1730_v29, 16  ;;  %2014 = vrot.lane.b32.xlu2 %v1951_v39, %s4439_s14 }
 0x182   : > { %v1955_v40 = vrot.slane %v1953_v35, 4  ;;  %v1958_v51 = vrot.slane %v1956_v38, 5  ;;  %v2442_v16 = vshrl.u32 %v2425_v3, 16  ;;  %v2445_v20 = vshll.u32 %v2425_v3, 16  ;;  %v5124_v27 = vld [vmem:[#allocation2 + $0x18] sm:$0xe] }
 0x183   : > { %v1776_v0 = vrot.slane %v1774_v36, 7  ;;  %v1642_v48 = vadd.f32 %v1641_v57, %v1613_v37  ;;  %v1964_v2 = vrot.slane %v1962_v41, 5  ;;  %v1852_v29 = vld [vmem:[#allocation2 + $0x38] sm:$0xf]  ;;  %v1855_v30 = vld [vmem:[#allocation2 + $0x3c] sm:$0x1] }
 0x184   : > { %v1959_v61 = vor.u32 %v1958_v51, %v1955_v40  ;;  %v1867_v34 = vld [vmem:[#allocation2 + $0x18] sm:$0xf]  ;;  %1873 = vst.msk [vmem:[#allocation4 + $0x14] sm:$0xf] %vm270_vm6, %v1865_v21  ;;  %v2619_v35 = vrot.slane %v5121_v22, 5  ;;  %v2444_v37 = vrot.slane %v2442_v16, 4 }
 0x185   : > { %v1779_v58 = vor.u32 %v1777_v4, %v1776_v0  ;;  %v1780_v59 = vrot.slane %v1776_v0, 4  ;;  %v1652_v60 = vmax.f32 %v1642_v48, 0.0  ;;  %v2447_v38 = vrot.slane %v2445_v20, 5  ;;  %1875 = vst.msk [vmem:[#allocation4 + $0x3c] sm:$0xf] %vm270_vm6, %v1867_v34 }
 0x186   : > { %v1585_v63 = vpop.f32.mrf.mxu2  ;;  %v1614_v11 = vpop.f32.mrf.mxu3  ;;  %v1960_v44 = vrot.slane %v1959_v61, 4  ;;  %v5133_v48 = vld [vmem:[#allocation2 + $0x10] sm:$0xe]  ;;  %v2427_v51 = vld [vmem:[#allocation2 + $0x18] sm:$0xf] }
 0x187   : > { %v1847_v49 = vsel %vm5047_vm14, %v1779_v58, %v1846_v52  ;;  %v1850_v1 = vsel %vm4983_vm12, %v1780_v59, %v1849_v54  ;;  %v1731_v8 = vpack.c.bf16 %v1652_v60, %v1652_v60  ;;  %v1586_v9 = vadd.f32 %v1585_v63, %v1557_v42  ;;  %v1890_v10 = vld [vmem:[#allocation2 + $0x28] sm:$0xf]  ;;  %v5135_v58 = vld [vmem:[#allocation2 + $0x1c] sm:$0x1]  ;;  %v2430_v5 = vld [vmem:[#allocation2 + $0x24] sm:$0x1] }
 0x188   : > { %1848 = vst [vmem:[#allocation2 + $0x30] sm:$0xf] %v1847_v49  ;;  %v1891_v12 = vld [vmem:[#allocation2 + $0x2c] sm:$0x1]  ;;  %v1967_v13 = vshrl.u32 %v1890_v10, 16  ;;  %v1970_v14 = vshll.u32 %v1890_v10, 16  ;;  %v1965_v18 = vsel %vm4545_vm2, %v1960_v44, %v1964_v2  ;;  %v2448_v49 = vor.u32 %v2447_v38, %v2444_v37 }
 0x189   : > { %1851 = vst [vmem:[#allocation2 + $0x34] sm:$0x1] %v1850_v1  ;;  %v1782_v45 = vshrl.u32 %v1731_v8, 16  ;;  %v1615_v15 = vadd.f32 %v1614_v11, %v1586_v9  ;;  %v1976_v19 = vshll.u32 %v1891_v12, 16  ;;  %v1785_v25 = vshll.u32 %v1731_v8, 16  ;;  %2016 = vrot.lane.b32.xlu0 %v1965_v18, %s4439_s14 }
 0x18a   : > { %v1969_v56 = vrot.slane %v1967_v13, 4  ;;  %v1972_v26 = vrot.slane %v1970_v14, 5  ;;  %v3903_v59 = vrot.slane %v5124_v27, 9  ;;  %v2429_v1 = vld [vmem:[#allocation2 + $0x20] sm:$0xf]  ;;  %v2456_v11 = vshrl.u32 %v2427_v51, 16 }
 0x18b   : > { %v1784_v23 = vrot.slane %v1782_v45, 7  ;;  %v1644_v43 = vadd.f32 %v1643_v17, %v1615_v15  ;;  %v1978_v36 = vrot.slane %v1976_v19, 5  ;;  %v2315_v10 = vld [vmem:[#allocation2 + $0x14] sm:$0x1]  ;;  %v2459_v44 = vshll.u32 %v2427_v51, 16 }
 0x18c   : > { %v1973_v33 = vor.u32 %v1972_v26, %v1969_v56  ;;  %v2623_v12 = vrot.slane %v5135_v58, 5  ;;  %v1858_v13 = vld [vmem:[#allocation2 + $0x40] sm:$0xf]  ;;  %v1861_v45 = vld [vmem:[#allocation2 + $0x44] sm:$0x1]  ;;  %v3895_v14 = vrot.slane %v5133_v48, 9 }
 0x18d   : > { %v1787_v31 = vor.u32 %v1785_v25, %v1784_v23  ;;  %v1788_v32 = vrot.slane %v1784_v23, 4  ;;  %v1653_v57 = vmax.f32 %v1644_v43, 0.0  ;;  %v2426_v18 = vld [vmem:[#allocation2 + $0x14] sm:$0x1]  ;;  %v2470_v56 = vshrl.u32 %v2429_v1, 16 }
 0x18e   : > { %v1974_v0 = vrot.slane %v1973_v33, 4  ;;  %v2473_v19 = vshll.u32 %v2429_v1, 16  ;;  %v2350_v23 = vrot.slane %v2315_v10, 5  ;;  %v5143_v25 = vrot.slane %v2448_v49, 4  ;;  %v5145_v43 = vld [vmem:[#allocation2 + $0x20] sm:$0xe] }
 0x18f   : > { %v1853_v39 = vsel %vm5047_vm14, %v1787_v31, %v1852_v29  ;;  %v1856_v40 = vsel %vm4983_vm12, %v1788_v32, %v1855_v30  ;;  %v1732_v41 = vpack.c.bf16 %v1653_v57, %v1653_v57  ;;  %v1892_v4 = vld [vmem:[#allocation2 + $0x30] sm:$0xf]  ;;  %v5147_v26 = vld [vmem:[#allocation2 + $0x24] sm:$0x1]  ;;  %v2120_v31 = vld [vmem:[#allocation2 + $0x8] sm:$0xf] }
 0x190   : > { %1854 = vst [vmem:[#allocation2 + $0x38] sm:$0xf] %v1853_v39  ;;  %v1893_v42 = vld [vmem:[#allocation2 + $0x34] sm:$0x1]  ;;  %v1981_v52 = vshrl.u32 %v1892_v4, 16  ;;  %v1984_v54 = vshll.u32 %v1892_v4, 16  ;;  %v1979_v61 = vsel %vm4545_vm2, %v1974_v0, %v1978_v36 }
 0x191   : > { %1857 = vst [vmem:[#allocation2 + $0x3c] sm:$0x1] %v1856_v40  ;;  %v1790_v60 = vshrl.u32 %v1732_v41, 16  ;;  %2018 = vrot.lane.b32.xlu1 %v1979_v61, %s4439_s14  ;;  %v1990_v3 = vshll.u32 %v1893_v42, 16  ;;  %v1793_v9 = vshll.u32 %v1732_v41, 16  ;;  %v2458_v33 = vrot.slane %v2456_v11, 4 }
 0x192   : > { %v1983_v63 = vrot.slane %v1981_v52, 4  ;;  %v1986_v2 = vrot.slane %v1984_v54, 5  ;;  %v2428_v57 = vld [vmem:[#allocation2 + $0x1c] sm:$0x1]  ;;  %v2461_v34 = vrot.slane %v2459_v44, 5  ;;  %v2472_v41 = vrot.slane %v2470_v56, 4 }
 0x193   : > { %v1792_v8 = vrot.slane %v1790_v60, 7  ;;  %v1992_v21 = vrot.slane %v1990_v3, 5  ;;  %v2431_v36 = vld [vmem:[#allocation2 + $0x28] sm:$0xf]  ;;  %v2475_v0 = vrot.slane %v2473_v19, 5  ;;  %v2451_v42 = vshll.u32 %v2426_v18, 16 }
 0x194   : > { %v1987_v15 = vor.u32 %v1986_v2, %v1983_v63  ;;  %v3897_v52 = vrot.slane %v5145_v43, 9  ;;  %v2358_v54 = vrot.slane %v5147_v26, 5  ;;  %v2484_v60 = vshrl.u32 %v2431_v36, 16  ;;  %v1866_v63 = vld [vmem:[#allocation2 + $0x10] sm:$0xf] }
 0x195   : > { %v1795_v16 = vor.u32 %v1793_v9, %v1792_v8  ;;  %v1796_v17 = vrot.slane %v1792_v8, 4  ;;  %v2487_v61 = vshll.u32 %v2431_v36, 16  ;;  %v2462_v3 = vor.u32 %v2461_v34, %v2458_v33  ;;  %v5159_v8 = vld [vmem:[#allocation2 + $0x18] sm:$0xe]  ;;  %v2432_v9 = vld [vmem:[#allocation2 + $0x2c] sm:$0x1] }
 0x196   : > { %v1988_v20 = vrot.slane %v1987_v15, 4  ;;  %v2465_v49 = vshll.u32 %v2428_v57, 16  ;;  %v2479_v1 = vshll.u32 %v2430_v5, 16  ;;  %v2476_v10 = vor.u32 %v2475_v0, %v2472_v41  ;;  %v5161_v11 = vld [vmem:[#allocation2 + $0x1c] sm:$0x1] }
 0x197   : > { %v1859_v29 = vsel %vm5047_vm14, %v1795_v16, %v1858_v13  ;;  %v1862_v30 = vsel %vm4983_vm12, %v1796_v17, %v1861_v45  ;;  %v1894_v32 = vld [vmem:[#allocation2 + $0x38] sm:$0xf]  ;;  %v5163_v44 = vld [vmem:[#allocation2 + $0x30] sm:$0xe]  ;;  %v5165_v13 = vld [vmem:[#allocation2 + $0x34] sm:$0x1]  ;;  %v2351_v16 = vsel %vm4583_vm5, %v3895_v14, %v2350_v23 }
 0x198   : > { %1860 = vst [vmem:[#allocation2 + $0x40] sm:$0xf] %v1859_v29  ;;  %v1993_v37 = vsel %vm4545_vm2, %v1988_v20, %v1992_v21  ;;  %v1895_v38 = vld [vmem:[#allocation2 + $0x3c] sm:$0x1]  ;;  %v1995_v39 = vshrl.u32 %v1894_v32, 16  ;;  %v1998_v40 = vshll.u32 %v1894_v32, 16 }
 0x199   : > { %1863 = vst [vmem:[#allocation2 + $0x44] sm:$0x1] %v1862_v30  ;;  %2020 = vrot.lane.b32.xlu2 %v1993_v37, %s4439_s14  ;;  %2136 = vrot.lane.b32.xlu1 %v2120_v31, %s4439_s14  ;;  %v2004_v51 = vshll.u32 %v1895_v38, 16  ;;  %v2433_v45 = vld [vmem:[#allocation2 + $0x30] sm:$0xf]  ;;  %v2453_v19 = vrot.slane %v2451_v42, 5 }
 0x19a   : > { %v1997_v4 = vrot.slane %v1995_v39, 4  ;;  %v2000_v48 = vrot.slane %v1998_v40, 5  ;;  %v2121_v15 = vld [vmem:[#allocation2 + $0x10] sm:$0xf]  ;;  %v2434_v56 = vld [vmem:[#allocation2 + $0x34] sm:$0x1] }
 0x19b   : > { %v2006_v18 = vrot.slane %v2004_v51, 5  ;;  %1874 = vst.msk [vmem:[#allocation4 + $0x28] sm:$0xf] %vm270_vm6, %v1866_v63  ;;  %v2486_v20 = vrot.slane %v2484_v60, 4  ;;  %v2489_v21 = vrot.slane %v2487_v61, 5  ;;  %v2493_v29 = vshll.u32 %v2432_v9, 16 }
 0x19c   : > { %v2001_v2 = vor.u32 %v2000_v48, %v1997_v4  ;;  %v5170_v30 = vld [vmem:[#allocation2 + $0x28] sm:$0xe]  ;;  %v1870_v31 = vld [vmem:[#allocation2 + $0x30] sm:$0xf]  ;;  %v5174_v57 = vrot.slane %v2462_v3, 4  ;;  %v2498_v33 = vshrl.u32 %v2433_v45, 16 }
 0x19d   : > { %v2501_v34 = vshll.u32 %v2433_v45, 16  ;;  %v1722_v14 = vld [vmem:[#allocation2 + $0x4c] sm:$0x1]  ;;  %v5178_v23 = vrot.slane %v2465_v49, 5  ;;  %v5180_v36 = vrot.slane %v2476_v10, 4  ;;  %v3896_v37 = vrot.slane %v5159_v8, 9 }
 0x19e   : > { %v2002_v17 = vrot.slane %v2001_v2, 4  ;;  %v2507_v38 = vshll.u32 %v2434_v56, 16  ;;  %v2042_v39 = vld [vmem:[#allocation2 + $0x8] sm:$0xe]  ;;  %v5184_v40 = vrot.slane %v2479_v1, 5  ;;  %v2354_v5 = vrot.slane %v5161_v11, 5 }
 0x19f   : > { %v3899_v41 = vrot.slane %v5163_v44, 9  ;;  %v2366_v0 = vrot.slane %v5165_v13, 5  ;;  %v5189_v4 = vld [vmem:[#allocation2 + $0x2c] sm:$0x1]  ;;  %1878 = vst.msk [vmem:[#allocation4 + $0x78] sm:$0xf] %vm270_vm6, %v1870_v31  ;;  %v2490_v48 = vor.u32 %v2489_v21, %v2486_v20  ;;  %v2454_v21 = vsel %vm4545_vm2, %v5143_v25, %v2453_v19 }
 0x1a0   : > { %v2007_v32 = vsel %vm4545_vm2, %v2002_v17, %v2006_v18  ;;  %v5192_v51 = vrot.slane %v2493_v29, 5  ;;  %v1723_v42 = vsel %vm4994_vm13, 0, %v1722_v14  ;;  %v2043_v60 = vld [vmem:[#allocation2 + $0xc] sm:$0x1]  ;;  %v1868_v61 = vld [vmem:[#allocation2 + $0x20] sm:$0xf]  ;;  %v2347_v29 = vsel %vm4583_vm5, %v3894_v6, %v2346_v7 }
 0x1a1   : > { %2138 = vrot.lane.b32.xlu2 %v2121_v15, %s4439_s14  ;;  %2022 = vrot.lane.b32.xlu0 %v2007_v32, %s4439_s14  ;;  %v5196_v63 = vrot.slane %v2498_v33, 4  ;;  %v5198_v2 = vrot.slane %v2501_v34, 5  ;;  %v3898_v3 = vrot.slane %v5170_v30, 9  ;;  %1724 = vst [vmem:[#allocation2 + $0x4c] sm:$0x1] %v1723_v42  ;;  %v3887_v49 = vrot.slane %v2042_v39, 9 }
 0x1a2   : > { %2378 = vrot.lane.b32.xlu1 %v2351_v16, %s4439_s14  ;;  %v5201_v1 = vrot.slane %v2507_v38, 5  ;;  %v5203_v9 = vld [vmem:[#allocation2 + $0x38] sm:$0xf]  ;;  %v2078_v10 = vrot.slane %v2043_v60, 5  ;;  %1876 = vst.msk [vmem:[#allocation4 + $0x50] sm:$0xf] %vm270_vm6, %v1868_v61  ;;  %v2367_v46 = vsel %vm4583_vm5, %v3899_v41, %v2366_v0 }
 0x1a3   : > { %v2409_v45 = vld [vmem:[#allocation2 + $0x10] sm:$0xf]  ;;  %v1869_v53 = vld [vmem:[#allocation2 + $0x28] sm:$0xf]  ;;  %v2046_v15 = vld [vmem:[#allocation2 + $0x18] sm:$0xe] }
 0x1a4   : > { %2417 = vst.msk [vmem:[#allocation4 + $0xc] sm:$0xf] %vm270_vm6, %v2409_v45  ;;  %v2122_v16 = vld [vmem:[#allocation2 + $0x18] sm:$0xf]  ;;  %v2362_v17 = vrot.slane %v5189_v4, 5  ;;  %v2079_v18 = vsel %vm4583_vm5, %v3887_v49, %v2078_v10  ;;  %v3889_v20 = vrot.slane %v2046_v15, 9 }
 0x1a5   : > { %1877 = vst.msk [vmem:[#allocation4 + $0x64] sm:$0xf] %vm270_vm6, %v1869_v53  ;;  %v2047_v56 = vld [vmem:[#allocation2 + $0x1c] sm:$0x1]  ;;  %v5220_v31 = vrot.slane %v2490_v48, 4  ;;  %v2512_v55 = vshrl.u32 %v5203_v9, 16 }
 0x1a6   : > { %2113 = vst.msk [vmem:[#allocation4 + $0x18] sm:$0xf] %vm270_vm6, %v2079_v18  ;;  %v2086_v32 = vrot.slane %v2047_v56, 5  ;;  %v2411_v33 = vld [vmem:[#allocation2 + $0x20] sm:$0xf]  ;;  %v2515_v60 = vshll.u32 %v5203_v9, 16 }
 0x1a7   : > { %2419 = vst.msk [vmem:[#allocation4 + $0x34] sm:$0xf] %vm270_vm6, %v2411_v33  ;;  %v2170_v25 = vld [vmem:[#allocation2 + $0x10] sm:$0xf]  ;;  %v2171_v19 = vld [vmem:[#allocation2 + $0x14] sm:$0x1] }
 0x1a8   : > { %v2087_v6 = vsel %vm4583_vm5, %v3889_v20, %v2086_v32  ;;  %v2199_v7 = vshrl.u32 %v2170_v25, 16  ;;  %v2202_v34 = vshll.u32 %v2170_v25, 16  ;;  %v2050_v14 = vld [vmem:[#allocation2 + $0x28] sm:$0xe]  ;;  %v2208_v38 = vshll.u32 %v2171_v19, 16  ;;  %v4238_v30 = vld [vmem:[%s5741_s3] sm:$0xff] }
 0x1a9   : > { %2553 = vrot.lane.b32.xlu2 %v2454_v21, %s4439_s14  ;;  %2376 = vrot.lane.b32.xlu0 %v2347_v29, %s4439_s14  ;;  %2115 = vst.msk [vmem:[#allocation4 + $0x40] sm:$0xf] %vm270_vm6, %v2087_v6  ;;  %v2051_v39 = vld [vmem:[#allocation2 + $0x2c] sm:$0x1]  ;;  %v3891_v48 = vrot.slane %v2050_v14, 9  ;;  %v2359_v25 = vsel %vm4583_vm5, %v3897_v52, %v2358_v54  ;;  %v2468_v19 = vsel %vm4545_vm2, %v5174_v57, %v5178_v23  ;;  %v5311_v47 = vrot.slane %v2512_v55, 4 }
 0x1aa   : > { %2140 = vrot.lane.b32.xlu1 %v2122_v16, %s4439_s14  ;;  %v5234_v42 = vld [vmem:[#allocation2 + $0x3c] sm:$0x1]  ;;  %v2201_v61 = vrot.slane %v2199_v7, 4  ;;  %v2204_v49 = vrot.slane %v2202_v34, 5  ;;  %v2094_v10 = vrot.slane %v2051_v39, 5  ;;  %v2210_v53 = vrot.slane %v2208_v38, 5 }
 0x1ab   : > { %v2044_v45 = vld [vmem:[#allocation2 + $0x10] sm:$0xe]  ;;  %v2045_v15 = vld [vmem:[#allocation2 + $0x14] sm:$0x1]  ;;  %v2168_v18 = vld [vmem:[#allocation2 + $0x8] sm:$0xf] }
 0x1ac   : > { %v3888_v16 = vrot.slane %v2044_v45, 9  ;;  %v2205_v56 = vor.u32 %v2204_v49, %v2201_v61  ;;  %v2095_v20 = vsel %vm4583_vm5, %v3891_v48, %v2094_v10  ;;  %v2082_v21 = vrot.slane %v2045_v15, 5  ;;  %v2169_v29 = vld [vmem:[#allocation2 + $0xc] sm:$0x1]  ;;  %v2174_v33 = vld [vmem:[#allocation2 + $0x20] sm:$0xf] }
 0x1ad   : > { %v2185_v32 = vshrl.u32 %v2168_v18, 16  ;;  %2117 = vst.msk [vmem:[#allocation4 + $0x68] sm:$0xf] %vm270_vm6, %v2095_v20  ;;  %v2188_v50 = vshll.u32 %v2168_v18, 16  ;;  %v2194_v6 = vshll.u32 %v2169_v29, 16  ;;  %v2227_v43 = vshrl.u32 %v2174_v33, 16 }
 0x1ae   : > { %v2175_v7 = vld [vmem:[#allocation2 + $0x24] sm:$0x1]  ;;  %v2123_v34 = vld [vmem:[#allocation2 + $0x20] sm:$0xf]  ;;  %v2206_v14 = vrot.slane %v2205_v56, 4  ;;  %v2083_v26 = vsel %vm4583_vm5, %v3888_v16, %v2082_v21  ;;  %v2521_v52 = vshll.u32 %v5234_v42, 16 }
 0x1af   : > { %v2187_v38 = vrot.slane %v2185_v32, 4  ;;  %2114 = vst.msk [vmem:[#allocation4 + $0x2c] sm:$0xf] %vm270_vm6, %v2083_v26  ;;  %v2190_v54 = vrot.slane %v2188_v50, 5  ;;  %v2230_v57 = vshll.u32 %v2174_v33, 16  ;;  %v2236_v23 = vshll.u32 %v2175_v7, 16  ;;  %v2009_v32 = vpop.permute.xlu2 %2008 }
 0x1b0   : > { %v4244_v39 = vld [vmem:[%s5741_s3 + $0x30] sm:$0xff]  ;;  %v1864_v48 = vld [vmem:[#allocation2] sm:$0xf]  ;;  %v4243_v61 = vld [vmem:[%s5741_s3 + $0x28] sm:$0xff]  ;;  %v2211_v49 = vsel %vm4545_vm2, %v2206_v14, %v2210_v53  ;;  %v2196_v10 = vrot.slane %v2194_v6, 5  ;;  %v2229_v45 = vrot.slane %v2227_v43, 4  ;;  %v2355_v14 = vsel %vm4583_vm5, %v3896_v37, %v2354_v5 }
 0x1b1   : > { %2142 = vrot.lane.b32.xlu2 %v2123_v34, %s4439_s14  ;;  %2555 = vrot.lane.b32.xlu0 %v2468_v19, %s4439_s14  ;;  %1872 = vst.msk [vmem:[#allocation4] sm:$0xf] %vm270_vm6, %v1864_v48  ;;  %v2191_v15 = vor.u32 %v2190_v54, %v2187_v38  ;;  %v2232_v16 = vrot.slane %v2230_v57, 5  ;;  %v2238_v18 = vrot.slane %v2236_v23, 5  ;;  %v2048_v56 = vld [vmem:[#allocation2 + $0x20] sm:$0xe]  ;;  %v2482_v57 = vsel %vm4545_vm2, %v5180_v36, %v5184_v40 }
 0x1b2   : > { %2382 = vrot.lane.b32.xlu1 %v2359_v25, %s4439_s14  ;;  %3238 = vmatpush.bf16.msrb.mxu1 %v4244_v39  ;;  %2305 = vst.msk [vmem:[#allocation4 + $0x1c] sm:$0xf] %vm270_vm6, %v2211_v49  ;;  %v1871_v20 = vld [vmem:[#allocation2 + $0x38] sm:$0xf]  ;;  %v2049_v29 = vld [vmem:[#allocation2 + $0x24] sm:$0x1]  ;;  %v2620_v39 = vsel %vm4583_vm5, %v3902_v62, %v2619_v35  ;;  %v2624_v49 = vsel %vm4583_vm5, %v3903_v59, %v2623_v12 }
 0x1b3   : > { %v2410_v21 = vld [vmem:[#allocation2 + $0x18] sm:$0xf]  ;;  %1879 = vst.msk [vmem:[#allocation4 + $0x8c] sm:$0xf] %vm270_vm6, %v1871_v20  ;;  %v2192_v33 = vrot.slane %v2191_v15, 4  ;;  %v2233_v25 = vor.u32 %v2232_v16, %v2229_v45  ;;  %v3890_v53 = vrot.slane %v2048_v56, 9  ;;  %v2504_v56 = vor.u32 %v5198_v2, %v5196_v63 }
 0x1b4   : > { %v2090_v19 = vrot.slane %v2049_v29, 5  ;;  %2032 = vst.msk [vmem:[#allocation4] sm:$0xf] %vm434_vm7, %v2009_v32  ;;  %v5269_v50 = vld [vmem:[#allocation2 + $0x38] sm:$0xe]  ;;  %v4242_v23 = vld [vmem:[%s5741_s3 + $0x20] sm:$0xff] }
 0x1b5   : > { %v2413_v6 = vld [vmem:[#allocation2 + $0x30] sm:$0xf]  ;;  %v2172_v7 = vld [vmem:[#allocation2 + $0x18] sm:$0xf]  ;;  %v2124_v34 = vld [vmem:[#allocation2 + $0x28] sm:$0xf]  ;;  %v2197_v26 = vsel %vm4545_vm2, %v2192_v33, %v2196_v10 }
 0x1b6   : > { %2421 = vst.msk [vmem:[#allocation4 + $0x5c] sm:$0xf] %vm270_vm6, %v2413_v6  ;;  %v2234_v38 = vrot.slane %v2233_v25, 4  ;;  %v2173_v43 = vld [vmem:[#allocation2 + $0x1c] sm:$0x1]  ;;  %v2213_v54 = vshrl.u32 %v2172_v7, 16  ;;  %3239 = vmatpush.bf16.msrb.mxu1 %v4243_v61  ;;  %v2091_v8 = vsel %vm4583_vm5, %v3890_v53, %v2090_v19  ;;  %v2496_v25 = vsel %vm4545_vm2, %v5220_v31, %v5192_v51 }
 0x1b7   : > { %2304 = vst.msk [vmem:[#allocation4 + $0x8] sm:$0xf] %vm270_vm6, %v2197_v26  ;;  %v2216_v11 = vshll.u32 %v2172_v7, 16  ;;  %v2222_v37 = vshll.u32 %v2173_v43, 16  ;;  %v2178_v5 = vld [vmem:[#allocation2 + $0x30] sm:$0xf] }
 0x1b8   : > { %v2239_v36 = vsel %vm4545_vm2, %v2234_v38, %v2238_v18  ;;  %2418 = vst.msk [vmem:[#allocation4 + $0x20] sm:$0xf] %vm270_vm6, %v2410_v21  ;;  %v2215_v40 = vrot.slane %v2213_v54, 4  ;;  %v2179_v48 = vld [vmem:[#allocation2 + $0x34] sm:$0x1]  ;;  %v2255_v10 = vshrl.u32 %v2178_v5, 16 }
 0x1b9   : > { %2557 = vrot.lane.b32.xlu2 %v2482_v57, %s4439_s14  ;;  %2380 = vrot.lane.b32.xlu0 %v2355_v14, %s4439_s14  ;;  %2307 = vst.msk [vmem:[#allocation4 + $0x44] sm:$0xf] %vm270_vm6, %v2239_v36  ;;  %v2218_v61 = vrot.slane %v2216_v11, 5  ;;  %v2258_v22 = vshll.u32 %v2178_v5, 16  ;;  %v5315_v62 = vrot.slane %v2515_v60, 5  ;;  %v3900_v35 = vrot.slane %v5269_v50, 9 }
 0x1ba   : > { %2144 = vrot.lane.b32.xlu1 %v2124_v34, %s4439_s14  ;;  %2116 = vst.msk [vmem:[#allocation4 + $0x54] sm:$0xf] %vm270_vm6, %v2091_v8  ;;  %v2264_v58 = vshll.u32 %v2179_v48, 16  ;;  %v2437_v45 = vld [vmem:[#allocation2 + $0x40] sm:$0xf]  ;;  %3240 = vmatpush.bf16.msrb.mxu1 %v4242_v23  ;;  %v2257_v59 = vrot.slane %v2255_v10, 4 }
 0x1bb   : > { %v2219_v27 = vor.u32 %v2218_v61, %v2215_v40  ;;  %2657 = vst.msk [vmem:[#allocation4 + $0x10] sm:$0xf] %vm270_vm6, %v2620_v39  ;;  %v2260_v12 = vrot.slane %v2258_v22, 5  ;;  %v2052_v15 = vld [vmem:[#allocation2 + $0x30] sm:$0xe]  ;;  %v2224_v55 = vrot.slane %v2222_v37, 5 }
 0x1bc   : > { %v5320_v16 = vld [vmem:[#allocation2 + $0x40] sm:$0xe]  ;;  %2658 = vst.msk [vmem:[#allocation4 + $0x24] sm:$0xf] %vm270_vm6, %v2624_v49  ;;  %v2266_v9 = vrot.slane %v2264_v58, 5  ;;  %v4241_v20 = vld [vmem:[%s5741_s3 + $0x18] sm:$0xff] }
 0x1bd   : > { %v2412_v60 = vld [vmem:[#allocation2 + $0x28] sm:$0xf]  ;;  %v2125_v18 = vld [vmem:[#allocation2 + $0x30] sm:$0xf]  ;;  %v2220_v29 = vrot.slane %v2219_v27, 4  ;;  %v2261_v32 = vor.u32 %v2260_v12, %v2257_v59  ;;  %v3892_v7 = vrot.slane %v2052_v15, 9 }
 0x1be   : > { %v1690_v21 = vld [vmem:[#allocation2 + $0x48] sm:$0x1]  ;;  %v2053_v33 = vld [vmem:[#allocation2 + $0x34] sm:$0x1]  ;;  %v2054_v19 = vld [vmem:[#allocation2 + $0x38] sm:$0xe]  ;;  %3241 = vmatpush.bf16.msrb.mxu1 %v4241_v20 }
 0x1bf   : > { %v1691_v53 = vsel %vm4983_vm12, 0, %v1690_v21  ;;  %v2055_v6 = vld [vmem:[#allocation2 + $0x3c] sm:$0x1]  ;;  %v5334_v63 = vld [vmem:[#allocation2 + $0x44] sm:$0x1]  ;;  %v3893_v2 = vrot.slane %v2054_v19, 9  ;;  %v2225_v14 = vsel %vm4545_vm2, %v2220_v29, %v2224_v55 }
 0x1c0   : > { %1692 = vst [vmem:[#allocation2 + $0x48] sm:$0x1] %v1691_v53  ;;  %v2102_v34 = vrot.slane %v2055_v6, 5  ;;  %v2262_v26 = vrot.slane %v2261_v32, 4  ;;  %v2526_v51 = vshrl.u32 %v2437_v45, 16  ;;  %v2529_v31 = vshll.u32 %v2437_v45, 16 }
 0x1c1   : > { %2146 = vrot.lane.b32.xlu2 %v2125_v18, %s4439_s14  ;;  %2559 = vrot.lane.b32.xlu0 %v2496_v25, %s4439_s14  ;;  %v4240_v38 = vld [vmem:[%s5741_s3 + $0x10] sm:$0xff]  ;;  %2306 = vst.msk [vmem:[#allocation4 + $0x30] sm:$0xf] %vm270_vm6, %v2225_v14  ;;  %v2098_v43 = vrot.slane %v2053_v33, 5  ;;  %v2505_v54 = vrot.slane %v2504_v56, 4  ;;  %v3901_v13 = vrot.slane %v5320_v16, 9  ;;  %v2363_v45 = vsel %vm4583_vm5, %v3898_v3, %v2362_v17 }
 0x1c2   : > { %2386 = vrot.lane.b32.xlu1 %v2367_v46, %s4439_s14  ;;  %v2103_v44 = vsel %vm4583_vm5, %v3893_v2, %v2102_v34  ;;  %v2267_v41 = vsel %vm4545_vm2, %v2262_v26, %v2266_v9  ;;  %2420 = vst.msk [vmem:[#allocation4 + $0x48] sm:$0xf] %vm270_vm6, %v2412_v60  ;;  %v2176_v0 = vld [vmem:[#allocation2 + $0x28] sm:$0xf]  ;;  %v2177_v8 = vld [vmem:[#allocation2 + $0x2c] sm:$0x1]  ;;  %3242 = vmatpush.bf16.msrb.mxu1 %v4240_v38 }
 0x1c3   : > { %2119 = vst.msk [vmem:[#allocation4 + $0x90] sm:$0xf] %vm270_vm6, %v2103_v44  ;;  %v2099_v57 = vsel %vm4583_vm5, %v3892_v7, %v2098_v43  ;;  %v2241_v11 = vshrl.u32 %v2176_v0, 16  ;;  %v2244_v37 = vshll.u32 %v2176_v0, 16  ;;  %v5362_v5 = vrot.slane %v2521_v52, 5  ;;  %v4253_v36 = vld [vmem:[%s5741_s3 + $0x78] sm:$0xff] }
 0x1c4   : > { %v5364_v23 = vld [vmem:[#allocation2 + $0x3c] sm:$0x1]  ;;  %v4239_v39 = vld [vmem:[%s5741_s3 + $0x8] sm:$0xff]  ;;  %2309 = vst.msk [vmem:[#allocation4 + $0x6c] sm:$0xf] %vm270_vm6, %v2267_v41  ;;  %v2374_v42 = vrot.slane %v5334_v63, 5  ;;  %3266 = vmatpush.bf16.msra.mxu2 %v4253_v36  ;;  %v2510_v15 = vsel %vm4545_vm2, %v2505_v54, %v5201_v1  ;;  %v2518_v9 = vor.u32 %v5315_v62, %v5311_v47 }
 0x1c5   : > { %v4261_v40 = vld [vmem:[%s5741_s3 + $0xb8] sm:$0xff]  ;;  %v2528_v52 = vrot.slane %v2526_v51, 4  ;;  %v2531_v48 = vrot.slane %v2529_v31, 5  ;;  %2118 = vst.msk [vmem:[#allocation4 + $0x7c] sm:$0xf] %vm270_vm6, %v2099_v57  ;;  %v2243_v61 = vrot.slane %v2241_v11, 4 }
 0x1c6   : > { %3295 = vmatpush.bf16.msra.mxu3 %v4261_v40  ;;  %v2246_v49 = vrot.slane %v2244_v37, 5  ;;  %v2250_v10 = vshll.u32 %v2177_v8, 16  ;;  %v2589_v22 = vld [vmem:[#allocation2 + $0x20] sm:$0xe]  ;;  %v2590_v58 = vld [vmem:[#allocation2 + $0x24] sm:$0x1]  ;;  %3243 = vmatpush.bf16.msrb.mxu1 %v4239_v39  ;;  %v2375_v39 = vsel %vm4583_vm5, %v3901_v13, %v2374_v42 }
 0x1c7   : > { %v5384_v27 = vld [vmem:[#allocation2 + $0x48] sm:$0xf]  ;;  %v2592_v12 = vld [vmem:[#allocation2 + $0x2c] sm:$0x1]  ;;  %v2126_v55 = vld [vmem:[#allocation2 + $0x38] sm:$0xf]  ;;  %v2532_v56 = vor.u32 %v2531_v48, %v2528_v52 }
 0x1c8   : > { %v2591_v59 = vld [vmem:[#allocation2 + $0x28] sm:$0xe]  ;;  %v2415_v4 = vld [vmem:[#allocation2 + $0x40] sm:$0xf]  ;;  %v2247_v60 = vor.u32 %v2246_v49, %v2243_v61  ;;  %v3904_v3 = vrot.slane %v2589_v22, 9  ;;  %v2370_v1 = vrot.slane %v5364_v23, 5 }
 0x1c9   : > { %2561 = vrot.lane.b32.xlu2 %v2510_v15, %s4439_s14  ;;  %2384 = vrot.lane.b32.xlu0 %v2363_v45, %s4439_s14  ;;  %v5396_v17 = vld [vmem:[#allocation2 + $0x44] sm:$0x1]  ;;  %2423 = vst.msk [vmem:[#allocation4 + $0x84] sm:$0xf] %vm270_vm6, %v2415_v4  ;;  %v2627_v18 = vrot.slane %v2590_v58, 5  ;;  %v3905_v47 = vrot.slane %v2591_v59, 9 }
 0x1ca   : > { %v2631_v62 = vrot.slane %v2592_v12, 5  ;;  %2148 = vrot.lane.b32.xlu1 %v2126_v55, %s4439_s14  ;;  %v2540_v20 = vshrl.u32 %v5384_v27, 16  ;;  %v2248_v21 = vrot.slane %v2247_v60, 4  ;;  %v2252_v29 = vrot.slane %v2250_v10, 5  ;;  %v2182_v32 = vld [vmem:[#allocation2 + $0x40] sm:$0xf]  ;;  %3244 = vmatpush.bf16.msrb.mxu1 %v4238_v30 }
 0x1cb   : > { %v2628_v33 = vsel %vm4583_vm5, %v3904_v3, %v2627_v18  ;;  %v2183_v25 = vld [vmem:[#allocation2 + $0x44] sm:$0x1]  ;;  %v2283_v53 = vshrl.u32 %v2182_v32, 16  ;;  %v2286_v19 = vshll.u32 %v2182_v32, 16  ;;  %v2414_v6 = vld [vmem:[#allocation2 + $0x38] sm:$0xf] }
 0x1cc   : > { %v2519_v7 = vrot.slane %v2518_v9, 4  ;;  %v2253_v2 = vsel %vm4545_vm2, %v2248_v21, %v2252_v29  ;;  %v2632_v34 = vsel %vm4583_vm5, %v3905_v47, %v2631_v62  ;;  %2659 = vst.msk [vmem:[#allocation4 + $0x38] sm:$0xf] %vm270_vm6, %v2628_v33  ;;  %v2292_v14 = vshll.u32 %v2183_v25, 16  ;;  %v2180_v26 = vld [vmem:[#allocation2 + $0x38] sm:$0xf] }
 0x1cd   : > { %2308 = vst.msk [vmem:[#allocation4 + $0x58] sm:$0xf] %vm270_vm6, %v2253_v2  ;;  %v2285_v46 = vrot.slane %v2283_v53, 4  ;;  %v2288_v51 = vrot.slane %v2286_v19, 5  ;;  %v2181_v31 = vld [vmem:[#allocation2 + $0x3c] sm:$0x1] }
 0x1ce   : > { %v2127_v38 = vld [vmem:[#allocation2 + $0x40] sm:$0xf]  ;;  %v5410_v43 = vrot.slane %v2532_v56, 4  ;;  %v2535_v54 = vshll.u32 %v5396_v17, 16  ;;  %v5413_v44 = vrot.slane %v2540_v20, 4  ;;  %v2543_v41 = vshll.u32 %v5384_v27, 16 }
 0x1cf   : > { %v4252_v0 = vld [vmem:[%s5741_s3 + $0x70] sm:$0xff]  ;;  %v4269_v8 = vld [vmem:[%s5741_s3 + $0xf8] sm:$0xff]  ;;  %2660 = vst.msk [vmem:[#allocation4 + $0x4c] sm:$0xf] %vm270_vm6, %v2632_v34  ;;  %v2289_v37 = vor.u32 %v2288_v51, %v2285_v46  ;;  %v2269_v36 = vshrl.u32 %v2180_v26, 16  ;;  %v2272_v40 = vshll.u32 %v2180_v26, 16  ;;  %v2524_v52 = vsel %vm4545_vm2, %v2519_v7, %v5362_v5 }
 0x1d0   : > { %v4260_v57 = vld [vmem:[%s5741_s3 + $0xb0] sm:$0xff]  ;;  %v4273_v11 = vld [vmem:[%s5741_s3 + $0x118] sm:$0xff]  ;;  %3267 = vmatpush.bf16.msra.mxu2 %v4252_v0  ;;  %v2294_v48 = vrot.slane %v2292_v14, 5  ;;  %2422 = vst.msk [vmem:[#allocation4 + $0x70] sm:$0xf] %vm270_vm6, %v2414_v6  ;;  %v2278_v61 = vshll.u32 %v2181_v31, 16  ;;  %3324 = vmatpush.bf16.msra.mxu0 %v4269_v8  ;;  %v2371_v7 = vsel %vm4583_vm5, %v3900_v35, %v2370_v1 }
 0x1d1   : > { %3296 = vmatpush.bf16.msra.mxu3 %v4260_v57  ;;  %v2593_v49 = vld [vmem:[#allocation2 + $0x30] sm:$0xe]  ;;  %2150 = vrot.lane.b32.xlu2 %v2127_v38, %s4439_s14  ;;  %v2290_v63 = vrot.slane %v2289_v37, 4  ;;  %v2271_v16 = vrot.slane %v2269_v36, 4  ;;  %v2274_v10 = vrot.slane %v2272_v40, 5  ;;  %v2545_v42 = vrot.slane %v2543_v41, 5 }
 0x1d2   : > { %2563 = vrot.lane.b32.xlu0 %v2524_v52, %s4439_s14  ;;  %v2594_v22 = vld [vmem:[#allocation2 + $0x34] sm:$0x1]  ;;  %v3906_v13 = vrot.slane %v2593_v49, 9  ;;  %2390 = vrot.lane.b32.xlu1 %v2375_v39, %s4439_s14  ;;  %v2595_v5 = vld [vmem:[#allocation2 + $0x38] sm:$0xe]  ;;  %v4251_v30 = vld [vmem:[%s5741_s3 + $0x68] sm:$0xff] }
 0x1d3   : > { %v2596_v58 = vld [vmem:[#allocation2 + $0x3c] sm:$0x1]  ;;  %v2635_v45 = vrot.slane %v2594_v22, 5  ;;  %v2440_v27 = vld [vmem:[#allocation2 + $0x4c] sm:$0x1]  ;;  %3357 = vmatpush.bf16.msra.mxu1 %v4273_v11  ;;  %v2295_v59 = vsel %vm4545_vm2, %v2290_v63, %v2294_v48  ;;  %v2275_v12 = vor.u32 %v2274_v10, %v2271_v16  ;;  %v3907_v15 = vrot.slane %v2595_v5, 9 }
 0x1d4   : > { %v2639_v55 = vrot.slane %v2596_v58, 5  ;;  %v2597_v9 = vld [vmem:[#allocation2 + $0x40] sm:$0xe]  ;;  %v4259_v4 = vld [vmem:[%s5741_s3 + $0xa8] sm:$0xff]  ;;  %v4268_v60 = vld [vmem:[%s5741_s3 + $0xf0] sm:$0xff]  ;;  %v2280_v3 = vrot.slane %v2278_v61, 5  ;;  %v2546_v21 = vor.u32 %v2545_v42, %v5413_v44  ;;  %3268 = vmatpush.bf16.msra.mxu2 %v4251_v30 }
 0x1d5   : > { %2311 = vst.msk [vmem:[#allocation4 + $0x94] sm:$0xf] %vm270_vm6, %v2295_v59  ;;  %v2636_v17 = vsel %vm4583_vm5, %v3906_v13, %v2635_v45  ;;  %v2276_v18 = vrot.slane %v2275_v12, 4  ;;  %v2598_v62 = vld [vmem:[#allocation2 + $0x44] sm:$0x1]  ;;  %v3908_v56 = vrot.slane %v2597_v9, 9  ;;  %3297 = vmatpush.bf16.msra.mxu3 %v4259_v4  ;;  %3325 = vmatpush.bf16.msra.mxu0 %v4268_v60 }
 0x1d6   : > { %v2640_v47 = vsel %vm4583_vm5, %v3907_v15, %v2639_v55  ;;  %2661 = vst.msk [vmem:[#allocation4 + $0x60] sm:$0xf] %vm270_vm6, %v2636_v17  ;;  %v2537_v20 = vrot.slane %v2535_v54, 5  ;;  %v2549_v29 = vshll.u32 %v2440_v27, 16  ;;  %v2599_v32 = vld [vmem:[#allocation2 + $0x48] sm:$0xe] }
 0x1d7   : > { %2662 = vst.msk [vmem:[#allocation4 + $0x74] sm:$0xf] %vm270_vm6, %v2640_v47  ;;  %v2281_v33 = vsel %vm4545_vm2, %v2276_v18, %v2280_v3  ;;  %v2600_v25 = vld [vmem:[#allocation2 + $0x4c] sm:$0x1]  ;;  %v2643_v53 = vrot.slane %v2598_v62, 5  ;;  %v3909_v19 = vrot.slane %v2599_v32, 9 }
 0x1d8   : > { %v2538_v6 = vsel %vm4545_vm2, %v5410_v43, %v2537_v20  ;;  %2310 = vst.msk [vmem:[#allocation4 + $0x80] sm:$0xf] %vm270_vm6, %v2281_v33  ;;  %v2647_v2 = vrot.slane %v2600_v25, 5  ;;  %v2547_v14 = vrot.slane %v2546_v21, 4  ;;  %v2551_v26 = vrot.slane %v2549_v29, 5  ;;  %v4250_v1 = vld [vmem:[%s5741_s3 + $0x60] sm:$0xff] }
 0x1d9   : > { %2565 = vrot.lane.b32.xlu2 %v2538_v6, %s4439_s14  ;;  %v2644_v34 = vsel %vm4583_vm5, %v3908_v56, %v2643_v53  ;;  %v4258_v46 = vld [vmem:[%s5741_s3 + $0xa0] sm:$0xff]  ;;  %v4267_v51 = vld [vmem:[%s5741_s3 + $0xe8] sm:$0xff]  ;;  %v4272_v31 = vld [vmem:[%s5741_s3 + $0x110] sm:$0xff]  ;;  %3269 = vmatpush.bf16.msra.mxu2 %v4250_v1 }
 0x1da   : > { %2388 = vrot.lane.b32.xlu0 %v2371_v7, %s4439_s14  ;;  %v2648_v23 = vsel %vm4583_vm5, %v3909_v19, %v2647_v2  ;;  %2663 = vst.msk [vmem:[#allocation4 + $0x88] sm:$0xf] %vm270_vm6, %v2644_v34  ;;  %v2552_v35 = vsel %vm4545_vm2, %v2547_v14, %v2551_v26  ;;  %3298 = vmatpush.bf16.msra.mxu3 %v4258_v46  ;;  %v4249_v43 = vld [vmem:[%s5741_s3 + $0x58] sm:$0xff]  ;;  %v4266_v44 = vld [vmem:[%s5741_s3 + $0xe0] sm:$0xff]  ;;  %v4248_v41 = vld [vmem:[%s5741_s3 + $0x50] sm:$0xff] }
 0x1db   : > { %2664 = vst.msk [vmem:[#allocation4 + $0x9c] sm:$0xf] %vm270_vm6, %v2648_v23  ;;  %v2015_v50 = vpop.permute.xlu2 %2014  ;;  %3326 = vmatpush.bf16.msra.mxu0 %v4267_v51  ;;  %3358 = vmatpush.bf16.msra.mxu1 %v4272_v31  ;;  %v4257_v54 = vld [vmem:[%s5741_s3 + $0x98] sm:$0xff]  ;;  %v3928_v0 = vld [vmem:[#allocation4] sm:$0xf]  ;;  %v4247_v49 = vld [vmem:[%s5741_s3 + $0x48] sm:$0xff] }
 0x1dc   : > { %2035 = vst.msk [vmem:[#allocation4 + $0x3c] sm:$0xf] %vm434_vm7, %v2015_v50  ;;  %v2040_v11 = vld [vmem:[#allocation2] sm:$0xe]  ;;  %v2041_v37 = vld [vmem:[#allocation2 + $0x4] sm:$0x1] }
 0x1dd   : > { %3270 = vmatpush.bf16.msra.mxu2 %v4249_v43  ;;  %v3886_v40 = vrot.slane %v2040_v11, 9  ;;  %v2074_v39 = vrot.slane %v2041_v37, 5  ;;  %v4256_v48 = vld [vmem:[%s5741_s3 + $0x90] sm:$0xff]  ;;  %v4265_v61 = vld [vmem:[%s5741_s3 + $0xd8] sm:$0xff]  ;;  %v4271_v63 = vld [vmem:[%s5741_s3 + $0x108] sm:$0xff] }
 0x1de   : > { %3299 = vmatpush.bf16.msra.mxu3 %v4257_v54  ;;  %v4255_v10 = vld [vmem:[%s5741_s3 + $0x88] sm:$0xff]  ;;  %v4264_v22 = vld [vmem:[%s5741_s3 + $0xd0] sm:$0xff]  ;;  %v4254_v27 = vld [vmem:[%s5741_s3 + $0x80] sm:$0xff] }
 0x1df   : > { %3327 = vmatpush.bf16.msra.mxu0 %v4266_v44  ;;  %v2075_v52 = vsel %vm4583_vm5, %v3886_v40, %v2074_v39  ;;  %3359 = vmatpush.bf16.msra.mxu1 %v4271_v63  ;;  %v4263_v59 = vld [vmem:[%s5741_s3 + $0xc8] sm:$0xff]  ;;  %v4270_v12 = vld [vmem:[%s5741_s3 + $0x100] sm:$0xff]  ;;  %v4222_v51 = vld [vmem:[#allocation4 + $0x20] sm:$0xf0] }
 0x1e0   : > { %2112 = vst.msk [vmem:[#allocation4 + $0x4] sm:$0xf] %vm270_vm6, %v2075_v52  ;;  %v4262_v9 = vld [vmem:[%s5741_s3 + $0xc0] sm:$0xff] }
 0x1e1   : > { %3271 = vmatpush.bf16.msra.mxu2 %v4248_v41 }
 0x1e2   : > { %2567 = vrot.lane.b32.xlu0 %v2552_v35, %s4439_s14  ;;  %3300 = vmatpush.bf16.msra.mxu3 %v4256_v48  ;;  %s5614_s14 = scalar_lea.vmem [#allocation7], %s3551_s19 }
 0x1e3   : > { %v2011_v38 = vpop.permute.xlu0 %2010  ;;  %3328 = vmatpush.bf16.msra.mxu0 %v4265_v61  ;;  %v4225_v5 = vld [vmem:[#allocation4 + $0x38] sm:$0xf0]  ;;  %3360 = vmatpush.bf16.msra.mxu1 %v4270_v12  ;;  %s3449_s11 = sshll.u32 %s5614_s14, 4  ;;  %s3450_s11 = int_to_ptr.vmem [resolvable:$true] %s3449_s11 }
 0x1e4   : > { %2033 = vst.msk [vmem:[#allocation4 + $0x14] sm:$0xf] %vm434_vm7, %v2011_v38  ;;  %v3944_v38 = vld [vmem:[#allocation4 + $0x10] sm:$0xf] }
 0x1e5   : > { %3272 = vmatpush.bf16.msra.mxu2 %v4247_v49  ;;  %v3945_v41 = vor.u32 %v4222_v51, %v3944_v38  ;;  %v4227_v49 = vld [vmem:[#allocation4 + $0x48] sm:$0xf0]  ;;  %v3911_v51 = vld [vmem:[%s4531_s13 + $0xc] sm:$0x1] }
 0x1e6   : > { %3301 = vmatpush.bf16.msra.mxu3 %v4255_v10 }
 0x1e7   : > { %3329 = vmatpush.bf16.msra.mxu0 %v4264_v22 }
 0x1e9   : > { %3273 = vmatpush.bf16.msra.mxu2 %v4246_v28  ;;  %v3964_v28 = vld [vmem:[#allocation4 + $0x38] sm:$0xf] }
 0x1ea   : > { %3302 = vmatpush.bf16.msra.mxu3 %v4254_v27 }
 0x1eb   : > { %v4220_v57 = vld [vmem:[#allocation4 + $0x10] sm:$0xf0]  ;;  %v2013_v36 = vpop.permute.xlu1 %2012  ;;  %3330 = vmatpush.bf16.msra.mxu0 %v4263_v59 }
 0x1ec   : > { %v3929_v8 = vor.u32 %v4220_v57, %v3928_v0  ;;  %2034 = vst.msk [vmem:[#allocation4 + $0x28] sm:$0xf] %vm434_vm7, %v2013_v36  ;;  %v2416_v0 = vld [vmem:[#allocation2 + $0x48] sm:$0xf] }
 0x1ed   : > { %2424 = vst.msk [vmem:[#allocation4 + $0x98] sm:$0xf] %vm270_vm6, %v2416_v0  ;;  %v5596_v0 = vld [vmem:[%s5742_s4] ss:$0 sm:$0xff] }
 0x1ee   : > { %3245 = vmatmul.bf16.vlgmr.msrb.gmra.mxu1 %v3929_v8 }
 0x1ef   : > { %3331 = vmatpush.bf16.msra.mxu0 %v4262_v9 }
 0x1f3   : > { %v2021_v16 = vpop.permute.xlu2 %2020  ;;  %v3948_v13 = vld [vmem:[#allocation4 + $0x28] sm:$0xf] }
 0x1f4   : > { %2038 = vst.msk [vmem:[#allocation4 + $0x78] sm:$0xf] %vm434_vm7, %v2021_v16  ;;  %v3949_v58 = vor.u32 %v4225_v5, %v3948_v13  ;;  %v3965_v13 = vor.u32 %v4227_v49, %v3964_v28 }
 0x1fb   : > { %v2139_v42 = vpop.permute.xlu2 %2138  ;;  %v2017_v45 = vpop.permute.xlu0 %2016  ;;  %v3988_v25 = vld [vmem:[#allocation4 + $0x78] sm:$0xf] }
 0x1fc   : > { %2161 = vst.msk [vmem:[#allocation4 + $0x18] sm:$0xf] %vm434_vm7, %v2139_v42 }
 0x1fd   : > { %2036 = vst.msk [vmem:[#allocation4 + $0x50] sm:$0xf] %vm434_vm7, %v2017_v45 }
 0x1fe   : > { %3250 = vmatmul.bf16.gmra.mxu1 %v3949_v58 }
 0x203   : > { %v2554_v15 = vpop.permute.xlu2 %2553  ;;  %v2019_v55 = vpop.permute.xlu1 %2018  ;;  %v3930_v20 = vld [vmem:[#allocation4 + $0x14] sm:$0xf0] }
 0x204   : > { %2577 = vst.msk [vmem:[#allocation4 + $0xc] sm:$0xf] %vm434_vm7, %v2554_v15  ;;  %v3968_v60 = vld [vmem:[#allocation4 + $0x50] sm:$0xf] }
 0x205   : > { %2037 = vst.msk [vmem:[#allocation4 + $0x64] sm:$0xf] %vm434_vm7, %v2019_v55 }
 0x20b   : > { %v2143_v30 = vpop.permute.xlu2 %2142  ;;  %v2137_v4 = vpop.permute.xlu1 %2136  ;;  %v4219_v43 = vld [vmem:[#allocation4 + $0xc] sm:$0xf] }
 0x20c   : > { %2163 = vst.msk [vmem:[#allocation4 + $0x40] sm:$0xf] %vm434_vm7, %v2143_v30  ;;  %v4230_v3 = vld [vmem:[#allocation4 + $0x60] sm:$0xf0] }
 0x20d   : > { %2160 = vst.msk [vmem:[#allocation4 + $0x4] sm:$0xf] %vm434_vm7, %v2137_v4  ;;  %v3969_v17 = vor.u32 %v4230_v3, %v3968_v60  ;;  %v4232_v4 = vld [vmem:[#allocation4 + $0x70] sm:$0xf0]  ;;  %v3984_v3 = vld [vmem:[#allocation4 + $0x60] sm:$0xf] }
 0x20f   : > { %3255 = vmatmul.bf16.gmra.mxu1 %v3969_v17  ;;  %v3985_v17 = vor.u32 %v4232_v4, %v3984_v3  ;;  %v3916_v4 = vld [vmem:[%s4531_s13 + $0x20] sm:$0xf] }
 0x213   : > { %v2558_v18 = vpop.permute.xlu2 %2557  ;;  %v2023_v47 = vpop.permute.xlu0 %2022  ;;  %v3950_v14 = vld [vmem:[#allocation4 + $0x3c] sm:$0xf0] }
 0x214   : > { %2579 = vst.msk [vmem:[#allocation4 + $0x34] sm:$0xf] %vm434_vm7, %v2558_v18  ;;  %v2379_v62 = vpop.permute.xlu1 %2378  ;;  %v4218_v56 = vld [vmem:[#allocation4 + $0x4] sm:$0xf] }
 0x215   : > { %2401 = vst.msk [vmem:[#allocation4 + $0x1c] sm:$0xf] %vm434_vm7, %v2379_v62  ;;  %v3933_v21 = vor.u32 %v4218_v56, %v3930_v20  ;;  %v4004_v20 = vld [vmem:[#allocation4 + $0x88] sm:$0xf] }
 0x216   : > { %2039 = vst.msk [vmem:[#allocation4 + $0x8c] sm:$0xf] %vm434_vm7, %v2023_v47 }
 0x217   : > { %3274 = vmatmul.bf16.vlgmr.msra.gmra.mxu2 %v3933_v21 }
 0x21b   : > { %v2147_v29 = vpop.permute.xlu2 %2146  ;;  %v2377_v32 = vpop.permute.xlu0 %2376  ;;  %v4224_v16 = vld [vmem:[#allocation4 + $0x34] sm:$0xf] }
 0x21c   : > { %2165 = vst.msk [vmem:[#allocation4 + $0x68] sm:$0xf] %vm434_vm7, %v2147_v29  ;;  %v2141_v33 = vpop.permute.xlu1 %2140  ;;  %v4221_v50 = vld [vmem:[#allocation4 + $0x18] sm:$0xf0] }
 0x21d   : > { %2162 = vst.msk [vmem:[#allocation4 + $0x2c] sm:$0xf] %vm434_vm7, %v2141_v33  ;;  %v4235_v53 = vld [vmem:[#allocation4 + $0x88] sm:$0xf0] }
 0x21e   : > { %2400 = vst.msk [vmem:[#allocation4 + $0x8] sm:$0xf] %vm434_vm7, %v2377_v32  ;;  %v3989_v19 = vor.u32 %v4235_v53, %v3988_v25  ;;  %v4237_v32 = vld [vmem:[#allocation4 + $0x98] sm:$0xf0] }
 0x21f   : > { %v4005_v25 = vor.u32 %v4237_v32, %v4004_v20  ;;  %v2823_v20 = vshll.u32 %v3916_v4, 16 }
 0x220   : > { %3260 = vmatmul.bf16.gmra.mxu1 %v3989_v19 }
 0x223   : > { %v2562_v6 = vpop.permute.xlu2 %2561  ;;  %v2556_v7 = vpop.permute.xlu0 %2555  ;;  %v3970_v36 = vld [vmem:[#allocation4 + $0x64] sm:$0xf0] }
 0x224   : > { %2581 = vst.msk [vmem:[#allocation4 + $0x5c] sm:$0xf] %vm434_vm7, %v2562_v6  ;;  %v2383_v2 = vpop.permute.xlu1 %2382  ;;  %v4223_v34 = vld [vmem:[#allocation4 + $0x2c] sm:$0xf] }
 0x225   : > { %2403 = vst.msk [vmem:[#allocation4 + $0x44] sm:$0xf] %vm434_vm7, %v2383_v2  ;;  %v3953_v26 = vor.u32 %v4223_v34, %v3950_v14  ;;  %v3936_v23 = vld [vmem:[#allocation4 + $0x8] sm:$0xf]  ;;  %v3910_v14 = vld [vmem:[%s4531_s13 + $0x8] sm:$0xf] }
 0x226   : > { %2578 = vst.msk [vmem:[#allocation4 + $0x20] sm:$0xf] %vm434_vm7, %v2556_v7  ;;  %v3937_v35 = vor.u32 %v4221_v50, %v3936_v23  ;;  %v2778_v23 = vshrl.u32 %v3910_v14, 16  ;;  %v2781_v50 = vshll.u32 %v3910_v14, 16 }
 0x227   : > { %3279 = vmatmul.bf16.gmra.mxu2 %v3953_v26 }
 0x228   : > { %3303 = vmatmul.bf16.vlgmr.msra.gmra.mxu3 %v3937_v35 }
 0x22b   : > { %v2151_v1 = vpop.permute.xlu2 %2150  ;;  %v2381_v46 = vpop.permute.xlu0 %2380  ;;  %v4229_v9 = vld [vmem:[#allocation4 + $0x5c] sm:$0xf] }
 0x22c   : > { %2167 = vst.msk [vmem:[#allocation4 + $0x90] sm:$0xf] %vm434_vm7, %v2151_v1  ;;  %v2145_v31 = vpop.permute.xlu1 %2144  ;;  %v4226_v52 = vld [vmem:[#allocation4 + $0x40] sm:$0xf0]  ;;  %v2780_v1 = vrot.slane %v2778_v23, 4 }
 0x22d   : > { %2164 = vst.msk [vmem:[#allocation4 + $0x54] sm:$0xf] %vm434_vm7, %v2145_v31  ;;  %v3938_v54 = vld [vmem:[#allocation4 + $0x1c] sm:$0xf0] }
 0x22e   : > { %2402 = vst.msk [vmem:[#allocation4 + $0x30] sm:$0xf] %vm434_vm7, %v2381_v46  ;;  %v3941_v44 = vor.u32 %v4219_v43, %v3938_v54  ;;  %v2783_v46 = vrot.slane %v2781_v50, 5  ;;  %v3912_v31 = vld [vmem:[%s4531_s13 + $0x10] sm:$0xf]  ;;  %v2787_v54 = vshll.u32 %v3911_v51, 16 }
 0x22f   : > { %v2825_v50 = vrot.slane %v2823_v20, 5  ;;  %v3917_v51 = vld [vmem:[%s4531_s13 + $0x24] sm:$0x1] }
 0x230   : > { %3332 = vmatmul.bf16.vlgmr.msra.gmra.mxu0 %v3941_v44  ;;  %4150 = vmatmul.msk.bf16.vlgmr.msra.gmra.mxu1 %vm1488_vm8, %v3945_v41  ;;  %v2784_v43 = vor.u32 %v2783_v46, %v2780_v1  ;;  %v2792_v44 = vshrl.u32 %v3912_v31, 16  ;;  %v2795_v41 = vshll.u32 %v3912_v31, 16  ;;  %v3918_v31 = vld [vmem:[%s4531_s13 + $0x28] sm:$0xf] }
 0x233   : > { %v2566_v57 = vpop.permute.xlu2 %2565  ;;  %v2560_v8 = vpop.permute.xlu0 %2559  ;;  %v3990_v59 = vld [vmem:[#allocation4 + $0x8c] sm:$0xf0] }
 0x234   : > { %2583 = vst.msk [vmem:[#allocation4 + $0x84] sm:$0xf] %vm434_vm7, %v2566_v57  ;;  %v2387_v11 = vpop.permute.xlu1 %2386  ;;  %v4228_v37 = vld [vmem:[#allocation4 + $0x54] sm:$0xf] }
 0x235   : > { %2405 = vst.msk [vmem:[#allocation4 + $0x6c] sm:$0xf] %vm434_vm7, %v2387_v11  ;;  %v3973_v40 = vor.u32 %v4228_v37, %v3970_v36  ;;  %v3956_v39 = vld [vmem:[#allocation4 + $0x30] sm:$0xf]  ;;  %v2789_v11 = vrot.slane %v2787_v54, 5  ;;  %v2794_v37 = vrot.slane %v2792_v44, 4 }
 0x236   : > { %2580 = vst.msk [vmem:[#allocation4 + $0x48] sm:$0xf] %vm434_vm7, %v2560_v8  ;;  %v3957_v48 = vor.u32 %v4226_v52, %v3956_v39  ;;  %v2785_v8 = vrot.slane %v2784_v43, 4  ;;  %v2797_v36 = vrot.slane %v2795_v41, 5  ;;  %v3913_v52 = vld [vmem:[%s4531_s13 + $0x14] sm:$0x1] }
 0x237   : > { %3284 = vmatmul.bf16.gmra.mxu2 %v3973_v40  ;;  %v3914_v40 = vld [vmem:[%s4531_s13 + $0x18] sm:$0xf] }
 0x238   : > { %3308 = vmatmul.bf16.gmra.mxu3 %v3957_v48  ;;  %v2809_v49 = vshll.u32 %v3914_v40, 16  ;;  %v2790_v28 = vsel %vm4545_vm2, %v2785_v8, %v2789_v11  ;;  %v2829_v8 = vshll.u32 %v3917_v51, 16  ;;  %v2834_v11 = vshrl.u32 %v3918_v31, 16 }
 0x23b   : > { %v2385_v61 = vpop.permute.xlu0 %2384  ;;  %v4234_v21 = vld [vmem:[#allocation4 + $0x84] sm:$0xf] }
 0x23c   : > { %v2149_v63 = vpop.permute.xlu1 %2148  ;;  %2404 = vst.msk [vmem:[#allocation4 + $0x58] sm:$0xf] %vm434_vm7, %v2385_v61  ;;  %v4231_v58 = vld [vmem:[#allocation4 + $0x68] sm:$0xf0]  ;;  %v2806_v61 = vshrl.u32 %v3914_v40, 16 }
 0x23d   : > { %2166 = vst.msk [vmem:[#allocation4 + $0x7c] sm:$0xf] %vm434_vm7, %v2149_v63  ;;  %v3958_v10 = vld [vmem:[#allocation4 + $0x44] sm:$0xf0] }
 0x23e   : > { %v3961_v22 = vor.u32 %v4224_v16, %v3958_v10  ;;  %v2798_v16 = vor.u32 %v2797_v36, %v2794_v37  ;;  %v2801_v10 = vshll.u32 %v3913_v52, 16  ;;  %v2837_v37 = vshll.u32 %v3918_v31, 16 }
 0x240   : > { %3337 = vmatmul.bf16.gmra.mxu0 %v3961_v22  ;;  %4151 = vmatmul.msk.bf16.gmra.mxu1 %vm1488_vm8, %v3965_v13 }
 0x243   : > { %v3976_v5 = vld [vmem:[#allocation4 + $0x58] sm:$0xf] }
 0x244   : > { %v2564_v42 = vpop.permute.xlu0 %2563  ;;  %v2391_v45 = vpop.permute.xlu1 %2390  ;;  %v4233_v27 = vld [vmem:[#allocation4 + $0x7c] sm:$0xf]  ;;  %v3977_v12 = vor.u32 %v4231_v58, %v3976_v5 }
 0x245   : > { %2582 = vst.msk [vmem:[#allocation4 + $0x70] sm:$0xf] %vm434_vm7, %v2564_v42  ;;  %v3993_v15 = vor.u32 %v4233_v27, %v3990_v59  ;;  %v2808_v27 = vrot.slane %v2806_v61, 4  ;;  %v2811_v59 = vrot.slane %v2809_v49, 5  ;;  %v2831_v49 = vrot.slane %v2829_v8, 5 }
 0x246   : > { %2407 = vst.msk [vmem:[#allocation4 + $0x94] sm:$0xf] %vm434_vm7, %v2391_v45  ;;  %v2897_v45 = vunpack.c.l.bf16 %v2790_v28  ;;  %v2839_v28 = vrot.slane %v2837_v37, 5  ;;  %v3923_v37 = vld [vmem:[%s4531_s13 + $0x3c] sm:$0x1] }
 0x247   : > { %3289 = vmatmul.bf16.gmra.mxu2 %v3993_v15  ;;  %v2803_v15 = vrot.slane %v2801_v10, 5 }
 0x248   : > { %3313 = vmatmul.bf16.gmra.mxu3 %v3977_v12  ;;  %v2799_v12 = vrot.slane %v2798_v16, 4  ;;  %v3920_v16 = vld [vmem:[%s4531_s13 + $0x30] sm:$0xf] }
 0x24c   : > { %v2389_v55 = vpop.permute.xlu0 %2388  ;;  %v3978_v30 = vld [vmem:[#allocation4 + $0x6c] sm:$0xf0] }
 0x24d   : > { %2406 = vst.msk [vmem:[#allocation4 + $0x80] sm:$0xf] %vm434_vm7, %v2389_v55  ;;  %v3981_v60 = vor.u32 %v4229_v9, %v3978_v30  ;;  %v4236_v62 = vld [vmem:[#allocation4 + $0x90] sm:$0xf0]  ;;  %v3915_v55 = vld [vmem:[%s4531_s13 + $0x1c] sm:$0x1] }
 0x250   : > { %3342 = vmatmul.bf16.gmra.mxu0 %v3981_v60  ;;  %4152 = vmatmul.msk.bf16.gmra.mxu1 %vm1488_vm8, %v3985_v17  ;;  %v2812_v17 = vor.u32 %v2811_v59, %v2808_v27  ;;  %v2851_v27 = vshll.u32 %v3920_v16, 16 }
 0x252   : > { %v2813_v14 = vrot.slane %v2812_v17, 4 }
 0x254   : > { %v2568_v18 = vpop.permute.xlu0 %2567  ;;  %v3996_v47 = vld [vmem:[#allocation4 + $0x80] sm:$0xf] }
 0x255   : > { %2584 = vst.msk [vmem:[#allocation4 + $0x98] sm:$0xf] %vm434_vm7, %v2568_v18  ;;  %v3997_v56 = vor.u32 %v4236_v62, %v3996_v47  ;;  %v2815_v18 = vshll.u32 %v3915_v55, 16  ;;  %v2804_v62 = vsel %vm4545_vm2, %v2799_v12, %v2803_v15 }
 0x258   : > { %3318 = vmatmul.bf16.gmra.mxu3 %v3997_v56  ;;  %v2820_v56 = vshrl.u32 %v3916_v4, 16 }
 0x25a   : > { %v2822_v23 = vrot.slane %v2820_v56, 4  ;;  %v3921_v56 = vld [vmem:[%s4531_s13 + $0x34] sm:$0x1] }
 0x25c   : > { %v3998_v29 = vld [vmem:[#allocation4 + $0x94] sm:$0xf0]  ;;  %v2826_v41 = vor.u32 %v2825_v50, %v2822_v23 }
 0x25d   : > { %v4001_v33 = vor.u32 %v4234_v21, %v3998_v29 }
 0x25e   : > { %v2827_v61 = vrot.slane %v2826_v41, 4 }
 0x260   : > { %3347 = vmatmul.bf16.gmra.mxu0 %v4001_v33  ;;  %4153 = vmatmul.msk.bf16.gmra.mxu1 %vm1488_vm8, %v4005_v25  ;;  %v2832_v12 = vsel %vm4545_vm2, %v2827_v61, %v2831_v49  ;;  %v2871_v61 = vshll.u32 %v3923_v37, 16 }
 0x26b   : > { %v3246_v53 = vpop.f32.mrf.mxu1 }
 0x26c   : > { %v3247_v39 = vadd.f32 %v5596_v0, %v3246_v53 }
 0x273   : > { %v3248_v19 = vpop.f32.mrf.mxu1 }
 0x274   : > { %v3249_v9 = vadd.f32 %v5596_v0, %v3248_v19  ;;  %v2898_v19 = vunpack.c.l.bf16 %v2804_v62 }
 0x27b   : > { %v5580_v6 = vpop.f32.mrf.mxu1 }
 0x27c   : > { %v3252_v1 = vadd.f32 %v5596_v0, %v5580_v6 }
 0x283   : > { %v5582_v7 = vpop.f32.mrf.mxu1 }
 0x284   : > { %v3254_v10 = vadd.f32 %v5596_v0, %v5582_v7 }
 0x28c   : > { %v5584_v2 = vpop.f32.mrf.mxu1 }
 0x28d   : > { %v3257_v20 = vadd.f32 %v5596_v0, %v5584_v2 }
 0x294   : > { %v5586_v34 = vpop.f32.mrf.mxu1 }
 0x295   : > { %v3259_v8 = vadd.f32 %v5596_v0, %v5586_v34 }
 0x29a   : > { %v3275_v26 = vpop.f32.mrf.mxu2 }
 0x29b   : > { %v3276_v48 = vadd.f32 %v3275_v26, %v3247_v39  ;;  %v2817_v26 = vrot.slane %v2815_v18, 5  ;;  %v2853_v18 = vrot.slane %v2851_v27, 5 }
 0x29d   : > { %v5589_v35 = vpop.f32.mrf.mxu1  ;;  %v2818_v54 = vsel %vm4545_vm2, %v2813_v14, %v2817_v26 }
 0x2a2   : > { %v3277_v38 = vpop.f32.mrf.mxu2 }
 0x2a3   : > { %v3278_v60 = vadd.f32 %v3277_v38, %v3249_v9 }
 0x2a5   : > { %v5598_v57 = vpop.f32.mrf.mxu1 }
 0x2aa   : > { %v3280_v22 = vpop.f32.mrf.mxu2 }
 0x2ab   : > { %v3304_v63 = vpop.f32.mrf.mxu3  ;;  %v3281_v38 = vadd.f32 %v3280_v22, %v3252_v1 }
 0x2ac   : > { %v3305_v13 = vadd.f32 %v3304_v63, %v3276_v48  ;;  %v2899_v48 = vunpack.c.l.bf16 %v2818_v54  ;;  %v2836_v63 = vrot.slane %v2834_v11, 4 }
 0x2ad   : > { %v3333_v42 = vpop.f32.mrf.mxu0  ;;  %v3362_v5 = vpop.f32.mrf.mxu1 }
 0x2ae   : > { %v3334_v58 = vadd.f32 %v3333_v42, %v3305_v13  ;;  %v3919_v42 = vld [vmem:[%s4531_s13 + $0x2c] sm:$0x1]  ;;  %v2840_v15 = vor.u32 %v2839_v28, %v2836_v63 }
 0x2af   : > { %v2843_v55 = vshll.u32 %v3919_v42, 16 }
 0x2b0   : > { %v3363_v30 = vadd.f32 %v3362_v5, %v3334_v58 }
 0x2b1   : > { %v2845_v62 = vrot.slane %v2843_v55, 5 }
 0x2b2   : > { %v3382_v3 = vadd.f32 %v3363_v30, %v2897_v45  ;;  %v3282_v25 = vpop.f32.mrf.mxu2  ;;  %v2848_v45 = vshrl.u32 %v3920_v16, 16 }
 0x2b3   : > { %v3306_v47 = vpop.f32.mrf.mxu3  ;;  %v3283_v5 = vadd.f32 %v3282_v25, %v3254_v10 }
 0x2b4   : > { %v3390_v21 = vmax.f32 %v3382_v3, 0.0  ;;  %3406 = vst.msk [vmem:[%s5614_s14] sm:$0xff] %vm1488_vm8, %v3382_v3  ;;  %v3307_v29 = vadd.f32 %v3306_v47, %v3278_v60  ;;  %v2900_v3 = vunpack.c.l.bf16 %v2832_v12  ;;  %v2850_v17 = vrot.slane %v2848_v45, 4 }
 0x2b5   : > { %v3335_v32 = vpop.f32.mrf.mxu0  ;;  %v3364_v33 = vpop.f32.mrf.mxu1  ;;  %v2841_v47 = vrot.slane %v2840_v15, 4  ;;  %v3925_v15 = vld [vmem:[%s4531_s13 + $0x44] sm:$0x1] }
 0x2b6   : > { %3398 = vst.msk [vmem:[%s5618_s20] sm:$0xff] %vm1488_vm8, %v3390_v21  ;;  %v3336_v53 = vadd.f32 %v3335_v32, %v3307_v29  ;;  %v3922_v29 = vld [vmem:[%s4531_s13 + $0x38] sm:$0xf] }
 0x2b7   : > { %v2846_v26 = vsel %vm4545_vm2, %v2841_v47, %v2845_v62  ;;  %v2862_v23 = vshrl.u32 %v3922_v29, 16  ;;  %v2865_v50 = vshll.u32 %v3922_v29, 16  ;;  %v3264_v29 = vadd.f32 %v5596_v0, %v5598_v57 }
 0x2b8   : > { %v3365_v46 = vadd.f32 %v3364_v33, %v3336_v53  ;;  %v2854_v53 = vor.u32 %v2853_v18, %v2850_v17 }
 0x2b9   : > { %v2867_v41 = vrot.slane %v2865_v50, 5 }
 0x2ba   : > { %v3383_v43 = vadd.f32 %v3365_v46, %v2898_v19  ;;  %v3285_v22 = vpop.f32.mrf.mxu2  ;;  %v2857_v19 = vshll.u32 %v3921_v56, 16 }
 0x2bb   : > { %v3309_v44 = vpop.f32.mrf.mxu3  ;;  %v3286_v32 = vadd.f32 %v3285_v22, %v3257_v20 }
 0x2bc   : > { %v3391_v36 = vmax.f32 %v3383_v43, 0.0  ;;  %3407 = vst.msk [vmem:[%s5614_s14 + $0x8] sm:$0xff] %vm1488_vm8, %v3383_v43  ;;  %v3310_v6 = vadd.f32 %v3309_v44, %v3281_v38  ;;  %v2901_v38 = vunpack.c.l.bf16 %v2846_v26  ;;  %v2855_v43 = vrot.slane %v2854_v53, 4 }
 0x2bd   : > { %v3338_v40 = vpop.f32.mrf.mxu0  ;;  %v3367_v39 = vpop.f32.mrf.mxu1  ;;  %v2859_v54 = vrot.slane %v2857_v19, 5  ;;  %v2864_v44 = vrot.slane %v2862_v23, 4 }
 0x2be   : > { %3399 = vst.msk [vmem:[%s5618_s20 + $0x8] sm:$0xff] %vm1488_vm8, %v3391_v36  ;;  %v3339_v52 = vadd.f32 %v3338_v40, %v3310_v6  ;;  %v3924_v36 = vld [vmem:[%s4531_s13 + $0x40] sm:$0xf]  ;;  %s4274_s13 = sshll.u32 %s4499_s25, 6 }
 0x2bf   : > { %v2876_v49 = vshrl.u32 %v3924_v36, 16  ;;  %v2879_v63 = vshll.u32 %v3924_v36, 16  ;;  %s3448_s29 = scalar_lea.hbm %s5744_s6, %s4274_s13  ;;  %s3431_s25 = scalar_lea.hbm %s5743_s5, %s4274_s13 }
 0x2c0   : > { %v3368_v13 = vadd.f32 %v3367_v39, %v3339_v52  ;;  %v2860_v39 = vsel %vm4545_vm2, %v2855_v43, %v2859_v54  ;;  %s3451_s12 = sshll.u32 %s3448_s29, 4  ;;  %s3434_s16 = sshll.u32 %s3431_s25, 4  ;;  %s3452_s12 = int_to_ptr.hbm [resolvable:$true] %s3451_s12  ;;  %s5692_s16 = int_to_ptr.hbm [resolvable:$true] %s3434_s16 }
 0x2c1   : > { %v2902_v42 = vunpack.c.l.bf16 %v2860_v39  ;;  %v2878_v45 = vrot.slane %v2876_v49, 4  ;;  %v2881_v27 = vrot.slane %v2879_v63, 5  ;;  %s4357_s19 = sshra.s32 %s3452_s12, 4  ;;  %s4363_s29 = scalar_lea.hbm %s5744_s6, 128  ;;  %s4358_s19 = int_to_ptr.hbm [resolvable:$true] %s4357_s19 }
 0x2c2   : > { %v3384_v58 = vadd.f32 %v3368_v13, %v2899_v48  ;;  %v3287_v33 = vpop.f32.mrf.mxu2  ;;  %v2868_v48 = vor.u32 %v2867_v41, %v2864_v44  ;;  %s4359_s13 = scalar_lea.hbm %s4358_s19, 64  ;;  %p4364_p0 = scmp.lt.s32.totalorder %s4358_s19, %s5744_s6 }
 0x2c3   : > { %v3311_v59 = vpop.f32.mrf.mxu3  ;;  %v3288_v6 = vadd.f32 %v3287_v33, %v3259_v8  ;;  %p4360_p11 = scmp.ne.s32.totalorder %s4358_s19, %s4359_s13  ;;  %p4365_p1 = scmp.lt.s32.totalorder %s4363_s29, %s4359_s13 }
 0x2c4   : > { %v3392_v9 = vmax.f32 %v3384_v58, 0.0  ;;  %3408 = vst.msk [vmem:[%s5614_s14 + $0x10] sm:$0xff] %vm1488_vm8, %v3384_v58  ;;  %v3312_v7 = vadd.f32 %v3311_v59, %v3283_v5  ;;  %v2869_v5 = vrot.slane %v2868_v48, 4  ;;  %v2873_v58 = vrot.slane %v2871_v61, 5 }
 0x2c5   : > { %v3340_v30 = vpop.f32.mrf.mxu0  ;;  %v3369_v4 = vpop.f32.mrf.mxu1  ;;  %v3262_v59 = vadd.f32 %v5596_v0, %v5589_v35  ;;  %p4361_p12 = pnand %p4360_p11, %p4516_p5  ;;  %p4366_p2 = por %p4365_p1, %p4364_p0 }
 0x2c6   : > { %3400 = vst.msk [vmem:[%s5618_s20 + $0x10] sm:$0xff] %vm1488_vm8, %v3392_v9  ;;  %v3341_v60 = vadd.f32 %v3340_v30, %v3312_v7  ;;  %v2874_v30 = vsel %vm4545_vm2, %v2869_v5, %v2873_v58 }
 0x2c7   : > { %v2903_v62 = vunpack.c.l.bf16 %v2874_v30  ;;  %p4362_p13 = pneg %p4361_p12 }
 0x2c8   : > { %v3370_v21 = vadd.f32 %v3369_v4, %v3341_v60  ;;  %v2882_v4 = vor.u32 %v2881_v27, %v2878_v45  ;;  %v2885_v60 = vshll.u32 %v3925_v15, 16 }
 0x2c9   : > { %p4367_p3 = pnand %p4366_p2, %p4362_p13 }
 0x2ca   : > { %v3385_v25 = vadd.f32 %v3370_v21, %v2900_v3  ;;  %v3290_v28 = vpop.f32.mrf.mxu2  ;;  %v2883_v20 = vrot.slane %v2882_v4, 4  ;;  %v2887_v21 = vrot.slane %v2885_v60, 5 }
 0x2cb   : > { %v3314_v14 = vpop.f32.mrf.mxu3  ;;  %v3291_v55 = vadd.f32 %v3290_v28, %v3262_v59 }
 0x2cc   : > { %v3393_v1 = vmax.f32 %v3385_v25, 0.0  ;;  %3409 = vst.msk [vmem:[%s5614_s14 + $0x18] sm:$0xff] %vm1488_vm8, %v3385_v25  ;;  %v3315_v2 = vadd.f32 %v3314_v14, %v3286_v32  ;;  %v2888_v19 = vsel %vm4545_vm2, %v2883_v20, %v2887_v21 }
 0x2cd   : > { %v3343_v46 = vpop.f32.mrf.mxu0  ;;  %v3372_v51 = vpop.f32.mrf.mxu1  ;;  %v2904_v24 = vunpack.c.l.bf16 %v2888_v19 }
 0x2ce   : > { %3401 = vst.msk [vmem:[%s5618_s20 + $0x18] sm:$0xff] %vm1488_vm8, %v3393_v1  ;;  %v3344_v31 = vadd.f32 %v3343_v46, %v3315_v2 }
 0x2d0   : > { %v3373_v11 = vadd.f32 %v3372_v51, %v3344_v31 }
 0x2d2   : > { %v3386_v40 = vadd.f32 %v3373_v11, %v2901_v38  ;;  %v3292_v56 = vpop.f32.mrf.mxu2 }
 0x2d3   : > { %v3316_v52 = vpop.f32.mrf.mxu3  ;;  %v3293_v33 = vadd.f32 %v3292_v56, %v3264_v29 }
 0x2d4   : > { %v3394_v16 = vmax.f32 %v3386_v40, 0.0  ;;  %3410 = vst.msk [vmem:[%s5614_s14 + $0x20] sm:$0xff] %vm1488_vm8, %v3386_v40  ;;  %v3317_v34 = vadd.f32 %v3316_v52, %v3288_v6 }
 0x2d5   : > { %v3345_v10 = vpop.f32.mrf.mxu0  ;;  %v3374_v22 = vpop.f32.mrf.mxu1 }
 0x2d6   : > { %3402 = vst.msk [vmem:[%s5618_s20 + $0x20] sm:$0xff] %vm1488_vm8, %v3394_v16  ;;  %v3346_v13 = vadd.f32 %v3345_v10, %v3317_v34 }
 0x2d8   : > { %v3375_v12 = vadd.f32 %v3374_v22, %v3346_v13 }
 0x2da   : > { %v3387_v9 = vadd.f32 %v3375_v12, %v2902_v42 }
 0x2db   : > { %v3319_v7 = vpop.f32.mrf.mxu3 }
 0x2dc   : > { %v3395_v3 = vmax.f32 %v3387_v9, 0.0  ;;  %3411 = vst.msk [vmem:[%s5614_s14 + $0x28] sm:$0xff] %vm1488_vm8, %v3387_v9  ;;  %v3320_v17 = vadd.f32 %v3319_v7, %v3291_v55 }
 0x2dd   : > { %v3348_v18 = vpop.f32.mrf.mxu0  ;;  %v3377_v47 = vpop.f32.mrf.mxu1 }
 0x2de   : > { %3403 = vst.msk [vmem:[%s5618_s20 + $0x28] sm:$0xff] %vm1488_vm8, %v3395_v3  ;;  %v3349_v35 = vadd.f32 %v3348_v18, %v3320_v17 }
 0x2e0   : > { %v3378_v32 = vadd.f32 %v3377_v47, %v3349_v35 }
 0x2e2   : > { %v3388_v25 = vadd.f32 %v3378_v32, %v2903_v62 }
 0x2e3   : > { %v3321_v53 = vpop.f32.mrf.mxu3 }
 0x2e4   : > { %v3396_v14 = vmax.f32 %v3388_v25, 0.0  ;;  %3412 = vst.msk [vmem:[%s5614_s14 + $0x30] sm:$0xff] %vm1488_vm8, %v3388_v25  ;;  %v3322_v26 = vadd.f32 %v3321_v53, %v3293_v33 }
 0x2e5   : > { %v3350_v0 = vpop.f32.mrf.mxu0  ;;  %v3379_v23 = vpop.f32.mrf.mxu1 }
 0x2e6   : > { %3404 = vst.msk [vmem:[%s5618_s20 + $0x30] sm:$0xff] %vm1488_vm8, %v3396_v14  ;;  %v3351_v57 = vadd.f32 %v3350_v0, %v3322_v26 }
 0x2e8   : > { %v3380_v50 = vadd.f32 %v3379_v23, %v3351_v57 }
 0x2ea   : > { %v3389_v1 = vadd.f32 %v3380_v50, %v2904_v24 }
 0x2ec   : > { %v3397_v2 = vmax.f32 %v3389_v1, 0.0  ;;  %3413 = vst.msk [vmem:[%s5614_s14 + $0x38] sm:$0xff] %vm1488_vm8, %v3389_v1 }
 0x2ed   : > { %4370 = shalt.err (!%p4367_p3)
}
 0x2ee   : > { %s4441_s14 = smov 128   ;;  %s4442_s25 = smov 8   ;;  %3405 = vst.msk [vmem:[%s5618_s20 + $0x38] sm:$0xff] %vm1488_vm8, %v3397_v2 }
 0x2ef   : > { %4294 = dma.vmem_to_hbm [thread:$0]  (%p4516_p5), %s3450_s11, 1024, %s3452_s12, %s3420_s17, %s4441_s14, %s4441_s14, %s4442_s25  }
 0x2f0   : > { %s3415_s26 = scalar_lea.sflag [#allocation6], %s5604_s18  ;;  %s4385_s28 = sshra.s32 %s5692_s16, 4  ;;  %s4386_s28 = int_to_ptr.hbm [resolvable:$true] %s4385_s28 }
 0x2f1   : > { %s4387_s9 = scalar_lea.hbm %s4386_s28, 64  ;;  %s4391_s29 = scalar_lea.hbm %s5743_s5, 128 }
 0x2f2   : > { %p4388_p4 = scmp.ne.s32.totalorder %s4386_s28, %s4387_s9  ;;  %p4392_p9 = scmp.lt.s32.totalorder %s4386_s28, %s5743_s5 }
 0x2f3   : > { %p4393_p10 = scmp.lt.s32.totalorder %s4391_s29, %s4387_s9 }
 0x2f4   : > { %p4389_p7 = pnand %p4388_p4, %p4516_p5 }
 0x2f5   : > { %p4394_p11 = por %p4393_p10, %p4392_p9 }
 0x2f6   : > { %p4390_p8 = pneg %p4389_p7 }
 0x2f8   : > { %p4395_p12 = pnand %p4394_p11, %p4390_p8 }
 0x2fa   : > { %4398 = shalt.err (!%p4395_p12)
}
 0x2fb   : > { %4293 = dma.vmem_to_hbm [thread:$0]  (%p4516_p5), %s5690_s15, 1024, %s5692_s16, %s3415_s26, %s4441_s14, %s4441_s14, %s4442_s25  }
 0x2fc PF: > { %p4304_p13 = scmp.ge.s32.totalorder %s4437_s24, 2  ;;  %s3466_s18 = sand.u32 1, %s4425_s21  }
 0x2fd   : > { %s3467_s0 = scalar_lea.sflag [#allocation6], %s3466_s18 }
 0x2fe   : > { %p4298_p0 = pnand %p4304_p13, %p4520_p6 }
 0x300   : > { %p4299_p1 = pneg %p4298_p0 }
 0x302   : > { %4416 = dma.done.wait (%p4299_p1), %s3467_s0, 1024  }
 0x303   : > { %4418 = vsyncadd (%p4299_p1), %s3467_s0, 4294966272  ;;  %s3477_s20 = scalar_lea.sflag [#allocation8], %s3466_s18 }
 0x304   : > { %4420 = dma.done.wait (%p4299_p1), %s3477_s20, 1024  }
 0x305   : > { %4422 = vsyncadd (%p4299_p1), %s3477_s20, 4294966272  ;;  %p20_p5 = scmp.ge.s32.totalorder %s4503_s27, 4   ;;  %s5759_s21 = smov %s4429_s22 }
 0x306   : > { %s5760_s22 = smov %s4433_s23  ;;  %s5761_s23 = smov %s4514_s30 }
 0x307   : > { %s5762_s24 = smov %s4503_s27  ;;  %22 = sbr.rel (!%p20_p5) target bundleno = 7 (0x7), region = 97 }
 0x30c   :  { %3483 = vsyncpa [#allocation6], 1 }
 0x30d   :  { %3485 = vsyncpa [#allocation6 + $0x1], 1 }
 0x30e   :  { %3486 = vsyncpa [#allocation8], 1 }
 0x30f   :  { %3488 = vsyncpa [#allocation8 + $0x1], 1 }

</bundles_post_ra>
